<compile_context>
chip_gen: v6e
topology: v6e:2x2x1
jax: 0.10.0
libtpu: 0.0.40
codegen_flags: <defaults>
</compile_context>

<pallas_src>
import functools

import jax
import jax.numpy as jnp
from jax.experimental import pallas as pl
from jax.experimental.pallas import tpu as pltpu


GROWTH_RATE = 32
BN_SIZE = 4
BLOCK_CONFIG = (6, 12, 24, 16)
NUM_INIT_FEATURES = 64


def _round_up(x, m):
    return (x + m - 1) // m * m


def _pick_tile(m):
    """Largest row tile (multiple of 16, <=256) dividing m with >=2 grid steps."""
    for t in (256, 128, 64, 32, 16):
        if m % t == 0 and m // t >= 2:
            return t
    return m


def _pick_reduce_tile(r):
    for t in (128, 64, 32, 16, 8):
        if r % t == 0 and r // t >= 2:
            return t
    return r


def _conv_hw(h, w, k, stride, padding):
    return (h + 2 * padding - k) // stride + 1, (w + 2 * padding - k) // stride + 1


# -----------------------------------------------------------------------------
# Pallas kernels
# -----------------------------------------------------------------------------

def _bn_relu_mm_bn_relu_kernel(a_ref, s1_ref, b1_ref, w_ref, s2_ref, b2_ref, o_ref):
    # DenseLayer bottleneck: relu(bn2( relu(bn1(a)) @ w1 )).
    a = jnp.maximum(a_ref[...].astype(jnp.float32) * s1_ref[...] + b1_ref[...], 0.0)
    acc = jnp.dot(a.astype(jnp.bfloat16), w_ref[...], preferred_element_type=jnp.float32)
    o_ref[...] = jnp.maximum(acc * s2_ref[...] + b2_ref[...], 0.0).astype(o_ref.dtype)


def _bn_relu_mm_kernel(a_ref, s_ref, b_ref, w_ref, o_ref):
    # Transition: relu(bn(a)) @ w  (BN+ReLU fused as matmul prologue).
    a = jnp.maximum(a_ref[...].astype(jnp.float32) * s_ref[...] + b_ref[...], 0.0)
    o_ref[...] = jnp.dot(a.astype(jnp.bfloat16), w_ref[...],
                         preferred_element_type=jnp.float32).astype(o_ref.dtype)


def _mm_bn_relu_kernel(a_ref, w_ref, s_ref, b_ref, o_ref):
    # Stem: relu(bn(a @ w))  (norm0+relu0 fused as conv0 epilogue).
    acc = jnp.dot(a_ref[...], w_ref[...], preferred_element_type=jnp.float32)
    o_ref[...] = jnp.maximum(acc * s_ref[...] + b_ref[...], 0.0).astype(o_ref.dtype)


def _mm_kernel(a_ref, w_ref, o_ref):
    # Plain bf16 MXU matmul (3x3 conv after im2col; BN2+ReLU already applied upstream).
    o_ref[...] = jnp.dot(a_ref[...], w_ref[...],
                         preferred_element_type=jnp.float32).astype(o_ref.dtype)


def _mm_bias_kernel(a_ref, w_ref, bias_ref, o_ref):
    # Classifier linear layer: bf16 matmul + bias, f32 output.
    o_ref[...] = (jnp.dot(a_ref[...], w_ref[...], preferred_element_type=jnp.float32)
                  + bias_ref[...])


def _max_stack_kernel(x_ref, o_ref):
    # x: (K, TR, C) window-stacked tensor -> max over the window axis.
    o_ref[...] = jnp.max(x_ref[...], axis=0)


def _mean_stack_kernel(x_ref, o_ref):
    # x: (K, TR, C) window-stacked tensor -> mean over the window axis.
    o_ref[...] = jnp.mean(x_ref[...].astype(jnp.float32), axis=0).astype(o_ref.dtype)


def _bn_relu_gap_kernel(x_ref, scale_ref, shift_ref, o_ref):
    # norm5 + ReLU fused with the global average pool: mean over HW of relu(bn(x)).
    x = x_ref[...].astype(jnp.float32) * scale_ref[...] + shift_ref[...]
    o_ref[...] = jnp.mean(jnp.maximum(x, 0.0), axis=1)


# -----------------------------------------------------------------------------
# Pallas wrappers (NOT individually jitted; traced into the single outer jit)
# -----------------------------------------------------------------------------

def _row_call(kernel, a, kp, side, n_out, out_dtype):
    """Row-tiled pallas_call: `a` is (M, Ka) and only its first `kp` columns are read
    (so `a` may be the wide dense-block feature buffer — no slice copy).  `side` are
    full-block constant operands (scale/shift vectors, packed weights, bias)."""
    M = a.shape[0]
    Mp = _round_up(M, 16)                       # bf16 vregs pack (16, 128)
    if Mp != M:
        a = jnp.pad(a, ((0, Mp - M), (0, 0)))
    TM = _pick_tile(Mp)
    in_specs = [pl.BlockSpec((TM, kp), lambda i: (i, 0))]
    for s in side:
        in_specs.append(pl.BlockSpec(s.shape, lambda i, nd=s.ndim: (0,) * nd))
    out = pl.pallas_call(
        kernel,
        out_shape=jax.ShapeDtypeStruct((Mp, n_out), out_dtype),
        grid=(Mp // TM,),
        in_specs=in_specs,
        out_specs=pl.BlockSpec((TM, n_out), lambda i: (i, 0)),
        compiler_params=pltpu.CompilerParams(dimension_semantics=("parallel",)),
    )(a, *side)
    return out if Mp == M else out[:M]


def _reduce_stack(stk, kernel):
    """stk: (K, R, C) -> (R, C) via a row-tiled Pallas reduction over axis 0."""
    K, R, C = stk.shape
    TR = _pick_reduce_tile(R)
    return pl.pallas_call(
        kernel,
        out_shape=jax.ShapeDtypeStruct((R, C), stk.dtype),
        grid=(R // TR,),
        in_specs=[pl.BlockSpec((K, TR, C), lambda i: (0, i, 0))],
        out_specs=pl.BlockSpec((TR, C), lambda i: (i, 0)),
        compiler_params=pltpu.CompilerParams(dimension_semantics=("parallel",)),
    )(stk)


def _max_pool_3x3_s2_p1(x):
    """MaxPool2d(3, stride=2, padding=1), NHWC bf16 -> (N*Ho*Wo, C).
    Inputs are post-ReLU (>= 0), so zero spatial padding is neutral for the max."""
    N, H, W, C = x.shape
    Ho, Wo = _conv_hw(H, W, 3, 2, 1)
    xp = jnp.pad(x, ((0, 0), (1, 1), (1, 1), (0, 0)))
    slices = [xp[:, ki:ki + 2 * Ho:2, kj:kj + 2 * Wo:2, :]
              for ki in range(3) for kj in range(3)]
    stk = jnp.stack(slices, axis=0).reshape(9, N * Ho * Wo, C)
    return _reduce_stack(stk, _max_stack_kernel)


def _avg_pool_2x2(x):
    """AvgPool2d(2, 2), NHWC -> (N*Ho*Wo, C)."""
    N, H, W, C = x.shape
    Ho, Wo = H // 2, W // 2
    slices = [x[:, ki::2, kj::2, :] for ki in range(2) for kj in range(2)]
    stk = jnp.stack(slices, axis=0).reshape(4, N * Ho * Wo, C)
    return _reduce_stack(stk, _mean_stack_kernel)


def _bn_relu_gap(x, scale, shift):
    """norm5 + ReLU + adaptive_avg_pool2d((1,1)).  x: (N, HW, C) bf16 -> (N, C) f32."""
    N, HW, C = x.shape
    TC = 512 if (C % 512 == 0 and C // 512 >= 2) else C    # grid 2 for C=1024 (v7x)
    return pl.pallas_call(
        _bn_relu_gap_kernel,
        out_shape=jax.ShapeDtypeStruct((N, C), jnp.float32),
        grid=(C // TC,),
        in_specs=[
            pl.BlockSpec((N, HW, TC), lambda j: (0, 0, j)),
            pl.BlockSpec((1, 1, TC), lambda j: (0, 0, j)),
            pl.BlockSpec((1, 1, TC), lambda j: (0, 0, j)),
        ],
        out_specs=pl.BlockSpec((N, TC), lambda j: (0, j)),
        compiler_params=pltpu.CompilerParams(dimension_semantics=("parallel",)),
    )(x, scale, shift)


def _im2col(x, kh, kw, stride, padding, kp):
    """NHWC -> (N*Ho*Wo, kh*kw*C) bf16, K padded to kp (zero rows in the packed weight)."""
    N, H, W, C = x.shape
    Ho = (H + 2 * padding - kh) // stride + 1
    Wo = (W + 2 * padding - kw) // stride + 1
    xp = jnp.pad(x, ((0, 0), (padding, padding), (padding, padding), (0, 0)))
    patches = [xp[:, ki:ki + stride * Ho:stride, kj:kj + stride * Wo:stride, :]
               for ki in range(kh) for kj in range(kw)]
    a = jnp.concatenate(patches, axis=-1).reshape(N * Ho * Wo, kh * kw * C)
    if kp > kh * kw * C:
        a = jnp.pad(a, ((0, 0), (0, kp - kh * kw * C)))
    return a.astype(jnp.bfloat16)


# -----------------------------------------------------------------------------
# Deterministic parameter generation (DenseNet-121 shapes) + one-time packing
# -----------------------------------------------------------------------------

class ParamGen:
    def __init__(self, seed=0):
        self._key = jax.random.PRNGKey(seed)

    def _next(self):
        self._key, sub = jax.random.split(self._key)
        return sub

    def conv(self, cout, cin, kh, kw):
        fan_in = cin * kh * kw
        return (jax.random.normal(self._next(), (cout, cin, kh, kw), jnp.float32)
                * jnp.sqrt(2.0 / fan_in))

    def bn(self, c):
        gamma = 1.0 + 0.1 * jax.random.normal(self._next(), (c,), jnp.float32)
        beta = 0.1 * jax.random.normal(self._next(), (c,), jnp.float32)
        mean = 0.1 * jax.random.normal(self._next(), (c,), jnp.float32)
        var = 1.0 + 0.1 * jnp.abs(jax.random.normal(self._next(), (c,), jnp.float32))
        return dict(gamma=gamma, beta=beta, mean=mean, var=var)

    def linear(self, out_f, in_f):
        w = (jax.random.normal(self._next(), (out_f, in_f), jnp.float32)
             * jnp.sqrt(1.0 / in_f))
        b = jnp.zeros((out_f,), jnp.float32)          # nn.init.constant_(m.bias, 0)
        return dict(w=w, b=b)


def init_densenet121_params(out_size, mode, seed=0):
    pg = ParamGen(seed)
    params = {}
    params["conv0"] = pg.conv(NUM_INIT_FEATURES, 3, 7, 7)
    params["norm0"] = pg.bn(NUM_INIT_FEATURES)

    num_features = NUM_INIT_FEATURES
    blocks, transitions = [], []
    for i, num_layers in enumerate(BLOCK_CONFIG):
        layers = []
        for j in range(num_layers):
            in_ch = num_features + j * GROWTH_RATE
            layers.append(dict(
                norm1=pg.bn(in_ch),
                conv1=pg.conv(BN_SIZE * GROWTH_RATE, in_ch, 1, 1),
                norm2=pg.bn(BN_SIZE * GROWTH_RATE),
                conv2=pg.conv(GROWTH_RATE, BN_SIZE * GROWTH_RATE, 3, 3),
            ))
        blocks.append(layers)
        num_features += num_layers * GROWTH_RATE
        if i != len(BLOCK_CONFIG) - 1:
            transitions.append(dict(
                norm=pg.bn(num_features),
                conv=pg.conv(num_features // 2, num_features, 1, 1),
            ))
            num_features //= 2
    params["blocks"] = blocks
    params["transitions"] = transitions
    params["norm5"] = pg.bn(num_features)             # 1024

    if mode in ("U-Ones", "U-Zeros"):
        params["classifier"] = pg.linear(out_size, num_features)
    elif mode in ("U-MultiClass",):
        params["Linear_0"] = pg.linear(out_size, num_features)
        params["Linear_1"] = pg.linear(out_size, num_features)
        params["Linear_u"] = pg.linear(out_size, num_features)
    return params


def pack_densenet121_params(raw, mode):
    """One-time packing: bf16 (Kp, Np) matmul weights + folded BN (scale, shift) f32."""
    eps = 1e-5

    def bn_fold(bn):
        s = bn["gamma"] / jnp.sqrt(bn["var"] + eps)
        return s, bn["beta"] - bn["mean"] * s

    def pack_conv(w, kp):
        cout, cin, kh, kw = w.shape
        m = jnp.transpose(w, (2, 3, 1, 0)).reshape(kh * kw * cin, cout)
        np_ = _round_up(cout, 128)
        return jnp.pad(m, ((0, kp - kh * kw * cin), (0, np_ - cout))).astype(jnp.bfloat16)

    def pack_vec(v, kp):
        return jnp.pad(v, (0, kp - v.shape[0])).reshape(1, kp).astype(jnp.float32)

    packed = {}

    # Stem: conv0 weight + norm0 folded over the *output* channels (epilogue fusion).
    packed["w0"] = pack_conv(raw["conv0"], _round_up(3 * 7 * 7, 128))
    s0, sh0 = bn_fold(raw["norm0"])
    packed["s0"], packed["sh0"] = pack_vec(s0, 128), pack_vec(sh0, 128)

    blocks, transitions = [], []
    num_features = NUM_INIT_FEATURES
    k2 = 9 * BN_SIZE * GROWTH_RATE                    # 1152
    n1 = BN_SIZE * GROWTH_RATE                        # 128: conv1 output width
    for bi, layers in enumerate(raw["blocks"]):
        bl = []
        for j, lp in enumerate(layers):
            cur = num_features + j * GROWTH_RATE
            kp1 = _round_up(cur, 128)
            s1, sh1 = bn_fold(lp["norm1"])
            s2, sh2 = bn_fold(lp["norm2"])            # applied as conv1 epilogue (width 128)
            bl.append(dict(
                w1=pack_conv(lp["conv1"], kp1),
                s1=pack_vec(s1, kp1), sh1=pack_vec(sh1, kp1),
                s2=pack_vec(s2, n1), sh2=pack_vec(sh2, n1),
                w2=pack_conv(lp["conv2"], k2),
            ))
        blocks.append(bl)
        num_features += GROWTH_RATE * len(layers)
        if bi != len(raw["blocks"]) - 1:
            tp = raw["transitions"][bi]
            st, sht = bn_fold(tp["norm"])
            transitions.append(dict(
                w=pack_conv(tp["conv"], num_features),     # num_features is a mult of 128
                s=pack_vec(st, num_features), sh=pack_vec(sht, num_features)))
            num_features //= 2
    packed["blocks"] = blocks
    packed["transitions"] = transitions

    s5, sh5 = bn_fold(raw["norm5"])
    packed["s5"] = s5.reshape(1, 1, -1).astype(jnp.float32)
    packed["sh5"] = sh5.reshape(1, 1, -1).astype(jnp.float32)

    def pack_linear(lp):
        out_f, in_f = lp["w"].shape
        np_ = _round_up(out_f, 128)
        return dict(
            w=jnp.pad(lp["w"].T, ((0, 0), (0, np_ - out_f))).astype(jnp.bfloat16),
            b=jnp.pad(lp["b"], (0, np_ - out_f)).reshape(1, np_).astype(jnp.float32))

    if mode in ("U-Ones", "U-Zeros"):
        packed["classifier"] = pack_linear(raw["classifier"])
    elif mode in ("U-MultiClass",):
        for name in ("Linear_0", "Linear_1", "Linear_u"):
            packed[name] = pack_linear(raw[name])
    return packed


# -----------------------------------------------------------------------------
# Forward pass (single jit; matches DenseNet121.forward of the PyTorch module)
# -----------------------------------------------------------------------------

@functools.partial(jax.jit, static_argnames=("mode", "out_size"))
def densenet121_forward(packed, x_nchw, mode, out_size):
    """Returns (activations, out) exactly like the PyTorch module (drop_rate=0 path)."""
    # TODO(synk): dropout (drop_rate > 0) is not implemented.
    N = x_nchw.shape[0]
    x = jnp.transpose(x_nchw.astype(jnp.float32), (0, 2, 3, 1))      # NCHW -> NHWC
    H, W = x.shape[1], x.shape[2]

    # --- stem: conv0 (7x7/2, pad 3) with norm0 + relu0 fused as matmul epilogue ---
    Ho, Wo = _conv_hw(H, W, 7, 2, 3)
    a0 = _im2col(x, 7, 7, 2, 3, 256)                                  # (M0, 256) bf16
    y0 = _row_call(_mm_bn_relu_kernel, a0, 256,
                   [packed["w0"], packed["s0"], packed["sh0"]],
                   128, jnp.bfloat16)                                 # (M0, 128); cols >=64 are 0

    # --- pool0: maxpool 3x3 stride 2 pad 1 (post-ReLU values, zero pad is neutral) ---
    feat = _max_pool_3x3_s2_p1(y0.reshape(N, Ho, Wo, 128))            # (N*Hc*Wc, 128)
    Hc, Wc = _conv_hw(Ho, Wo, 3, 2, 1)
    num_features = NUM_INIT_FEATURES           # 64 real channels; padded cols are zero

    # --- dense blocks + transitions ---
    for bi, layers in enumerate(packed["blocks"]):
        wide = num_features + GROWTH_RATE * len(layers)               # 256/512/1024/1024
        # Single per-block feature buffer; unwritten channels are 0 and their folded-BN
        # scale/shift and weight rows are 0, so reading them contributes nothing.
        buf = jnp.pad(feat, ((0, 0), (0, wide - feat.shape[1])))      # (M, wide) bf16
        off = num_features
        for lp in layers:
            kp1 = lp["w1"].shape[0]
            # conv1 (1x1) with norm1+relu prologue AND norm2+relu epilogue: output is
            # exactly the activated input of conv2 (spatial zero pad applied after).
            h1 = _row_call(_bn_relu_mm_bn_relu_kernel, buf, kp1,
                           [lp["s1"], lp["sh1"], lp["w1"], lp["s2"], lp["sh2"]],
                           128, jnp.bfloat16)                         # (M, 128)
            # conv2 (3x3, pad 1): plain bf16 matmul on the im2col'd activated input.
            a2 = _im2col(h1.reshape(N, Hc, Wc, 128), 3, 3, 1, 1, 9 * 128)   # (M, 1152)
            h2 = _row_call(_mm_kernel, a2, 9 * 128, [lp["w2"]], 128, jnp.bfloat16)
            # Write the 32 new channels into the wide buffer (XLA fuses this in-place
            # inside the single jit).  TODO(synk): group 4 layers into one 128-lane write.
            buf = jax.lax.dynamic_update_slice(buf, h2[:, :GROWTH_RATE], (0, off))
            off += GROWTH_RATE
        num_features = wide

        if bi != len(packed["blocks"]) - 1:
            tp = packed["transitions"][bi]
            # transition: norm + relu + 1x1 conv (prologue-fused) then avgpool 2x2.
            t = _row_call(_bn_relu_mm_kernel, buf, wide,
                          [tp["s"], tp["sh"], tp["w"]], wide // 2, jnp.bfloat16)
            feat = _avg_pool_2x2(t.reshape(N, Hc, Wc, wide // 2))
            Hc, Wc = Hc // 2, Wc // 2
            num_features = wide // 2
        else:
            feat = buf

    # --- norm5 + F.relu(features) + adaptive_avg_pool2d((1,1)), fused ---
    activations = _bn_relu_gap(feat.reshape(N, Hc * Wc, num_features),
                               packed["s5"], packed["sh5"])           # (N, 1024) f32
    acts_bf16 = activations.astype(jnp.bfloat16)

    if mode in ("U-Ones", "U-Zeros"):
        cl = packed["classifier"]
        out = _row_call(_mm_bias_kernel, acts_bf16, 1024, [cl["w"], cl["b"]],
                        cl["w"].shape[1], jnp.float32)[:, :out_size]  # (N, out_size)
    elif mode in ("U-MultiClass",):
        outs = []
        for name in ("Linear_0", "Linear_1", "Linear_u"):
            lp = packed[name]
            o = _row_call(_mm_bias_kernel, acts_bf16, 1024, [lp["w"], lp["b"]],
                          lp["w"].shape[1], jnp.float32)[:, :out_size]
            outs.append(o.reshape(N, 1, -1))
        out = jnp.concatenate(outs, axis=1)                           # (N, 3, out_size)
    else:
        raise ValueError(mode)
    return activations, out


# -----------------------------------------------------------------------------
# main
# -----------------------------------------------------------------------------

if __name__ == "__main__":
    out_size = 5
    mode = "U-Ones"

    raw = init_densenet121_params(out_size, mode, seed=0)
    params = pack_densenet121_params(raw, mode)

    # Small input consistent with DenseNet-121: 3 channels, 32x32 spatial, batch 2.
    x = jax.random.normal(jax.random.PRNGKey(0), (2, 3, 32, 32), jnp.float32)

    activations, out = densenet121_forward(params, x, mode, out_size)
    activations = jax.block_until_ready(activations)
    out = jax.block_until_ready(out)

    assert activations.shape == (2, 1024)
    assert out.shape == (2, out_size)
    assert bool(jnp.all(jnp.isfinite(activations))) and bool(jnp.all(jnp.isfinite(out)))

    print("KERNEL_OK")
</pallas_src>

<mosaic_0001>
module attributes {stable_mosaic.version = 11 : i64} {
  func.func @_mm_bn_relu_kernel(%arg0: i32, %arg1: memref<256x256xbf16, #tpu.memory_space<vmem>>, %arg2: memref<256x128xbf16, #tpu.memory_space<vmem>>, %arg3: memref<1x128xf32, #tpu.memory_space<vmem>>, %arg4: memref<1x128xf32, #tpu.memory_space<vmem>>, %arg5: memref<256x128xbf16, #tpu.memory_space<vmem>>) attributes {dimension_semantics = [#tpu.dimension_semantics<parallel>], iteration_bounds = array<i64: 2>, scalar_prefetch = 0 : i64, scratch_operands = 0 : i64, tpu.core_type = #tpu.core_type<tc>, window_params = [{transform_indices = @transform_0, window_bounds = array<i64: 256, 256>}, {pipeline_mode = #tpu.pipeline_mode<synchronous>, transform_indices = @transform_1, window_bounds = array<i64: 256, 128>}, {pipeline_mode = #tpu.pipeline_mode<synchronous>, transform_indices = @transform_2, window_bounds = array<i64: 1, 128>}, {pipeline_mode = #tpu.pipeline_mode<synchronous>, transform_indices = @transform_3, window_bounds = array<i64: 1, 128>}, {transform_indices = @transform_4, window_bounds = array<i64: 256, 128>}]} {
    %c0 = arith.constant 0 : index
    %c0_0 = arith.constant 0 : index
    %0 = vector.load %arg1[%c0, %c0_0] : memref<256x256xbf16, #tpu.memory_space<vmem>>, vector<256x256xbf16>
    %c0_1 = arith.constant 0 : index
    %c0_2 = arith.constant 0 : index
    %1 = vector.load %arg2[%c0_1, %c0_2] : memref<256x128xbf16, #tpu.memory_space<vmem>>, vector<256x128xbf16>
    %cst = arith.constant dense<0.000000e+00> : vector<256x128xf32>
    %2 = tpu.matmul %0, %1, %cst {dimension_numbers = #tpu.dot_dimension_numbers<[1], [0], [0], [1], [0, 0, 1, 1], [], []>} : vector<256x256xbf16>, vector<256x128xbf16>, vector<256x128xf32> -> vector<256x128xf32>
    %c0_3 = arith.constant 0 : index
    %c0_4 = arith.constant 0 : index
    %3 = vector.load %arg3[%c0_3, %c0_4] : memref<1x128xf32, #tpu.memory_space<vmem>>, vector<1x128xf32>
    %4 = vector.broadcast %3 : vector<1x128xf32> to vector<256x128xf32>
    %5 = arith.mulf %2, %4 : vector<256x128xf32>
    %c0_5 = arith.constant 0 : index
    %c0_6 = arith.constant 0 : index
    %6 = vector.load %arg4[%c0_5, %c0_6] : memref<1x128xf32, #tpu.memory_space<vmem>>, vector<1x128xf32>
    %7 = vector.broadcast %6 : vector<1x128xf32> to vector<256x128xf32>
    %8 = arith.addf %5, %7 : vector<256x128xf32>
    %cst_7 = arith.constant 0.000000e+00 : f32
    %9 = vector.broadcast %cst_7 : f32 to vector<256x128xf32>
    %10 = arith.maximumf %8, %9 : vector<256x128xf32>
    %11 = arith.truncf %10 : vector<256x128xf32> to vector<256x128xbf16>
    %c0_8 = arith.constant 0 : index
    %c0_9 = arith.constant 0 : index
    %12 = vector.load %arg5[%c0_8, %c0_9] : memref<256x128xbf16, #tpu.memory_space<vmem>>, vector<256x128xbf16>
    tpu.vector_store %arg5[%c0_8, %c0_9], %11 {strides = array<i32>} : memref<256x128xbf16, #tpu.memory_space<vmem>>, vector<256x128xbf16>,
    return
  }
  func.func @transform_0(%arg0: i32) -> (i32, i32) {
    %c0_i32 = arith.constant 0 : i32
    %c0_i32_0 = arith.constant 0 : i32
    return %arg0, %c0_i32 : i32, i32
  }
  func.func @transform_1(%arg0: i32) -> (i32, i32) {
    %c0_i32 = arith.constant 0 : i32
    %c0_i32_0 = arith.constant 0 : i32
    %c0_i32_1 = arith.constant 0 : i32
    return %c0_i32, %c0_i32_0 : i32, i32
  }
  func.func @transform_2(%arg0: i32) -> (i32, i32) {
    %c0_i32 = arith.constant 0 : i32
    %c0_i32_0 = arith.constant 0 : i32
    %c0_i32_1 = arith.constant 0 : i32
    return %c0_i32, %c0_i32_0 : i32, i32
  }
  func.func @transform_3(%arg0: i32) -> (i32, i32) {
    %c0_i32 = arith.constant 0 : i32
    %c0_i32_0 = arith.constant 0 : i32
    %c0_i32_1 = arith.constant 0 : i32
    return %c0_i32, %c0_i32_0 : i32, i32
  }
  func.func @transform_4(%arg0: i32) -> (i32, i32) {
    %c0_i32 = arith.constant 0 : i32
    %c0_i32_0 = arith.constant 0 : i32
    return %arg0, %c0_i32 : i32, i32
  }
}

module attributes {stable_mosaic.version = 11 : i64} {
  func.func @_max_stack_kernel(%arg0: i32, %arg1: memref<9x64x128xbf16, #tpu.memory_space<vmem>>, %arg2: memref<64x128xbf16, #tpu.memory_space<vmem>>) attributes {dimension_semantics = [#tpu.dimension_semantics<parallel>], iteration_bounds = array<i64: 2>, scalar_prefetch = 0 : i64, scratch_operands = 0 : i64, tpu.core_type = #tpu.core_type<tc>, window_params = [{transform_indices = @transform_0, window_bounds = array<i64: 9, 64, 128>}, {transform_indices = @transform_1, window_bounds = array<i64: 64, 128>}]} {
    %c0 = arith.constant 0 : index
    %c0_0 = arith.constant 0 : index
    %c0_1 = arith.constant 0 : index
    %0 = vector.load %arg1[%c0, %c0_0, %c0_1] : memref<9x64x128xbf16, #tpu.memory_space<vmem>>, vector<9x64x128xbf16>
    %cst = arith.constant dense<0xFF80> : vector<64x128xbf16>
    %1 = vector.multi_reduction <maximumf>, %0, %cst [0] : vector<9x64x128xbf16> to vector<64x128xbf16>
    %c0_2 = arith.constant 0 : index
    %c0_3 = arith.constant 0 : index
    %2 = vector.load %arg2[%c0_2, %c0_3] : memref<64x128xbf16, #tpu.memory_space<vmem>>, vector<64x128xbf16>
    tpu.vector_store %arg2[%c0_2, %c0_3], %1 {strides = array<i32>} : memref<64x128xbf16, #tpu.memory_space<vmem>>, vector<64x128xbf16>,
    return
  }
  func.func @transform_0(%arg0: i32) -> (i32, i32, i32) {
    %c0_i32 = arith.constant 0 : i32
    %c0_i32_0 = arith.constant 0 : i32
    %c0_i32_1 = arith.constant 0 : i32
    return %c0_i32, %arg0, %c0_i32_0 : i32, i32, i32
  }
  func.func @transform_1(%arg0: i32) -> (i32, i32) {
    %c0_i32 = arith.constant 0 : i32
    %c0_i32_0 = arith.constant 0 : i32
    return %arg0, %c0_i32 : i32, i32
  }
}

module attributes {stable_mosaic.version = 11 : i64} {
  func.func @_bn_relu_mm_bn_relu_kernel(%arg0: i32, %arg1: memref<64x128xbf16, #tpu.memory_space<vmem>>, %arg2: memref<1x128xf32, #tpu.memory_space<vmem>>, %arg3: memref<1x128xf32, #tpu.memory_space<vmem>>, %arg4: memref<128x128xbf16, #tpu.memory_space<vmem>>, %arg5: memref<1x128xf32, #tpu.memory_space<vmem>>, %arg6: memref<1x128xf32, #tpu.memory_space<vmem>>, %arg7: memref<64x128xbf16, #tpu.memory_space<vmem>>) attributes {dimension_semantics = [#tpu.dimension_semantics<parallel>], iteration_bounds = array<i64: 2>, scalar_prefetch = 0 : i64, scratch_operands = 0 : i64, tpu.core_type = #tpu.core_type<tc>, window_params = [{transform_indices = @transform_0, window_bounds = array<i64: 64, 128>}, {pipeline_mode = #tpu.pipeline_mode<synchronous>, transform_indices = @transform_1, window_bounds = array<i64: 1, 128>}, {pipeline_mode = #tpu.pipeline_mode<synchronous>, transform_indices = @transform_2, window_bounds = array<i64: 1, 128>}, {pipeline_mode = #tpu.pipeline_mode<synchronous>, transform_indices = @transform_3, window_bounds = array<i64: 128, 128>}, {pipeline_mode = #tpu.pipeline_mode<synchronous>, transform_indices = @transform_4, window_bounds = array<i64: 1, 128>}, {pipeline_mode = #tpu.pipeline_mode<synchronous>, transform_indices = @transform_5, window_bounds = array<i64: 1, 128>}, {transform_indices = @transform_6, window_bounds = array<i64: 64, 128>}]} {
    %c0 = arith.constant 0 : index
    %c0_0 = arith.constant 0 : index
    %0 = vector.load %arg1[%c0, %c0_0] : memref<64x128xbf16, #tpu.memory_space<vmem>>, vector<64x128xbf16>
    %1 = arith.extf %0 : vector<64x128xbf16> to vector<64x128xf32>
    %c0_1 = arith.constant 0 : index
    %c0_2 = arith.constant 0 : index
    %2 = vector.load %arg2[%c0_1, %c0_2] : memref<1x128xf32, #tpu.memory_space<vmem>>, vector<1x128xf32>
    %3 = vector.broadcast %2 : vector<1x128xf32> to vector<64x128xf32>
    %4 = arith.mulf %1, %3 : vector<64x128xf32>
    %c0_3 = arith.constant 0 : index
    %c0_4 = arith.constant 0 : index
    %5 = vector.load %arg3[%c0_3, %c0_4] : memref<1x128xf32, #tpu.memory_space<vmem>>, vector<1x128xf32>
    %6 = vector.broadcast %5 : vector<1x128xf32> to vector<64x128xf32>
    %7 = arith.addf %4, %6 : vector<64x128xf32>
    %cst = arith.constant 0.000000e+00 : f32
    %8 = vector.broadcast %cst : f32 to vector<64x128xf32>
    %9 = arith.maximumf %7, %8 : vector<64x128xf32>
    %10 = arith.truncf %9 : vector<64x128xf32> to vector<64x128xbf16>
    %c0_5 = arith.constant 0 : index
    %c0_6 = arith.constant 0 : index
    %11 = vector.load %arg4[%c0_5, %c0_6] : memref<128x128xbf16, #tpu.memory_space<vmem>>, vector<128x128xbf16>
    %cst_7 = arith.constant dense<0.000000e+00> : vector<64x128xf32>
    %12 = tpu.matmul %10, %11, %cst_7 {dimension_numbers = #tpu.dot_dimension_numbers<[1], [0], [0], [1], [0, 0, 1, 1], [], []>} : vector<64x128xbf16>, vector<128x128xbf16>, vector<64x128xf32> -> vector<64x128xf32>
    %c0_8 = arith.constant 0 : index
    %c0_9 = arith.constant 0 : index
    %13 = vector.load %arg5[%c0_8, %c0_9] : memref<1x128xf32, #tpu.memory_space<vmem>>, vector<1x128xf32>
    %14 = vector.broadcast %13 : vector<1x128xf32> to vector<64x128xf32>
    %15 = arith.mulf %12, %14 : vector<64x128xf32>
    %c0_10 = arith.constant 0 : index
    %c0_11 = arith.constant 0 : index
    %16 = vector.load %arg6[%c0_10, %c0_11] : memref<1x128xf32, #tpu.memory_space<vmem>>, vector<1x128xf32>
    %17 = vector.broadcast %16 : vector<1x128xf32> to vector<64x128xf32>
    %18 = arith.addf %15, %17 : vector<64x128xf32>
    %cst_12 = arith.constant 0.000000e+00 : f32
    %19 = vector.broadcast %cst_12 : f32 to vector<64x128xf32>
    %20 = arith.maximumf %18, %19 : vector<64x128xf32>
    %21 = arith.truncf %20 : vector<64x128xf32> to vector<64x128xbf16>
    %c0_13 = arith.constant 0 : index
    %c0_14 = arith.constant 0 : index
    %22 = vector.load %arg7[%c0_13, %c0_14] : memref<64x128xbf16, #tpu.memory_space<vmem>>, vector<64x128xbf16>
    tpu.vector_store %arg7[%c0_13, %c0_14], %21 {strides = array<i32>} : memref<64x128xbf16, #tpu.memory_space<vmem>>, vector<64x128xbf16>,
    return
  }
  func.func @transform_0(%arg0: i32) -> (i32, i32) {
    %c0_i32 = arith.constant 0 : i32
    %c0_i32_0 = arith.constant 0 : i32
    return %arg0, %c0_i32 : i32, i32
  }
  func.func @transform_1(%arg0: i32) -> (i32, i32) {
    %c0_i32 = arith.constant 0 : i32
    %c0_i32_0 = arith.constant 0 : i32
    %c0_i32_1 = arith.constant 0 : i32
    return %c0_i32, %c0_i32_0 : i32, i32
  }
  func.func @transform_2(%arg0: i32) -> (i32, i32) {
    %c0_i32 = arith.constant 0 : i32
    %c0_i32_0 = arith.constant 0 : i32
    %c0_i32_1 = arith.constant 0 : i32
    return %c0_i32, %c0_i32_0 : i32, i32
  }
  func.func @transform_3(%arg0: i32) -> (i32, i32) {
    %c0_i32 = arith.constant 0 : i32
    %c0_i32_0 = arith.constant 0 : i32
    %c0_i32_1 = arith.constant 0 : i32
    return %c0_i32, %c0_i32_0 : i32, i32
  }
  func.func @transform_4(%arg0: i32) -> (i32, i32) {
    %c0_i32 = arith.constant 0 : i32
    %c0_i32_0 = arith.constant 0 : i32
    %c0_i32_1 = arith.constant 0 : i32
    return %c0_i32, %c0_i32_0 : i32, i32
  }
  func.func @transform_5(%arg0: i32) -> (i32, i32) {
    %c0_i32 = arith.constant 0 : i32
    %c0_i32_0 = arith.constant 0 : i32
    %c0_i32_1 = arith.constant 0 : i32
    return %c0_i32, %c0_i32_0 : i32, i32
  }
  func.func @transform_6(%arg0: i32) -> (i32, i32) {
    %c0_i32 = arith.constant 0 : i32
    %c0_i32_0 = arith.constant 0 : i32
    return %arg0, %c0_i32 : i32, i32
  }
}

module attributes {stable_mosaic.version = 11 : i64} {
  func.func @_mm_kernel(%arg0: i32, %arg1: memref<64x1152xbf16, #tpu.memory_space<vmem>>, %arg2: memref<1152x128xbf16, #tpu.memory_space<vmem>>, %arg3: memref<64x128xbf16, #tpu.memory_space<vmem>>) attributes {dimension_semantics = [#tpu.dimension_semantics<parallel>], iteration_bounds = array<i64: 2>, scalar_prefetch = 0 : i64, scratch_operands = 0 : i64, tpu.core_type = #tpu.core_type<tc>, window_params = [{transform_indices = @transform_0, window_bounds = array<i64: 64, 1152>}, {pipeline_mode = #tpu.pipeline_mode<synchronous>, transform_indices = @transform_1, window_bounds = array<i64: 1152, 128>}, {transform_indices = @transform_2, window_bounds = array<i64: 64, 128>}]} {
    %c0 = arith.constant 0 : index
    %c0_0 = arith.constant 0 : index
    %0 = vector.load %arg1[%c0, %c0_0] : memref<64x1152xbf16, #tpu.memory_space<vmem>>, vector<64x1152xbf16>
    %c0_1 = arith.constant 0 : index
    %c0_2 = arith.constant 0 : index
    %1 = vector.load %arg2[%c0_1, %c0_2] : memref<1152x128xbf16, #tpu.memory_space<vmem>>, vector<1152x128xbf16>
    %cst = arith.constant dense<0.000000e+00> : vector<64x128xf32>
    %2 = tpu.matmul %0, %1, %cst {dimension_numbers = #tpu.dot_dimension_numbers<[1], [0], [0], [1], [0, 0, 1, 1], [], []>} : vector<64x1152xbf16>, vector<1152x128xbf16>, vector<64x128xf32> -> vector<64x128xf32>
    %3 = arith.truncf %2 : vector<64x128xf32> to vector<64x128xbf16>
    %c0_3 = arith.constant 0 : index
    %c0_4 = arith.constant 0 : index
    %4 = vector.load %arg3[%c0_3, %c0_4] : memref<64x128xbf16, #tpu.memory_space<vmem>>, vector<64x128xbf16>
    tpu.vector_store %arg3[%c0_3, %c0_4], %3 {strides = array<i32>} : memref<64x128xbf16, #tpu.memory_space<vmem>>, vector<64x128xbf16>,
    return
  }
  func.func @transform_0(%arg0: i32) -> (i32, i32) {
    %c0_i32 = arith.constant 0 : i32
    %c0_i32_0 = arith.constant 0 : i32
    return %arg0, %c0_i32 : i32, i32
  }
  func.func @transform_1(%arg0: i32) -> (i32, i32) {
    %c0_i32 = arith.constant 0 : i32
    %c0_i32_0 = arith.constant 0 : i32
    %c0_i32_1 = arith.constant 0 : i32
    return %c0_i32, %c0_i32_0 : i32, i32
  }
  func.func @transform_2(%arg0: i32) -> (i32, i32) {
    %c0_i32 = arith.constant 0 : i32
    %c0_i32_0 = arith.constant 0 : i32
    return %arg0, %c0_i32 : i32, i32
  }
}

module attributes {stable_mosaic.version = 11 : i64} {
  func.func @_bn_relu_mm_bn_relu_kernel(%arg0: i32, %arg1: memref<64x256xbf16, #tpu.memory_space<vmem>>, %arg2: memref<1x256xf32, #tpu.memory_space<vmem>>, %arg3: memref<1x256xf32, #tpu.memory_space<vmem>>, %arg4: memref<256x128xbf16, #tpu.memory_space<vmem>>, %arg5: memref<1x128xf32, #tpu.memory_space<vmem>>, %arg6: memref<1x128xf32, #tpu.memory_space<vmem>>, %arg7: memref<64x128xbf16, #tpu.memory_space<vmem>>) attributes {dimension_semantics = [#tpu.dimension_semantics<parallel>], iteration_bounds = array<i64: 2>, scalar_prefetch = 0 : i64, scratch_operands = 0 : i64, tpu.core_type = #tpu.core_type<tc>, window_params = [{transform_indices = @transform_0, window_bounds = array<i64: 64, 256>}, {pipeline_mode = #tpu.pipeline_mode<synchronous>, transform_indices = @transform_1, window_bounds = array<i64: 1, 256>}, {pipeline_mode = #tpu.pipeline_mode<synchronous>, transform_indices = @transform_2, window_bounds = array<i64: 1, 256>}, {pipeline_mode = #tpu.pipeline_mode<synchronous>, transform_indices = @transform_3, window_bounds = array<i64: 256, 128>}, {pipeline_mode = #tpu.pipeline_mode<synchronous>, transform_indices = @transform_4, window_bounds = array<i64: 1, 128>}, {pipeline_mode = #tpu.pipeline_mode<synchronous>, transform_indices = @transform_5, window_bounds = array<i64: 1, 128>}, {transform_indices = @transform_6, window_bounds = array<i64: 64, 128>}]} {
    %c0 = arith.constant 0 : index
    %c0_0 = arith.constant 0 : index
    %0 = vector.load %arg1[%c0, %c0_0] : memref<64x256xbf16, #tpu.memory_space<vmem>>, vector<64x256xbf16>
    %1 = arith.extf %0 : vector<64x256xbf16> to vector<64x256xf32>
    %c0_1 = arith.constant 0 : index
    %c0_2 = arith.constant 0 : index
    %2 = vector.load %arg2[%c0_1, %c0_2] : memref<1x256xf32, #tpu.memory_space<vmem>>, vector<1x256xf32>
    %3 = vector.broadcast %2 : vector<1x256xf32> to vector<64x256xf32>
    %4 = arith.mulf %1, %3 : vector<64x256xf32>
    %c0_3 = arith.constant 0 : index
    %c0_4 = arith.constant 0 : index
    %5 = vector.load %arg3[%c0_3, %c0_4] : memref<1x256xf32, #tpu.memory_space<vmem>>, vector<1x256xf32>
    %6 = vector.broadcast %5 : vector<1x256xf32> to vector<64x256xf32>
    %7 = arith.addf %4, %6 : vector<64x256xf32>
    %cst = arith.constant 0.000000e+00 : f32
    %8 = vector.broadcast %cst : f32 to vector<64x256xf32>
    %9 = arith.maximumf %7, %8 : vector<64x256xf32>
    %10 = arith.truncf %9 : vector<64x256xf32> to vector<64x256xbf16>
    %c0_5 = arith.constant 0 : index
    %c0_6 = arith.constant 0 : index
    %11 = vector.load %arg4[%c0_5, %c0_6] : memref<256x128xbf16, #tpu.memory_space<vmem>>, vector<256x128xbf16>
    %cst_7 = arith.constant dense<0.000000e+00> : vector<64x128xf32>
    %12 = tpu.matmul %10, %11, %cst_7 {dimension_numbers = #tpu.dot_dimension_numbers<[1], [0], [0], [1], [0, 0, 1, 1], [], []>} : vector<64x256xbf16>, vector<256x128xbf16>, vector<64x128xf32> -> vector<64x128xf32>
    %c0_8 = arith.constant 0 : index
    %c0_9 = arith.constant 0 : index
    %13 = vector.load %arg5[%c0_8, %c0_9] : memref<1x128xf32, #tpu.memory_space<vmem>>, vector<1x128xf32>
    %14 = vector.broadcast %13 : vector<1x128xf32> to vector<64x128xf32>
    %15 = arith.mulf %12, %14 : vector<64x128xf32>
    %c0_10 = arith.constant 0 : index
    %c0_11 = arith.constant 0 : index
    %16 = vector.load %arg6[%c0_10, %c0_11] : memref<1x128xf32, #tpu.memory_space<vmem>>, vector<1x128xf32>
    %17 = vector.broadcast %16 : vector<1x128xf32> to vector<64x128xf32>
    %18 = arith.addf %15, %17 : vector<64x128xf32>
    %cst_12 = arith.constant 0.000000e+00 : f32
    %19 = vector.broadcast %cst_12 : f32 to vector<64x128xf32>
    %20 = arith.maximumf %18, %19 : vector<64x128xf32>
    %21 = arith.truncf %20 : vector<64x128xf32> to vector<64x128xbf16>
    %c0_13 = arith.constant 0 : index
    %c0_14 = arith.constant 0 : index
    %22 = vector.load %arg7[%c0_13, %c0_14] : memref<64x128xbf16, #tpu.memory_space<vmem>>, vector<64x128xbf16>
    tpu.vector_store %arg7[%c0_13, %c0_14], %21 {strides = array<i32>} : memref<64x128xbf16, #tpu.memory_space<vmem>>, vector<64x128xbf16>,
    return
  }
  func.func @transform_0(%arg0: i32) -> (i32, i32) {
    %c0_i32 = arith.constant 0 : i32
    %c0_i32_0 = arith.constant 0 : i32
    return %arg0, %c0_i32 : i32, i32
  }
  func.func @transform_1(%arg0: i32) -> (i32, i32) {
    %c0_i32 = arith.constant 0 : i32
    %c0_i32_0 = arith.constant 0 : i32
    %c0_i32_1 = arith.constant 0 : i32
    return %c0_i32, %c0_i32_0 : i32, i32
  }
  func.func @transform_2(%arg0: i32) -> (i32, i32) {
    %c0_i32 = arith.constant 0 : i32
    %c0_i32_0 = arith.constant 0 : i32
    %c0_i32_1 = arith.constant 0 : i32
    return %c0_i32, %c0_i32_0 : i32, i32
  }
  func.func @transform_3(%arg0: i32) -> (i32, i32) {
    %c0_i32 = arith.constant 0 : i32
    %c0_i32_0 = arith.constant 0 : i32
    %c0_i32_1 = arith.constant 0 : i32
    return %c0_i32, %c0_i32_0 : i32, i32
  }
  func.func @transform_4(%arg0: i32) -> (i32, i32) {
    %c0_i32 = arith.constant 0 : i32
    %c0_i32_0 = arith.constant 0 : i32
    %c0_i32_1 = arith.constant 0 : i32
    return %c0_i32, %c0_i32_0 : i32, i32
  }
  func.func @transform_5(%arg0: i32) -> (i32, i32) {
    %c0_i32 = arith.constant 0 : i32
    %c0_i32_0 = arith.constant 0 : i32
    %c0_i32_1 = arith.constant 0 : i32
    return %c0_i32, %c0_i32_0 : i32, i32
  }
  func.func @transform_6(%arg0: i32) -> (i32, i32) {
    %c0_i32 = arith.constant 0 : i32
    %c0_i32_0 = arith.constant 0 : i32
    return %arg0, %c0_i32 : i32, i32
  }
}

module attributes {stable_mosaic.version = 11 : i64} {
  func.func @_bn_relu_mm_kernel(%arg0: i32, %arg1: memref<64x256xbf16, #tpu.memory_space<vmem>>, %arg2: memref<1x256xf32, #tpu.memory_space<vmem>>, %arg3: memref<1x256xf32, #tpu.memory_space<vmem>>, %arg4: memref<256x128xbf16, #tpu.memory_space<vmem>>, %arg5: memref<64x128xbf16, #tpu.memory_space<vmem>>) attributes {dimension_semantics = [#tpu.dimension_semantics<parallel>], iteration_bounds = array<i64: 2>, scalar_prefetch = 0 : i64, scratch_operands = 0 : i64, tpu.core_type = #tpu.core_type<tc>, window_params = [{transform_indices = @transform_0, window_bounds = array<i64: 64, 256>}, {pipeline_mode = #tpu.pipeline_mode<synchronous>, transform_indices = @transform_1, window_bounds = array<i64: 1, 256>}, {pipeline_mode = #tpu.pipeline_mode<synchronous>, transform_indices = @transform_2, window_bounds = array<i64: 1, 256>}, {pipeline_mode = #tpu.pipeline_mode<synchronous>, transform_indices = @transform_3, window_bounds = array<i64: 256, 128>}, {transform_indices = @transform_4, window_bounds = array<i64: 64, 128>}]} {
    %c0 = arith.constant 0 : index
    %c0_0 = arith.constant 0 : index
    %0 = vector.load %arg1[%c0, %c0_0] : memref<64x256xbf16, #tpu.memory_space<vmem>>, vector<64x256xbf16>
    %1 = arith.extf %0 : vector<64x256xbf16> to vector<64x256xf32>
    %c0_1 = arith.constant 0 : index
    %c0_2 = arith.constant 0 : index
    %2 = vector.load %arg2[%c0_1, %c0_2] : memref<1x256xf32, #tpu.memory_space<vmem>>, vector<1x256xf32>
    %3 = vector.broadcast %2 : vector<1x256xf32> to vector<64x256xf32>
    %4 = arith.mulf %1, %3 : vector<64x256xf32>
    %c0_3 = arith.constant 0 : index
    %c0_4 = arith.constant 0 : index
    %5 = vector.load %arg3[%c0_3, %c0_4] : memref<1x256xf32, #tpu.memory_space<vmem>>, vector<1x256xf32>
    %6 = vector.broadcast %5 : vector<1x256xf32> to vector<64x256xf32>
    %7 = arith.addf %4, %6 : vector<64x256xf32>
    %cst = arith.constant 0.000000e+00 : f32
    %8 = vector.broadcast %cst : f32 to vector<64x256xf32>
    %9 = arith.maximumf %7, %8 : vector<64x256xf32>
    %10 = arith.truncf %9 : vector<64x256xf32> to vector<64x256xbf16>
    %c0_5 = arith.constant 0 : index
    %c0_6 = arith.constant 0 : index
    %11 = vector.load %arg4[%c0_5, %c0_6] : memref<256x128xbf16, #tpu.memory_space<vmem>>, vector<256x128xbf16>
    %cst_7 = arith.constant dense<0.000000e+00> : vector<64x128xf32>
    %12 = tpu.matmul %10, %11, %cst_7 {dimension_numbers = #tpu.dot_dimension_numbers<[1], [0], [0], [1], [0, 0, 1, 1], [], []>} : vector<64x256xbf16>, vector<256x128xbf16>, vector<64x128xf32> -> vector<64x128xf32>
    %13 = arith.truncf %12 : vector<64x128xf32> to vector<64x128xbf16>
    %c0_8 = arith.constant 0 : index
    %c0_9 = arith.constant 0 : index
    %14 = vector.load %arg5[%c0_8, %c0_9] : memref<64x128xbf16, #tpu.memory_space<vmem>>, vector<64x128xbf16>
    tpu.vector_store %arg5[%c0_8, %c0_9], %13 {strides = array<i32>} : memref<64x128xbf16, #tpu.memory_space<vmem>>, vector<64x128xbf16>,
    return
  }
  func.func @transform_0(%arg0: i32) -> (i32, i32) {
    %c0_i32 = arith.constant 0 : i32
    %c0_i32_0 = arith.constant 0 : i32
    return %arg0, %c0_i32 : i32, i32
  }
  func.func @transform_1(%arg0: i32) -> (i32, i32) {
    %c0_i32 = arith.constant 0 : i32
    %c0_i32_0 = arith.constant 0 : i32
    %c0_i32_1 = arith.constant 0 : i32
    return %c0_i32, %c0_i32_0 : i32, i32
  }
  func.func @transform_2(%arg0: i32) -> (i32, i32) {
    %c0_i32 = arith.constant 0 : i32
    %c0_i32_0 = arith.constant 0 : i32
    %c0_i32_1 = arith.constant 0 : i32
    return %c0_i32, %c0_i32_0 : i32, i32
  }
  func.func @transform_3(%arg0: i32) -> (i32, i32) {
    %c0_i32 = arith.constant 0 : i32
    %c0_i32_0 = arith.constant 0 : i32
    %c0_i32_1 = arith.constant 0 : i32
    return %c0_i32, %c0_i32_0 : i32, i32
  }
  func.func @transform_4(%arg0: i32) -> (i32, i32) {
    %c0_i32 = arith.constant 0 : i32
    %c0_i32_0 = arith.constant 0 : i32
    return %arg0, %c0_i32 : i32, i32
  }
}

module attributes {stable_mosaic.version = 11 : i64} {
  func.func @_bn_relu_mm_bn_relu_kernel(%arg0: i32, %arg1: memref<16x128xbf16, #tpu.memory_space<vmem>>, %arg2: memref<1x128xf32, #tpu.memory_space<vmem>>, %arg3: memref<1x128xf32, #tpu.memory_space<vmem>>, %arg4: memref<128x128xbf16, #tpu.memory_space<vmem>>, %arg5: memref<1x128xf32, #tpu.memory_space<vmem>>, %arg6: memref<1x128xf32, #tpu.memory_space<vmem>>, %arg7: memref<16x128xbf16, #tpu.memory_space<vmem>>) attributes {dimension_semantics = [#tpu.dimension_semantics<parallel>], iteration_bounds = array<i64: 2>, scalar_prefetch = 0 : i64, scratch_operands = 0 : i64, tpu.core_type = #tpu.core_type<tc>, window_params = [{transform_indices = @transform_0, window_bounds = array<i64: 16, 128>}, {pipeline_mode = #tpu.pipeline_mode<synchronous>, transform_indices = @transform_1, window_bounds = array<i64: 1, 128>}, {pipeline_mode = #tpu.pipeline_mode<synchronous>, transform_indices = @transform_2, window_bounds = array<i64: 1, 128>}, {pipeline_mode = #tpu.pipeline_mode<synchronous>, transform_indices = @transform_3, window_bounds = array<i64: 128, 128>}, {pipeline_mode = #tpu.pipeline_mode<synchronous>, transform_indices = @transform_4, window_bounds = array<i64: 1, 128>}, {pipeline_mode = #tpu.pipeline_mode<synchronous>, transform_indices = @transform_5, window_bounds = array<i64: 1, 128>}, {transform_indices = @transform_6, window_bounds = array<i64: 16, 128>}]} {
    %c0 = arith.constant 0 : index
    %c0_0 = arith.constant 0 : index
    %0 = vector.load %arg1[%c0, %c0_0] : memref<16x128xbf16, #tpu.memory_space<vmem>>, vector<16x128xbf16>
    %1 = arith.extf %0 : vector<16x128xbf16> to vector<16x128xf32>
    %c0_1 = arith.constant 0 : index
    %c0_2 = arith.constant 0 : index
    %2 = vector.load %arg2[%c0_1, %c0_2] : memref<1x128xf32, #tpu.memory_space<vmem>>, vector<1x128xf32>
    %3 = vector.broadcast %2 : vector<1x128xf32> to vector<16x128xf32>
    %4 = arith.mulf %1, %3 : vector<16x128xf32>
    %c0_3 = arith.constant 0 : index
    %c0_4 = arith.constant 0 : index
    %5 = vector.load %arg3[%c0_3, %c0_4] : memref<1x128xf32, #tpu.memory_space<vmem>>, vector<1x128xf32>
    %6 = vector.broadcast %5 : vector<1x128xf32> to vector<16x128xf32>
    %7 = arith.addf %4, %6 : vector<16x128xf32>
    %cst = arith.constant 0.000000e+00 : f32
    %8 = vector.broadcast %cst : f32 to vector<16x128xf32>
    %9 = arith.maximumf %7, %8 : vector<16x128xf32>
    %10 = arith.truncf %9 : vector<16x128xf32> to vector<16x128xbf16>
    %c0_5 = arith.constant 0 : index
    %c0_6 = arith.constant 0 : index
    %11 = vector.load %arg4[%c0_5, %c0_6] : memref<128x128xbf16, #tpu.memory_space<vmem>>, vector<128x128xbf16>
    %cst_7 = arith.constant dense<0.000000e+00> : vector<16x128xf32>
    %12 = tpu.matmul %10, %11, %cst_7 {dimension_numbers = #tpu.dot_dimension_numbers<[1], [0], [0], [1], [0, 0, 1, 1], [], []>} : vector<16x128xbf16>, vector<128x128xbf16>, vector<16x128xf32> -> vector<16x128xf32>
    %c0_8 = arith.constant 0 : index
    %c0_9 = arith.constant 0 : index
    %13 = vector.load %arg5[%c0_8, %c0_9] : memref<1x128xf32, #tpu.memory_space<vmem>>, vector<1x128xf32>
    %14 = vector.broadcast %13 : vector<1x128xf32> to vector<16x128xf32>
    %15 = arith.mulf %12, %14 : vector<16x128xf32>
    %c0_10 = arith.constant 0 : index
    %c0_11 = arith.constant 0 : index
    %16 = vector.load %arg6[%c0_10, %c0_11] : memref<1x128xf32, #tpu.memory_space<vmem>>, vector<1x128xf32>
    %17 = vector.broadcast %16 : vector<1x128xf32> to vector<16x128xf32>
    %18 = arith.addf %15, %17 : vector<16x128xf32>
    %cst_12 = arith.constant 0.000000e+00 : f32
    %19 = vector.broadcast %cst_12 : f32 to vector<16x128xf32>
    %20 = arith.maximumf %18, %19 : vector<16x128xf32>
    %21 = arith.truncf %20 : vector<16x128xf32> to vector<16x128xbf16>
    %c0_13 = arith.constant 0 : index
    %c0_14 = arith.constant 0 : index
    %22 = vector.load %arg7[%c0_13, %c0_14] : memref<16x128xbf16, #tpu.memory_space<vmem>>, vector<16x128xbf16>
    tpu.vector_store %arg7[%c0_13, %c0_14], %21 {strides = array<i32>} : memref<16x128xbf16, #tpu.memory_space<vmem>>, vector<16x128xbf16>,
    return
  }
  func.func @transform_0(%arg0: i32) -> (i32, i32) {
    %c0_i32 = arith.constant 0 : i32
    %c0_i32_0 = arith.constant 0 : i32
    return %arg0, %c0_i32 : i32, i32
  }
  func.func @transform_1(%arg0: i32) -> (i32, i32) {
    %c0_i32 = arith.constant 0 : i32
    %c0_i32_0 = arith.constant 0 : i32
    %c0_i32_1 = arith.constant 0 : i32
    return %c0_i32, %c0_i32_0 : i32, i32
  }
  func.func @transform_2(%arg0: i32) -> (i32, i32) {
    %c0_i32 = arith.constant 0 : i32
    %c0_i32_0 = arith.constant 0 : i32
    %c0_i32_1 = arith.constant 0 : i32
    return %c0_i32, %c0_i32_0 : i32, i32
  }
  func.func @transform_3(%arg0: i32) -> (i32, i32) {
    %c0_i32 = arith.constant 0 : i32
    %c0_i32_0 = arith.constant 0 : i32
    %c0_i32_1 = arith.constant 0 : i32
    return %c0_i32, %c0_i32_0 : i32, i32
  }
  func.func @transform_4(%arg0: i32) -> (i32, i32) {
    %c0_i32 = arith.constant 0 : i32
    %c0_i32_0 = arith.constant 0 : i32
    %c0_i32_1 = arith.constant 0 : i32
    return %c0_i32, %c0_i32_0 : i32, i32
  }
  func.func @transform_5(%arg0: i32) -> (i32, i32) {
    %c0_i32 = arith.constant 0 : i32
    %c0_i32_0 = arith.constant 0 : i32
    %c0_i32_1 = arith.constant 0 : i32
    return %c0_i32, %c0_i32_0 : i32, i32
  }
  func.func @transform_6(%arg0: i32) -> (i32, i32) {
    %c0_i32 = arith.constant 0 : i32
    %c0_i32_0 = arith.constant 0 : i32
    return %arg0, %c0_i32 : i32, i32
  }
}

module attributes {stable_mosaic.version = 11 : i64} {
  func.func @_mean_stack_kernel(%arg0: i32, %arg1: memref<4x16x128xbf16, #tpu.memory_space<vmem>>, %arg2: memref<16x128xbf16, #tpu.memory_space<vmem>>) attributes {dimension_semantics = [#tpu.dimension_semantics<parallel>], iteration_bounds = array<i64: 2>, scalar_prefetch = 0 : i64, scratch_operands = 0 : i64, tpu.core_type = #tpu.core_type<tc>, window_params = [{transform_indices = @transform_0, window_bounds = array<i64: 4, 16, 128>}, {transform_indices = @transform_1, window_bounds = array<i64: 16, 128>}]} {
    %c0 = arith.constant 0 : index
    %c0_0 = arith.constant 0 : index
    %c0_1 = arith.constant 0 : index
    %0 = vector.load %arg1[%c0, %c0_0, %c0_1] : memref<4x16x128xbf16, #tpu.memory_space<vmem>>, vector<4x16x128xbf16>
    %1 = arith.extf %0 : vector<4x16x128xbf16> to vector<4x16x128xf32>
    %cst = arith.constant dense<0.000000e+00> : vector<16x128xf32>
    %2 = vector.multi_reduction <add>, %1, %cst [0] : vector<4x16x128xf32> to vector<16x128xf32>
    %cst_2 = arith.constant 4.000000e+00 : f32
    %3 = vector.broadcast %cst_2 : f32 to vector<16x128xf32>
    %4 = arith.divf %2, %3 : vector<16x128xf32>
    %5 = arith.truncf %4 : vector<16x128xf32> to vector<16x128xbf16>
    %c0_3 = arith.constant 0 : index
    %c0_4 = arith.constant 0 : index
    %6 = vector.load %arg2[%c0_3, %c0_4] : memref<16x128xbf16, #tpu.memory_space<vmem>>, vector<16x128xbf16>
    tpu.vector_store %arg2[%c0_3, %c0_4], %5 {strides = array<i32>} : memref<16x128xbf16, #tpu.memory_space<vmem>>, vector<16x128xbf16>,
    return
  }
  func.func @transform_0(%arg0: i32) -> (i32, i32, i32) {
    %c0_i32 = arith.constant 0 : i32
    %c0_i32_0 = arith.constant 0 : i32
    %c0_i32_1 = arith.constant 0 : i32
    return %c0_i32, %arg0, %c0_i32_0 : i32, i32, i32
  }
  func.func @transform_1(%arg0: i32) -> (i32, i32) {
    %c0_i32 = arith.constant 0 : i32
    %c0_i32_0 = arith.constant 0 : i32
    return %arg0, %c0_i32 : i32, i32
  }
}

module attributes {stable_mosaic.version = 11 : i64} {
  func.func @_mm_kernel(%arg0: i32, %arg1: memref<16x1152xbf16, #tpu.memory_space<vmem>>, %arg2: memref<1152x128xbf16, #tpu.memory_space<vmem>>, %arg3: memref<16x128xbf16, #tpu.memory_space<vmem>>) attributes {dimension_semantics = [#tpu.dimension_semantics<parallel>], iteration_bounds = array<i64: 2>, scalar_prefetch = 0 : i64, scratch_operands = 0 : i64, tpu.core_type = #tpu.core_type<tc>, window_params = [{transform_indices = @transform_0, window_bounds = array<i64: 16, 1152>}, {pipeline_mode = #tpu.pipeline_mode<synchronous>, transform_indices = @transform_1, window_bounds = array<i64: 1152, 128>}, {transform_indices = @transform_2, window_bounds = array<i64: 16, 128>}]} {
    %c0 = arith.constant 0 : index
    %c0_0 = arith.constant 0 : index
    %0 = vector.load %arg1[%c0, %c0_0] : memref<16x1152xbf16, #tpu.memory_space<vmem>>, vector<16x1152xbf16>
    %c0_1 = arith.constant 0 : index
    %c0_2 = arith.constant 0 : index
    %1 = vector.load %arg2[%c0_1, %c0_2] : memref<1152x128xbf16, #tpu.memory_space<vmem>>, vector<1152x128xbf16>
    %cst = arith.constant dense<0.000000e+00> : vector<16x128xf32>
    %2 = tpu.matmul %0, %1, %cst {dimension_numbers = #tpu.dot_dimension_numbers<[1], [0], [0], [1], [0, 0, 1, 1], [], []>} : vector<16x1152xbf16>, vector<1152x128xbf16>, vector<16x128xf32> -> vector<16x128xf32>
    %3 = arith.truncf %2 : vector<16x128xf32> to vector<16x128xbf16>
    %c0_3 = arith.constant 0 : index
    %c0_4 = arith.constant 0 : index
    %4 = vector.load %arg3[%c0_3, %c0_4] : memref<16x128xbf16, #tpu.memory_space<vmem>>, vector<16x128xbf16>
    tpu.vector_store %arg3[%c0_3, %c0_4], %3 {strides = array<i32>} : memref<16x128xbf16, #tpu.memory_space<vmem>>, vector<16x128xbf16>,
    return
  }
  func.func @transform_0(%arg0: i32) -> (i32, i32) {
    %c0_i32 = arith.constant 0 : i32
    %c0_i32_0 = arith.constant 0 : i32
    return %arg0, %c0_i32 : i32, i32
  }
  func.func @transform_1(%arg0: i32) -> (i32, i32) {
    %c0_i32 = arith.constant 0 : i32
    %c0_i32_0 = arith.constant 0 : i32
    %c0_i32_1 = arith.constant 0 : i32
    return %c0_i32, %c0_i32_0 : i32, i32
  }
  func.func @transform_2(%arg0: i32) -> (i32, i32) {
    %c0_i32 = arith.constant 0 : i32
    %c0_i32_0 = arith.constant 0 : i32
    return %arg0, %c0_i32 : i32, i32
  }
}

module attributes {stable_mosaic.version = 11 : i64} {
  func.func @_bn_relu_mm_bn_relu_kernel(%arg0: i32, %arg1: memref<16x256xbf16, #tpu.memory_space<vmem>>, %arg2: memref<1x256xf32, #tpu.memory_space<vmem>>, %arg3: memref<1x256xf32, #tpu.memory_space<vmem>>, %arg4: memref<256x128xbf16, #tpu.memory_space<vmem>>, %arg5: memref<1x128xf32, #tpu.memory_space<vmem>>, %arg6: memref<1x128xf32, #tpu.memory_space<vmem>>, %arg7: memref<16x128xbf16, #tpu.memory_space<vmem>>) attributes {dimension_semantics = [#tpu.dimension_semantics<parallel>], iteration_bounds = array<i64: 2>, scalar_prefetch = 0 : i64, scratch_operands = 0 : i64, tpu.core_type = #tpu.core_type<tc>, window_params = [{transform_indices = @transform_0, window_bounds = array<i64: 16, 256>}, {pipeline_mode = #tpu.pipeline_mode<synchronous>, transform_indices = @transform_1, window_bounds = array<i64: 1, 256>}, {pipeline_mode = #tpu.pipeline_mode<synchronous>, transform_indices = @transform_2, window_bounds = array<i64: 1, 256>}, {pipeline_mode = #tpu.pipeline_mode<synchronous>, transform_indices = @transform_3, window_bounds = array<i64: 256, 128>}, {pipeline_mode = #tpu.pipeline_mode<synchronous>, transform_indices = @transform_4, window_bounds = array<i64: 1, 128>}, {pipeline_mode = #tpu.pipeline_mode<synchronous>, transform_indices = @transform_5, window_bounds = array<i64: 1, 128>}, {transform_indices = @transform_6, window_bounds = array<i64: 16, 128>}]} {
    %c0 = arith.constant 0 : index
    %c0_0 = arith.constant 0 : index
    %0 = vector.load %arg1[%c0, %c0_0] : memref<16x256xbf16, #tpu.memory_space<vmem>>, vector<16x256xbf16>
    %1 = arith.extf %0 : vector<16x256xbf16> to vector<16x256xf32>
    %c0_1 = arith.constant 0 : index
    %c0_2 = arith.constant 0 : index
    %2 = vector.load %arg2[%c0_1, %c0_2] : memref<1x256xf32, #tpu.memory_space<vmem>>, vector<1x256xf32>
    %3 = vector.broadcast %2 : vector<1x256xf32> to vector<16x256xf32>
    %4 = arith.mulf %1, %3 : vector<16x256xf32>
    %c0_3 = arith.constant 0 : index
    %c0_4 = arith.constant 0 : index
    %5 = vector.load %arg3[%c0_3, %c0_4] : memref<1x256xf32, #tpu.memory_space<vmem>>, vector<1x256xf32>
    %6 = vector.broadcast %5 : vector<1x256xf32> to vector<16x256xf32>
    %7 = arith.addf %4, %6 : vector<16x256xf32>
    %cst = arith.constant 0.000000e+00 : f32
    %8 = vector.broadcast %cst : f32 to vector<16x256xf32>
    %9 = arith.maximumf %7, %8 : vector<16x256xf32>
    %10 = arith.truncf %9 : vector<16x256xf32> to vector<16x256xbf16>
    %c0_5 = arith.constant 0 : index
    %c0_6 = arith.constant 0 : index
    %11 = vector.load %arg4[%c0_5, %c0_6] : memref<256x128xbf16, #tpu.memory_space<vmem>>, vector<256x128xbf16>
    %cst_7 = arith.constant dense<0.000000e+00> : vector<16x128xf32>
    %12 = tpu.matmul %10, %11, %cst_7 {dimension_numbers = #tpu.dot_dimension_numbers<[1], [0], [0], [1], [0, 0, 1, 1], [], []>} : vector<16x256xbf16>, vector<256x128xbf16>, vector<16x128xf32> -> vector<16x128xf32>
    %c0_8 = arith.constant 0 : index
    %c0_9 = arith.constant 0 : index
    %13 = vector.load %arg5[%c0_8, %c0_9] : memref<1x128xf32, #tpu.memory_space<vmem>>, vector<1x128xf32>
    %14 = vector.broadcast %13 : vector<1x128xf32> to vector<16x128xf32>
    %15 = arith.mulf %12, %14 : vector<16x128xf32>
    %c0_10 = arith.constant 0 : index
    %c0_11 = arith.constant 0 : index
    %16 = vector.load %arg6[%c0_10, %c0_11] : memref<1x128xf32, #tpu.memory_space<vmem>>, vector<1x128xf32>
    %17 = vector.broadcast %16 : vector<1x128xf32> to vector<16x128xf32>
    %18 = arith.addf %15, %17 : vector<16x128xf32>
    %cst_12 = arith.constant 0.000000e+00 : f32
    %19 = vector.broadcast %cst_12 : f32 to vector<16x128xf32>
    %20 = arith.maximumf %18, %19 : vector<16x128xf32>
    %21 = arith.truncf %20 : vector<16x128xf32> to vector<16x128xbf16>
    %c0_13 = arith.constant 0 : index
    %c0_14 = arith.constant 0 : index
    %22 = vector.load %arg7[%c0_13, %c0_14] : memref<16x128xbf16, #tpu.memory_space<vmem>>, vector<16x128xbf16>
    tpu.vector_store %arg7[%c0_13, %c0_14], %21 {strides = array<i32>} : memref<16x128xbf16, #tpu.memory_space<vmem>>, vector<16x128xbf16>,
    return
  }
  func.func @transform_0(%arg0: i32) -> (i32, i32) {
    %c0_i32 = arith.constant 0 : i32
    %c0_i32_0 = arith.constant 0 : i32
    return %arg0, %c0_i32 : i32, i32
  }
  func.func @transform_1(%arg0: i32) -> (i32, i32) {
    %c0_i32 = arith.constant 0 : i32
    %c0_i32_0 = arith.constant 0 : i32
    %c0_i32_1 = arith.constant 0 : i32
    return %c0_i32, %c0_i32_0 : i32, i32
  }
  func.func @transform_2(%arg0: i32) -> (i32, i32) {
    %c0_i32 = arith.constant 0 : i32
    %c0_i32_0 = arith.constant 0 : i32
    %c0_i32_1 = arith.constant 0 : i32
    return %c0_i32, %c0_i32_0 : i32, i32
  }
  func.func @transform_3(%arg0: i32) -> (i32, i32) {
    %c0_i32 = arith.constant 0 : i32
    %c0_i32_0 = arith.constant 0 : i32
    %c0_i32_1 = arith.constant 0 : i32
    return %c0_i32, %c0_i32_0 : i32, i32
  }
  func.func @transform_4(%arg0: i32) -> (i32, i32) {
    %c0_i32 = arith.constant 0 : i32
    %c0_i32_0 = arith.constant 0 : i32
    %c0_i32_1 = arith.constant 0 : i32
    return %c0_i32, %c0_i32_0 : i32, i32
  }
  func.func @transform_5(%arg0: i32) -> (i32, i32) {
    %c0_i32 = arith.constant 0 : i32
    %c0_i32_0 = arith.constant 0 : i32
    %c0_i32_1 = arith.constant 0 : i32
    return %c0_i32, %c0_i32_0 : i32, i32
  }
  func.func @transform_6(%arg0: i32) -> (i32, i32) {
    %c0_i32 = arith.constant 0 : i32
    %c0_i32_0 = arith.constant 0 : i32
    return %arg0, %c0_i32 : i32, i32
  }
}

module attributes {stable_mosaic.version = 11 : i64} {
  func.func @_bn_relu_mm_bn_relu_kernel(%arg0: i32, %arg1: memref<16x384xbf16, #tpu.memory_space<vmem>>, %arg2: memref<1x384xf32, #tpu.memory_space<vmem>>, %arg3: memref<1x384xf32, #tpu.memory_space<vmem>>, %arg4: memref<384x128xbf16, #tpu.memory_space<vmem>>, %arg5: memref<1x128xf32, #tpu.memory_space<vmem>>, %arg6: memref<1x128xf32, #tpu.memory_space<vmem>>, %arg7: memref<16x128xbf16, #tpu.memory_space<vmem>>) attributes {dimension_semantics = [#tpu.dimension_semantics<parallel>], iteration_bounds = array<i64: 2>, scalar_prefetch = 0 : i64, scratch_operands = 0 : i64, tpu.core_type = #tpu.core_type<tc>, window_params = [{transform_indices = @transform_0, window_bounds = array<i64: 16, 384>}, {pipeline_mode = #tpu.pipeline_mode<synchronous>, transform_indices = @transform_1, window_bounds = array<i64: 1, 384>}, {pipeline_mode = #tpu.pipeline_mode<synchronous>, transform_indices = @transform_2, window_bounds = array<i64: 1, 384>}, {pipeline_mode = #tpu.pipeline_mode<synchronous>, transform_indices = @transform_3, window_bounds = array<i64: 384, 128>}, {pipeline_mode = #tpu.pipeline_mode<synchronous>, transform_indices = @transform_4, window_bounds = array<i64: 1, 128>}, {pipeline_mode = #tpu.pipeline_mode<synchronous>, transform_indices = @transform_5, window_bounds = array<i64: 1, 128>}, {transform_indices = @transform_6, window_bounds = array<i64: 16, 128>}]} {
    %c0 = arith.constant 0 : index
    %c0_0 = arith.constant 0 : index
    %0 = vector.load %arg1[%c0, %c0_0] : memref<16x384xbf16, #tpu.memory_space<vmem>>, vector<16x384xbf16>
    %1 = arith.extf %0 : vector<16x384xbf16> to vector<16x384xf32>
    %c0_1 = arith.constant 0 : index
    %c0_2 = arith.constant 0 : index
    %2 = vector.load %arg2[%c0_1, %c0_2] : memref<1x384xf32, #tpu.memory_space<vmem>>, vector<1x384xf32>
    %3 = vector.broadcast %2 : vector<1x384xf32> to vector<16x384xf32>
    %4 = arith.mulf %1, %3 : vector<16x384xf32>
    %c0_3 = arith.constant 0 : index
    %c0_4 = arith.constant 0 : index
    %5 = vector.load %arg3[%c0_3, %c0_4] : memref<1x384xf32, #tpu.memory_space<vmem>>, vector<1x384xf32>
    %6 = vector.broadcast %5 : vector<1x384xf32> to vector<16x384xf32>
    %7 = arith.addf %4, %6 : vector<16x384xf32>
    %cst = arith.constant 0.000000e+00 : f32
    %8 = vector.broadcast %cst : f32 to vector<16x384xf32>
    %9 = arith.maximumf %7, %8 : vector<16x384xf32>
    %10 = arith.truncf %9 : vector<16x384xf32> to vector<16x384xbf16>
    %c0_5 = arith.constant 0 : index
    %c0_6 = arith.constant 0 : index
    %11 = vector.load %arg4[%c0_5, %c0_6] : memref<384x128xbf16, #tpu.memory_space<vmem>>, vector<384x128xbf16>
    %cst_7 = arith.constant dense<0.000000e+00> : vector<16x128xf32>
    %12 = tpu.matmul %10, %11, %cst_7 {dimension_numbers = #tpu.dot_dimension_numbers<[1], [0], [0], [1], [0, 0, 1, 1], [], []>} : vector<16x384xbf16>, vector<384x128xbf16>, vector<16x128xf32> -> vector<16x128xf32>
    %c0_8 = arith.constant 0 : index
    %c0_9 = arith.constant 0 : index
    %13 = vector.load %arg5[%c0_8, %c0_9] : memref<1x128xf32, #tpu.memory_space<vmem>>, vector<1x128xf32>
    %14 = vector.broadcast %13 : vector<1x128xf32> to vector<16x128xf32>
    %15 = arith.mulf %12, %14 : vector<16x128xf32>
    %c0_10 = arith.constant 0 : index
    %c0_11 = arith.constant 0 : index
    %16 = vector.load %arg6[%c0_10, %c0_11] : memref<1x128xf32, #tpu.memory_space<vmem>>, vector<1x128xf32>
    %17 = vector.broadcast %16 : vector<1x128xf32> to vector<16x128xf32>
    %18 = arith.addf %15, %17 : vector<16x128xf32>
    %cst_12 = arith.constant 0.000000e+00 : f32
    %19 = vector.broadcast %cst_12 : f32 to vector<16x128xf32>
    %20 = arith.maximumf %18, %19 : vector<16x128xf32>
    %21 = arith.truncf %20 : vector<16x128xf32> to vector<16x128xbf16>
    %c0_13 = arith.constant 0 : index
    %c0_14 = arith.constant 0 : index
    %22 = vector.load %arg7[%c0_13, %c0_14] : memref<16x128xbf16, #tpu.memory_space<vmem>>, vector<16x128xbf16>
    tpu.vector_store %arg7[%c0_13, %c0_14], %21 {strides = array<i32>} : memref<16x128xbf16, #tpu.memory_space<vmem>>, vector<16x128xbf16>,
    return
  }
  func.func @transform_0(%arg0: i32) -> (i32, i32) {
    %c0_i32 = arith.constant 0 : i32
    %c0_i32_0 = arith.constant 0 : i32
    return %arg0, %c0_i32 : i32, i32
  }
  func.func @transform_1(%arg0: i32) -> (i32, i32) {
    %c0_i32 = arith.constant 0 : i32
    %c0_i32_0 = arith.constant 0 : i32
    %c0_i32_1 = arith.constant 0 : i32
    return %c0_i32, %c0_i32_0 : i32, i32
  }
  func.func @transform_2(%arg0: i32) -> (i32, i32) {
    %c0_i32 = arith.constant 0 : i32
    %c0_i32_0 = arith.constant 0 : i32
    %c0_i32_1 = arith.constant 0 : i32
    return %c0_i32, %c0_i32_0 : i32, i32
  }
  func.func @transform_3(%arg0: i32) -> (i32, i32) {
    %c0_i32 = arith.constant 0 : i32
    %c0_i32_0 = arith.constant 0 : i32
    %c0_i32_1 = arith.constant 0 : i32
    return %c0_i32, %c0_i32_0 : i32, i32
  }
  func.func @transform_4(%arg0: i32) -> (i32, i32) {
    %c0_i32 = arith.constant 0 : i32
    %c0_i32_0 = arith.constant 0 : i32
    %c0_i32_1 = arith.constant 0 : i32
    return %c0_i32, %c0_i32_0 : i32, i32
  }
  func.func @transform_5(%arg0: i32) -> (i32, i32) {
    %c0_i32 = arith.constant 0 : i32
    %c0_i32_0 = arith.constant 0 : i32
    %c0_i32_1 = arith.constant 0 : i32
    return %c0_i32, %c0_i32_0 : i32, i32
  }
  func.func @transform_6(%arg0: i32) -> (i32, i32) {
    %c0_i32 = arith.constant 0 : i32
    %c0_i32_0 = arith.constant 0 : i32
    return %arg0, %c0_i32 : i32, i32
  }
}

module attributes {stable_mosaic.version = 11 : i64} {
  func.func @_bn_relu_mm_bn_relu_kernel(%arg0: i32, %arg1: memref<16x512xbf16, #tpu.memory_space<vmem>>, %arg2: memref<1x512xf32, #tpu.memory_space<vmem>>, %arg3: memref<1x512xf32, #tpu.memory_space<vmem>>, %arg4: memref<512x128xbf16, #tpu.memory_space<vmem>>, %arg5: memref<1x128xf32, #tpu.memory_space<vmem>>, %arg6: memref<1x128xf32, #tpu.memory_space<vmem>>, %arg7: memref<16x128xbf16, #tpu.memory_space<vmem>>) attributes {dimension_semantics = [#tpu.dimension_semantics<parallel>], iteration_bounds = array<i64: 2>, scalar_prefetch = 0 : i64, scratch_operands = 0 : i64, tpu.core_type = #tpu.core_type<tc>, window_params = [{transform_indices = @transform_0, window_bounds = array<i64: 16, 512>}, {pipeline_mode = #tpu.pipeline_mode<synchronous>, transform_indices = @transform_1, window_bounds = array<i64: 1, 512>}, {pipeline_mode = #tpu.pipeline_mode<synchronous>, transform_indices = @transform_2, window_bounds = array<i64: 1, 512>}, {pipeline_mode = #tpu.pipeline_mode<synchronous>, transform_indices = @transform_3, window_bounds = array<i64: 512, 128>}, {pipeline_mode = #tpu.pipeline_mode<synchronous>, transform_indices = @transform_4, window_bounds = array<i64: 1, 128>}, {pipeline_mode = #tpu.pipeline_mode<synchronous>, transform_indices = @transform_5, window_bounds = array<i64: 1, 128>}, {transform_indices = @transform_6, window_bounds = array<i64: 16, 128>}]} {
    %c0 = arith.constant 0 : index
    %c0_0 = arith.constant 0 : index
    %0 = vector.load %arg1[%c0, %c0_0] : memref<16x512xbf16, #tpu.memory_space<vmem>>, vector<16x512xbf16>
    %1 = arith.extf %0 : vector<16x512xbf16> to vector<16x512xf32>
    %c0_1 = arith.constant 0 : index
    %c0_2 = arith.constant 0 : index
    %2 = vector.load %arg2[%c0_1, %c0_2] : memref<1x512xf32, #tpu.memory_space<vmem>>, vector<1x512xf32>
    %3 = vector.broadcast %2 : vector<1x512xf32> to vector<16x512xf32>
    %4 = arith.mulf %1, %3 : vector<16x512xf32>
    %c0_3 = arith.constant 0 : index
    %c0_4 = arith.constant 0 : index
    %5 = vector.load %arg3[%c0_3, %c0_4] : memref<1x512xf32, #tpu.memory_space<vmem>>, vector<1x512xf32>
    %6 = vector.broadcast %5 : vector<1x512xf32> to vector<16x512xf32>
    %7 = arith.addf %4, %6 : vector<16x512xf32>
    %cst = arith.constant 0.000000e+00 : f32
    %8 = vector.broadcast %cst : f32 to vector<16x512xf32>
    %9 = arith.maximumf %7, %8 : vector<16x512xf32>
    %10 = arith.truncf %9 : vector<16x512xf32> to vector<16x512xbf16>
    %c0_5 = arith.constant 0 : index
    %c0_6 = arith.constant 0 : index
    %11 = vector.load %arg4[%c0_5, %c0_6] : memref<512x128xbf16, #tpu.memory_space<vmem>>, vector<512x128xbf16>
    %cst_7 = arith.constant dense<0.000000e+00> : vector<16x128xf32>
    %12 = tpu.matmul %10, %11, %cst_7 {dimension_numbers = #tpu.dot_dimension_numbers<[1], [0], [0], [1], [0, 0, 1, 1], [], []>} : vector<16x512xbf16>, vector<512x128xbf16>, vector<16x128xf32> -> vector<16x128xf32>
    %c0_8 = arith.constant 0 : index
    %c0_9 = arith.constant 0 : index
    %13 = vector.load %arg5[%c0_8, %c0_9] : memref<1x128xf32, #tpu.memory_space<vmem>>, vector<1x128xf32>
    %14 = vector.broadcast %13 : vector<1x128xf32> to vector<16x128xf32>
    %15 = arith.mulf %12, %14 : vector<16x128xf32>
    %c0_10 = arith.constant 0 : index
    %c0_11 = arith.constant 0 : index
    %16 = vector.load %arg6[%c0_10, %c0_11] : memref<1x128xf32, #tpu.memory_space<vmem>>, vector<1x128xf32>
    %17 = vector.broadcast %16 : vector<1x128xf32> to vector<16x128xf32>
    %18 = arith.addf %15, %17 : vector<16x128xf32>
    %cst_12 = arith.constant 0.000000e+00 : f32
    %19 = vector.broadcast %cst_12 : f32 to vector<16x128xf32>
    %20 = arith.maximumf %18, %19 : vector<16x128xf32>
    %21 = arith.truncf %20 : vector<16x128xf32> to vector<16x128xbf16>
    %c0_13 = arith.constant 0 : index
    %c0_14 = arith.constant 0 : index
    %22 = vector.load %arg7[%c0_13, %c0_14] : memref<16x128xbf16, #tpu.memory_space<vmem>>, vector<16x128xbf16>
    tpu.vector_store %arg7[%c0_13, %c0_14], %21 {strides = array<i32>} : memref<16x128xbf16, #tpu.memory_space<vmem>>, vector<16x128xbf16>,
    return
  }
  func.func @transform_0(%arg0: i32) -> (i32, i32) {
    %c0_i32 = arith.constant 0 : i32
    %c0_i32_0 = arith.constant 0 : i32
    return %arg0, %c0_i32 : i32, i32
  }
  func.func @transform_1(%arg0: i32) -> (i32, i32) {
    %c0_i32 = arith.constant 0 : i32
    %c0_i32_0 = arith.constant 0 : i32
    %c0_i32_1 = arith.constant 0 : i32
    return %c0_i32, %c0_i32_0 : i32, i32
  }
  func.func @transform_2(%arg0: i32) -> (i32, i32) {
    %c0_i32 = arith.constant 0 : i32
    %c0_i32_0 = arith.constant 0 : i32
    %c0_i32_1 = arith.constant 0 : i32
    return %c0_i32, %c0_i32_0 : i32, i32
  }
  func.func @transform_3(%arg0: i32) -> (i32, i32) {
    %c0_i32 = arith.constant 0 : i32
    %c0_i32_0 = arith.constant 0 : i32
    %c0_i32_1 = arith.constant 0 : i32
    return %c0_i32, %c0_i32_0 : i32, i32
  }
  func.func @transform_4(%arg0: i32) -> (i32, i32) {
    %c0_i32 = arith.constant 0 : i32
    %c0_i32_0 = arith.constant 0 : i32
    %c0_i32_1 = arith.constant 0 : i32
    return %c0_i32, %c0_i32_0 : i32, i32
  }
  func.func @transform_5(%arg0: i32) -> (i32, i32) {
    %c0_i32 = arith.constant 0 : i32
    %c0_i32_0 = arith.constant 0 : i32
    %c0_i32_1 = arith.constant 0 : i32
    return %c0_i32, %c0_i32_0 : i32, i32
  }
  func.func @transform_6(%arg0: i32) -> (i32, i32) {
    %c0_i32 = arith.constant 0 : i32
    %c0_i32_0 = arith.constant 0 : i32
    return %arg0, %c0_i32 : i32, i32
  }
}

module attributes {stable_mosaic.version = 11 : i64} {
  func.func @_bn_relu_mm_kernel(%arg0: i32, %arg1: memref<16x512xbf16, #tpu.memory_space<vmem>>, %arg2: memref<1x512xf32, #tpu.memory_space<vmem>>, %arg3: memref<1x512xf32, #tpu.memory_space<vmem>>, %arg4: memref<512x256xbf16, #tpu.memory_space<vmem>>, %arg5: memref<16x256xbf16, #tpu.memory_space<vmem>>) attributes {dimension_semantics = [#tpu.dimension_semantics<parallel>], iteration_bounds = array<i64: 2>, scalar_prefetch = 0 : i64, scratch_operands = 0 : i64, tpu.core_type = #tpu.core_type<tc>, window_params = [{transform_indices = @transform_0, window_bounds = array<i64: 16, 512>}, {pipeline_mode = #tpu.pipeline_mode<synchronous>, transform_indices = @transform_1, window_bounds = array<i64: 1, 512>}, {pipeline_mode = #tpu.pipeline_mode<synchronous>, transform_indices = @transform_2, window_bounds = array<i64: 1, 512>}, {pipeline_mode = #tpu.pipeline_mode<synchronous>, transform_indices = @transform_3, window_bounds = array<i64: 512, 256>}, {transform_indices = @transform_4, window_bounds = array<i64: 16, 256>}]} {
    %c0 = arith.constant 0 : index
    %c0_0 = arith.constant 0 : index
    %0 = vector.load %arg1[%c0, %c0_0] : memref<16x512xbf16, #tpu.memory_space<vmem>>, vector<16x512xbf16>
    %1 = arith.extf %0 : vector<16x512xbf16> to vector<16x512xf32>
    %c0_1 = arith.constant 0 : index
    %c0_2 = arith.constant 0 : index
    %2 = vector.load %arg2[%c0_1, %c0_2] : memref<1x512xf32, #tpu.memory_space<vmem>>, vector<1x512xf32>
    %3 = vector.broadcast %2 : vector<1x512xf32> to vector<16x512xf32>
    %4 = arith.mulf %1, %3 : vector<16x512xf32>
    %c0_3 = arith.constant 0 : index
    %c0_4 = arith.constant 0 : index
    %5 = vector.load %arg3[%c0_3, %c0_4] : memref<1x512xf32, #tpu.memory_space<vmem>>, vector<1x512xf32>
    %6 = vector.broadcast %5 : vector<1x512xf32> to vector<16x512xf32>
    %7 = arith.addf %4, %6 : vector<16x512xf32>
    %cst = arith.constant 0.000000e+00 : f32
    %8 = vector.broadcast %cst : f32 to vector<16x512xf32>
    %9 = arith.maximumf %7, %8 : vector<16x512xf32>
    %10 = arith.truncf %9 : vector<16x512xf32> to vector<16x512xbf16>
    %c0_5 = arith.constant 0 : index
    %c0_6 = arith.constant 0 : index
    %11 = vector.load %arg4[%c0_5, %c0_6] : memref<512x256xbf16, #tpu.memory_space<vmem>>, vector<512x256xbf16>
    %cst_7 = arith.constant dense<0.000000e+00> : vector<16x256xf32>
    %12 = tpu.matmul %10, %11, %cst_7 {dimension_numbers = #tpu.dot_dimension_numbers<[1], [0], [0], [1], [0, 0, 1, 1], [], []>} : vector<16x512xbf16>, vector<512x256xbf16>, vector<16x256xf32> -> vector<16x256xf32>
    %13 = arith.truncf %12 : vector<16x256xf32> to vector<16x256xbf16>
    %c0_8 = arith.constant 0 : index
    %c0_9 = arith.constant 0 : index
    %14 = vector.load %arg5[%c0_8, %c0_9] : memref<16x256xbf16, #tpu.memory_space<vmem>>, vector<16x256xbf16>
    tpu.vector_store %arg5[%c0_8, %c0_9], %13 {strides = array<i32>} : memref<16x256xbf16, #tpu.memory_space<vmem>>, vector<16x256xbf16>,
    return
  }
  func.func @transform_0(%arg0: i32) -> (i32, i32) {
    %c0_i32 = arith.constant 0 : i32
    %c0_i32_0 = arith.constant 0 : i32
    return %arg0, %c0_i32 : i32, i32
  }
  func.func @transform_1(%arg0: i32) -> (i32, i32) {
    %c0_i32 = arith.constant 0 : i32
    %c0_i32_0 = arith.constant 0 : i32
    %c0_i32_1 = arith.constant 0 : i32
    return %c0_i32, %c0_i32_0 : i32, i32
  }
  func.func @transform_2(%arg0: i32) -> (i32, i32) {
    %c0_i32 = arith.constant 0 : i32
    %c0_i32_0 = arith.constant 0 : i32
    %c0_i32_1 = arith.constant 0 : i32
    return %c0_i32, %c0_i32_0 : i32, i32
  }
  func.func @transform_3(%arg0: i32) -> (i32, i32) {
    %c0_i32 = arith.constant 0 : i32
    %c0_i32_0 = arith.constant 0 : i32
    %c0_i32_1 = arith.constant 0 : i32
    return %c0_i32, %c0_i32_0 : i32, i32
  }
  func.func @transform_4(%arg0: i32) -> (i32, i32) {
    %c0_i32 = arith.constant 0 : i32
    %c0_i32_0 = arith.constant 0 : i32
    return %arg0, %c0_i32 : i32, i32
  }
}

module attributes {stable_mosaic.version = 11 : i64} {
  func.func @_mean_stack_kernel(%arg0: i32, %arg1: memref<4x8x256xbf16, #tpu.memory_space<vmem>>, %arg2: memref<8x256xbf16, #tpu.memory_space<vmem>>) attributes {dimension_semantics = [#tpu.dimension_semantics<parallel>], iteration_bounds = array<i64: 1>, scalar_prefetch = 0 : i64, scratch_operands = 0 : i64, tpu.core_type = #tpu.core_type<tc>, window_params = [{transform_indices = @transform_0, window_bounds = array<i64: 4, 8, 256>}, {transform_indices = @transform_1, window_bounds = array<i64: 8, 256>}]} {
    %c0 = arith.constant 0 : index
    %c0_0 = arith.constant 0 : index
    %c0_1 = arith.constant 0 : index
    %0 = vector.load %arg1[%c0, %c0_0, %c0_1] : memref<4x8x256xbf16, #tpu.memory_space<vmem>>, vector<4x8x256xbf16>
    %1 = arith.extf %0 : vector<4x8x256xbf16> to vector<4x8x256xf32>
    %cst = arith.constant dense<0.000000e+00> : vector<8x256xf32>
    %2 = vector.multi_reduction <add>, %1, %cst [0] : vector<4x8x256xf32> to vector<8x256xf32>
    %cst_2 = arith.constant 4.000000e+00 : f32
    %3 = vector.broadcast %cst_2 : f32 to vector<8x256xf32>
    %4 = arith.divf %2, %3 : vector<8x256xf32>
    %5 = arith.truncf %4 : vector<8x256xf32> to vector<8x256xbf16>
    %c0_3 = arith.constant 0 : index
    %c0_4 = arith.constant 0 : index
    %6 = vector.load %arg2[%c0_3, %c0_4] : memref<8x256xbf16, #tpu.memory_space<vmem>>, vector<8x256xbf16>
    tpu.vector_store %arg2[%c0_3, %c0_4], %5 {strides = array<i32>} : memref<8x256xbf16, #tpu.memory_space<vmem>>, vector<8x256xbf16>,
    return
  }
  func.func @transform_0(%arg0: i32) -> (i32, i32, i32) {
    %c0_i32 = arith.constant 0 : i32
    %c0_i32_0 = arith.constant 0 : i32
    %c0_i32_1 = arith.constant 0 : i32
    return %c0_i32, %arg0, %c0_i32_0 : i32, i32, i32
  }
  func.func @transform_1(%arg0: i32) -> (i32, i32) {
    %c0_i32 = arith.constant 0 : i32
    %c0_i32_0 = arith.constant 0 : i32
    return %arg0, %c0_i32 : i32, i32
  }
}

module attributes {stable_mosaic.version = 11 : i64} {
  func.func @_bn_relu_mm_bn_relu_kernel(%arg0: i32, %arg1: memref<16x256xbf16, #tpu.memory_space<vmem>>, %arg2: memref<1x256xf32, #tpu.memory_space<vmem>>, %arg3: memref<1x256xf32, #tpu.memory_space<vmem>>, %arg4: memref<256x128xbf16, #tpu.memory_space<vmem>>, %arg5: memref<1x128xf32, #tpu.memory_space<vmem>>, %arg6: memref<1x128xf32, #tpu.memory_space<vmem>>, %arg7: memref<16x128xbf16, #tpu.memory_space<vmem>>) attributes {dimension_semantics = [#tpu.dimension_semantics<parallel>], iteration_bounds = array<i64: 1>, scalar_prefetch = 0 : i64, scratch_operands = 0 : i64, tpu.core_type = #tpu.core_type<tc>, window_params = [{transform_indices = @transform_0, window_bounds = array<i64: 16, 256>}, {pipeline_mode = #tpu.pipeline_mode<synchronous>, transform_indices = @transform_1, window_bounds = array<i64: 1, 256>}, {pipeline_mode = #tpu.pipeline_mode<synchronous>, transform_indices = @transform_2, window_bounds = array<i64: 1, 256>}, {pipeline_mode = #tpu.pipeline_mode<synchronous>, transform_indices = @transform_3, window_bounds = array<i64: 256, 128>}, {pipeline_mode = #tpu.pipeline_mode<synchronous>, transform_indices = @transform_4, window_bounds = array<i64: 1, 128>}, {pipeline_mode = #tpu.pipeline_mode<synchronous>, transform_indices = @transform_5, window_bounds = array<i64: 1, 128>}, {transform_indices = @transform_6, window_bounds = array<i64: 16, 128>}]} {
    %c0 = arith.constant 0 : index
    %c0_0 = arith.constant 0 : index
    %0 = vector.load %arg1[%c0, %c0_0] : memref<16x256xbf16, #tpu.memory_space<vmem>>, vector<16x256xbf16>
    %1 = arith.extf %0 : vector<16x256xbf16> to vector<16x256xf32>
    %c0_1 = arith.constant 0 : index
    %c0_2 = arith.constant 0 : index
    %2 = vector.load %arg2[%c0_1, %c0_2] : memref<1x256xf32, #tpu.memory_space<vmem>>, vector<1x256xf32>
    %3 = vector.broadcast %2 : vector<1x256xf32> to vector<16x256xf32>
    %4 = arith.mulf %1, %3 : vector<16x256xf32>
    %c0_3 = arith.constant 0 : index
    %c0_4 = arith.constant 0 : index
    %5 = vector.load %arg3[%c0_3, %c0_4] : memref<1x256xf32, #tpu.memory_space<vmem>>, vector<1x256xf32>
    %6 = vector.broadcast %5 : vector<1x256xf32> to vector<16x256xf32>
    %7 = arith.addf %4, %6 : vector<16x256xf32>
    %cst = arith.constant 0.000000e+00 : f32
    %8 = vector.broadcast %cst : f32 to vector<16x256xf32>
    %9 = arith.maximumf %7, %8 : vector<16x256xf32>
    %10 = arith.truncf %9 : vector<16x256xf32> to vector<16x256xbf16>
    %c0_5 = arith.constant 0 : index
    %c0_6 = arith.constant 0 : index
    %11 = vector.load %arg4[%c0_5, %c0_6] : memref<256x128xbf16, #tpu.memory_space<vmem>>, vector<256x128xbf16>
    %cst_7 = arith.constant dense<0.000000e+00> : vector<16x128xf32>
    %12 = tpu.matmul %10, %11, %cst_7 {dimension_numbers = #tpu.dot_dimension_numbers<[1], [0], [0], [1], [0, 0, 1, 1], [], []>} : vector<16x256xbf16>, vector<256x128xbf16>, vector<16x128xf32> -> vector<16x128xf32>
    %c0_8 = arith.constant 0 : index
    %c0_9 = arith.constant 0 : index
    %13 = vector.load %arg5[%c0_8, %c0_9] : memref<1x128xf32, #tpu.memory_space<vmem>>, vector<1x128xf32>
    %14 = vector.broadcast %13 : vector<1x128xf32> to vector<16x128xf32>
    %15 = arith.mulf %12, %14 : vector<16x128xf32>
    %c0_10 = arith.constant 0 : index
    %c0_11 = arith.constant 0 : index
    %16 = vector.load %arg6[%c0_10, %c0_11] : memref<1x128xf32, #tpu.memory_space<vmem>>, vector<1x128xf32>
    %17 = vector.broadcast %16 : vector<1x128xf32> to vector<16x128xf32>
    %18 = arith.addf %15, %17 : vector<16x128xf32>
    %cst_12 = arith.constant 0.000000e+00 : f32
    %19 = vector.broadcast %cst_12 : f32 to vector<16x128xf32>
    %20 = arith.maximumf %18, %19 : vector<16x128xf32>
    %21 = arith.truncf %20 : vector<16x128xf32> to vector<16x128xbf16>
    %c0_13 = arith.constant 0 : index
    %c0_14 = arith.constant 0 : index
    %22 = vector.load %arg7[%c0_13, %c0_14] : memref<16x128xbf16, #tpu.memory_space<vmem>>, vector<16x128xbf16>
    tpu.vector_store %arg7[%c0_13, %c0_14], %21 {strides = array<i32>} : memref<16x128xbf16, #tpu.memory_space<vmem>>, vector<16x128xbf16>,
    return
  }
  func.func @transform_0(%arg0: i32) -> (i32, i32) {
    %c0_i32 = arith.constant 0 : i32
    %c0_i32_0 = arith.constant 0 : i32
    return %arg0, %c0_i32 : i32, i32
  }
  func.func @transform_1(%arg0: i32) -> (i32, i32) {
    %c0_i32 = arith.constant 0 : i32
    %c0_i32_0 = arith.constant 0 : i32
    %c0_i32_1 = arith.constant 0 : i32
    return %c0_i32, %c0_i32_0 : i32, i32
  }
  func.func @transform_2(%arg0: i32) -> (i32, i32) {
    %c0_i32 = arith.constant 0 : i32
    %c0_i32_0 = arith.constant 0 : i32
    %c0_i32_1 = arith.constant 0 : i32
    return %c0_i32, %c0_i32_0 : i32, i32
  }
  func.func @transform_3(%arg0: i32) -> (i32, i32) {
    %c0_i32 = arith.constant 0 : i32
    %c0_i32_0 = arith.constant 0 : i32
    %c0_i32_1 = arith.constant 0 : i32
    return %c0_i32, %c0_i32_0 : i32, i32
  }
  func.func @transform_4(%arg0: i32) -> (i32, i32) {
    %c0_i32 = arith.constant 0 : i32
    %c0_i32_0 = arith.constant 0 : i32
    %c0_i32_1 = arith.constant 0 : i32
    return %c0_i32, %c0_i32_0 : i32, i32
  }
  func.func @transform_5(%arg0: i32) -> (i32, i32) {
    %c0_i32 = arith.constant 0 : i32
    %c0_i32_0 = arith.constant 0 : i32
    %c0_i32_1 = arith.constant 0 : i32
    return %c0_i32, %c0_i32_0 : i32, i32
  }
  func.func @transform_6(%arg0: i32) -> (i32, i32) {
    %c0_i32 = arith.constant 0 : i32
    %c0_i32_0 = arith.constant 0 : i32
    return %arg0, %c0_i32 : i32, i32
  }
}

module attributes {stable_mosaic.version = 11 : i64} {
  func.func @_mm_kernel(%arg0: i32, %arg1: memref<16x1152xbf16, #tpu.memory_space<vmem>>, %arg2: memref<1152x128xbf16, #tpu.memory_space<vmem>>, %arg3: memref<16x128xbf16, #tpu.memory_space<vmem>>) attributes {dimension_semantics = [#tpu.dimension_semantics<parallel>], iteration_bounds = array<i64: 1>, scalar_prefetch = 0 : i64, scratch_operands = 0 : i64, tpu.core_type = #tpu.core_type<tc>, window_params = [{transform_indices = @transform_0, window_bounds = array<i64: 16, 1152>}, {pipeline_mode = #tpu.pipeline_mode<synchronous>, transform_indices = @transform_1, window_bounds = array<i64: 1152, 128>}, {transform_indices = @transform_2, window_bounds = array<i64: 16, 128>}]} {
    %c0 = arith.constant 0 : index
    %c0_0 = arith.constant 0 : index
    %0 = vector.load %arg1[%c0, %c0_0] : memref<16x1152xbf16, #tpu.memory_space<vmem>>, vector<16x1152xbf16>
    %c0_1 = arith.constant 0 : index
    %c0_2 = arith.constant 0 : index
    %1 = vector.load %arg2[%c0_1, %c0_2] : memref<1152x128xbf16, #tpu.memory_space<vmem>>, vector<1152x128xbf16>
    %cst = arith.constant dense<0.000000e+00> : vector<16x128xf32>
    %2 = tpu.matmul %0, %1, %cst {dimension_numbers = #tpu.dot_dimension_numbers<[1], [0], [0], [1], [0, 0, 1, 1], [], []>} : vector<16x1152xbf16>, vector<1152x128xbf16>, vector<16x128xf32> -> vector<16x128xf32>
    %3 = arith.truncf %2 : vector<16x128xf32> to vector<16x128xbf16>
    %c0_3 = arith.constant 0 : index
    %c0_4 = arith.constant 0 : index
    %4 = vector.load %arg3[%c0_3, %c0_4] : memref<16x128xbf16, #tpu.memory_space<vmem>>, vector<16x128xbf16>
    tpu.vector_store %arg3[%c0_3, %c0_4], %3 {strides = array<i32>} : memref<16x128xbf16, #tpu.memory_space<vmem>>, vector<16x128xbf16>,
    return
  }
  func.func @transform_0(%arg0: i32) -> (i32, i32) {
    %c0_i32 = arith.constant 0 : i32
    %c0_i32_0 = arith.constant 0 : i32
    return %arg0, %c0_i32 : i32, i32
  }
  func.func @transform_1(%arg0: i32) -> (i32, i32) {
    %c0_i32 = arith.constant 0 : i32
    %c0_i32_0 = arith.constant 0 : i32
    %c0_i32_1 = arith.constant 0 : i32
    return %c0_i32, %c0_i32_0 : i32, i32
  }
  func.func @transform_2(%arg0: i32) -> (i32, i32) {
    %c0_i32 = arith.constant 0 : i32
    %c0_i32_0 = arith.constant 0 : i32
    return %arg0, %c0_i32 : i32, i32
  }
}

module attributes {stable_mosaic.version = 11 : i64} {
  func.func @_bn_relu_mm_bn_relu_kernel(%arg0: i32, %arg1: memref<16x384xbf16, #tpu.memory_space<vmem>>, %arg2: memref<1x384xf32, #tpu.memory_space<vmem>>, %arg3: memref<1x384xf32, #tpu.memory_space<vmem>>, %arg4: memref<384x128xbf16, #tpu.memory_space<vmem>>, %arg5: memref<1x128xf32, #tpu.memory_space<vmem>>, %arg6: memref<1x128xf32, #tpu.memory_space<vmem>>, %arg7: memref<16x128xbf16, #tpu.memory_space<vmem>>) attributes {dimension_semantics = [#tpu.dimension_semantics<parallel>], iteration_bounds = array<i64: 1>, scalar_prefetch = 0 : i64, scratch_operands = 0 : i64, tpu.core_type = #tpu.core_type<tc>, window_params = [{transform_indices = @transform_0, window_bounds = array<i64: 16, 384>}, {pipeline_mode = #tpu.pipeline_mode<synchronous>, transform_indices = @transform_1, window_bounds = array<i64: 1, 384>}, {pipeline_mode = #tpu.pipeline_mode<synchronous>, transform_indices = @transform_2, window_bounds = array<i64: 1, 384>}, {pipeline_mode = #tpu.pipeline_mode<synchronous>, transform_indices = @transform_3, window_bounds = array<i64: 384, 128>}, {pipeline_mode = #tpu.pipeline_mode<synchronous>, transform_indices = @transform_4, window_bounds = array<i64: 1, 128>}, {pipeline_mode = #tpu.pipeline_mode<synchronous>, transform_indices = @transform_5, window_bounds = array<i64: 1, 128>}, {transform_indices = @transform_6, window_bounds = array<i64: 16, 128>}]} {
    %c0 = arith.constant 0 : index
    %c0_0 = arith.constant 0 : index
    %0 = vector.load %arg1[%c0, %c0_0] : memref<16x384xbf16, #tpu.memory_space<vmem>>, vector<16x384xbf16>
    %1 = arith.extf %0 : vector<16x384xbf16> to vector<16x384xf32>
    %c0_1 = arith.constant 0 : index
    %c0_2 = arith.constant 0 : index
    %2 = vector.load %arg2[%c0_1, %c0_2] : memref<1x384xf32, #tpu.memory_space<vmem>>, vector<1x384xf32>
    %3 = vector.broadcast %2 : vector<1x384xf32> to vector<16x384xf32>
    %4 = arith.mulf %1, %3 : vector<16x384xf32>
    %c0_3 = arith.constant 0 : index
    %c0_4 = arith.constant 0 : index
    %5 = vector.load %arg3[%c0_3, %c0_4] : memref<1x384xf32, #tpu.memory_space<vmem>>, vector<1x384xf32>
    %6 = vector.broadcast %5 : vector<1x384xf32> to vector<16x384xf32>
    %7 = arith.addf %4, %6 : vector<16x384xf32>
    %cst = arith.constant 0.000000e+00 : f32
    %8 = vector.broadcast %cst : f32 to vector<16x384xf32>
    %9 = arith.maximumf %7, %8 : vector<16x384xf32>
    %10 = arith.truncf %9 : vector<16x384xf32> to vector<16x384xbf16>
    %c0_5 = arith.constant 0 : index
    %c0_6 = arith.constant 0 : index
    %11 = vector.load %arg4[%c0_5, %c0_6] : memref<384x128xbf16, #tpu.memory_space<vmem>>, vector<384x128xbf16>
    %cst_7 = arith.constant dense<0.000000e+00> : vector<16x128xf32>
    %12 = tpu.matmul %10, %11, %cst_7 {dimension_numbers = #tpu.dot_dimension_numbers<[1], [0], [0], [1], [0, 0, 1, 1], [], []>} : vector<16x384xbf16>, vector<384x128xbf16>, vector<16x128xf32> -> vector<16x128xf32>
    %c0_8 = arith.constant 0 : index
    %c0_9 = arith.constant 0 : index
    %13 = vector.load %arg5[%c0_8, %c0_9] : memref<1x128xf32, #tpu.memory_space<vmem>>, vector<1x128xf32>
    %14 = vector.broadcast %13 : vector<1x128xf32> to vector<16x128xf32>
    %15 = arith.mulf %12, %14 : vector<16x128xf32>
    %c0_10 = arith.constant 0 : index
    %c0_11 = arith.constant 0 : index
    %16 = vector.load %arg6[%c0_10, %c0_11] : memref<1x128xf32, #tpu.memory_space<vmem>>, vector<1x128xf32>
    %17 = vector.broadcast %16 : vector<1x128xf32> to vector<16x128xf32>
    %18 = arith.addf %15, %17 : vector<16x128xf32>
    %cst_12 = arith.constant 0.000000e+00 : f32
    %19 = vector.broadcast %cst_12 : f32 to vector<16x128xf32>
    %20 = arith.maximumf %18, %19 : vector<16x128xf32>
    %21 = arith.truncf %20 : vector<16x128xf32> to vector<16x128xbf16>
    %c0_13 = arith.constant 0 : index
    %c0_14 = arith.constant 0 : index
    %22 = vector.load %arg7[%c0_13, %c0_14] : memref<16x128xbf16, #tpu.memory_space<vmem>>, vector<16x128xbf16>
    tpu.vector_store %arg7[%c0_13, %c0_14], %21 {strides = array<i32>} : memref<16x128xbf16, #tpu.memory_space<vmem>>, vector<16x128xbf16>,
    return
  }
  func.func @transform_0(%arg0: i32) -> (i32, i32) {
    %c0_i32 = arith.constant 0 : i32
    %c0_i32_0 = arith.constant 0 : i32
    return %arg0, %c0_i32 : i32, i32
  }
  func.func @transform_1(%arg0: i32) -> (i32, i32) {
    %c0_i32 = arith.constant 0 : i32
    %c0_i32_0 = arith.constant 0 : i32
    %c0_i32_1 = arith.constant 0 : i32
    return %c0_i32, %c0_i32_0 : i32, i32
  }
  func.func @transform_2(%arg0: i32) -> (i32, i32) {
    %c0_i32 = arith.constant 0 : i32
    %c0_i32_0 = arith.constant 0 : i32
    %c0_i32_1 = arith.constant 0 : i32
    return %c0_i32, %c0_i32_0 : i32, i32
  }
  func.func @transform_3(%arg0: i32) -> (i32, i32) {
    %c0_i32 = arith.constant 0 : i32
    %c0_i32_0 = arith.constant 0 : i32
    %c0_i32_1 = arith.constant 0 : i32
    return %c0_i32, %c0_i32_0 : i32, i32
  }
  func.func @transform_4(%arg0: i32) -> (i32, i32) {
    %c0_i32 = arith.constant 0 : i32
    %c0_i32_0 = arith.constant 0 : i32
    %c0_i32_1 = arith.constant 0 : i32
    return %c0_i32, %c0_i32_0 : i32, i32
  }
  func.func @transform_5(%arg0: i32) -> (i32, i32) {
    %c0_i32 = arith.constant 0 : i32
    %c0_i32_0 = arith.constant 0 : i32
    %c0_i32_1 = arith.constant 0 : i32
    return %c0_i32, %c0_i32_0 : i32, i32
  }
  func.func @transform_6(%arg0: i32) -> (i32, i32) {
    %c0_i32 = arith.constant 0 : i32
    %c0_i32_0 = arith.constant 0 : i32
    return %arg0, %c0_i32 : i32, i32
  }
}

module attributes {stable_mosaic.version = 11 : i64} {
  func.func @_bn_relu_mm_bn_relu_kernel(%arg0: i32, %arg1: memref<16x512xbf16, #tpu.memory_space<vmem>>, %arg2: memref<1x512xf32, #tpu.memory_space<vmem>>, %arg3: memref<1x512xf32, #tpu.memory_space<vmem>>, %arg4: memref<512x128xbf16, #tpu.memory_space<vmem>>, %arg5: memref<1x128xf32, #tpu.memory_space<vmem>>, %arg6: memref<1x128xf32, #tpu.memory_space<vmem>>, %arg7: memref<16x128xbf16, #tpu.memory_space<vmem>>) attributes {dimension_semantics = [#tpu.dimension_semantics<parallel>], iteration_bounds = array<i64: 1>, scalar_prefetch = 0 : i64, scratch_operands = 0 : i64, tpu.core_type = #tpu.core_type<tc>, window_params = [{transform_indices = @transform_0, window_bounds = array<i64: 16, 512>}, {pipeline_mode = #tpu.pipeline_mode<synchronous>, transform_indices = @transform_1, window_bounds = array<i64: 1, 512>}, {pipeline_mode = #tpu.pipeline_mode<synchronous>, transform_indices = @transform_2, window_bounds = array<i64: 1, 512>}, {pipeline_mode = #tpu.pipeline_mode<synchronous>, transform_indices = @transform_3, window_bounds = array<i64: 512, 128>}, {pipeline_mode = #tpu.pipeline_mode<synchronous>, transform_indices = @transform_4, window_bounds = array<i64: 1, 128>}, {pipeline_mode = #tpu.pipeline_mode<synchronous>, transform_indices = @transform_5, window_bounds = array<i64: 1, 128>}, {transform_indices = @transform_6, window_bounds = array<i64: 16, 128>}]} {
    %c0 = arith.constant 0 : index
    %c0_0 = arith.constant 0 : index
    %0 = vector.load %arg1[%c0, %c0_0] : memref<16x512xbf16, #tpu.memory_space<vmem>>, vector<16x512xbf16>
    %1 = arith.extf %0 : vector<16x512xbf16> to vector<16x512xf32>
    %c0_1 = arith.constant 0 : index
    %c0_2 = arith.constant 0 : index
    %2 = vector.load %arg2[%c0_1, %c0_2] : memref<1x512xf32, #tpu.memory_space<vmem>>, vector<1x512xf32>
    %3 = vector.broadcast %2 : vector<1x512xf32> to vector<16x512xf32>
    %4 = arith.mulf %1, %3 : vector<16x512xf32>
    %c0_3 = arith.constant 0 : index
    %c0_4 = arith.constant 0 : index
    %5 = vector.load %arg3[%c0_3, %c0_4] : memref<1x512xf32, #tpu.memory_space<vmem>>, vector<1x512xf32>
    %6 = vector.broadcast %5 : vector<1x512xf32> to vector<16x512xf32>
    %7 = arith.addf %4, %6 : vector<16x512xf32>
    %cst = arith.constant 0.000000e+00 : f32
    %8 = vector.broadcast %cst : f32 to vector<16x512xf32>
    %9 = arith.maximumf %7, %8 : vector<16x512xf32>
    %10 = arith.truncf %9 : vector<16x512xf32> to vector<16x512xbf16>
    %c0_5 = arith.constant 0 : index
    %c0_6 = arith.constant 0 : index
    %11 = vector.load %arg4[%c0_5, %c0_6] : memref<512x128xbf16, #tpu.memory_space<vmem>>, vector<512x128xbf16>
    %cst_7 = arith.constant dense<0.000000e+00> : vector<16x128xf32>
    %12 = tpu.matmul %10, %11, %cst_7 {dimension_numbers = #tpu.dot_dimension_numbers<[1], [0], [0], [1], [0, 0, 1, 1], [], []>} : vector<16x512xbf16>, vector<512x128xbf16>, vector<16x128xf32> -> vector<16x128xf32>
    %c0_8 = arith.constant 0 : index
    %c0_9 = arith.constant 0 : index
    %13 = vector.load %arg5[%c0_8, %c0_9] : memref<1x128xf32, #tpu.memory_space<vmem>>, vector<1x128xf32>
    %14 = vector.broadcast %13 : vector<1x128xf32> to vector<16x128xf32>
    %15 = arith.mulf %12, %14 : vector<16x128xf32>
    %c0_10 = arith.constant 0 : index
    %c0_11 = arith.constant 0 : index
    %16 = vector.load %arg6[%c0_10, %c0_11] : memref<1x128xf32, #tpu.memory_space<vmem>>, vector<1x128xf32>
    %17 = vector.broadcast %16 : vector<1x128xf32> to vector<16x128xf32>
    %18 = arith.addf %15, %17 : vector<16x128xf32>
    %cst_12 = arith.constant 0.000000e+00 : f32
    %19 = vector.broadcast %cst_12 : f32 to vector<16x128xf32>
    %20 = arith.maximumf %18, %19 : vector<16x128xf32>
    %21 = arith.truncf %20 : vector<16x128xf32> to vector<16x128xbf16>
    %c0_13 = arith.constant 0 : index
    %c0_14 = arith.constant 0 : index
    %22 = vector.load %arg7[%c0_13, %c0_14] : memref<16x128xbf16, #tpu.memory_space<vmem>>, vector<16x128xbf16>
    tpu.vector_store %arg7[%c0_13, %c0_14], %21 {strides = array<i32>} : memref<16x128xbf16, #tpu.memory_space<vmem>>, vector<16x128xbf16>,
    return
  }
  func.func @transform_0(%arg0: i32) -> (i32, i32) {
    %c0_i32 = arith.constant 0 : i32
    %c0_i32_0 = arith.constant 0 : i32
    return %arg0, %c0_i32 : i32, i32
  }
  func.func @transform_1(%arg0: i32) -> (i32, i32) {
    %c0_i32 = arith.constant 0 : i32
    %c0_i32_0 = arith.constant 0 : i32
    %c0_i32_1 = arith.constant 0 : i32
    return %c0_i32, %c0_i32_0 : i32, i32
  }
  func.func @transform_2(%arg0: i32) -> (i32, i32) {
    %c0_i32 = arith.constant 0 : i32
    %c0_i32_0 = arith.constant 0 : i32
    %c0_i32_1 = arith.constant 0 : i32
    return %c0_i32, %c0_i32_0 : i32, i32
  }
  func.func @transform_3(%arg0: i32) -> (i32, i32) {
    %c0_i32 = arith.constant 0 : i32
    %c0_i32_0 = arith.constant 0 : i32
    %c0_i32_1 = arith.constant 0 : i32
    return %c0_i32, %c0_i32_0 : i32, i32
  }
  func.func @transform_4(%arg0: i32) -> (i32, i32) {
    %c0_i32 = arith.constant 0 : i32
    %c0_i32_0 = arith.constant 0 : i32
    %c0_i32_1 = arith.constant 0 : i32
    return %c0_i32, %c0_i32_0 : i32, i32
  }
  func.func @transform_5(%arg0: i32) -> (i32, i32) {
    %c0_i32 = arith.constant 0 : i32
    %c0_i32_0 = arith.constant 0 : i32
    %c0_i32_1 = arith.constant 0 : i32
    return %c0_i32, %c0_i32_0 : i32, i32
  }
  func.func @transform_6(%arg0: i32) -> (i32, i32) {
    %c0_i32 = arith.constant 0 : i32
    %c0_i32_0 = arith.constant 0 : i32
    return %arg0, %c0_i32 : i32, i32
  }
}

module attributes {stable_mosaic.version = 11 : i64} {
  func.func @_bn_relu_mm_bn_relu_kernel(%arg0: i32, %arg1: memref<16x640xbf16, #tpu.memory_space<vmem>>, %arg2: memref<1x640xf32, #tpu.memory_space<vmem>>, %arg3: memref<1x640xf32, #tpu.memory_space<vmem>>, %arg4: memref<640x128xbf16, #tpu.memory_space<vmem>>, %arg5: memref<1x128xf32, #tpu.memory_space<vmem>>, %arg6: memref<1x128xf32, #tpu.memory_space<vmem>>, %arg7: memref<16x128xbf16, #tpu.memory_space<vmem>>) attributes {dimension_semantics = [#tpu.dimension_semantics<parallel>], iteration_bounds = array<i64: 1>, scalar_prefetch = 0 : i64, scratch_operands = 0 : i64, tpu.core_type = #tpu.core_type<tc>, window_params = [{transform_indices = @transform_0, window_bounds = array<i64: 16, 640>}, {pipeline_mode = #tpu.pipeline_mode<synchronous>, transform_indices = @transform_1, window_bounds = array<i64: 1, 640>}, {pipeline_mode = #tpu.pipeline_mode<synchronous>, transform_indices = @transform_2, window_bounds = array<i64: 1, 640>}, {pipeline_mode = #tpu.pipeline_mode<synchronous>, transform_indices = @transform_3, window_bounds = array<i64: 640, 128>}, {pipeline_mode = #tpu.pipeline_mode<synchronous>, transform_indices = @transform_4, window_bounds = array<i64: 1, 128>}, {pipeline_mode = #tpu.pipeline_mode<synchronous>, transform_indices = @transform_5, window_bounds = array<i64: 1, 128>}, {transform_indices = @transform_6, window_bounds = array<i64: 16, 128>}]} {
    %c0 = arith.constant 0 : index
    %c0_0 = arith.constant 0 : index
    %0 = vector.load %arg1[%c0, %c0_0] : memref<16x640xbf16, #tpu.memory_space<vmem>>, vector<16x640xbf16>
    %1 = arith.extf %0 : vector<16x640xbf16> to vector<16x640xf32>
    %c0_1 = arith.constant 0 : index
    %c0_2 = arith.constant 0 : index
    %2 = vector.load %arg2[%c0_1, %c0_2] : memref<1x640xf32, #tpu.memory_space<vmem>>, vector<1x640xf32>
    %3 = vector.broadcast %2 : vector<1x640xf32> to vector<16x640xf32>
    %4 = arith.mulf %1, %3 : vector<16x640xf32>
    %c0_3 = arith.constant 0 : index
    %c0_4 = arith.constant 0 : index
    %5 = vector.load %arg3[%c0_3, %c0_4] : memref<1x640xf32, #tpu.memory_space<vmem>>, vector<1x640xf32>
    %6 = vector.broadcast %5 : vector<1x640xf32> to vector<16x640xf32>
    %7 = arith.addf %4, %6 : vector<16x640xf32>
    %cst = arith.constant 0.000000e+00 : f32
    %8 = vector.broadcast %cst : f32 to vector<16x640xf32>
    %9 = arith.maximumf %7, %8 : vector<16x640xf32>
    %10 = arith.truncf %9 : vector<16x640xf32> to vector<16x640xbf16>
    %c0_5 = arith.constant 0 : index
    %c0_6 = arith.constant 0 : index
    %11 = vector.load %arg4[%c0_5, %c0_6] : memref<640x128xbf16, #tpu.memory_space<vmem>>, vector<640x128xbf16>
    %cst_7 = arith.constant dense<0.000000e+00> : vector<16x128xf32>
    %12 = tpu.matmul %10, %11, %cst_7 {dimension_numbers = #tpu.dot_dimension_numbers<[1], [0], [0], [1], [0, 0, 1, 1], [], []>} : vector<16x640xbf16>, vector<640x128xbf16>, vector<16x128xf32> -> vector<16x128xf32>
    %c0_8 = arith.constant 0 : index
    %c0_9 = arith.constant 0 : index
    %13 = vector.load %arg5[%c0_8, %c0_9] : memref<1x128xf32, #tpu.memory_space<vmem>>, vector<1x128xf32>
    %14 = vector.broadcast %13 : vector<1x128xf32> to vector<16x128xf32>
    %15 = arith.mulf %12, %14 : vector<16x128xf32>
    %c0_10 = arith.constant 0 : index
    %c0_11 = arith.constant 0 : index
    %16 = vector.load %arg6[%c0_10, %c0_11] : memref<1x128xf32, #tpu.memory_space<vmem>>, vector<1x128xf32>
    %17 = vector.broadcast %16 : vector<1x128xf32> to vector<16x128xf32>
    %18 = arith.addf %15, %17 : vector<16x128xf32>
    %cst_12 = arith.constant 0.000000e+00 : f32
    %19 = vector.broadcast %cst_12 : f32 to vector<16x128xf32>
    %20 = arith.maximumf %18, %19 : vector<16x128xf32>
    %21 = arith.truncf %20 : vector<16x128xf32> to vector<16x128xbf16>
    %c0_13 = arith.constant 0 : index
    %c0_14 = arith.constant 0 : index
    %22 = vector.load %arg7[%c0_13, %c0_14] : memref<16x128xbf16, #tpu.memory_space<vmem>>, vector<16x128xbf16>
    tpu.vector_store %arg7[%c0_13, %c0_14], %21 {strides = array<i32>} : memref<16x128xbf16, #tpu.memory_space<vmem>>, vector<16x128xbf16>,
    return
  }
  func.func @transform_0(%arg0: i32) -> (i32, i32) {
    %c0_i32 = arith.constant 0 : i32
    %c0_i32_0 = arith.constant 0 : i32
    return %arg0, %c0_i32 : i32, i32
  }
  func.func @transform_1(%arg0: i32) -> (i32, i32) {
    %c0_i32 = arith.constant 0 : i32
    %c0_i32_0 = arith.constant 0 : i32
    %c0_i32_1 = arith.constant 0 : i32
    return %c0_i32, %c0_i32_0 : i32, i32
  }
  func.func @transform_2(%arg0: i32) -> (i32, i32) {
    %c0_i32 = arith.constant 0 : i32
    %c0_i32_0 = arith.constant 0 : i32
    %c0_i32_1 = arith.constant 0 : i32
    return %c0_i32, %c0_i32_0 : i32, i32
  }
  func.func @transform_3(%arg0: i32) -> (i32, i32) {
    %c0_i32 = arith.constant 0 : i32
    %c0_i32_0 = arith.constant 0 : i32
    %c0_i32_1 = arith.constant 0 : i32
    return %c0_i32, %c0_i32_0 : i32, i32
  }
  func.func @transform_4(%arg0: i32) -> (i32, i32) {
    %c0_i32 = arith.constant 0 : i32
    %c0_i32_0 = arith.constant 0 : i32
    %c0_i32_1 = arith.constant 0 : i32
    return %c0_i32, %c0_i32_0 : i32, i32
  }
  func.func @transform_5(%arg0: i32) -> (i32, i32) {
    %c0_i32 = arith.constant 0 : i32
    %c0_i32_0 = arith.constant 0 : i32
    %c0_i32_1 = arith.constant 0 : i32
    return %c0_i32, %c0_i32_0 : i32, i32
  }
  func.func @transform_6(%arg0: i32) -> (i32, i32) {
    %c0_i32 = arith.constant 0 : i32
    %c0_i32_0 = arith.constant 0 : i32
    return %arg0, %c0_i32 : i32, i32
  }
}

module attributes {stable_mosaic.version = 11 : i64} {
  func.func @_bn_relu_mm_bn_relu_kernel(%arg0: i32, %arg1: memref<16x768xbf16, #tpu.memory_space<vmem>>, %arg2: memref<1x768xf32, #tpu.memory_space<vmem>>, %arg3: memref<1x768xf32, #tpu.memory_space<vmem>>, %arg4: memref<768x128xbf16, #tpu.memory_space<vmem>>, %arg5: memref<1x128xf32, #tpu.memory_space<vmem>>, %arg6: memref<1x128xf32, #tpu.memory_space<vmem>>, %arg7: memref<16x128xbf16, #tpu.memory_space<vmem>>) attributes {dimension_semantics = [#tpu.dimension_semantics<parallel>], iteration_bounds = array<i64: 1>, scalar_prefetch = 0 : i64, scratch_operands = 0 : i64, tpu.core_type = #tpu.core_type<tc>, window_params = [{transform_indices = @transform_0, window_bounds = array<i64: 16, 768>}, {pipeline_mode = #tpu.pipeline_mode<synchronous>, transform_indices = @transform_1, window_bounds = array<i64: 1, 768>}, {pipeline_mode = #tpu.pipeline_mode<synchronous>, transform_indices = @transform_2, window_bounds = array<i64: 1, 768>}, {pipeline_mode = #tpu.pipeline_mode<synchronous>, transform_indices = @transform_3, window_bounds = array<i64: 768, 128>}, {pipeline_mode = #tpu.pipeline_mode<synchronous>, transform_indices = @transform_4, window_bounds = array<i64: 1, 128>}, {pipeline_mode = #tpu.pipeline_mode<synchronous>, transform_indices = @transform_5, window_bounds = array<i64: 1, 128>}, {transform_indices = @transform_6, window_bounds = array<i64: 16, 128>}]} {
    %c0 = arith.constant 0 : index
    %c0_0 = arith.constant 0 : index
    %0 = vector.load %arg1[%c0, %c0_0] : memref<16x768xbf16, #tpu.memory_space<vmem>>, vector<16x768xbf16>
    %1 = arith.extf %0 : vector<16x768xbf16> to vector<16x768xf32>
    %c0_1 = arith.constant 0 : index
    %c0_2 = arith.constant 0 : index
    %2 = vector.load %arg2[%c0_1, %c0_2] : memref<1x768xf32, #tpu.memory_space<vmem>>, vector<1x768xf32>
    %3 = vector.broadcast %2 : vector<1x768xf32> to vector<16x768xf32>
    %4 = arith.mulf %1, %3 : vector<16x768xf32>
    %c0_3 = arith.constant 0 : index
    %c0_4 = arith.constant 0 : index
    %5 = vector.load %arg3[%c0_3, %c0_4] : memref<1x768xf32, #tpu.memory_space<vmem>>, vector<1x768xf32>
    %6 = vector.broadcast %5 : vector<1x768xf32> to vector<16x768xf32>
    %7 = arith.addf %4, %6 : vector<16x768xf32>
    %cst = arith.constant 0.000000e+00 : f32
    %8 = vector.broadcast %cst : f32 to vector<16x768xf32>
    %9 = arith.maximumf %7, %8 : vector<16x768xf32>
    %10 = arith.truncf %9 : vector<16x768xf32> to vector<16x768xbf16>
    %c0_5 = arith.constant 0 : index
    %c0_6 = arith.constant 0 : index
    %11 = vector.load %arg4[%c0_5, %c0_6] : memref<768x128xbf16, #tpu.memory_space<vmem>>, vector<768x128xbf16>
    %cst_7 = arith.constant dense<0.000000e+00> : vector<16x128xf32>
    %12 = tpu.matmul %10, %11, %cst_7 {dimension_numbers = #tpu.dot_dimension_numbers<[1], [0], [0], [1], [0, 0, 1, 1], [], []>} : vector<16x768xbf16>, vector<768x128xbf16>, vector<16x128xf32> -> vector<16x128xf32>
    %c0_8 = arith.constant 0 : index
    %c0_9 = arith.constant 0 : index
    %13 = vector.load %arg5[%c0_8, %c0_9] : memref<1x128xf32, #tpu.memory_space<vmem>>, vector<1x128xf32>
    %14 = vector.broadcast %13 : vector<1x128xf32> to vector<16x128xf32>
    %15 = arith.mulf %12, %14 : vector<16x128xf32>
    %c0_10 = arith.constant 0 : index
    %c0_11 = arith.constant 0 : index
    %16 = vector.load %arg6[%c0_10, %c0_11] : memref<1x128xf32, #tpu.memory_space<vmem>>, vector<1x128xf32>
    %17 = vector.broadcast %16 : vector<1x128xf32> to vector<16x128xf32>
    %18 = arith.addf %15, %17 : vector<16x128xf32>
    %cst_12 = arith.constant 0.000000e+00 : f32
    %19 = vector.broadcast %cst_12 : f32 to vector<16x128xf32>
    %20 = arith.maximumf %18, %19 : vector<16x128xf32>
    %21 = arith.truncf %20 : vector<16x128xf32> to vector<16x128xbf16>
    %c0_13 = arith.constant 0 : index
    %c0_14 = arith.constant 0 : index
    %22 = vector.load %arg7[%c0_13, %c0_14] : memref<16x128xbf16, #tpu.memory_space<vmem>>, vector<16x128xbf16>
    tpu.vector_store %arg7[%c0_13, %c0_14], %21 {strides = array<i32>} : memref<16x128xbf16, #tpu.memory_space<vmem>>, vector<16x128xbf16>,
    return
  }
  func.func @transform_0(%arg0: i32) -> (i32, i32) {
    %c0_i32 = arith.constant 0 : i32
    %c0_i32_0 = arith.constant 0 : i32
    return %arg0, %c0_i32 : i32, i32
  }
  func.func @transform_1(%arg0: i32) -> (i32, i32) {
    %c0_i32 = arith.constant 0 : i32
    %c0_i32_0 = arith.constant 0 : i32
    %c0_i32_1 = arith.constant 0 : i32
    return %c0_i32, %c0_i32_0 : i32, i32
  }
  func.func @transform_2(%arg0: i32) -> (i32, i32) {
    %c0_i32 = arith.constant 0 : i32
    %c0_i32_0 = arith.constant 0 : i32
    %c0_i32_1 = arith.constant 0 : i32
    return %c0_i32, %c0_i32_0 : i32, i32
  }
  func.func @transform_3(%arg0: i32) -> (i32, i32) {
    %c0_i32 = arith.constant 0 : i32
    %c0_i32_0 = arith.constant 0 : i32
    %c0_i32_1 = arith.constant 0 : i32
    return %c0_i32, %c0_i32_0 : i32, i32
  }
  func.func @transform_4(%arg0: i32) -> (i32, i32) {
    %c0_i32 = arith.constant 0 : i32
    %c0_i32_0 = arith.constant 0 : i32
    %c0_i32_1 = arith.constant 0 : i32
    return %c0_i32, %c0_i32_0 : i32, i32
  }
  func.func @transform_5(%arg0: i32) -> (i32, i32) {
    %c0_i32 = arith.constant 0 : i32
    %c0_i32_0 = arith.constant 0 : i32
    %c0_i32_1 = arith.constant 0 : i32
    return %c0_i32, %c0_i32_0 : i32, i32
  }
  func.func @transform_6(%arg0: i32) -> (i32, i32) {
    %c0_i32 = arith.constant 0 : i32
    %c0_i32_0 = arith.constant 0 : i32
    return %arg0, %c0_i32 : i32, i32
  }
}

module attributes {stable_mosaic.version = 11 : i64} {
  func.func @_bn_relu_mm_bn_relu_kernel(%arg0: i32, %arg1: memref<16x896xbf16, #tpu.memory_space<vmem>>, %arg2: memref<1x896xf32, #tpu.memory_space<vmem>>, %arg3: memref<1x896xf32, #tpu.memory_space<vmem>>, %arg4: memref<896x128xbf16, #tpu.memory_space<vmem>>, %arg5: memref<1x128xf32, #tpu.memory_space<vmem>>, %arg6: memref<1x128xf32, #tpu.memory_space<vmem>>, %arg7: memref<16x128xbf16, #tpu.memory_space<vmem>>) attributes {dimension_semantics = [#tpu.dimension_semantics<parallel>], iteration_bounds = array<i64: 1>, scalar_prefetch = 0 : i64, scratch_operands = 0 : i64, tpu.core_type = #tpu.core_type<tc>, window_params = [{transform_indices = @transform_0, window_bounds = array<i64: 16, 896>}, {pipeline_mode = #tpu.pipeline_mode<synchronous>, transform_indices = @transform_1, window_bounds = array<i64: 1, 896>}, {pipeline_mode = #tpu.pipeline_mode<synchronous>, transform_indices = @transform_2, window_bounds = array<i64: 1, 896>}, {pipeline_mode = #tpu.pipeline_mode<synchronous>, transform_indices = @transform_3, window_bounds = array<i64: 896, 128>}, {pipeline_mode = #tpu.pipeline_mode<synchronous>, transform_indices = @transform_4, window_bounds = array<i64: 1, 128>}, {pipeline_mode = #tpu.pipeline_mode<synchronous>, transform_indices = @transform_5, window_bounds = array<i64: 1, 128>}, {transform_indices = @transform_6, window_bounds = array<i64: 16, 128>}]} {
    %c0 = arith.constant 0 : index
    %c0_0 = arith.constant 0 : index
    %0 = vector.load %arg1[%c0, %c0_0] : memref<16x896xbf16, #tpu.memory_space<vmem>>, vector<16x896xbf16>
    %1 = arith.extf %0 : vector<16x896xbf16> to vector<16x896xf32>
    %c0_1 = arith.constant 0 : index
    %c0_2 = arith.constant 0 : index
    %2 = vector.load %arg2[%c0_1, %c0_2] : memref<1x896xf32, #tpu.memory_space<vmem>>, vector<1x896xf32>
    %3 = vector.broadcast %2 : vector<1x896xf32> to vector<16x896xf32>
    %4 = arith.mulf %1, %3 : vector<16x896xf32>
    %c0_3 = arith.constant 0 : index
    %c0_4 = arith.constant 0 : index
    %5 = vector.load %arg3[%c0_3, %c0_4] : memref<1x896xf32, #tpu.memory_space<vmem>>, vector<1x896xf32>
    %6 = vector.broadcast %5 : vector<1x896xf32> to vector<16x896xf32>
    %7 = arith.addf %4, %6 : vector<16x896xf32>
    %cst = arith.constant 0.000000e+00 : f32
    %8 = vector.broadcast %cst : f32 to vector<16x896xf32>
    %9 = arith.maximumf %7, %8 : vector<16x896xf32>
    %10 = arith.truncf %9 : vector<16x896xf32> to vector<16x896xbf16>
    %c0_5 = arith.constant 0 : index
    %c0_6 = arith.constant 0 : index
    %11 = vector.load %arg4[%c0_5, %c0_6] : memref<896x128xbf16, #tpu.memory_space<vmem>>, vector<896x128xbf16>
    %cst_7 = arith.constant dense<0.000000e+00> : vector<16x128xf32>
    %12 = tpu.matmul %10, %11, %cst_7 {dimension_numbers = #tpu.dot_dimension_numbers<[1], [0], [0], [1], [0, 0, 1, 1], [], []>} : vector<16x896xbf16>, vector<896x128xbf16>, vector<16x128xf32> -> vector<16x128xf32>
    %c0_8 = arith.constant 0 : index
    %c0_9 = arith.constant 0 : index
    %13 = vector.load %arg5[%c0_8, %c0_9] : memref<1x128xf32, #tpu.memory_space<vmem>>, vector<1x128xf32>
    %14 = vector.broadcast %13 : vector<1x128xf32> to vector<16x128xf32>
    %15 = arith.mulf %12, %14 : vector<16x128xf32>
    %c0_10 = arith.constant 0 : index
    %c0_11 = arith.constant 0 : index
    %16 = vector.load %arg6[%c0_10, %c0_11] : memref<1x128xf32, #tpu.memory_space<vmem>>, vector<1x128xf32>
    %17 = vector.broadcast %16 : vector<1x128xf32> to vector<16x128xf32>
    %18 = arith.addf %15, %17 : vector<16x128xf32>
    %cst_12 = arith.constant 0.000000e+00 : f32
    %19 = vector.broadcast %cst_12 : f32 to vector<16x128xf32>
    %20 = arith.maximumf %18, %19 : vector<16x128xf32>
    %21 = arith.truncf %20 : vector<16x128xf32> to vector<16x128xbf16>
    %c0_13 = arith.constant 0 : index
    %c0_14 = arith.constant 0 : index
    %22 = vector.load %arg7[%c0_13, %c0_14] : memref<16x128xbf16, #tpu.memory_space<vmem>>, vector<16x128xbf16>
    tpu.vector_store %arg7[%c0_13, %c0_14], %21 {strides = array<i32>} : memref<16x128xbf16, #tpu.memory_space<vmem>>, vector<16x128xbf16>,
    return
  }
  func.func @transform_0(%arg0: i32) -> (i32, i32) {
    %c0_i32 = arith.constant 0 : i32
    %c0_i32_0 = arith.constant 0 : i32
    return %arg0, %c0_i32 : i32, i32
  }
  func.func @transform_1(%arg0: i32) -> (i32, i32) {
    %c0_i32 = arith.constant 0 : i32
    %c0_i32_0 = arith.constant 0 : i32
    %c0_i32_1 = arith.constant 0 : i32
    return %c0_i32, %c0_i32_0 : i32, i32
  }
  func.func @transform_2(%arg0: i32) -> (i32, i32) {
    %c0_i32 = arith.constant 0 : i32
    %c0_i32_0 = arith.constant 0 : i32
    %c0_i32_1 = arith.constant 0 : i32
    return %c0_i32, %c0_i32_0 : i32, i32
  }
  func.func @transform_3(%arg0: i32) -> (i32, i32) {
    %c0_i32 = arith.constant 0 : i32
    %c0_i32_0 = arith.constant 0 : i32
    %c0_i32_1 = arith.constant 0 : i32
    return %c0_i32, %c0_i32_0 : i32, i32
  }
  func.func @transform_4(%arg0: i32) -> (i32, i32) {
    %c0_i32 = arith.constant 0 : i32
    %c0_i32_0 = arith.constant 0 : i32
    %c0_i32_1 = arith.constant 0 : i32
    return %c0_i32, %c0_i32_0 : i32, i32
  }
  func.func @transform_5(%arg0: i32) -> (i32, i32) {
    %c0_i32 = arith.constant 0 : i32
    %c0_i32_0 = arith.constant 0 : i32
    %c0_i32_1 = arith.constant 0 : i32
    return %c0_i32, %c0_i32_0 : i32, i32
  }
  func.func @transform_6(%arg0: i32) -> (i32, i32) {
    %c0_i32 = arith.constant 0 : i32
    %c0_i32_0 = arith.constant 0 : i32
    return %arg0, %c0_i32 : i32, i32
  }
}

module attributes {stable_mosaic.version = 11 : i64} {
  func.func @_bn_relu_mm_bn_relu_kernel(%arg0: i32, %arg1: memref<16x1024xbf16, #tpu.memory_space<vmem>>, %arg2: memref<1x1024xf32, #tpu.memory_space<vmem>>, %arg3: memref<1x1024xf32, #tpu.memory_space<vmem>>, %arg4: memref<1024x128xbf16, #tpu.memory_space<vmem>>, %arg5: memref<1x128xf32, #tpu.memory_space<vmem>>, %arg6: memref<1x128xf32, #tpu.memory_space<vmem>>, %arg7: memref<16x128xbf16, #tpu.memory_space<vmem>>) attributes {dimension_semantics = [#tpu.dimension_semantics<parallel>], iteration_bounds = array<i64: 1>, scalar_prefetch = 0 : i64, scratch_operands = 0 : i64, tpu.core_type = #tpu.core_type<tc>, window_params = [{transform_indices = @transform_0, window_bounds = array<i64: 16, 1024>}, {pipeline_mode = #tpu.pipeline_mode<synchronous>, transform_indices = @transform_1, window_bounds = array<i64: 1, 1024>}, {pipeline_mode = #tpu.pipeline_mode<synchronous>, transform_indices = @transform_2, window_bounds = array<i64: 1, 1024>}, {pipeline_mode = #tpu.pipeline_mode<synchronous>, transform_indices = @transform_3, window_bounds = array<i64: 1024, 128>}, {pipeline_mode = #tpu.pipeline_mode<synchronous>, transform_indices = @transform_4, window_bounds = array<i64: 1, 128>}, {pipeline_mode = #tpu.pipeline_mode<synchronous>, transform_indices = @transform_5, window_bounds = array<i64: 1, 128>}, {transform_indices = @transform_6, window_bounds = array<i64: 16, 128>}]} {
    %c0 = arith.constant 0 : index
    %c0_0 = arith.constant 0 : index
    %0 = vector.load %arg1[%c0, %c0_0] : memref<16x1024xbf16, #tpu.memory_space<vmem>>, vector<16x1024xbf16>
    %1 = arith.extf %0 : vector<16x1024xbf16> to vector<16x1024xf32>
    %c0_1 = arith.constant 0 : index
    %c0_2 = arith.constant 0 : index
    %2 = vector.load %arg2[%c0_1, %c0_2] : memref<1x1024xf32, #tpu.memory_space<vmem>>, vector<1x1024xf32>
    %3 = vector.broadcast %2 : vector<1x1024xf32> to vector<16x1024xf32>
    %4 = arith.mulf %1, %3 : vector<16x1024xf32>
    %c0_3 = arith.constant 0 : index
    %c0_4 = arith.constant 0 : index
    %5 = vector.load %arg3[%c0_3, %c0_4] : memref<1x1024xf32, #tpu.memory_space<vmem>>, vector<1x1024xf32>
    %6 = vector.broadcast %5 : vector<1x1024xf32> to vector<16x1024xf32>
    %7 = arith.addf %4, %6 : vector<16x1024xf32>
    %cst = arith.constant 0.000000e+00 : f32
    %8 = vector.broadcast %cst : f32 to vector<16x1024xf32>
    %9 = arith.maximumf %7, %8 : vector<16x1024xf32>
    %10 = arith.truncf %9 : vector<16x1024xf32> to vector<16x1024xbf16>
    %c0_5 = arith.constant 0 : index
    %c0_6 = arith.constant 0 : index
    %11 = vector.load %arg4[%c0_5, %c0_6] : memref<1024x128xbf16, #tpu.memory_space<vmem>>, vector<1024x128xbf16>
    %cst_7 = arith.constant dense<0.000000e+00> : vector<16x128xf32>
    %12 = tpu.matmul %10, %11, %cst_7 {dimension_numbers = #tpu.dot_dimension_numbers<[1], [0], [0], [1], [0, 0, 1, 1], [], []>} : vector<16x1024xbf16>, vector<1024x128xbf16>, vector<16x128xf32> -> vector<16x128xf32>
    %c0_8 = arith.constant 0 : index
    %c0_9 = arith.constant 0 : index
    %13 = vector.load %arg5[%c0_8, %c0_9] : memref<1x128xf32, #tpu.memory_space<vmem>>, vector<1x128xf32>
    %14 = vector.broadcast %13 : vector<1x128xf32> to vector<16x128xf32>
    %15 = arith.mulf %12, %14 : vector<16x128xf32>
    %c0_10 = arith.constant 0 : index
    %c0_11 = arith.constant 0 : index
    %16 = vector.load %arg6[%c0_10, %c0_11] : memref<1x128xf32, #tpu.memory_space<vmem>>, vector<1x128xf32>
    %17 = vector.broadcast %16 : vector<1x128xf32> to vector<16x128xf32>
    %18 = arith.addf %15, %17 : vector<16x128xf32>
    %cst_12 = arith.constant 0.000000e+00 : f32
    %19 = vector.broadcast %cst_12 : f32 to vector<16x128xf32>
    %20 = arith.maximumf %18, %19 : vector<16x128xf32>
    %21 = arith.truncf %20 : vector<16x128xf32> to vector<16x128xbf16>
    %c0_13 = arith.constant 0 : index
    %c0_14 = arith.constant 0 : index
    %22 = vector.load %arg7[%c0_13, %c0_14] : memref<16x128xbf16, #tpu.memory_space<vmem>>, vector<16x128xbf16>
    tpu.vector_store %arg7[%c0_13, %c0_14], %21 {strides = array<i32>} : memref<16x128xbf16, #tpu.memory_space<vmem>>, vector<16x128xbf16>,
    return
  }
  func.func @transform_0(%arg0: i32) -> (i32, i32) {
    %c0_i32 = arith.constant 0 : i32
    %c0_i32_0 = arith.constant 0 : i32
    return %arg0, %c0_i32 : i32, i32
  }
  func.func @transform_1(%arg0: i32) -> (i32, i32) {
    %c0_i32 = arith.constant 0 : i32
    %c0_i32_0 = arith.constant 0 : i32
    %c0_i32_1 = arith.constant 0 : i32
    return %c0_i32, %c0_i32_0 : i32, i32
  }
  func.func @transform_2(%arg0: i32) -> (i32, i32) {
    %c0_i32 = arith.constant 0 : i32
    %c0_i32_0 = arith.constant 0 : i32
    %c0_i32_1 = arith.constant 0 : i32
    return %c0_i32, %c0_i32_0 : i32, i32
  }
  func.func @transform_3(%arg0: i32) -> (i32, i32) {
    %c0_i32 = arith.constant 0 : i32
    %c0_i32_0 = arith.constant 0 : i32
    %c0_i32_1 = arith.constant 0 : i32
    return %c0_i32, %c0_i32_0 : i32, i32
  }
  func.func @transform_4(%arg0: i32) -> (i32, i32) {
    %c0_i32 = arith.constant 0 : i32
    %c0_i32_0 = arith.constant 0 : i32
    %c0_i32_1 = arith.constant 0 : i32
    return %c0_i32, %c0_i32_0 : i32, i32
  }
  func.func @transform_5(%arg0: i32) -> (i32, i32) {
    %c0_i32 = arith.constant 0 : i32
    %c0_i32_0 = arith.constant 0 : i32
    %c0_i32_1 = arith.constant 0 : i32
    return %c0_i32, %c0_i32_0 : i32, i32
  }
  func.func @transform_6(%arg0: i32) -> (i32, i32) {
    %c0_i32 = arith.constant 0 : i32
    %c0_i32_0 = arith.constant 0 : i32
    return %arg0, %c0_i32 : i32, i32
  }
}

module attributes {stable_mosaic.version = 11 : i64} {
  func.func @_bn_relu_mm_kernel(%arg0: i32, %arg1: memref<16x1024xbf16, #tpu.memory_space<vmem>>, %arg2: memref<1x1024xf32, #tpu.memory_space<vmem>>, %arg3: memref<1x1024xf32, #tpu.memory_space<vmem>>, %arg4: memref<1024x512xbf16, #tpu.memory_space<vmem>>, %arg5: memref<16x512xbf16, #tpu.memory_space<vmem>>) attributes {dimension_semantics = [#tpu.dimension_semantics<parallel>], iteration_bounds = array<i64: 1>, scalar_prefetch = 0 : i64, scratch_operands = 0 : i64, tpu.core_type = #tpu.core_type<tc>, window_params = [{transform_indices = @transform_0, window_bounds = array<i64: 16, 1024>}, {pipeline_mode = #tpu.pipeline_mode<synchronous>, transform_indices = @transform_1, window_bounds = array<i64: 1, 1024>}, {pipeline_mode = #tpu.pipeline_mode<synchronous>, transform_indices = @transform_2, window_bounds = array<i64: 1, 1024>}, {pipeline_mode = #tpu.pipeline_mode<synchronous>, transform_indices = @transform_3, window_bounds = array<i64: 1024, 512>}, {transform_indices = @transform_4, window_bounds = array<i64: 16, 512>}]} {
    %c0 = arith.constant 0 : index
    %c0_0 = arith.constant 0 : index
    %0 = vector.load %arg1[%c0, %c0_0] : memref<16x1024xbf16, #tpu.memory_space<vmem>>, vector<16x1024xbf16>
    %1 = arith.extf %0 : vector<16x1024xbf16> to vector<16x1024xf32>
    %c0_1 = arith.constant 0 : index
    %c0_2 = arith.constant 0 : index
    %2 = vector.load %arg2[%c0_1, %c0_2] : memref<1x1024xf32, #tpu.memory_space<vmem>>, vector<1x1024xf32>
    %3 = vector.broadcast %2 : vector<1x1024xf32> to vector<16x1024xf32>
    %4 = arith.mulf %1, %3 : vector<16x1024xf32>
    %c0_3 = arith.constant 0 : index
    %c0_4 = arith.constant 0 : index
    %5 = vector.load %arg3[%c0_3, %c0_4] : memref<1x1024xf32, #tpu.memory_space<vmem>>, vector<1x1024xf32>
    %6 = vector.broadcast %5 : vector<1x1024xf32> to vector<16x1024xf32>
    %7 = arith.addf %4, %6 : vector<16x1024xf32>
    %cst = arith.constant 0.000000e+00 : f32
    %8 = vector.broadcast %cst : f32 to vector<16x1024xf32>
    %9 = arith.maximumf %7, %8 : vector<16x1024xf32>
    %10 = arith.truncf %9 : vector<16x1024xf32> to vector<16x1024xbf16>
    %c0_5 = arith.constant 0 : index
    %c0_6 = arith.constant 0 : index
    %11 = vector.load %arg4[%c0_5, %c0_6] : memref<1024x512xbf16, #tpu.memory_space<vmem>>, vector<1024x512xbf16>
    %cst_7 = arith.constant dense<0.000000e+00> : vector<16x512xf32>
    %12 = tpu.matmul %10, %11, %cst_7 {dimension_numbers = #tpu.dot_dimension_numbers<[1], [0], [0], [1], [0, 0, 1, 1], [], []>} : vector<16x1024xbf16>, vector<1024x512xbf16>, vector<16x512xf32> -> vector<16x512xf32>
    %13 = arith.truncf %12 : vector<16x512xf32> to vector<16x512xbf16>
    %c0_8 = arith.constant 0 : index
    %c0_9 = arith.constant 0 : index
    %14 = vector.load %arg5[%c0_8, %c0_9] : memref<16x512xbf16, #tpu.memory_space<vmem>>, vector<16x512xbf16>
    tpu.vector_store %arg5[%c0_8, %c0_9], %13 {strides = array<i32>} : memref<16x512xbf16, #tpu.memory_space<vmem>>, vector<16x512xbf16>,
    return
  }
  func.func @transform_0(%arg0: i32) -> (i32, i32) {
    %c0_i32 = arith.constant 0 : i32
    %c0_i32_0 = arith.constant 0 : i32
    return %arg0, %c0_i32 : i32, i32
  }
  func.func @transform_1(%arg0: i32) -> (i32, i32) {
    %c0_i32 = arith.constant 0 : i32
    %c0_i32_0 = arith.constant 0 : i32
    %c0_i32_1 = arith.constant 0 : i32
    return %c0_i32, %c0_i32_0 : i32, i32
  }
  func.func @transform_2(%arg0: i32) -> (i32, i32) {
    %c0_i32 = arith.constant 0 : i32
    %c0_i32_0 = arith.constant 0 : i32
    %c0_i32_1 = arith.constant 0 : i32
    return %c0_i32, %c0_i32_0 : i32, i32
  }
  func.func @transform_3(%arg0: i32) -> (i32, i32) {
    %c0_i32 = arith.constant 0 : i32
    %c0_i32_0 = arith.constant 0 : i32
    %c0_i32_1 = arith.constant 0 : i32
    return %c0_i32, %c0_i32_0 : i32, i32
  }
  func.func @transform_4(%arg0: i32) -> (i32, i32) {
    %c0_i32 = arith.constant 0 : i32
    %c0_i32_0 = arith.constant 0 : i32
    return %arg0, %c0_i32 : i32, i32
  }
}

module attributes {stable_mosaic.version = 11 : i64} {
  func.func @_mean_stack_kernel(%arg0: i32, %arg1: memref<4x2x512xbf16, #tpu.memory_space<vmem>>, %arg2: memref<2x512xbf16, #tpu.memory_space<vmem>>) attributes {dimension_semantics = [#tpu.dimension_semantics<parallel>], iteration_bounds = array<i64: 1>, scalar_prefetch = 0 : i64, scratch_operands = 0 : i64, tpu.core_type = #tpu.core_type<tc>, window_params = [{transform_indices = @transform_0, window_bounds = array<i64: 4, 2, 512>}, {transform_indices = @transform_1, window_bounds = array<i64: 2, 512>}]} {
    %c0 = arith.constant 0 : index
    %c0_0 = arith.constant 0 : index
    %c0_1 = arith.constant 0 : index
    %0 = vector.load %arg1[%c0, %c0_0, %c0_1] : memref<4x2x512xbf16, #tpu.memory_space<vmem>>, vector<4x2x512xbf16>
    %1 = arith.extf %0 : vector<4x2x512xbf16> to vector<4x2x512xf32>
    %cst = arith.constant dense<0.000000e+00> : vector<2x512xf32>
    %2 = vector.multi_reduction <add>, %1, %cst [0] : vector<4x2x512xf32> to vector<2x512xf32>
    %cst_2 = arith.constant 4.000000e+00 : f32
    %3 = vector.broadcast %cst_2 : f32 to vector<2x512xf32>
    %4 = arith.divf %2, %3 : vector<2x512xf32>
    %5 = arith.truncf %4 : vector<2x512xf32> to vector<2x512xbf16>
    %c0_3 = arith.constant 0 : index
    %c0_4 = arith.constant 0 : index
    %6 = vector.load %arg2[%c0_3, %c0_4] : memref<2x512xbf16, #tpu.memory_space<vmem>>, vector<2x512xbf16>
    tpu.vector_store %arg2[%c0_3, %c0_4], %5 {strides = array<i32>} : memref<2x512xbf16, #tpu.memory_space<vmem>>, vector<2x512xbf16>,
    return
  }
  func.func @transform_0(%arg0: i32) -> (i32, i32, i32) {
    %c0_i32 = arith.constant 0 : i32
    %c0_i32_0 = arith.constant 0 : i32
    %c0_i32_1 = arith.constant 0 : i32
    return %c0_i32, %arg0, %c0_i32_0 : i32, i32, i32
  }
  func.func @transform_1(%arg0: i32) -> (i32, i32) {
    %c0_i32 = arith.constant 0 : i32
    %c0_i32_0 = arith.constant 0 : i32
    return %arg0, %c0_i32 : i32, i32
  }
}

module attributes {stable_mosaic.version = 11 : i64} {
  func.func @_bn_relu_gap_kernel(%arg0: i32, %arg1: memref<2x1x512xbf16, #tpu.memory_space<vmem>>, %arg2: memref<1x1x512xf32, #tpu.memory_space<vmem>>, %arg3: memref<1x1x512xf32, #tpu.memory_space<vmem>>, %arg4: memref<2x512xf32, #tpu.memory_space<vmem>>) attributes {dimension_semantics = [#tpu.dimension_semantics<parallel>], iteration_bounds = array<i64: 2>, scalar_prefetch = 0 : i64, scratch_operands = 0 : i64, tpu.core_type = #tpu.core_type<tc>, window_params = [{transform_indices = @transform_0, window_bounds = array<i64: 2, 1, 512>}, {transform_indices = @transform_1, window_bounds = array<i64: 1, 1, 512>}, {transform_indices = @transform_2, window_bounds = array<i64: 1, 1, 512>}, {transform_indices = @transform_3, window_bounds = array<i64: 2, 512>}]} {
    %c0 = arith.constant 0 : index
    %c0_0 = arith.constant 0 : index
    %c0_1 = arith.constant 0 : index
    %0 = vector.load %arg1[%c0, %c0_0, %c0_1] : memref<2x1x512xbf16, #tpu.memory_space<vmem>>, vector<2x1x512xbf16>
    %1 = arith.extf %0 : vector<2x1x512xbf16> to vector<2x1x512xf32>
    %c0_2 = arith.constant 0 : index
    %c0_3 = arith.constant 0 : index
    %c0_4 = arith.constant 0 : index
    %2 = vector.load %arg2[%c0_2, %c0_3, %c0_4] : memref<1x1x512xf32, #tpu.memory_space<vmem>>, vector<1x1x512xf32>
    %3 = vector.broadcast %2 : vector<1x1x512xf32> to vector<2x1x512xf32>
    %4 = arith.mulf %1, %3 : vector<2x1x512xf32>
    %c0_5 = arith.constant 0 : index
    %c0_6 = arith.constant 0 : index
    %c0_7 = arith.constant 0 : index
    %5 = vector.load %arg3[%c0_5, %c0_6, %c0_7] : memref<1x1x512xf32, #tpu.memory_space<vmem>>, vector<1x1x512xf32>
    %6 = vector.broadcast %5 : vector<1x1x512xf32> to vector<2x1x512xf32>
    %7 = arith.addf %4, %6 : vector<2x1x512xf32>
    %cst = arith.constant 0.000000e+00 : f32
    %8 = vector.broadcast %cst : f32 to vector<2x1x512xf32>
    %9 = arith.maximumf %7, %8 : vector<2x1x512xf32>
    %cst_8 = arith.constant dense<0.000000e+00> : vector<2x512xf32>
    %10 = vector.multi_reduction <add>, %9, %cst_8 [1] : vector<2x1x512xf32> to vector<2x512xf32>
    %cst_9 = arith.constant 1.000000e+00 : f32
    %11 = vector.broadcast %cst_9 : f32 to vector<2x512xf32>
    %12 = arith.divf %10, %11 : vector<2x512xf32>
    %c0_10 = arith.constant 0 : index
    %c0_11 = arith.constant 0 : index
    %13 = vector.load %arg4[%c0_10, %c0_11] : memref<2x512xf32, #tpu.memory_space<vmem>>, vector<2x512xf32>
    tpu.vector_store %arg4[%c0_10, %c0_11], %12 {strides = array<i32>} : memref<2x512xf32, #tpu.memory_space<vmem>>, vector<2x512xf32>,
    return
  }
  func.func @transform_0(%arg0: i32) -> (i32, i32, i32) {
    %c0_i32 = arith.constant 0 : i32
    %c0_i32_0 = arith.constant 0 : i32
    %c0_i32_1 = arith.constant 0 : i32
    return %c0_i32, %c0_i32_0, %arg0 : i32, i32, i32
  }
  func.func @transform_1(%arg0: i32) -> (i32, i32, i32) {
    %c0_i32 = arith.constant 0 : i32
    %c0_i32_0 = arith.constant 0 : i32
    %c0_i32_1 = arith.constant 0 : i32
    return %c0_i32, %c0_i32_0, %arg0 : i32, i32, i32
  }
  func.func @transform_2(%arg0: i32) -> (i32, i32, i32) {
    %c0_i32 = arith.constant 0 : i32
    %c0_i32_0 = arith.constant 0 : i32
    %c0_i32_1 = arith.constant 0 : i32
    return %c0_i32, %c0_i32_0, %arg0 : i32, i32, i32
  }
  func.func @transform_3(%arg0: i32) -> (i32, i32) {
    %c0_i32 = arith.constant 0 : i32
    %c0_i32_0 = arith.constant 0 : i32
    return %c0_i32, %arg0 : i32, i32
  }
}

module attributes {stable_mosaic.version = 11 : i64} {
  func.func @_mm_bias_kernel(%arg0: i32, %arg1: memref<16x1024xbf16, #tpu.memory_space<vmem>>, %arg2: memref<1024x128xbf16, #tpu.memory_space<vmem>>, %arg3: memref<1x128xf32, #tpu.memory_space<vmem>>, %arg4: memref<16x128xf32, #tpu.memory_space<vmem>>) attributes {dimension_semantics = [#tpu.dimension_semantics<parallel>], iteration_bounds = array<i64: 1>, scalar_prefetch = 0 : i64, scratch_operands = 0 : i64, tpu.core_type = #tpu.core_type<tc>, window_params = [{transform_indices = @transform_0, window_bounds = array<i64: 16, 1024>}, {pipeline_mode = #tpu.pipeline_mode<synchronous>, transform_indices = @transform_1, window_bounds = array<i64: 1024, 128>}, {pipeline_mode = #tpu.pipeline_mode<synchronous>, transform_indices = @transform_2, window_bounds = array<i64: 1, 128>}, {transform_indices = @transform_3, window_bounds = array<i64: 16, 128>}]} {
    %c0 = arith.constant 0 : index
    %c0_0 = arith.constant 0 : index
    %0 = vector.load %arg1[%c0, %c0_0] : memref<16x1024xbf16, #tpu.memory_space<vmem>>, vector<16x1024xbf16>
    %c0_1 = arith.constant 0 : index
    %c0_2 = arith.constant 0 : index
    %1 = vector.load %arg2[%c0_1, %c0_2] : memref<1024x128xbf16, #tpu.memory_space<vmem>>, vector<1024x128xbf16>
    %cst = arith.constant dense<0.000000e+00> : vector<16x128xf32>
    %2 = tpu.matmul %0, %1, %cst {dimension_numbers = #tpu.dot_dimension_numbers<[1], [0], [0], [1], [0, 0, 1, 1], [], []>} : vector<16x1024xbf16>, vector<1024x128xbf16>, vector<16x128xf32> -> vector<16x128xf32>
    %c0_3 = arith.constant 0 : index
    %c0_4 = arith.constant 0 : index
    %3 = vector.load %arg3[%c0_3, %c0_4] : memref<1x128xf32, #tpu.memory_space<vmem>>, vector<1x128xf32>
    %4 = vector.broadcast %3 : vector<1x128xf32> to vector<16x128xf32>
    %5 = arith.addf %2, %4 : vector<16x128xf32>
    %c0_5 = arith.constant 0 : index
    %c0_6 = arith.constant 0 : index
    %6 = vector.load %arg4[%c0_5, %c0_6] : memref<16x128xf32, #tpu.memory_space<vmem>>, vector<16x128xf32>
    tpu.vector_store %arg4[%c0_5, %c0_6], %5 {strides = array<i32>} : memref<16x128xf32, #tpu.memory_space<vmem>>, vector<16x128xf32>,
    return
  }
  func.func @transform_0(%arg0: i32) -> (i32, i32) {
    %c0_i32 = arith.constant 0 : i32
    %c0_i32_0 = arith.constant 0 : i32
    return %arg0, %c0_i32 : i32, i32
  }
  func.func @transform_1(%arg0: i32) -> (i32, i32) {
    %c0_i32 = arith.constant 0 : i32
    %c0_i32_0 = arith.constant 0 : i32
    %c0_i32_1 = arith.constant 0 : i32
    return %c0_i32, %c0_i32_0 : i32, i32
  }
  func.func @transform_2(%arg0: i32) -> (i32, i32) {
    %c0_i32 = arith.constant 0 : i32
    %c0_i32_0 = arith.constant 0 : i32
    %c0_i32_1 = arith.constant 0 : i32
    return %c0_i32, %c0_i32_0 : i32, i32
  }
  func.func @transform_3(%arg0: i32) -> (i32, i32) {
    %c0_i32 = arith.constant 0 : i32
    %c0_i32_0 = arith.constant 0 : i32
    return %arg0, %c0_i32 : i32, i32
  }
}

</mosaic_0001>

<bundles_post_ra>
// kernel: densenet121_forward.127
= control target key start
LH: loop header
LB: loop body
LE: loop exit
PB: predicated region body
PF: predicated region fallthrough
CT: control target
= control target key end

     0   :  { %s971_s6 = smov 0   ;;  %s973_s7 = smov 0   ;;  %s1255_s0 = inlined_call_operand.vmem [shape: bf16[9,128,128], index: 0, kind: input, shape index: {}]   ;;  %s1256_s1 = inlined_call_operand.vmem [shape: bf16[128,128], index: 1, kind: output, shape index: {}]  }
   0x1   :  { %s975_s8 = smov 0  }
   0x2 LB: > { %s872_s9 = sadd.s32 4294967295, %s959_s8   ;;  %s988_s10 = sadd.s32 1, %s959_s8   ;;  %s959_s8 = sphi %s975_s8, %s1259_s8   ;;  %s955_s7 = sphi %s973_s7, %s1258_s7   ;;  %s951_s6 = sphi %s971_s6, %s1257_s6  }
   0x3   : > { %s15_s11 = ssub.s32 %s959_s8, %s988_s10  ;;  %s18_s12 = sadd.s32 1, %s955_s7 }
   0x4   : > { %p16_p0 = scmp.eq.s32.totalorder %s15_s11, 0  ;;  %p25_p1 = scmp.ne.s32.totalorder %s955_s7, %s951_s6 }
   0x5   : > { %p26_p2 = scmp.eq.s32.totalorder %s959_s8, 0  ;;  %p875_p4 = scmp.ge.s32.totalorder %s959_s8, 2 }
   0x6   : > { %s997_s13 = scalar_select %p16_p0, %s955_s7, %s18_s12  }
   0x7   : > { %p27_p3 = por %p26_p2, %p25_p1  ;;  %77 = sbr.rel (%p875_p4) target bundleno = 35 (0x23), region = 16 }
   0xc   : > { %80 = sbr.rel (!%p27_p3) target bundleno = 35 (0x23), region = 20  ;;  %s82_s14 = sand.u32 (%p27_p3), 1, %s955_s7  }
   0xd   : > { %s883_s15 = sshll.u32 (%p27_p3), %s959_s8, 5  ;;  %s911_s16 = smul.u32 (%p27_p3), 288, %s82_s14 }
   0xe   : > { %s1005_s19 = scalar_lea.vmem (%p27_p3), %s1255_s0, %s883_s15 }
   0xf   : > { %v104_v0 = vld [vmem:[%s1005_s19] sm:$0xff] (%p27_p3)   ;;  %v108_v1 = vld [vmem:[%s1005_s19 + $0x8] sm:$0xff] (%p27_p3)   ;;  %v112_v2 = vld [vmem:[%s1005_s19 + $0x10] sm:$0xff] (%p27_p3)   ;;  %s1013_s20 = scalar_lea.vmem (%p27_p3), [#allocation2], %s911_s16 }
  0x10   : > { %v116_v3 = vld [vmem:[%s1005_s19 + $0x18] sm:$0xff] (%p27_p3)   ;;  %v120_v4 = vld [vmem:[%s1005_s19 + $0x40] sm:$0xff] (%p27_p3)   ;;  %v124_v5 = vld [vmem:[%s1005_s19 + $0x48] sm:$0xff] (%p27_p3)   ;;  %105 = vst [vmem:[%s1013_s20] sm:$0xff] (%p27_p3), %v104_v0  }
  0x11   : > { %109 = vst [vmem:[%s1013_s20 + $0x8] sm:$0xff] %v108_v1   ;;  %113 = vst [vmem:[%s1013_s20 + $0x10] sm:$0xff] %v112_v2   ;;  %v128_v6 = vld [vmem:[%s1005_s19 + $0x50] sm:$0xff]   ;;  %v132_v7 = vld [vmem:[%s1005_s19 + $0x58] sm:$0xff]  }
  0x12   : > { %117 = vst [vmem:[%s1013_s20 + $0x18] sm:$0xff] %v116_v3   ;;  %121 = vst [vmem:[%s1013_s20 + $0x20] sm:$0xff] %v120_v4   ;;  %v136_v8 = vld [vmem:[%s1005_s19 + $0x80] sm:$0xff]   ;;  %v140_v9 = vld [vmem:[%s1005_s19 + $0x88] sm:$0xff]  }
  0x13   : > { %125 = vst [vmem:[%s1013_s20 + $0x28] sm:$0xff] %v124_v5   ;;  %129 = vst [vmem:[%s1013_s20 + $0x30] sm:$0xff] %v128_v6   ;;  %v144_v10 = vld [vmem:[%s1005_s19 + $0x90] sm:$0xff]   ;;  %v148_v11 = vld [vmem:[%s1005_s19 + $0x98] sm:$0xff]  }
  0x14   : > { %133 = vst [vmem:[%s1013_s20 + $0x38] sm:$0xff] %v132_v7   ;;  %137 = vst [vmem:[%s1013_s20 + $0x40] sm:$0xff] %v136_v8   ;;  %v152_v12 = vld [vmem:[%s1005_s19 + $0xc0] sm:$0xff]   ;;  %v156_v13 = vld [vmem:[%s1005_s19 + $0xc8] sm:$0xff]  }
  0x15   : > { %141 = vst [vmem:[%s1013_s20 + $0x48] sm:$0xff] %v140_v9   ;;  %145 = vst [vmem:[%s1013_s20 + $0x50] sm:$0xff] %v144_v10   ;;  %v160_v14 = vld [vmem:[%s1005_s19 + $0xd0] sm:$0xff]   ;;  %v164_v15 = vld [vmem:[%s1005_s19 + $0xd8] sm:$0xff]  }
  0x16   : > { %149 = vst [vmem:[%s1013_s20 + $0x58] sm:$0xff] %v148_v11   ;;  %153 = vst [vmem:[%s1013_s20 + $0x60] sm:$0xff] %v152_v12   ;;  %v168_v16 = vld [vmem:[%s1005_s19 + $0x100] sm:$0xff]   ;;  %v172_v17 = vld [vmem:[%s1005_s19 + $0x108] sm:$0xff]  }
  0x17   : > { %157 = vst [vmem:[%s1013_s20 + $0x68] sm:$0xff] %v156_v13   ;;  %161 = vst [vmem:[%s1013_s20 + $0x70] sm:$0xff] %v160_v14   ;;  %v176_v18 = vld [vmem:[%s1005_s19 + $0x110] sm:$0xff]   ;;  %v180_v19 = vld [vmem:[%s1005_s19 + $0x118] sm:$0xff]  }
  0x18   : > { %165 = vst [vmem:[%s1013_s20 + $0x78] sm:$0xff] %v164_v15   ;;  %169 = vst [vmem:[%s1013_s20 + $0x80] sm:$0xff] %v168_v16   ;;  %v184_v20 = vld [vmem:[%s1005_s19 + $0x140] sm:$0xff]   ;;  %v188_v21 = vld [vmem:[%s1005_s19 + $0x148] sm:$0xff]  }
  0x19   : > { %173 = vst [vmem:[%s1013_s20 + $0x88] sm:$0xff] %v172_v17   ;;  %177 = vst [vmem:[%s1013_s20 + $0x90] sm:$0xff] %v176_v18   ;;  %v192_v22 = vld [vmem:[%s1005_s19 + $0x150] sm:$0xff]   ;;  %v196_v23 = vld [vmem:[%s1005_s19 + $0x158] sm:$0xff]  }
  0x1a   : > { %181 = vst [vmem:[%s1013_s20 + $0x98] sm:$0xff] %v180_v19   ;;  %185 = vst [vmem:[%s1013_s20 + $0xa0] sm:$0xff] %v184_v20   ;;  %v200_v24 = vld [vmem:[%s1005_s19 + $0x180] sm:$0xff]   ;;  %v204_v25 = vld [vmem:[%s1005_s19 + $0x188] sm:$0xff]  }
  0x1b   : > { %189 = vst [vmem:[%s1013_s20 + $0xa8] sm:$0xff] %v188_v21   ;;  %193 = vst [vmem:[%s1013_s20 + $0xb0] sm:$0xff] %v192_v22   ;;  %v208_v26 = vld [vmem:[%s1005_s19 + $0x190] sm:$0xff]   ;;  %v212_v27 = vld [vmem:[%s1005_s19 + $0x198] sm:$0xff]  }
  0x1c   : > { %197 = vst [vmem:[%s1013_s20 + $0xb8] sm:$0xff] %v196_v23   ;;  %201 = vst [vmem:[%s1013_s20 + $0xc0] sm:$0xff] %v200_v24   ;;  %v216_v28 = vld [vmem:[%s1005_s19 + $0x1c0] sm:$0xff]   ;;  %v220_v29 = vld [vmem:[%s1005_s19 + $0x1c8] sm:$0xff]  }
  0x1d   : > { %205 = vst [vmem:[%s1013_s20 + $0xc8] sm:$0xff] %v204_v25   ;;  %209 = vst [vmem:[%s1013_s20 + $0xd0] sm:$0xff] %v208_v26   ;;  %v224_v30 = vld [vmem:[%s1005_s19 + $0x1d0] sm:$0xff]   ;;  %v228_v31 = vld [vmem:[%s1005_s19 + $0x1d8] sm:$0xff]  }
  0x1e   : > { %213 = vst [vmem:[%s1013_s20 + $0xd8] sm:$0xff] %v212_v27   ;;  %217 = vst [vmem:[%s1013_s20 + $0xe0] sm:$0xff] %v216_v28   ;;  %v232_v32 = vld [vmem:[%s1005_s19 + $0x200] sm:$0xff]   ;;  %v236_v33 = vld [vmem:[%s1005_s19 + $0x208] sm:$0xff]  }
  0x1f   : > { %221 = vst [vmem:[%s1013_s20 + $0xe8] sm:$0xff] %v220_v29   ;;  %225 = vst [vmem:[%s1013_s20 + $0xf0] sm:$0xff] %v224_v30   ;;  %v240_v34 = vld [vmem:[%s1005_s19 + $0x210] sm:$0xff]   ;;  %v244_v35 = vld [vmem:[%s1005_s19 + $0x218] sm:$0xff]  }
  0x20   : > { %229 = vst [vmem:[%s1013_s20 + $0xf8] sm:$0xff] %v228_v31   ;;  %233 = vst [vmem:[%s1013_s20 + $0x100] sm:$0xff] %v232_v32  }
  0x21   : > { %237 = vst [vmem:[%s1013_s20 + $0x108] sm:$0xff] %v236_v33   ;;  %241 = vst [vmem:[%s1013_s20 + $0x110] sm:$0xff] %v240_v34  }
  0x22   : > { %245 = vst [vmem:[%s1013_s20 + $0x118] sm:$0xff] %v244_v35  }
  0x23 PF: > { %p878_p5 = scmp.ge.s32.totalorder %s959_s8, 1  ;;  %p414_p6 = scmp.lt.s32.totalorder %s959_s8, 3 }
  0x25   : > { %p415_p7 = pnand %p878_p5, %p414_p6 }
  0x26   : > { %s421_s21 = sand.u32 (!%p415_p7), 1, %s951_s6   ;;  %s879_s24 = sshll.u32 (!%p415_p7), %s872_s9, 3 }
  0x27   : > { %418 = sbr.rel (%p415_p7) target bundleno = 106 (0x6a), region = 61  ;;  %p442_p8 = scmp.lt.s32.totalorder (!%p415_p7), %s879_s24, 15 }
  0x28   : > { %s912_s22 = smul.u32 (!%p415_p7), 288, %s421_s21 }
  0x2a   : > { %s1084_s23 = scalar_lea.vmem (!%p415_p7), [#allocation2], %s912_s22 }
  0x2c   : > { %v448_v36 = vld [vmem:[%s1084_s23] sm:$0xf]  ;;  %vm520_vm0 = vcmask 1043456   ;;  %v449_v39 = vld [vmem:[%s1084_s23 + $0x4] sm:$0xf]  ;;  %s1261_s24 = smov (!%p442_p8, %s879_s24), 15 }
  0x2d   : > { %v456_v37 = vld [vmem:[%s1084_s23 + $0x20] sm:$0xf]  ;;  %v457_v40 = vld [vmem:[%s1084_s23 + $0x24] sm:$0xf]  ;;  %v523_v42 = vsel %vm520_vm0, %v448_v36, 4286644096 }
  0x2e   : > { %v464_v38 = vld [vmem:[%s1084_s23 + $0x40] sm:$0xf]  ;;  %v465_v43 = vld [vmem:[%s1084_s23 + $0x44] sm:$0xf]  ;;  %v526_v44 = vsel %vm520_vm0, %v456_v37, 4286644096 }
  0x2f   : > { %v472_v41 = vld [vmem:[%s1084_s23 + $0x60] sm:$0xf]  ;;  %v530_v45 = vsel %vm520_vm0, %v464_v38, 4286644096  ;;  %v528_v47 = vmax.bf16 %v526_v44, %v523_v42  ;;  %v473_v48 = vld [vmem:[%s1084_s23 + $0x64] sm:$0xf] }
  0x30   : > { %v480_v46 = vld [vmem:[%s1084_s23 + $0x80] sm:$0xf]  ;;  %v534_v49 = vsel %vm520_vm0, %v472_v41, 4286644096  ;;  %v558_v50 = vsel %vm520_vm0, %v449_v39, 4286644096 }
  0x31   : > { %v488_v51 = vld [vmem:[%s1084_s23 + $0xa0] sm:$0xf]  ;;  %v532_v52 = vmax.bf16 %v530_v45, %v528_v47  ;;  %v561_v53 = vsel %vm520_vm0, %v457_v40, 4286644096  ;;  %v565_v54 = vsel %vm520_vm0, %v465_v43, 4286644096 }
  0x32   : > { %v481_v55 = vld [vmem:[%s1084_s23 + $0x84] sm:$0xf]  ;;  %v538_v56 = vsel %vm520_vm0, %v480_v46, 4286644096  ;;  %v563_v57 = vmax.bf16 %v561_v53, %v558_v50  ;;  %v496_v58 = vld [vmem:[%s1084_s23 + $0xc0] sm:$0xf] }
  0x33   : > { %v504_v59 = vld [vmem:[%s1084_s23 + $0xe0] sm:$0xf]  ;;  %v536_v60 = vmax.bf16 %v534_v49, %v532_v52  ;;  %v569_v61 = vsel %vm520_vm0, %v473_v48, 4286644096  ;;  %v489_v62 = vld [vmem:[%s1084_s23 + $0xa4] sm:$0xf] }
  0x34   : > { %v542_v63 = vsel %vm520_vm0, %v488_v51, 4286644096  ;;  %v567_v0 = vmax.bf16 %v565_v54, %v563_v57  ;;  %v497_v1 = vld [vmem:[%s1084_s23 + $0xc4] sm:$0xf]  ;;  %v512_v2 = vld [vmem:[%s1084_s23 + $0x100] sm:$0xf] }
  0x35   : > { %v540_v3 = vmax.bf16 %v538_v56, %v536_v60  ;;  %v573_v4 = vsel %vm520_vm0, %v481_v55, 4286644096  ;;  %v505_v5 = vld [vmem:[%s1084_s23 + $0xe4] sm:$0xf]  ;;  %v546_v7 = vsel %vm520_vm0, %v496_v58, 4286644096 }
  0x36   : > { %v513_v6 = vld [vmem:[%s1084_s23 + $0x104] sm:$0xf]  ;;  %v550_v8 = vsel %vm520_vm0, %v504_v59, 4286644096  ;;  %v571_v9 = vmax.bf16 %v569_v61, %v567_v0  ;;  %v450_v10 = vld [vmem:[%s1084_s23 + $0x8] sm:$0xf] }
  0x37   : > { %v544_v11 = vmax.bf16 %v542_v63, %v540_v3  ;;  %v577_v12 = vsel %vm520_vm0, %v489_v62, 4286644096  ;;  %v458_v13 = vld [vmem:[%s1084_s23 + $0x28] sm:$0xf]  ;;  %v554_v15 = vsel %vm520_vm0, %v512_v2, 4286644096 }
  0x38   : > { %v466_v14 = vld [vmem:[%s1084_s23 + $0x48] sm:$0xf]  ;;  %v575_v16 = vmax.bf16 %v573_v4, %v571_v9  ;;  %v581_v17 = vsel %vm520_vm0, %v497_v1, 4286644096  ;;  %v451_v18 = vld [vmem:[%s1084_s23 + $0xc] sm:$0xf] }
  0x39   : > { %v548_v19 = vmax.bf16 %v546_v7, %v544_v11  ;;  %v459_v20 = vld [vmem:[%s1084_s23 + $0x2c] sm:$0xf]  ;;  %v474_v21 = vld [vmem:[%s1084_s23 + $0x68] sm:$0xf]  ;;  %v593_v22 = vsel %vm520_vm0, %v450_v10, 4286644096 }
  0x3a   : > { %v579_v23 = vmax.bf16 %v577_v12, %v575_v16  ;;  %v482_v24 = vld [vmem:[%s1084_s23 + $0x88] sm:$0xf]  ;;  %v596_v25 = vsel %vm520_vm0, %v458_v13, 4286644096  ;;  %v600_v26 = vsel %vm520_vm0, %v466_v14, 4286644096 }
  0x3b   : > { %v552_v27 = vmax.bf16 %v550_v8, %v548_v19  ;;  %v585_v28 = vsel %vm520_vm0, %v505_v5, 4286644096  ;;  %v589_v29 = vsel %vm520_vm0, %v513_v6, 4286644096  ;;  %v467_v30 = vld [vmem:[%s1084_s23 + $0x4c] sm:$0xf]  ;;  %v598_v31 = vmax.bf16 %v596_v25, %v593_v22 }
  0x3c   : > { %v583_v32 = vmax.bf16 %v581_v17, %v579_v23  ;;  %v475_v33 = vld [vmem:[%s1084_s23 + $0x6c] sm:$0xf]  ;;  %v490_v34 = vld [vmem:[%s1084_s23 + $0xa8] sm:$0xf]  ;;  %v604_v35 = vsel %vm520_vm0, %v474_v21, 4286644096 }
  0x3d   : > { %v602_v36 = vmax.bf16 %v600_v26, %v598_v31  ;;  %v608_v37 = vsel %vm520_vm0, %v482_v24, 4286644096  ;;  %v628_v38 = vsel %vm520_vm0, %v451_v18, 4286644096  ;;  %v631_v39 = vsel %vm520_vm0, %v459_v20, 4286644096 }
  0x3e   : > { %s880_s25 = sshll.u32 %s1261_s24, 2  ;;  %v556_v40 = vmax.bf16 %v554_v15, %v552_v27  ;;  %v587_v41 = vmax.bf16 %v585_v28, %v583_v32  ;;  %v483_v42 = vld [vmem:[%s1084_s23 + $0x8c] sm:$0xf]  ;;  %v633_v43 = vmax.bf16 %v631_v39, %v628_v38  ;;  %v635_v44 = vsel %vm520_vm0, %v467_v30, 4286644096 }
  0x3f   : > { %v498_v45 = vld [vmem:[%s1084_s23 + $0xc8] sm:$0xf]  ;;  %v606_v47 = vmax.bf16 %v604_v35, %v602_v36  ;;  %v639_v48 = vsel %vm520_vm0, %v475_v33, 4286644096  ;;  %v491_v50 = vld [vmem:[%s1084_s23 + $0xac] sm:$0xf]  ;;  %s1155_s28 = scalar_lea.vmem %s1256_s1, %s880_s25 }
  0x40   : > { %v506_v46 = vld [vmem:[%s1084_s23 + $0xe8] sm:$0xf]  ;;  %v591_v49 = vmax.bf16 %v589_v29, %v587_v41  ;;  %v612_v51 = vsel %vm520_vm0, %v490_v34, 4286644096  ;;  %v637_v52 = vmax.bf16 %v635_v44, %v633_v43  ;;  %v499_v53 = vld [vmem:[%s1084_s23 + $0xcc] sm:$0xf] }
  0x41   : > { %v514_v54 = vld [vmem:[%s1084_s23 + $0x108] sm:$0xf]  ;;  %v610_v55 = vmax.bf16 %v608_v37, %v606_v47  ;;  %v643_v56 = vsel %vm520_vm0, %v483_v42, 4286644096  ;;  %v507_v58 = vld [vmem:[%s1084_s23 + $0xec] sm:$0xf] }
  0x42   : > { %v904_v57 = vcombine.low %v556_v40, %v591_v49  ;;  %v515_v59 = vld [vmem:[%s1084_s23 + $0x10c] sm:$0xf]  ;;  %v616_v60 = vsel %vm520_vm0, %v498_v45, 4286644096  ;;  %v620_v61 = vsel %vm520_vm0, %v506_v46, 4286644096  ;;  %v641_v62 = vmax.bf16 %v639_v48, %v637_v52 }
  0x43   : > { %v452_v63 = vld [vmem:[%s1084_s23 + $0x10] sm:$0xf]  ;;  %v614_v0 = vmax.bf16 %v612_v51, %v610_v55  ;;  %v647_v1 = vsel %vm520_vm0, %v491_v50, 4286644096  ;;  %v624_v4 = vsel %vm520_vm0, %v514_v54, 4286644096 }
  0x44   : > { %v460_v2 = vld [vmem:[%s1084_s23 + $0x30] sm:$0xf]  ;;  %888 = vst [vmem:[%s1155_s28] sm:$0xff] %v904_v57   ;;  %v645_v5 = vmax.bf16 %v643_v56, %v641_v62  ;;  %v651_v6 = vsel %vm520_vm0, %v499_v53, 4286644096  ;;  %v453_v7 = vld [vmem:[%s1084_s23 + $0x14] sm:$0xf] }
  0x45   : > { %v468_v3 = vld [vmem:[%s1084_s23 + $0x50] sm:$0xf]  ;;  %v618_v8 = vmax.bf16 %v616_v60, %v614_v0  ;;  %v461_v9 = vld [vmem:[%s1084_s23 + $0x34] sm:$0xf]  ;;  %v663_v11 = vsel %vm520_vm0, %v452_v63, 4286644096 }
  0x46   : > { %v476_v10 = vld [vmem:[%s1084_s23 + $0x70] sm:$0xf]  ;;  %v649_v12 = vmax.bf16 %v647_v1, %v645_v5  ;;  %v666_v14 = vsel %vm520_vm0, %v460_v2, 4286644096  ;;  %v670_v15 = vsel %vm520_vm0, %v468_v3, 4286644096 }
  0x47   : > { %v484_v13 = vld [vmem:[%s1084_s23 + $0x90] sm:$0xf]  ;;  %v622_v16 = vmax.bf16 %v620_v61, %v618_v8  ;;  %v655_v17 = vsel %vm520_vm0, %v507_v58, 4286644096  ;;  %v659_v18 = vsel %vm520_vm0, %v515_v59, 4286644096  ;;  %v668_v20 = vmax.bf16 %v666_v14, %v663_v11 }
  0x48   : > { %v469_v19 = vld [vmem:[%s1084_s23 + $0x54] sm:$0xf]  ;;  %v653_v21 = vmax.bf16 %v651_v6, %v649_v12  ;;  %v492_v23 = vld [vmem:[%s1084_s23 + $0xb0] sm:$0xf]  ;;  %v674_v24 = vsel %vm520_vm0, %v476_v10, 4286644096 }
  0x49   : > { %v477_v22 = vld [vmem:[%s1084_s23 + $0x74] sm:$0xf]  ;;  %v672_v25 = vmax.bf16 %v670_v15, %v668_v20  ;;  %v678_v26 = vsel %vm520_vm0, %v484_v13, 4286644096  ;;  %v698_v27 = vsel %vm520_vm0, %v453_v7, 4286644096  ;;  %v626_v29 = vmax.bf16 %v624_v4, %v622_v16 }
  0x4a   : > { %v701_v28 = vsel %vm520_vm0, %v461_v9, 4286644096  ;;  %v657_v30 = vmax.bf16 %v655_v17, %v653_v21  ;;  %v485_v31 = vld [vmem:[%s1084_s23 + $0x94] sm:$0xf]  ;;  %v705_v33 = vsel %vm520_vm0, %v469_v19, 4286644096 }
  0x4b   : > { %v703_v32 = vmax.bf16 %v701_v28, %v698_v27  ;;  %v500_v34 = vld [vmem:[%s1084_s23 + $0xd0] sm:$0xf]  ;;  %v676_v36 = vmax.bf16 %v674_v24, %v672_v25  ;;  %v709_v37 = vsel %vm520_vm0, %v477_v22, 4286644096  ;;  %v493_v39 = vld [vmem:[%s1084_s23 + $0xb4] sm:$0xf] }
  0x4c   : > { %v508_v35 = vld [vmem:[%s1084_s23 + $0xf0] sm:$0xf]  ;;  %v661_v38 = vmax.bf16 %v659_v18, %v657_v30  ;;  %v682_v40 = vsel %vm520_vm0, %v492_v23, 4286644096  ;;  %v501_v42 = vld [vmem:[%s1084_s23 + $0xd4] sm:$0xf] }
  0x4d   : > { %v707_v41 = vmax.bf16 %v705_v33, %v703_v32  ;;  %v516_v43 = vld [vmem:[%s1084_s23 + $0x110] sm:$0xf]  ;;  %v680_v44 = vmax.bf16 %v678_v26, %v676_v36  ;;  %v713_v45 = vsel %vm520_vm0, %v485_v31, 4286644096  ;;  %v509_v47 = vld [vmem:[%s1084_s23 + $0xf4] sm:$0xf] }
  0x4e   : > { %v905_v46 = vcombine.low %v626_v29, %v661_v38  ;;  %v517_v48 = vld [vmem:[%s1084_s23 + $0x114] sm:$0xf]  ;;  %v686_v49 = vsel %vm520_vm0, %v500_v34, 4286644096  ;;  %v690_v50 = vsel %vm520_vm0, %v508_v35, 4286644096 }
  0x4f   : > { %v711_v51 = vmax.bf16 %v709_v37, %v707_v41  ;;  %v454_v52 = vld [vmem:[%s1084_s23 + $0x18] sm:$0xf]  ;;  %v684_v53 = vmax.bf16 %v682_v40, %v680_v44  ;;  %v717_v54 = vsel %vm520_vm0, %v493_v39, 4286644096  ;;  %v694_v57 = vsel %vm520_vm0, %v516_v43, 4286644096 }
  0x50   : > { %v462_v55 = vld [vmem:[%s1084_s23 + $0x38] sm:$0xf]  ;;  %906 = vst [vmem:[%s1155_s28 + $0x8] sm:$0xff] %v905_v46   ;;  %v721_v59 = vsel %vm520_vm0, %v501_v42, 4286644096 }
  0x51   : > { %v470_v56 = vld [vmem:[%s1084_s23 + $0x58] sm:$0xf]  ;;  %v715_v58 = vmax.bf16 %v713_v45, %v711_v51  ;;  %v455_v60 = vld [vmem:[%s1084_s23 + $0x1c] sm:$0xf]  ;;  %v688_v61 = vmax.bf16 %v686_v49, %v684_v53  ;;  %v733_v0 = vsel %vm520_vm0, %v454_v52, 4286644096 }
  0x52   : > { %v463_v62 = vld [vmem:[%s1084_s23 + $0x3c] sm:$0xf]  ;;  %v478_v63 = vld [vmem:[%s1084_s23 + $0x78] sm:$0xf]  ;;  %v736_v3 = vsel %vm520_vm0, %v462_v55, 4286644096 }
  0x53   : > { %v719_v1 = vmax.bf16 %v717_v54, %v715_v58  ;;  %v486_v2 = vld [vmem:[%s1084_s23 + $0x98] sm:$0xf]  ;;  %v740_v4 = vsel %vm520_vm0, %v470_v56, 4286644096  ;;  %v692_v5 = vmax.bf16 %v690_v50, %v688_v61  ;;  %v725_v6 = vsel %vm520_vm0, %v509_v47, 4286644096 }
  0x54   : > { %v729_v7 = vsel %vm520_vm0, %v517_v48, 4286644096  ;;  %v471_v8 = vld [vmem:[%s1084_s23 + $0x5c] sm:$0xf]  ;;  %v738_v9 = vmax.bf16 %v736_v3, %v733_v0  ;;  %v494_v12 = vld [vmem:[%s1084_s23 + $0xb8] sm:$0xf] }
  0x55   : > { %v723_v10 = vmax.bf16 %v721_v59, %v719_v1  ;;  %v479_v11 = vld [vmem:[%s1084_s23 + $0x7c] sm:$0xf]  ;;  %v744_v13 = vsel %vm520_vm0, %v478_v63, 4286644096  ;;  %v748_v15 = vsel %vm520_vm0, %v486_v2, 4286644096  ;;  %v696_v18 = vmax.bf16 %v694_v57, %v692_v5 }
  0x56   : > { %v742_v14 = vmax.bf16 %v740_v4, %v738_v9  ;;  %v768_v16 = vsel %vm520_vm0, %v455_v60, 4286644096  ;;  %v771_v17 = vsel %vm520_vm0, %v463_v62, 4286644096  ;;  %v487_v20 = vld [vmem:[%s1084_s23 + $0x9c] sm:$0xf] }
  0x57   : > { %v727_v19 = vmax.bf16 %v725_v6, %v723_v10  ;;  %v773_v21 = vmax.bf16 %v771_v17, %v768_v16  ;;  %v775_v22 = vsel %vm520_vm0, %v471_v8, 4286644096  ;;  %v502_v23 = vld [vmem:[%s1084_s23 + $0xd8] sm:$0xf]  ;;  %v779_v25 = vsel %vm520_vm0, %v479_v11, 4286644096 }
  0x58   : > { %v746_v24 = vmax.bf16 %v744_v13, %v742_v14  ;;  %v495_v27 = vld [vmem:[%s1084_s23 + $0xbc] sm:$0xf]  ;;  %v752_v28 = vsel %vm520_vm0, %v494_v12, 4286644096  ;;  %v510_v30 = vld [vmem:[%s1084_s23 + $0xf8] sm:$0xf] }
  0x59   : > { %v731_v26 = vmax.bf16 %v729_v7, %v727_v19  ;;  %v777_v29 = vmax.bf16 %v775_v22, %v773_v21  ;;  %v783_v32 = vsel %vm520_vm0, %v487_v20, 4286644096  ;;  %v503_v34 = vld [vmem:[%s1084_s23 + $0xdc] sm:$0xf]  ;;  %v756_v35 = vsel %vm520_vm0, %v502_v23, 4286644096 }
  0x5a   : > { %v750_v31 = vmax.bf16 %v748_v15, %v746_v24  ;;  %v787_v38 = vsel %vm520_vm0, %v495_v27, 4286644096  ;;  %v511_v39 = vld [vmem:[%s1084_s23 + $0xfc] sm:$0xf]  ;;  %v518_v40 = vld [vmem:[%s1084_s23 + $0x118] sm:$0xf] }
  0x5b   : > { %v907_v33 = vcombine.low %v696_v18, %v731_v26  ;;  %v781_v36 = vmax.bf16 %v779_v25, %v777_v29  ;;  %v760_v41 = vsel %vm520_vm0, %v510_v30, 4286644096  ;;  %v791_v44 = vsel %vm520_vm0, %v503_v34, 4286644096  ;;  %v519_v45 = vld [vmem:[%s1084_s23 + $0x11c] sm:$0xf] }
  0x5c   : > { %v754_v37 = vmax.bf16 %v752_v28, %v750_v31  ;;  %v764_v48 = vsel %vm520_vm0, %v518_v40, 4286644096  ;;  %v795_v49 = vsel %vm520_vm0, %v511_v39, 4286644096  ;;  %v799_v51 = vsel %vm520_vm0, %v519_v45, 4286644096 }
  0x5d   : > { %908 = vst [vmem:[%s1155_s28 + $0x10] sm:$0xff] %v907_v33   ;;  %v785_v42 = vmax.bf16 %v783_v32, %v781_v36 }
  0x5e   : > { %v758_v43 = vmax.bf16 %v756_v35, %v754_v37 }
  0x5f   : > { %v789_v46 = vmax.bf16 %v787_v38, %v785_v42 }
  0x60   : > { %v762_v47 = vmax.bf16 %v760_v41, %v758_v43 }
  0x61   : > { %v793_v50 = vmax.bf16 %v791_v44, %v789_v46 }
  0x62   : > { %v766_v52 = vmax.bf16 %v764_v48, %v762_v47 }
  0x63   : > { %v797_v53 = vmax.bf16 %v795_v49, %v793_v50 }
  0x65   : > { %v801_v54 = vmax.bf16 %v799_v51, %v797_v53 }
  0x67   : > { %v909_v55 = vcombine.low %v766_v52, %v801_v54 }
  0x69   : > { %910 = vst [vmem:[%s1155_s28 + $0x18] sm:$0xff] %v909_v55  }
  0x6a PF: > { %p8_p9 = scmp.ge.s32.totalorder %s988_s10, 4   ;;  %s1257_s6 = smov %s955_s7 }
  0x6b   : > { %s1258_s7 = smov %s997_s13  ;;  %s1259_s8 = smov %s988_s10 }
  0x6c   :  { %10 = sbr.rel (!%p8_p9) target bundleno = 2 (0x2), region = 100 }

// kernel: densenet121_forward.128
= control target key start
LH: loop header
LB: loop body
LE: loop exit
PB: predicated region body
PF: predicated region fallthrough
CT: control target
= control target key end

     0   :  { %s884_s21 = smov 0   ;;  %s886_s22 = smov 0   ;;  %s972_s0 = inlined_call_operand.vmem [shape: bf16[128,256], index: 0, kind: input, shape index: {}]   ;;  %s973_s1 = inlined_call_operand.vmem [shape: f32[1,128], index: 1, kind: input, shape index: {}]   ;;  %s974_s2 = inlined_call_operand.vmem [shape: f32[1,128], index: 2, kind: input, shape index: {}]   ;;  %s975_s3 = inlined_call_operand.vmem [shape: bf16[128,128], index: 3, kind: input, shape index: {}]   ;;  %s976_s4 = inlined_call_operand.vmem [shape: f32[1,128], index: 4, kind: input, shape index: {}]   ;;  %s977_s5 = inlined_call_operand.vmem [shape: f32[1,128], index: 5, kind: input, shape index: {}]   ;;  %s978_s6 = inlined_call_operand.vmem [shape: bf16[128,128], index: 6, kind: output, shape index: {}]  }
   0x1   :  { %s888_s23 = smov 0  }
   0x2 LB: > { %s655_s24 = sadd.s32 4294967295, %s847_s23   ;;  %s901_s25 = sadd.s32 1, %s847_s23   ;;  %s847_s23 = sphi %s888_s23, %s981_s23   ;;  %s843_s22 = sphi %s886_s22, %s980_s22   ;;  %s839_s21 = sphi %s884_s21, %s979_s21  }
   0x3   : > { %s20_s26 = ssub.s32 %s847_s23, %s901_s25  ;;  %s23_s27 = sadd.s32 1, %s843_s22 }
   0x4   : > { %p21_p0 = scmp.eq.s32.totalorder %s20_s26, 0  ;;  %p30_p1 = scmp.ne.s32.totalorder %s843_s22, %s839_s21 }
   0x5   : > { %p31_p2 = scmp.eq.s32.totalorder %s847_s23, 0  ;;  %p658_p4 = scmp.ge.s32.totalorder %s847_s23, 2 }
   0x6   : > { %s910_s28 = scalar_select %p21_p0, %s843_s22, %s23_s27  }
   0x7   : > { %p32_p3 = por %p31_p2, %p30_p1  ;;  %202 = sbr.rel (%p658_p4) target bundleno = 21 (0x15), region = 36 }
   0xc   : > { %205 = sbr.rel (!%p32_p3) target bundleno = 21 (0x15), region = 40  ;;  %s207_s29 = sand.u32 (%p32_p3), 1, %s843_s22  }
   0xd   : > { %s690_s30 = sshll.u32 (%p32_p3), %s847_s23, 6  ;;  %s659_s7 = sshll.u32 (%p32_p3), %s207_s29, 5 }
   0xe   : > { %s213_s10 = scalar_lea.vmem (%p32_p3), %s972_s0, %s690_s30  ;;  %s209_s11 = scalar_lea.vmem (%p32_p3), [#allocation2], %s659_s7 }
   0xf   : > { %v230_v0 = vld [vmem:[%s213_s10] sm:$0xf] (%p32_p3)  ;;  %v232_v1 = vld [vmem:[%s213_s10 + $0x8] sm:$0xf] (%p32_p3)  ;;  %v234_v2 = vld [vmem:[%s213_s10 + $0x10] sm:$0xf] (%p32_p3) }
  0x10   : > { %231 = vst [vmem:[%s209_s11] sm:$0xf] (%p32_p3), %v230_v0  ;;  %233 = vst [vmem:[%s209_s11 + $0x4] sm:$0xf] (%p32_p3), %v232_v1  ;;  %v236_v3 = vld [vmem:[%s213_s10 + $0x18] sm:$0xf] (%p32_p3) }
  0x11   : > { %v238_v4 = vld [vmem:[%s213_s10 + $0x20] sm:$0xf]  ;;  %235 = vst [vmem:[%s209_s11 + $0x8] sm:$0xf] %v234_v2  ;;  %237 = vst [vmem:[%s209_s11 + $0xc] sm:$0xf] %v236_v3 }
  0x12   : > { %239 = vst [vmem:[%s209_s11 + $0x10] sm:$0xf] %v238_v4  ;;  %v240_v5 = vld [vmem:[%s213_s10 + $0x28] sm:$0xf]  ;;  %v242_v6 = vld [vmem:[%s213_s10 + $0x30] sm:$0xf] }
  0x13   : > { %v244_v7 = vld [vmem:[%s213_s10 + $0x38] sm:$0xf]  ;;  %241 = vst [vmem:[%s209_s11 + $0x14] sm:$0xf] %v240_v5  ;;  %243 = vst [vmem:[%s209_s11 + $0x18] sm:$0xf] %v242_v6 }
  0x14   : > { %245 = vst [vmem:[%s209_s11 + $0x1c] sm:$0xf] %v244_v7 }
  0x15 PF: > { %p663_p5 = scmp.ge.s32.totalorder %s847_s23, 1  ;;  %p284_p6 = scmp.lt.s32.totalorder %s847_s23, 3 }
  0x17   : > { %p285_p7 = pnand %p663_p5, %p284_p6 }
  0x18   : > { %s291_s14 = sand.u32 (!%p285_p7), 1, %s839_s21   ;;  %s665_s16 = sshll.u32 (!%p285_p7), %s655_s24, 3 }
  0x19   : > { %288 = sbr.rel (%p285_p7) target bundleno = 271 (0x10f), region = 81  ;;  %s664_s17 = sshll.u32 (!%p285_p7), %s291_s14, 5 }
  0x1a   : > { %s293_s26 = scalar_lea.vmem (!%p285_p7), [#allocation2], %s664_s17  ;;  %p322_p8 = scmp.lt.s32.totalorder (!%p285_p7), %s665_s16, 15 }
  0x1e   : > { %v817_v8 = vld [vmem:[%s975_s3 + $0x38] sm:$0xff]   ;;  %v818_v9 = vld [vmem:[%s975_s3 + $0x30] sm:$0xff]   ;;  %v819_v10 = vld [vmem:[%s975_s3 + $0x28] sm:$0xff]   ;;  %s983_s16 = smov (!%p322_p8, %s665_s16), 15 }
  0x1f   : > { %753 = vmatprep.subr.bf16.mxu0 %v817_v8  ;;  %777 = vmatprep.subr.bf16.mxu1 %v817_v8  ;;  %v820_v11 = vld [vmem:[%s975_s3 + $0x20] sm:$0xff]   ;;  %v736_v16 = vld [vmem:[%s293_s26 + $0x10] sm:$0xff]   ;;  %v735_v20 = vld [vmem:[%s293_s26 + $0x8] sm:$0xff]   ;;  %s666_s23 = sshll.u32 %s983_s16, 2 }
  0x20   : > { %754 = vmatpush3.bf16.msra.mxu0 %v817_v8  ;;  %785 = vmatpush3.bf16.msra.mxu1 %v817_v8  ;;  %v700_v12 = vld [vmem:[%s293_s26] sm:$0xff]   ;;  %v709_v18 = vunpack.c.l.bf16 %v736_v16  ;;  %v710_v19 = vunpack.c.h.bf16 %v736_v16  ;;  %v737_v23 = vld [vmem:[%s293_s26 + $0x18] sm:$0xff]   ;;  %v705_v29 = vunpack.c.l.bf16 %v735_v20  ;;  %v706_v30 = vunpack.c.h.bf16 %v735_v20  ;;  %v822_v37 = vld [vmem:[%s975_s3 + $0x10] sm:$0xff]   ;;  %s325_s26 = scalar_lea.vmem %s978_s6, %s666_s23 }
  0x21   : > { %755 = vmatprep.subr.bf16.mxu0 %v818_v9  ;;  %778 = vmatprep.subr.bf16.mxu1 %v818_v9  ;;  %v667_v13 = vld [vmem:[%s973_s1] ss:$0 sm:$0xff]  ;;  %v701_v14 = vunpack.c.l.bf16 %v700_v12  ;;  %v702_v15 = vunpack.c.h.bf16 %v700_v12  ;;  %v821_v24 = vld [vmem:[%s975_s3 + $0x18] sm:$0xff]   ;;  %v713_v33 = vunpack.c.l.bf16 %v737_v23  ;;  %v714_v34 = vunpack.c.h.bf16 %v737_v23  ;;  %v823_v46 = vld [vmem:[%s975_s3 + $0x8] sm:$0xff]  }
  0x22   : > { %v668_v17 = vld [vmem:[%s974_s2] ss:$0 sm:$0xff]  ;;  %v355_v25 = vmul.f32 %v709_v18, %v667_v13  ;;  %v356_v26 = vmul.f32 %v710_v19, %v667_v13  ;;  %v353_v41 = vmul.f32 %v705_v29, %v667_v13  ;;  %v354_v43 = vmul.f32 %v706_v30, %v667_v13 }
  0x23   : > { %v351_v21 = vmul.f32 %v701_v14, %v667_v13  ;;  %v352_v22 = vmul.f32 %v702_v15, %v667_v13  ;;  %v357_v44 = vmul.f32 %v713_v33, %v667_v13  ;;  %v358_v45 = vmul.f32 %v714_v34, %v667_v13  ;;  %v824_v51 = vld [vmem:[%s975_s3] sm:$0xff]  }
  0x24   : > { %756 = vmatpush3.bf16.msra.mxu0 %v818_v9  ;;  %786 = vmatpush3.bf16.msra.mxu1 %v818_v9  ;;  %v370_v31 = vadd.f32 %v668_v17, %v355_v25  ;;  %v371_v32 = vadd.f32 %v668_v17, %v356_v26  ;;  %v368_v47 = vadd.f32 %v668_v17, %v353_v41  ;;  %v677_v58 = vld [vmem:[%s976_s4] ss:$0 sm:$0xff] }
  0x25   : > { %757 = vmatprep.subr.bf16.mxu0 %v819_v10  ;;  %779 = vmatprep.subr.bf16.mxu1 %v819_v10  ;;  %v366_v27 = vadd.f32 %v668_v17, %v351_v21  ;;  %v367_v28 = vadd.f32 %v668_v17, %v352_v22  ;;  %v369_v48 = vadd.f32 %v668_v17, %v354_v43  ;;  %v678_v1 = vld [vmem:[%s977_s5] ss:$0 sm:$0xff] }
  0x26   : > { %v378_v38 = vmax.f32 %v370_v31, 0.0  ;;  %v379_v39 = vmax.f32 %v371_v32, 0.0  ;;  %v372_v49 = vadd.f32 %v668_v17, %v357_v44  ;;  %v373_v50 = vadd.f32 %v668_v17, %v358_v45 }
  0x27   : > { %v374_v35 = vmax.f32 %v366_v27, 0.0  ;;  %v375_v36 = vmax.f32 %v367_v28, 0.0  ;;  %v376_v52 = vmax.f32 %v368_v47, 0.0  ;;  %v377_v53 = vmax.f32 %v369_v48, 0.0 }
  0x28   : > { %758 = vmatpush3.bf16.msra.mxu0 %v819_v10  ;;  %787 = vmatpush3.bf16.msra.mxu1 %v819_v10  ;;  %v384_v42 = vpack.c.bf16 %v379_v39, %v378_v38  ;;  %v380_v54 = vmax.f32 %v372_v49, 0.0  ;;  %v381_v55 = vmax.f32 %v373_v50, 0.0 }
  0x29   : > { %759 = vmatprep.subr.bf16.mxu0 %v820_v11  ;;  %780 = vmatprep.subr.bf16.mxu1 %v820_v11  ;;  %v382_v40 = vpack.c.bf16 %v375_v36, %v374_v35  ;;  %v383_v56 = vpack.c.bf16 %v377_v53, %v376_v52 }
  0x2a   : > { %773 = vmatprep.mubr.bf16.mxu1 %v384_v42  ;;  %v385_v57 = vpack.c.bf16 %v381_v55, %v380_v54 }
  0x2b   : > { %769 = vmatprep.mubr.bf16.mxu0 %v382_v40 }
  0x2c   : > { %760 = vmatpush3.bf16.msra.mxu0 %v820_v11  ;;  %788 = vmatpush3.bf16.msra.mxu1 %v820_v11 }
  0x2d   : > { %761 = vmatprep.subr.bf16.mxu0 %v821_v24  ;;  %781 = vmatprep.subr.bf16.mxu1 %v821_v24 }
  0x30   : > { %762 = vmatpush3.bf16.msra.mxu0 %v821_v24  ;;  %789 = vmatpush3.bf16.msra.mxu1 %v821_v24 }
  0x31   : > { %763 = vmatprep.subr.bf16.mxu0 %v822_v37  ;;  %782 = vmatprep.subr.bf16.mxu1 %v822_v37 }
  0x34   : > { %764 = vmatpush3.bf16.msra.mxu0 %v822_v37  ;;  %790 = vmatpush3.bf16.msra.mxu1 %v822_v37 }
  0x35   : > { %765 = vmatprep.subr.bf16.mxu0 %v823_v46  ;;  %783 = vmatprep.subr.bf16.mxu1 %v823_v46 }
  0x38   : > { %766 = vmatpush3.bf16.msra.mxu0 %v823_v46  ;;  %791 = vmatpush3.bf16.msra.mxu1 %v823_v46 }
  0x39   : > { %767 = vmatprep.subr.bf16.mxu0 %v824_v51  ;;  %784 = vmatprep.subr.bf16.mxu1 %v824_v51 }
  0x3c   : > { %768 = vmatpush3.bf16.msra.mxu0 %v824_v51  ;;  %792 = vmatpush3.bf16.msra.mxu1 %v824_v51 }
  0x3f   : > { %770 = vmatmul.mubr.bf16.vlgmr.msra.gmra.mxu0 %v383_v56  ;;  %774 = vmatmul.mubr.bf16.vlgmr.msra.gmra.mxu1 %v385_v57 }
  0xff   : > { %v771_v59 = vpop.f32.mrf.mxu0  ;;  %v775_v60 = vpop.f32.mrf.mxu1 }
 0x100   : > { %v524_v61 = vmul.f32 %v771_v59, %v677_v58  ;;  %v528_v62 = vmul.f32 %v775_v60, %v677_v58 }
 0x101   : > { %v484_v63 = vpop.f32.mrf.mxu0  ;;  %v500_v0 = vpop.f32.mrf.mxu1 }
 0x102   : > { %v522_v2 = vmul.f32 %v677_v58, %v484_v63  ;;  %v526_v3 = vmul.f32 %v677_v58, %v500_v0  ;;  %v539_v6 = vadd.f32 %v678_v1, %v524_v61  ;;  %v543_v7 = vadd.f32 %v678_v1, %v528_v62 }
 0x103   : > { %v772_v4 = vpop.f32.mrf.mxu0  ;;  %v776_v5 = vpop.f32.mrf.mxu1 }
 0x104   : > { %v525_v8 = vmul.f32 %v772_v4, %v677_v58  ;;  %v529_v9 = vmul.f32 %v776_v5, %v677_v58  ;;  %v537_v12 = vadd.f32 %v678_v1, %v522_v2  ;;  %v541_v13 = vadd.f32 %v678_v1, %v526_v3 }
 0x105   : > { %v487_v10 = vpop.f32.mrf.mxu0  ;;  %v503_v11 = vpop.f32.mrf.mxu1  ;;  %v547_v20 = vmax.f32 %v539_v6, 0.0  ;;  %v551_v21 = vmax.f32 %v543_v7, 0.0 }
 0x106   : > { %v523_v14 = vmul.f32 %v677_v58, %v487_v10  ;;  %v527_v15 = vmul.f32 %v677_v58, %v503_v11  ;;  %v540_v16 = vadd.f32 %v678_v1, %v525_v8  ;;  %v544_v17 = vadd.f32 %v678_v1, %v529_v9 }
 0x107   : > { %v545_v24 = vmax.f32 %v537_v12, 0.0  ;;  %v549_v25 = vmax.f32 %v541_v13, 0.0 }
 0x108   : > { %v538_v18 = vadd.f32 %v678_v1, %v523_v14  ;;  %v542_v19 = vadd.f32 %v678_v1, %v527_v15  ;;  %v548_v22 = vmax.f32 %v540_v16, 0.0  ;;  %v552_v23 = vmax.f32 %v544_v17, 0.0 }
 0x10a   : > { %v546_v26 = vmax.f32 %v538_v18, 0.0  ;;  %v550_v27 = vmax.f32 %v542_v19, 0.0  ;;  %v723_v28 = vpack.c.bf16 %v548_v22, %v547_v20  ;;  %v733_v29 = vpack.c.bf16 %v552_v23, %v551_v21 }
 0x10c   : > { %v718_v30 = vpack.c.bf16 %v546_v26, %v545_v24  ;;  %v728_v31 = vpack.c.bf16 %v550_v27, %v549_v25  ;;  %738 = vst [vmem:[%s325_s26 + $0x8] sm:$0xff] %v723_v28   ;;  %740 = vst [vmem:[%s325_s26 + $0x18] sm:$0xff] %v733_v29  }
 0x10e   : > { %719 = vst [vmem:[%s325_s26] sm:$0xff] %v718_v30   ;;  %739 = vst [vmem:[%s325_s26 + $0x10] sm:$0xff] %v728_v31  }
 0x10f PF: > { %p13_p9 = scmp.ge.s32.totalorder %s901_s25, 4   ;;  %s979_s21 = smov %s843_s22 }
 0x110   : > { %s980_s22 = smov %s910_s28  ;;  %s981_s23 = smov %s901_s25 }
 0x111   :  { %15 = sbr.rel (!%p13_p9) target bundleno = 2 (0x2), region = 120 }

// kernel: densenet121_forward.126
= control target key start
LH: loop header
LB: loop body
LE: loop exit
PB: predicated region body
PF: predicated region fallthrough
CT: control target
= control target key end

     0   :  { %s1467_s15 = smov 0   ;;  %s1662_s0 = inlined_call_operand.vmem [shape: bf16[512,256], index: 0, kind: input, shape index: {}]   ;;  %s1663_s1 = inlined_call_operand.vmem [shape: bf16[256,128], index: 1, kind: input, shape index: {}]   ;;  %s1664_s2 = inlined_call_operand.vmem [shape: f32[1,128], index: 2, kind: input, shape index: {}]   ;;  %s1665_s3 = inlined_call_operand.vmem [shape: f32[1,128], index: 3, kind: input, shape index: {}]   ;;  %s1666_s4 = inlined_call_operand.vmem [shape: bf16[512,128], index: 4, kind: output, shape index: {}]  }
   0x1 LB: > { %s1012_s16 = sadd.s32 4294967295, %s1440_s15   ;;  %p1016_p0 = scmp.ge.s32.totalorder %s1440_s15, 1  ;;  %s1440_s15 = sphi %s1467_s15, %s14_s15  }
   0x2   : > { %p164_p1 = scmp.lt.s32.totalorder %s1440_s15, 3 }
   0x4   : > { %p165_p2 = pnand %p1016_p0, %p164_p1 }
   0x5   : > { %s1017_s19 = sshll.u32 (!%p165_p2), %s1012_s16, 5 }
   0x6   : > { %168 = sbr.rel (%p165_p2) target bundleno = 310 (0x136), region = 36  ;;  %p192_p3 = scmp.lt.s32.totalorder (!%p165_p2), %s1017_s19, 63 }
   0xb   : > { %v1370_v0 = vld [vmem:[%s1663_s1 + $0x78] sm:$0xff]   ;;  %v1372_v2 = vld [vmem:[%s1663_s1 + $0x70] sm:$0xff]   ;;  %v1374_v4 = vld [vmem:[%s1663_s1 + $0x68] sm:$0xff]   ;;  %s1668_s19 = smov (!%p192_p3, %s1017_s19), 63 }
   0xc   : > { %v1371_v1 = vld [vmem:[%s1663_s1 + $0x38] sm:$0xff]   ;;  %1234 = vmatprep.subr.bf16.mxu0 %v1370_v0  ;;  %1346 = vmatprep.subr.bf16.mxu1 %v1370_v0  ;;  %v1373_v3 = vld [vmem:[%s1663_s1 + $0x30] sm:$0xff]   ;;  %v1375_v5 = vld [vmem:[%s1663_s1 + $0x28] sm:$0xff]   ;;  %s1106_s8 = sshll.u32 %s1668_s19, 3 }
   0xd   : > { %1235 = vmatpush3.bf16.msra.mxu0 %v1371_v1  ;;  %1354 = vmatpush3.bf16.msra.mxu1 %v1371_v1  ;;  %v1376_v6 = vld [vmem:[%s1663_s1 + $0x60] sm:$0xff]   ;;  %v1378_v8 = vld [vmem:[%s1663_s1 + $0x58] sm:$0xff]   ;;  %s1508_s13 = scalar_lea.vmem %s1662_s0, %s1106_s8  ;;  %v1380_v10 = vld [vmem:[%s1663_s1 + $0x50] sm:$0xff]   ;;  %s1021_s8 = sshll.u32 %s1668_s19, 2 }
   0xe   : > { %1236 = vmatprep.subr.bf16.mxu0 %v1372_v2  ;;  %1347 = vmatprep.subr.bf16.mxu1 %v1372_v2  ;;  %v1377_v7 = vld [vmem:[%s1663_s1 + $0x20] sm:$0xff]   ;;  %v1379_v9 = vld [vmem:[%s1663_s1 + $0x18] sm:$0xff]   ;;  %v1381_v13 = vld [vmem:[%s1663_s1 + $0x10] sm:$0xff]   ;;  %s1585_s11 = scalar_lea.vmem %s1666_s4, %s1021_s8 }
   0xf   : > { %v1388_v11 = vld [vmem:[%s1508_s13 + $0x4] ss:$8 sps:$4 sm:$0xff]   ;;  %v1386_v18 = vld [vmem:[%s1508_s13] ss:$8 sps:$4 sm:$0xff]   ;;  %v1392_v20 = vld [vmem:[%s1508_s13 + $0x14] ss:$8 sps:$4 sm:$0xff]  }
  0x10   : > { %v1391_v12 = vld [vmem:[%s1508_s13 + $0x84] ss:$8 sps:$4 sm:$0xff]   ;;  %557 = vmatprep.mubr.bf16.mxu0 %v1388_v11  ;;  %v1389_v19 = vld [vmem:[%s1508_s13 + $0x80] ss:$8 sps:$4 sm:$0xff]   ;;  %v1394_v21 = vld [vmem:[%s1508_s13 + $0x94] ss:$8 sps:$4 sm:$0xff]  }
  0x11   : > { %1237 = vmatpush3.bf16.msra.mxu0 %v1373_v3  ;;  %1355 = vmatpush3.bf16.msra.mxu1 %v1373_v3  ;;  %v1382_v14 = vld [vmem:[%s1663_s1 + $0x48] sm:$0xff]   ;;  %v1384_v16 = vld [vmem:[%s1663_s1 + $0x40] sm:$0xff]   ;;  %v1396_v22 = vld [vmem:[%s1508_s13 + $0x10] ss:$8 sps:$4 sm:$0xff]  }
  0x12   : > { %1238 = vmatprep.subr.bf16.mxu0 %v1374_v4  ;;  %1348 = vmatprep.subr.bf16.mxu1 %v1374_v4  ;;  %v1383_v15 = vld [vmem:[%s1663_s1 + $0x8] sm:$0xff]   ;;  %v1385_v17 = vld [vmem:[%s1663_s1] sm:$0xff]   ;;  %v1397_v23 = vld [vmem:[%s1508_s13 + $0x90] ss:$8 sps:$4 sm:$0xff]  }
  0x13   : > { %621 = vmatprep.mubr.bf16.mxu1 %v1391_v12  ;;  %v1398_v24 = vld [vmem:[%s1508_s13 + $0x24] ss:$8 sps:$4 sm:$0xff]   ;;  %v1402_v26 = vld [vmem:[%s1508_s13 + $0x20] ss:$8 sps:$4 sm:$0xff]   ;;  %v1404_v28 = vld [vmem:[%s1508_s13 + $0x34] ss:$8 sps:$4 sm:$0xff]  }
  0x14   : > { %v1400_v25 = vld [vmem:[%s1508_s13 + $0xa4] ss:$8 sps:$4 sm:$0xff]   ;;  %v1403_v27 = vld [vmem:[%s1508_s13 + $0xa0] ss:$8 sps:$4 sm:$0xff]   ;;  %v1406_v29 = vld [vmem:[%s1508_s13 + $0xb4] ss:$8 sps:$4 sm:$0xff]  }
  0x15   : > { %1239 = vmatpush3.bf16.msra.mxu0 %v1375_v5  ;;  %1356 = vmatpush3.bf16.msra.mxu1 %v1375_v5  ;;  %v1408_v30 = vld [vmem:[%s1508_s13 + $0x30] ss:$8 sps:$4 sm:$0xff]   ;;  %v1410_v32 = vld [vmem:[%s1508_s13 + $0x44] ss:$8 sps:$4 sm:$0xff]   ;;  %v1414_v34 = vld [vmem:[%s1508_s13 + $0x40] ss:$8 sps:$4 sm:$0xff]  }
  0x16   : > { %1240 = vmatprep.subr.bf16.mxu0 %v1376_v6  ;;  %1349 = vmatprep.subr.bf16.mxu1 %v1376_v6  ;;  %v1409_v31 = vld [vmem:[%s1508_s13 + $0xb0] ss:$8 sps:$4 sm:$0xff]   ;;  %v1412_v33 = vld [vmem:[%s1508_s13 + $0xc4] ss:$8 sps:$4 sm:$0xff]   ;;  %v1415_v35 = vld [vmem:[%s1508_s13 + $0xc0] ss:$8 sps:$4 sm:$0xff]  }
  0x17   : > { %v1416_v36 = vld [vmem:[%s1508_s13 + $0x54] ss:$8 sps:$4 sm:$0xff]   ;;  %v1420_v38 = vld [vmem:[%s1508_s13 + $0x50] ss:$8 sps:$4 sm:$0xff]   ;;  %v1422_v40 = vld [vmem:[%s1508_s13 + $0x64] ss:$8 sps:$4 sm:$0xff]  }
  0x18   : > { %v1418_v37 = vld [vmem:[%s1508_s13 + $0xd4] ss:$8 sps:$4 sm:$0xff]   ;;  %v1421_v39 = vld [vmem:[%s1508_s13 + $0xd0] ss:$8 sps:$4 sm:$0xff]   ;;  %v1424_v41 = vld [vmem:[%s1508_s13 + $0xe4] ss:$8 sps:$4 sm:$0xff]  }
  0x19   : > { %1241 = vmatpush3.bf16.msra.mxu0 %v1377_v7  ;;  %1357 = vmatpush3.bf16.msra.mxu1 %v1377_v7  ;;  %v1426_v42 = vld [vmem:[%s1508_s13 + $0x60] ss:$8 sps:$4 sm:$0xff]   ;;  %v1428_v44 = vld [vmem:[%s1508_s13 + $0x74] ss:$8 sps:$4 sm:$0xff]   ;;  %v1432_v46 = vld [vmem:[%s1508_s13 + $0x70] ss:$8 sps:$4 sm:$0xff]  }
  0x1a   : > { %1242 = vmatprep.subr.bf16.mxu0 %v1378_v8  ;;  %1350 = vmatprep.subr.bf16.mxu1 %v1378_v8  ;;  %v1427_v43 = vld [vmem:[%s1508_s13 + $0xe0] ss:$8 sps:$4 sm:$0xff]   ;;  %v1430_v45 = vld [vmem:[%s1508_s13 + $0xf4] ss:$8 sps:$4 sm:$0xff]   ;;  %v1433_v47 = vld [vmem:[%s1508_s13 + $0xf0] ss:$8 sps:$4 sm:$0xff]  }
  0x1b   : > { %v1566_v51 = vld [vmem:[%s1664_s2] ss:$0 sm:$0xff] }
  0x1c   : > { %v1573_v59 = vld [vmem:[%s1665_s3] ss:$0 sm:$0xff] }
  0x1d   : > { %1243 = vmatpush3.bf16.msra.mxu0 %v1379_v9  ;;  %1358 = vmatpush3.bf16.msra.mxu1 %v1379_v9 }
  0x1e   : > { %1244 = vmatprep.subr.bf16.mxu0 %v1380_v10  ;;  %1351 = vmatprep.subr.bf16.mxu1 %v1380_v10 }
  0x21   : > { %1245 = vmatpush3.bf16.msra.mxu0 %v1381_v13  ;;  %1359 = vmatpush3.bf16.msra.mxu1 %v1381_v13 }
  0x22   : > { %1246 = vmatprep.subr.bf16.mxu0 %v1382_v14  ;;  %1352 = vmatprep.subr.bf16.mxu1 %v1382_v14 }
  0x25   : > { %1247 = vmatpush3.bf16.msra.mxu0 %v1383_v15  ;;  %1360 = vmatpush3.bf16.msra.mxu1 %v1383_v15 }
  0x26   : > { %1248 = vmatprep.subr.bf16.mxu0 %v1384_v16  ;;  %1353 = vmatprep.subr.bf16.mxu1 %v1384_v16 }
  0x29   : > { %1249 = vmatpush3.bf16.msra.mxu0 %v1385_v17  ;;  %1361 = vmatpush3.bf16.msra.mxu1 %v1385_v17 }
  0x2c   : > { %558 = vmatmul.mubr.bf16.vlgmr.msra.gmra.mxu0 %v1386_v18  ;;  %622 = vmatmul.mubr.bf16.vlgmr.msra.gmra.mxu1 %v1389_v19 }
  0x2d   : > { %565 = vmatprep.mubr.bf16.mxu0 %v1392_v20  ;;  %629 = vmatprep.mubr.bf16.mxu1 %v1394_v21 }
  0x34   : > { %566 = vmatmul.mubr.bf16.gmra.mxu0 %v1396_v22  ;;  %630 = vmatmul.mubr.bf16.gmra.mxu1 %v1397_v23 }
  0x35   : > { %573 = vmatprep.mubr.bf16.mxu0 %v1398_v24  ;;  %637 = vmatprep.mubr.bf16.mxu1 %v1400_v25 }
  0x3c   : > { %574 = vmatmul.mubr.bf16.gmra.mxu0 %v1402_v26  ;;  %638 = vmatmul.mubr.bf16.gmra.mxu1 %v1403_v27 }
  0x3d   : > { %581 = vmatprep.mubr.bf16.mxu0 %v1404_v28  ;;  %645 = vmatprep.mubr.bf16.mxu1 %v1406_v29 }
  0x44   : > { %582 = vmatmul.mubr.bf16.gmra.mxu0 %v1408_v30  ;;  %646 = vmatmul.mubr.bf16.gmra.mxu1 %v1409_v31 }
  0x45   : > { %589 = vmatprep.mubr.bf16.mxu0 %v1410_v32  ;;  %653 = vmatprep.mubr.bf16.mxu1 %v1412_v33 }
  0x4c   : > { %590 = vmatmul.mubr.bf16.gmra.mxu0 %v1414_v34  ;;  %654 = vmatmul.mubr.bf16.gmra.mxu1 %v1415_v35 }
  0x4d   : > { %597 = vmatprep.mubr.bf16.mxu0 %v1416_v36  ;;  %661 = vmatprep.mubr.bf16.mxu1 %v1418_v37 }
  0x54   : > { %598 = vmatmul.mubr.bf16.gmra.mxu0 %v1420_v38  ;;  %662 = vmatmul.mubr.bf16.gmra.mxu1 %v1421_v39 }
  0x55   : > { %605 = vmatprep.mubr.bf16.mxu0 %v1422_v40  ;;  %669 = vmatprep.mubr.bf16.mxu1 %v1424_v41 }
  0x5c   : > { %606 = vmatmul.mubr.bf16.gmra.mxu0 %v1426_v42  ;;  %670 = vmatmul.mubr.bf16.gmra.mxu1 %v1427_v43 }
  0x5d   : > { %613 = vmatprep.mubr.bf16.mxu0 %v1428_v44  ;;  %677 = vmatprep.mubr.bf16.mxu1 %v1430_v45 }
  0x64   : > { %614 = vmatmul.mubr.bf16.gmra.mxu0 %v1432_v46  ;;  %678 = vmatmul.mubr.bf16.gmra.mxu1 %v1433_v47 }
  0xec   : > { %v1250_v48 = vpop.f32.mrf.mxu0  ;;  %v1298_v49 = vpop.f32.mrf.mxu1 }
  0xee   : > { %v1251_v50 = vpop.f32.mrf.mxu0  ;;  %v1299_v52 = vpop.f32.mrf.mxu1 }
  0xef   : > { %v1252_v53 = vadd.f32 %v1251_v50, %v1250_v48  ;;  %v1300_v54 = vadd.f32 %v1299_v52, %v1298_v49 }
  0xf0   : > { %v1253_v55 = vpop.f32.mrf.mxu0  ;;  %v1301_v56 = vpop.f32.mrf.mxu1 }
  0xf1   : > { %v693_v57 = vmul.f32 %v1252_v53, %v1566_v51  ;;  %v709_v58 = vmul.f32 %v1300_v54, %v1566_v51 }
  0xf2   : > { %v1254_v60 = vpop.f32.mrf.mxu0  ;;  %v1302_v61 = vpop.f32.mrf.mxu1 }
  0xf3   : > { %v1255_v62 = vadd.f32 %v1254_v60, %v1253_v55  ;;  %v1303_v63 = vadd.f32 %v1302_v61, %v1301_v56  ;;  %v732_v2 = vadd.f32 %v1573_v59, %v693_v57  ;;  %v748_v3 = vadd.f32 %v1573_v59, %v709_v58 }
  0xf4   : > { %v1256_v0 = vpop.f32.mrf.mxu0  ;;  %v1304_v1 = vpop.f32.mrf.mxu1 }
  0xf5   : > { %v694_v4 = vmul.f32 %v1255_v62, %v1566_v51  ;;  %v710_v5 = vmul.f32 %v1303_v63, %v1566_v51  ;;  %v764_v14 = vmax.f32 %v732_v2, 0.0  ;;  %v780_v15 = vmax.f32 %v748_v3, 0.0 }
  0xf6   : > { %v1257_v6 = vpop.f32.mrf.mxu0  ;;  %v1305_v7 = vpop.f32.mrf.mxu1 }
  0xf7   : > { %v733_v8 = vadd.f32 %v1573_v59, %v694_v4  ;;  %v749_v9 = vadd.f32 %v1573_v59, %v710_v5  ;;  %v1258_v10 = vadd.f32 %v1257_v6, %v1256_v0  ;;  %v1306_v11 = vadd.f32 %v1305_v7, %v1304_v1 }
  0xf8   : > { %v1259_v12 = vpop.f32.mrf.mxu0  ;;  %v1307_v13 = vpop.f32.mrf.mxu1 }
  0xf9   : > { %v765_v16 = vmax.f32 %v733_v8, 0.0  ;;  %v781_v17 = vmax.f32 %v749_v9, 0.0  ;;  %v695_v18 = vmul.f32 %v1258_v10, %v1566_v51  ;;  %v711_v19 = vmul.f32 %v1306_v11, %v1566_v51 }
  0xfa   : > { %v1260_v20 = vpop.f32.mrf.mxu0  ;;  %v1308_v21 = vpop.f32.mrf.mxu1 }
  0xfb   : > { %v1142_v22 = vpack.c.bf16 %v765_v16, %v764_v14  ;;  %v1182_v23 = vpack.c.bf16 %v781_v17, %v780_v15  ;;  %v1261_v24 = vadd.f32 %v1260_v20, %v1259_v12  ;;  %v1309_v25 = vadd.f32 %v1308_v21, %v1307_v13 }
  0xfc   : > { %v1262_v26 = vpop.f32.mrf.mxu0  ;;  %v1310_v27 = vpop.f32.mrf.mxu1  ;;  %v734_v28 = vadd.f32 %v1573_v59, %v695_v18  ;;  %v750_v29 = vadd.f32 %v1573_v59, %v711_v19 }
  0xfd   : > { %1143 = vst [vmem:[%s1585_s11] sm:$0xff] %v1142_v22   ;;  %1226 = vst [vmem:[%s1585_s11 + $0x40] sm:$0xff] %v1182_v23   ;;  %v696_v30 = vmul.f32 %v1261_v24, %v1566_v51  ;;  %v712_v31 = vmul.f32 %v1309_v25, %v1566_v51 }
  0xfe   : > { %v1263_v32 = vpop.f32.mrf.mxu0  ;;  %v1311_v33 = vpop.f32.mrf.mxu1  ;;  %v766_v42 = vmax.f32 %v734_v28, 0.0  ;;  %v782_v43 = vmax.f32 %v750_v29, 0.0 }
  0xff   : > { %v1264_v34 = vadd.f32 %v1263_v32, %v1262_v26  ;;  %v1312_v35 = vadd.f32 %v1311_v33, %v1310_v27  ;;  %v735_v36 = vadd.f32 %v1573_v59, %v696_v30  ;;  %v751_v37 = vadd.f32 %v1573_v59, %v712_v31 }
 0x100   : > { %v1265_v38 = vpop.f32.mrf.mxu0  ;;  %v1313_v39 = vpop.f32.mrf.mxu1 }
 0x101   : > { %v697_v40 = vmul.f32 %v1264_v34, %v1566_v51  ;;  %v713_v41 = vmul.f32 %v1312_v35, %v1566_v51  ;;  %v767_v44 = vmax.f32 %v735_v36, 0.0  ;;  %v783_v45 = vmax.f32 %v751_v37, 0.0 }
 0x102   : > { %v1266_v46 = vpop.f32.mrf.mxu0  ;;  %v1314_v47 = vpop.f32.mrf.mxu1 }
 0x103   : > { %v1267_v48 = vadd.f32 %v1266_v46, %v1265_v38  ;;  %v1315_v49 = vadd.f32 %v1314_v47, %v1313_v39  ;;  %v1147_v50 = vpack.c.bf16 %v767_v44, %v766_v42  ;;  %v1187_v52 = vpack.c.bf16 %v783_v45, %v782_v43 }
 0x104   : > { %v1268_v53 = vpop.f32.mrf.mxu0  ;;  %v1316_v54 = vpop.f32.mrf.mxu1  ;;  %v736_v55 = vadd.f32 %v1573_v59, %v697_v40  ;;  %v752_v56 = vadd.f32 %v1573_v59, %v713_v41 }
 0x105   : > { %v698_v57 = vmul.f32 %v1267_v48, %v1566_v51  ;;  %v714_v58 = vmul.f32 %v1315_v49, %v1566_v51  ;;  %1219 = vst [vmem:[%s1585_s11 + $0x8] sm:$0xff] %v1147_v50   ;;  %1227 = vst [vmem:[%s1585_s11 + $0x48] sm:$0xff] %v1187_v52  }
 0x106   : > { %v1269_v60 = vpop.f32.mrf.mxu0  ;;  %v1317_v61 = vpop.f32.mrf.mxu1  ;;  %v768_v4 = vmax.f32 %v736_v55, 0.0  ;;  %v784_v5 = vmax.f32 %v752_v56, 0.0 }
 0x107   : > { %v737_v62 = vadd.f32 %v1573_v59, %v698_v57  ;;  %v753_v63 = vadd.f32 %v1573_v59, %v714_v58  ;;  %v1270_v0 = vadd.f32 %v1269_v60, %v1268_v53  ;;  %v1318_v1 = vadd.f32 %v1317_v61, %v1316_v54 }
 0x108   : > { %v1271_v2 = vpop.f32.mrf.mxu0  ;;  %v1319_v3 = vpop.f32.mrf.mxu1 }
 0x109   : > { %v769_v6 = vmax.f32 %v737_v62, 0.0  ;;  %v785_v7 = vmax.f32 %v753_v63, 0.0  ;;  %v699_v8 = vmul.f32 %v1270_v0, %v1566_v51  ;;  %v715_v9 = vmul.f32 %v1318_v1, %v1566_v51 }
 0x10a   : > { %v1272_v10 = vpop.f32.mrf.mxu0  ;;  %v1320_v11 = vpop.f32.mrf.mxu1 }
 0x10b   : > { %v1152_v12 = vpack.c.bf16 %v769_v6, %v768_v4  ;;  %v1192_v13 = vpack.c.bf16 %v785_v7, %v784_v5  ;;  %v1273_v14 = vadd.f32 %v1272_v10, %v1271_v2  ;;  %v1321_v15 = vadd.f32 %v1320_v11, %v1319_v3 }
 0x10c   : > { %v1274_v16 = vpop.f32.mrf.mxu0  ;;  %v1322_v17 = vpop.f32.mrf.mxu1  ;;  %v738_v18 = vadd.f32 %v1573_v59, %v699_v8  ;;  %v754_v19 = vadd.f32 %v1573_v59, %v715_v9 }
 0x10d   : > { %1220 = vst [vmem:[%s1585_s11 + $0x10] sm:$0xff] %v1152_v12   ;;  %1228 = vst [vmem:[%s1585_s11 + $0x50] sm:$0xff] %v1192_v13   ;;  %v700_v20 = vmul.f32 %v1273_v14, %v1566_v51  ;;  %v716_v21 = vmul.f32 %v1321_v15, %v1566_v51 }
 0x10e   : > { %v1275_v22 = vpop.f32.mrf.mxu0  ;;  %v1323_v23 = vpop.f32.mrf.mxu1  ;;  %v770_v32 = vmax.f32 %v738_v18, 0.0  ;;  %v786_v33 = vmax.f32 %v754_v19, 0.0 }
 0x10f   : > { %v1276_v24 = vadd.f32 %v1275_v22, %v1274_v16  ;;  %v1324_v25 = vadd.f32 %v1323_v23, %v1322_v17  ;;  %v739_v26 = vadd.f32 %v1573_v59, %v700_v20  ;;  %v755_v27 = vadd.f32 %v1573_v59, %v716_v21 }
 0x110   : > { %v1277_v28 = vpop.f32.mrf.mxu0  ;;  %v1325_v29 = vpop.f32.mrf.mxu1 }
 0x111   : > { %v701_v30 = vmul.f32 %v1276_v24, %v1566_v51  ;;  %v717_v31 = vmul.f32 %v1324_v25, %v1566_v51  ;;  %v771_v34 = vmax.f32 %v739_v26, 0.0  ;;  %v787_v35 = vmax.f32 %v755_v27, 0.0 }
 0x112   : > { %v1278_v36 = vpop.f32.mrf.mxu0  ;;  %v1326_v37 = vpop.f32.mrf.mxu1 }
 0x113   : > { %v1279_v38 = vadd.f32 %v1278_v36, %v1277_v28  ;;  %v1327_v39 = vadd.f32 %v1326_v37, %v1325_v29  ;;  %v1157_v40 = vpack.c.bf16 %v771_v34, %v770_v32  ;;  %v1197_v41 = vpack.c.bf16 %v787_v35, %v786_v33 }
 0x114   : > { %v1280_v42 = vpop.f32.mrf.mxu0  ;;  %v1328_v43 = vpop.f32.mrf.mxu1  ;;  %v740_v44 = vadd.f32 %v1573_v59, %v701_v30  ;;  %v756_v45 = vadd.f32 %v1573_v59, %v717_v31 }
 0x115   : > { %v702_v46 = vmul.f32 %v1279_v38, %v1566_v51  ;;  %v718_v47 = vmul.f32 %v1327_v39, %v1566_v51  ;;  %1221 = vst [vmem:[%s1585_s11 + $0x18] sm:$0xff] %v1157_v40   ;;  %1229 = vst [vmem:[%s1585_s11 + $0x58] sm:$0xff] %v1197_v41  }
 0x116   : > { %v1281_v48 = vpop.f32.mrf.mxu0  ;;  %v1329_v49 = vpop.f32.mrf.mxu1  ;;  %v772_v57 = vmax.f32 %v740_v44, 0.0  ;;  %v788_v58 = vmax.f32 %v756_v45, 0.0 }
 0x117   : > { %v741_v50 = vadd.f32 %v1573_v59, %v702_v46  ;;  %v757_v52 = vadd.f32 %v1573_v59, %v718_v47  ;;  %v1282_v53 = vadd.f32 %v1281_v48, %v1280_v42  ;;  %v1330_v54 = vadd.f32 %v1329_v49, %v1328_v43 }
 0x118   : > { %v1283_v55 = vpop.f32.mrf.mxu0  ;;  %v1331_v56 = vpop.f32.mrf.mxu1 }
 0x119   : > { %v773_v60 = vmax.f32 %v741_v50, 0.0  ;;  %v789_v61 = vmax.f32 %v757_v52, 0.0  ;;  %v703_v62 = vmul.f32 %v1282_v53, %v1566_v51  ;;  %v719_v63 = vmul.f32 %v1330_v54, %v1566_v51 }
 0x11a   : > { %v1284_v0 = vpop.f32.mrf.mxu0  ;;  %v1332_v1 = vpop.f32.mrf.mxu1 }
 0x11b   : > { %v1162_v2 = vpack.c.bf16 %v773_v60, %v772_v57  ;;  %v1202_v3 = vpack.c.bf16 %v789_v61, %v788_v58  ;;  %v1285_v4 = vadd.f32 %v1284_v0, %v1283_v55  ;;  %v1333_v5 = vadd.f32 %v1332_v1, %v1331_v56 }
 0x11c   : > { %v1286_v6 = vpop.f32.mrf.mxu0  ;;  %v1334_v7 = vpop.f32.mrf.mxu1  ;;  %v742_v8 = vadd.f32 %v1573_v59, %v703_v62  ;;  %v758_v9 = vadd.f32 %v1573_v59, %v719_v63 }
 0x11d   : > { %1222 = vst [vmem:[%s1585_s11 + $0x20] sm:$0xff] %v1162_v2   ;;  %1230 = vst [vmem:[%s1585_s11 + $0x60] sm:$0xff] %v1202_v3   ;;  %v704_v10 = vmul.f32 %v1285_v4, %v1566_v51  ;;  %v720_v11 = vmul.f32 %v1333_v5, %v1566_v51 }
 0x11e   : > { %v1287_v12 = vpop.f32.mrf.mxu0  ;;  %v1335_v13 = vpop.f32.mrf.mxu1  ;;  %v774_v22 = vmax.f32 %v742_v8, 0.0  ;;  %v790_v23 = vmax.f32 %v758_v9, 0.0 }
 0x11f   : > { %v1288_v14 = vadd.f32 %v1287_v12, %v1286_v6  ;;  %v1336_v15 = vadd.f32 %v1335_v13, %v1334_v7  ;;  %v743_v16 = vadd.f32 %v1573_v59, %v704_v10  ;;  %v759_v17 = vadd.f32 %v1573_v59, %v720_v11 }
 0x120   : > { %v1289_v18 = vpop.f32.mrf.mxu0  ;;  %v1337_v19 = vpop.f32.mrf.mxu1 }
 0x121   : > { %v705_v20 = vmul.f32 %v1288_v14, %v1566_v51  ;;  %v721_v21 = vmul.f32 %v1336_v15, %v1566_v51  ;;  %v775_v24 = vmax.f32 %v743_v16, 0.0  ;;  %v791_v25 = vmax.f32 %v759_v17, 0.0 }
 0x122   : > { %v1290_v26 = vpop.f32.mrf.mxu0  ;;  %v1338_v27 = vpop.f32.mrf.mxu1 }
 0x123   : > { %v1291_v28 = vadd.f32 %v1290_v26, %v1289_v18  ;;  %v1339_v29 = vadd.f32 %v1338_v27, %v1337_v19  ;;  %v1167_v30 = vpack.c.bf16 %v775_v24, %v774_v22  ;;  %v1207_v31 = vpack.c.bf16 %v791_v25, %v790_v23 }
 0x124   : > { %v1292_v32 = vpop.f32.mrf.mxu0  ;;  %v1340_v33 = vpop.f32.mrf.mxu1  ;;  %v744_v34 = vadd.f32 %v1573_v59, %v705_v20  ;;  %v760_v35 = vadd.f32 %v1573_v59, %v721_v21 }
 0x125   : > { %v706_v36 = vmul.f32 %v1291_v28, %v1566_v51  ;;  %v722_v37 = vmul.f32 %v1339_v29, %v1566_v51  ;;  %1223 = vst [vmem:[%s1585_s11 + $0x28] sm:$0xff] %v1167_v30   ;;  %1231 = vst [vmem:[%s1585_s11 + $0x68] sm:$0xff] %v1207_v31  }
 0x126   : > { %v1293_v38 = vpop.f32.mrf.mxu0  ;;  %v1341_v39 = vpop.f32.mrf.mxu1  ;;  %v776_v46 = vmax.f32 %v744_v34, 0.0  ;;  %v792_v47 = vmax.f32 %v760_v35, 0.0 }
 0x127   : > { %v745_v40 = vadd.f32 %v1573_v59, %v706_v36  ;;  %v761_v41 = vadd.f32 %v1573_v59, %v722_v37  ;;  %v1294_v42 = vadd.f32 %v1293_v38, %v1292_v32  ;;  %v1342_v43 = vadd.f32 %v1341_v39, %v1340_v33 }
 0x128   : > { %v1295_v44 = vpop.f32.mrf.mxu0  ;;  %v1343_v45 = vpop.f32.mrf.mxu1 }
 0x129   : > { %v777_v48 = vmax.f32 %v745_v40, 0.0  ;;  %v793_v49 = vmax.f32 %v761_v41, 0.0  ;;  %v707_v50 = vmul.f32 %v1294_v42, %v1566_v51  ;;  %v723_v52 = vmul.f32 %v1342_v43, %v1566_v51 }
 0x12a   : > { %v1296_v53 = vpop.f32.mrf.mxu0  ;;  %v1344_v54 = vpop.f32.mrf.mxu1 }
 0x12b   : > { %v1172_v55 = vpack.c.bf16 %v777_v48, %v776_v46  ;;  %v1212_v56 = vpack.c.bf16 %v793_v49, %v792_v47  ;;  %v1297_v57 = vadd.f32 %v1296_v53, %v1295_v44  ;;  %v1345_v58 = vadd.f32 %v1344_v54, %v1343_v45 }
 0x12c   : > { %v746_v60 = vadd.f32 %v1573_v59, %v707_v50  ;;  %v762_v61 = vadd.f32 %v1573_v59, %v723_v52 }
 0x12d   : > { %1224 = vst [vmem:[%s1585_s11 + $0x30] sm:$0xff] %v1172_v55   ;;  %1232 = vst [vmem:[%s1585_s11 + $0x70] sm:$0xff] %v1212_v56   ;;  %v708_v62 = vmul.f32 %v1297_v57, %v1566_v51  ;;  %v724_v63 = vmul.f32 %v1345_v58, %v1566_v51 }
 0x12e   : > { %v778_v2 = vmax.f32 %v746_v60, 0.0  ;;  %v794_v3 = vmax.f32 %v762_v61, 0.0 }
 0x12f   : > { %v747_v0 = vadd.f32 %v1573_v59, %v708_v62  ;;  %v763_v1 = vadd.f32 %v1573_v59, %v724_v63 }
 0x131   : > { %v779_v4 = vmax.f32 %v747_v0, 0.0  ;;  %v795_v5 = vmax.f32 %v763_v1, 0.0 }
 0x133   : > { %v1177_v6 = vpack.c.bf16 %v779_v4, %v778_v2  ;;  %v1217_v7 = vpack.c.bf16 %v795_v5, %v794_v3 }
 0x135   : > { %1225 = vst [vmem:[%s1585_s11 + $0x38] sm:$0xff] %v1177_v6   ;;  %1233 = vst [vmem:[%s1585_s11 + $0x78] sm:$0xff] %v1217_v7  }
 0x136 PF: > { %s14_s15 = sadd.s32 1, %s1440_s15  }
 0x137   : > { %p11_p4 = scmp.ge.s32.totalorder %s14_s15, 4  }
 0x139   :  { %13 = sbr.rel (!%p11_p4) target bundleno = 1 (0x1), region = 66 }

// kernel: densenet121_forward.129
= control target key start
LH: loop header
LB: loop body
LE: loop exit
PB: predicated region body
PF: predicated region fallthrough
CT: control target
= control target key end

     0   :  { %s1898_s9 = smov 0   ;;  %s2226_s0 = inlined_call_operand.vmem [shape: bf16[128,1152], index: 0, kind: input, shape index: {}]   ;;  %s2227_s1 = inlined_call_operand.vmem [shape: bf16[1152,128], index: 1, kind: input, shape index: {}]   ;;  %s2228_s2 = inlined_call_operand.vmem [shape: bf16[128,128], index: 2, kind: output, shape index: {}]  }
   0x1 LB: > { %s1372_s10 = sadd.s32 4294967295, %s1881_s9   ;;  %p1376_p0 = scmp.ge.s32.totalorder %s1881_s9, 1  ;;  %s1881_s9 = sphi %s1898_s9, %s12_s9  }
   0x2   : > { %p114_p1 = scmp.lt.s32.totalorder %s1881_s9, 3 }
   0x4   : > { %p115_p2 = pnand %p1376_p0, %p114_p1 }
   0x6   : > { %118 = sbr.rel (%p115_p2) target bundleno = 315 (0x13b), region = 28 }
   0xb   : > { %v1751_v0 = vld [vmem:[%s2227_s1 + $0x78] sm:$0xff]   ;;  %v1755_v4 = vld [vmem:[%s2227_s1 + $0x70] sm:$0xff]   ;;  %v1759_v8 = vld [vmem:[%s2227_s1 + $0x68] sm:$0xff]   ;;  %s1377_s15 = sshll.u32 %s1372_s10, 3 }
   0xc   : > { %v1752_v1 = vld [vmem:[%s2227_s1 + $0xf8] sm:$0xff]   ;;  %1530 = vmatprep.subr.bf16.mxu0 %v1751_v0  ;;  %v1756_v5 = vld [vmem:[%s2227_s1 + $0xf0] sm:$0xff]   ;;  %v1760_v9 = vld [vmem:[%s2227_s1 + $0xe8] sm:$0xff]   ;;  %p138_p3 = scmp.lt.s32.totalorder %s1377_s15, 15 }
   0xd   : > { %v1753_v2 = vld [vmem:[%s2227_s1 + $0x38] sm:$0xff]   ;;  %1570 = vmatprep.subr.bf16.mxu1 %v1752_v1  ;;  %v1757_v6 = vld [vmem:[%s2227_s1 + $0x30] sm:$0xff]   ;;  %v1761_v10 = vld [vmem:[%s2227_s1 + $0x28] sm:$0xff]  }
   0xe   : > { %v1754_v3 = vld [vmem:[%s2227_s1 + $0xb8] sm:$0xff]   ;;  %1531 = vmatpush3.bf16.msra.mxu0 %v1753_v2  ;;  %v1758_v7 = vld [vmem:[%s2227_s1 + $0xb0] sm:$0xff]   ;;  %v1762_v11 = vld [vmem:[%s2227_s1 + $0xa8] sm:$0xff]   ;;  %s2240_s15 = smov (!%p138_p3, %s1377_s15), 15 }
   0xf   : > { %1571 = vmatpush3.bf16.msra.mxu1 %v1754_v3  ;;  %1532 = vmatprep.subr.bf16.mxu0 %v1755_v4  ;;  %v1763_v12 = vld [vmem:[%s2227_s1 + $0x60] sm:$0xff]   ;;  %v1767_v16 = vld [vmem:[%s2227_s1 + $0x58] sm:$0xff]   ;;  %v1771_v20 = vld [vmem:[%s2227_s1 + $0x50] sm:$0xff]   ;;  %s1742_s11 = smul.u32 36, %s2240_s15 }
  0x10   : > { %1572 = vmatprep.subr.bf16.mxu1 %v1756_v5  ;;  %v1764_v13 = vld [vmem:[%s2227_s1 + $0xe0] sm:$0xff]   ;;  %v1768_v17 = vld [vmem:[%s2227_s1 + $0xd8] sm:$0xff]   ;;  %v1772_v21 = vld [vmem:[%s2227_s1 + $0xd0] sm:$0xff]  }
  0x11   : > { %v1765_v14 = vld [vmem:[%s2227_s1 + $0x20] sm:$0xff]   ;;  %v1769_v18 = vld [vmem:[%s2227_s1 + $0x18] sm:$0xff]   ;;  %v1773_v22 = vld [vmem:[%s2227_s1 + $0x10] sm:$0xff]   ;;  %s2004_s23 = scalar_lea.vmem %s2226_s0, %s1742_s11 }
  0x12   : > { %1533 = vmatpush3.bf16.msra.mxu0 %v1757_v6  ;;  %v1766_v15 = vld [vmem:[%s2227_s1 + $0xa0] sm:$0xff]   ;;  %v1770_v19 = vld [vmem:[%s2227_s1 + $0x98] sm:$0xff]   ;;  %v1774_v23 = vld [vmem:[%s2227_s1 + $0x90] sm:$0xff]  }
  0x13   : > { %1573 = vmatpush3.bf16.msra.mxu1 %v1758_v7  ;;  %1534 = vmatprep.subr.bf16.mxu0 %v1759_v8  ;;  %v1775_v24 = vld [vmem:[%s2227_s1 + $0x48] sm:$0xff]   ;;  %v1779_v28 = vld [vmem:[%s2227_s1 + $0x40] sm:$0xff]   ;;  %v1789_v36 = vld [vmem:[%s2227_s1 + $0x178] sm:$0xff]  }
  0x14   : > { %1574 = vmatprep.subr.bf16.mxu1 %v1760_v9  ;;  %v1776_v25 = vld [vmem:[%s2227_s1 + $0xc8] sm:$0xff]   ;;  %v1780_v29 = vld [vmem:[%s2227_s1 + $0xc0] sm:$0xff]   ;;  %v1790_v37 = vld [vmem:[%s2227_s1 + $0x1f8] sm:$0xff]  }
  0x15   : > { %v1777_v26 = vld [vmem:[%s2227_s1 + $0x8] sm:$0xff]   ;;  %v1781_v30 = vld [vmem:[%s2227_s1] sm:$0xff]   ;;  %v1791_v38 = vld [vmem:[%s2227_s1 + $0x138] sm:$0xff]  }
  0x16   : > { %1535 = vmatpush3.bf16.msra.mxu0 %v1761_v10  ;;  %v1778_v27 = vld [vmem:[%s2227_s1 + $0x88] sm:$0xff]   ;;  %v1782_v31 = vld [vmem:[%s2227_s1 + $0x80] sm:$0xff]   ;;  %v1792_v39 = vld [vmem:[%s2227_s1 + $0x1b8] sm:$0xff]  }
  0x17   : > { %1575 = vmatpush3.bf16.msra.mxu1 %v1762_v11  ;;  %1536 = vmatprep.subr.bf16.mxu0 %v1763_v12  ;;  %v1783_v32 = vld [vmem:[%s2004_s23] ss:$36 sps:$4 sm:$0xff]   ;;  %v1786_v34 = vld [vmem:[%s2004_s23 + $0x8] ss:$36 sps:$4 sm:$0xff]   ;;  %v1793_v40 = vld [vmem:[%s2227_s1 + $0x170] sm:$0xff]  }
  0x18   : > { %1576 = vmatprep.subr.bf16.mxu1 %v1764_v13  ;;  %v1785_v33 = vld [vmem:[%s2004_s23 + $0x4] ss:$36 sps:$4 sm:$0xff]   ;;  %v1788_v35 = vld [vmem:[%s2004_s23 + $0xc] ss:$36 sps:$4 sm:$0xff]   ;;  %v1799_v45 = vld [vmem:[%s2004_s23 + $0x54] ss:$36 sps:$4 sm:$0xff]  }
  0x19   : > { %983 = vmatprep.mubr.bf16.mxu0 %v1785_v33  ;;  %1048 = vmatprep.mubr.bf16.mxu1 %v1788_v35  ;;  %v1794_v41 = vld [vmem:[%s2227_s1 + $0x1f0] sm:$0xff]   ;;  %v1801_v46 = vld [vmem:[%s2004_s23 + $0x48] ss:$36 sps:$4 sm:$0xff]   ;;  %v1807_v52 = vld [vmem:[%s2227_s1 + $0x160] sm:$0xff]  }
  0x1a   : > { %1537 = vmatpush3.bf16.msra.mxu0 %v1765_v14  ;;  %v1795_v42 = vld [vmem:[%s2227_s1 + $0x130] sm:$0xff]   ;;  %v1803_v48 = vld [vmem:[%s2227_s1 + $0x168] sm:$0xff]   ;;  %v1808_v53 = vld [vmem:[%s2227_s1 + $0x1e0] sm:$0xff]  }
  0x1b   : > { %1577 = vmatpush3.bf16.msra.mxu1 %v1766_v15  ;;  %1538 = vmatprep.subr.bf16.mxu0 %v1767_v16  ;;  %v1796_v43 = vld [vmem:[%s2227_s1 + $0x1b0] sm:$0xff]   ;;  %v1804_v49 = vld [vmem:[%s2227_s1 + $0x1e8] sm:$0xff]   ;;  %v1809_v54 = vld [vmem:[%s2227_s1 + $0x120] sm:$0xff]  }
  0x1c   : > { %1578 = vmatprep.subr.bf16.mxu1 %v1768_v17  ;;  %v1797_v44 = vld [vmem:[%s2004_s23 + $0x4c] ss:$36 sps:$4 sm:$0xff]   ;;  %v1810_v55 = vld [vmem:[%s2227_s1 + $0x1a0] sm:$0xff]   ;;  %v1811_v56 = vld [vmem:[%s2004_s23 + $0x94] ss:$36 sps:$4 sm:$0xff]  }
  0x1d   : > { %v1802_v47 = vld [vmem:[%s2004_s23 + $0x50] ss:$36 sps:$4 sm:$0xff]   ;;  %v1805_v50 = vld [vmem:[%s2227_s1 + $0x128] sm:$0xff]   ;;  %v1813_v57 = vld [vmem:[%s2004_s23 + $0x9c] ss:$36 sps:$4 sm:$0xff]  }
  0x1e   : > { %1539 = vmatpush3.bf16.msra.mxu0 %v1769_v18  ;;  %v1806_v51 = vld [vmem:[%s2227_s1 + $0x1a8] sm:$0xff]   ;;  %v1815_v58 = vld [vmem:[%s2004_s23 + $0x90] ss:$36 sps:$4 sm:$0xff]   ;;  %v1816_v59 = vld [vmem:[%s2004_s23 + $0x98] ss:$36 sps:$4 sm:$0xff]  }
  0x1f   : > { %1579 = vmatpush3.bf16.msra.mxu1 %v1770_v19  ;;  %1540 = vmatprep.subr.bf16.mxu0 %v1771_v20  ;;  %v1817_v60 = vld [vmem:[%s2227_s1 + $0x158] sm:$0xff]   ;;  %v1821_v0 = vld [vmem:[%s2227_s1 + $0x150] sm:$0xff]   ;;  %v1827_v5 = vld [vmem:[%s2004_s23 + $0xe4] ss:$36 sps:$4 sm:$0xff]  }
  0x20   : > { %1580 = vmatprep.subr.bf16.mxu1 %v1772_v21  ;;  %v1818_v61 = vld [vmem:[%s2227_s1 + $0x1d8] sm:$0xff]   ;;  %v1822_v1 = vld [vmem:[%s2227_s1 + $0x1d0] sm:$0xff]   ;;  %v1830_v7 = vld [vmem:[%s2004_s23 + $0xe0] ss:$36 sps:$4 sm:$0xff]  }
  0x21   : > { %v1819_v62 = vld [vmem:[%s2227_s1 + $0x118] sm:$0xff]   ;;  %v1823_v2 = vld [vmem:[%s2227_s1 + $0x110] sm:$0xff]   ;;  %v1831_v8 = vld [vmem:[%s2227_s1 + $0x148] sm:$0xff]  }
  0x22   : > { %1541 = vmatpush3.bf16.msra.mxu0 %v1773_v22  ;;  %v1820_v63 = vld [vmem:[%s2227_s1 + $0x198] sm:$0xff]   ;;  %v1824_v3 = vld [vmem:[%s2227_s1 + $0x190] sm:$0xff]   ;;  %v1832_v9 = vld [vmem:[%s2227_s1 + $0x1c8] sm:$0xff]  }
  0x23   : > { %1581 = vmatpush3.bf16.msra.mxu1 %v1774_v23  ;;  %1542 = vmatprep.subr.bf16.mxu0 %v1775_v24  ;;  %v1825_v4 = vld [vmem:[%s2004_s23 + $0xdc] ss:$36 sps:$4 sm:$0xff]   ;;  %v1833_v10 = vld [vmem:[%s2227_s1 + $0x108] sm:$0xff]   ;;  %v1839_v16 = vld [vmem:[%s2004_s23 + $0x10] ss:$36 sps:$4 sm:$0xff]  }
  0x24   : > { %1582 = vmatprep.subr.bf16.mxu1 %v1776_v25  ;;  %v1829_v6 = vld [vmem:[%s2004_s23 + $0xd8] ss:$36 sps:$4 sm:$0xff]   ;;  %v1834_v11 = vld [vmem:[%s2227_s1 + $0x188] sm:$0xff]   ;;  %v1835_v12 = vld [vmem:[%s2227_s1 + $0x140] sm:$0xff]  }
  0x25   : > { %v1836_v13 = vld [vmem:[%s2227_s1 + $0x1c0] sm:$0xff]   ;;  %v1841_v17 = vld [vmem:[%s2004_s23 + $0x14] ss:$36 sps:$4 sm:$0xff]   ;;  %v1863_v33 = vld [vmem:[%s2004_s23 + $0xec] ss:$36 sps:$4 sm:$0xff]  }
  0x26   : > { %1543 = vmatpush3.bf16.msra.mxu0 %v1777_v26  ;;  %v1837_v14 = vld [vmem:[%s2227_s1 + $0x100] sm:$0xff]   ;;  %v1842_v18 = vld [vmem:[%s2004_s23 + $0x18] ss:$36 sps:$4 sm:$0xff]   ;;  %v1846_v21 = vld [vmem:[%s2227_s1 + $0x230] sm:$0xff]  }
  0x27   : > { %1583 = vmatpush3.bf16.msra.mxu1 %v1778_v27  ;;  %1544 = vmatprep.subr.bf16.mxu0 %v1779_v28  ;;  %v1838_v15 = vld [vmem:[%s2227_s1 + $0x180] sm:$0xff]   ;;  %v1845_v20 = vld [vmem:[%s2227_s1 + $0x238] sm:$0xff]   ;;  %v1853_v26 = vld [vmem:[%s2227_s1 + $0x228] sm:$0xff]  }
  0x28   : > { %1584 = vmatprep.subr.bf16.mxu1 %v1780_v29  ;;  %v1844_v19 = vld [vmem:[%s2004_s23 + $0x1c] ss:$36 sps:$4 sm:$0xff]   ;;  %v1849_v23 = vld [vmem:[%s2004_s23 + $0x64] ss:$36 sps:$4 sm:$0xff]   ;;  %v1857_v28 = vld [vmem:[%s2004_s23 + $0xac] ss:$36 sps:$4 sm:$0xff]  }
  0x29   : > { %v1847_v22 = vld [vmem:[%s2004_s23 + $0x5c] ss:$36 sps:$4 sm:$0xff]   ;;  %v1855_v27 = vld [vmem:[%s2004_s23 + $0xa4] ss:$36 sps:$4 sm:$0xff]   ;;  %v1862_v35 = vld [vmem:[%s2227_s1 + $0x210] sm:$0xff]  }
  0x2a   : > { %1545 = vmatpush3.bf16.msra.mxu0 %v1781_v30  ;;  %v1851_v24 = vld [vmem:[%s2004_s23 + $0x58] ss:$36 sps:$4 sm:$0xff]   ;;  %v1852_v25 = vld [vmem:[%s2004_s23 + $0x60] ss:$36 sps:$4 sm:$0xff]  }
  0x2b   : > { %1585 = vmatpush3.bf16.msra.mxu1 %v1782_v31  ;;  %1610 = vmatprep.subr.bf16.mxu0 %v1789_v36  ;;  %v1854_v29 = vld [vmem:[%s2227_s1 + $0x220] sm:$0xff]   ;;  %v1860_v31 = vld [vmem:[%s2004_s23 + $0xa8] ss:$36 sps:$4 sm:$0xff]  }
  0x2c   : > { %1650 = vmatprep.subr.bf16.mxu1 %v1790_v37  ;;  %v1859_v30 = vld [vmem:[%s2004_s23 + $0xa0] ss:$36 sps:$4 sm:$0xff]   ;;  %v1867_v36 = vld [vmem:[%s2004_s23 + $0xe8] ss:$36 sps:$4 sm:$0xff]  }
  0x2d   : > { %984 = vmatmul.mubr.bf16.vlgmr.msra.gmra.mxu0 %v1783_v32  ;;  %v1861_v32 = vld [vmem:[%s2227_s1 + $0x218] sm:$0xff]   ;;  %v1869_v37 = vld [vmem:[%s2227_s1 + $0x208] sm:$0xff]  }
  0x2e   : > { %1049 = vmatmul.mubr.bf16.vlgmr.msra.gmra.mxu1 %v1786_v34  ;;  %1611 = vmatpush3.bf16.msra.mxu0 %v1791_v38  ;;  %v1865_v34 = vld [vmem:[%s2004_s23 + $0xf4] ss:$36 sps:$4 sm:$0xff]  }
  0x2f   : > { %1651 = vmatpush3.bf16.msra.mxu1 %v1792_v39  ;;  %1612 = vmatprep.subr.bf16.mxu0 %v1793_v40  ;;  %v1868_v38 = vld [vmem:[%s2004_s23 + $0xf0] ss:$36 sps:$4 sm:$0xff]   ;;  %v1871_v39 = vld [vmem:[%s2004_s23 + $0x20] ss:$36 sps:$4 sm:$0xff]  }
  0x30   : > { %1652 = vmatprep.subr.bf16.mxu1 %v1794_v41  ;;  %991 = vmatprep.mubr.bf16.mxu0 %v1797_v44  ;;  %v1872_v40 = vld [vmem:[%s2004_s23 + $0xb0] ss:$36 sps:$4 sm:$0xff]   ;;  %v1870_v41 = vld [vmem:[%s2227_s1 + $0x200] sm:$0xff]  }
  0x31   : > { %1056 = vmatprep.mubr.bf16.mxu1 %v1799_v45 }
  0x32   : > { %1613 = vmatpush3.bf16.msra.mxu0 %v1795_v42  ;;  %v1873_v42 = vld [vmem:[%s2004_s23 + $0x68] ss:$36 sps:$4 sm:$0xff]  }
  0x33   : > { %1653 = vmatpush3.bf16.msra.mxu1 %v1796_v43  ;;  %1614 = vmatprep.subr.bf16.mxu0 %v1803_v48  ;;  %v1874_v43 = vld [vmem:[%s2004_s23 + $0xf8] ss:$36 sps:$4 sm:$0xff]   ;;  %s1380_s23 = sshll.u32 %s2240_s15, 2 }
  0x34   : > { %1654 = vmatprep.subr.bf16.mxu1 %v1804_v49  ;;  %s148_s6 = scalar_lea.vmem %s2228_s2, %s1380_s23 }
  0x35   : > { %992 = vmatmul.mubr.bf16.gmra.mxu0 %v1801_v46 }
  0x36   : > { %1057 = vmatmul.mubr.bf16.gmra.mxu1 %v1802_v47  ;;  %1615 = vmatpush3.bf16.msra.mxu0 %v1805_v50 }
  0x37   : > { %1655 = vmatpush3.bf16.msra.mxu1 %v1806_v51  ;;  %1616 = vmatprep.subr.bf16.mxu0 %v1807_v52 }
  0x38   : > { %1656 = vmatprep.subr.bf16.mxu1 %v1808_v53  ;;  %999 = vmatprep.mubr.bf16.mxu0 %v1811_v56 }
  0x39   : > { %1064 = vmatprep.mubr.bf16.mxu1 %v1813_v57 }
  0x3a   : > { %1617 = vmatpush3.bf16.msra.mxu0 %v1809_v54 }
  0x3b   : > { %1657 = vmatpush3.bf16.msra.mxu1 %v1810_v55  ;;  %1618 = vmatprep.subr.bf16.mxu0 %v1817_v60 }
  0x3c   : > { %1658 = vmatprep.subr.bf16.mxu1 %v1818_v61 }
  0x3d   : > { %1000 = vmatmul.mubr.bf16.gmra.mxu0 %v1815_v58 }
  0x3e   : > { %1065 = vmatmul.mubr.bf16.gmra.mxu1 %v1816_v59  ;;  %1619 = vmatpush3.bf16.msra.mxu0 %v1819_v62 }
  0x3f   : > { %1659 = vmatpush3.bf16.msra.mxu1 %v1820_v63  ;;  %1620 = vmatprep.subr.bf16.mxu0 %v1821_v0 }
  0x40   : > { %1660 = vmatprep.subr.bf16.mxu1 %v1822_v1  ;;  %1007 = vmatprep.mubr.bf16.mxu0 %v1825_v4 }
  0x41   : > { %1072 = vmatprep.mubr.bf16.mxu1 %v1827_v5 }
  0x42   : > { %1621 = vmatpush3.bf16.msra.mxu0 %v1823_v2 }
  0x43   : > { %1661 = vmatpush3.bf16.msra.mxu1 %v1824_v3  ;;  %1622 = vmatprep.subr.bf16.mxu0 %v1831_v8 }
  0x44   : > { %1662 = vmatprep.subr.bf16.mxu1 %v1832_v9 }
  0x45   : > { %1008 = vmatmul.mubr.bf16.gmra.mxu0 %v1829_v6 }
  0x46   : > { %1073 = vmatmul.mubr.bf16.gmra.mxu1 %v1830_v7  ;;  %1623 = vmatpush3.bf16.msra.mxu0 %v1833_v10 }
  0x47   : > { %1663 = vmatpush3.bf16.msra.mxu1 %v1834_v11  ;;  %1624 = vmatprep.subr.bf16.mxu0 %v1835_v12 }
  0x48   : > { %1664 = vmatprep.subr.bf16.mxu1 %v1836_v13  ;;  %1113 = vmatprep.mubr.bf16.mxu0 %v1841_v17 }
  0x49   : > { %1178 = vmatprep.mubr.bf16.mxu1 %v1844_v19 }
  0x4a   : > { %1625 = vmatpush3.bf16.msra.mxu0 %v1837_v14 }
  0x4b   : > { %1665 = vmatpush3.bf16.msra.mxu1 %v1838_v15  ;;  %1702 = vmatprep.subr.bf16.mxu0 %v1845_v20 }
  0x4c   : > { %1726 = vmatprep.subr.bf16.mxu1 %v1845_v20 }
  0x4d   : > { %1114 = vmatmul.mubr.bf16.vlgmr.msra.gmra.mxu0 %v1839_v16 }
  0x4e   : > { %1179 = vmatmul.mubr.bf16.vlgmr.msra.gmra.mxu1 %v1842_v18  ;;  %1703 = vmatpush3.bf16.msra.mxu0 %v1845_v20 }
  0x4f   : > { %1734 = vmatpush3.bf16.msra.mxu1 %v1845_v20  ;;  %1704 = vmatprep.subr.bf16.mxu0 %v1846_v21 }
  0x50   : > { %1727 = vmatprep.subr.bf16.mxu1 %v1846_v21  ;;  %1121 = vmatprep.mubr.bf16.mxu0 %v1847_v22 }
  0x51   : > { %1186 = vmatprep.mubr.bf16.mxu1 %v1849_v23 }
  0x52   : > { %1705 = vmatpush3.bf16.msra.mxu0 %v1846_v21 }
  0x53   : > { %1735 = vmatpush3.bf16.msra.mxu1 %v1846_v21  ;;  %1706 = vmatprep.subr.bf16.mxu0 %v1853_v26 }
  0x54   : > { %1728 = vmatprep.subr.bf16.mxu1 %v1853_v26 }
  0x55   : > { %1122 = vmatmul.mubr.bf16.gmra.mxu0 %v1851_v24 }
  0x56   : > { %1187 = vmatmul.mubr.bf16.gmra.mxu1 %v1852_v25  ;;  %1129 = vmatprep.mubr.bf16.mxu0 %v1855_v27 }
  0x57   : > { %1707 = vmatpush3.bf16.msra.mxu0 %v1853_v26  ;;  %1194 = vmatprep.mubr.bf16.mxu1 %v1857_v28 }
  0x58   : > { %1736 = vmatpush3.bf16.msra.mxu1 %v1853_v26  ;;  %1708 = vmatprep.subr.bf16.mxu0 %v1854_v29 }
  0x59   : > { %1729 = vmatprep.subr.bf16.mxu1 %v1854_v29 }
  0x5b   : > { %1709 = vmatpush3.bf16.msra.mxu0 %v1854_v29 }
  0x5c   : > { %1737 = vmatpush3.bf16.msra.mxu1 %v1854_v29  ;;  %1710 = vmatprep.subr.bf16.mxu0 %v1861_v32 }
  0x5d   : > { %1130 = vmatmul.mubr.bf16.gmra.mxu0 %v1859_v30  ;;  %1730 = vmatprep.subr.bf16.mxu1 %v1861_v32 }
  0x5e   : > { %1195 = vmatmul.mubr.bf16.gmra.mxu1 %v1860_v31  ;;  %1137 = vmatprep.mubr.bf16.mxu0 %v1863_v33 }
  0x5f   : > { %1711 = vmatpush3.bf16.msra.mxu0 %v1861_v32  ;;  %1202 = vmatprep.mubr.bf16.mxu1 %v1865_v34 }
  0x60   : > { %1738 = vmatpush3.bf16.msra.mxu1 %v1861_v32  ;;  %1712 = vmatprep.subr.bf16.mxu0 %v1862_v35 }
  0x61   : > { %1731 = vmatprep.subr.bf16.mxu1 %v1862_v35 }
  0x63   : > { %1713 = vmatpush3.bf16.msra.mxu0 %v1862_v35 }
  0x64   : > { %1739 = vmatpush3.bf16.msra.mxu1 %v1862_v35  ;;  %1714 = vmatprep.subr.bf16.mxu0 %v1869_v37 }
  0x65   : > { %1138 = vmatmul.mubr.bf16.gmra.mxu0 %v1867_v36  ;;  %1732 = vmatprep.subr.bf16.mxu1 %v1869_v37 }
  0x66   : > { %1203 = vmatmul.mubr.bf16.gmra.mxu1 %v1868_v38  ;;  %1718 = vmatprep.mubr.bf16.mxu0 %v1871_v39 }
  0x67   : > { %1715 = vmatpush3.bf16.msra.mxu0 %v1869_v37  ;;  %1722 = vmatprep.mubr.bf16.mxu1 %v1872_v40 }
  0x68   : > { %1740 = vmatpush3.bf16.msra.mxu1 %v1869_v37  ;;  %1716 = vmatprep.subr.bf16.mxu0 %v1870_v41 }
  0x69   : > { %1733 = vmatprep.subr.bf16.mxu1 %v1870_v41 }
  0x6b   : > { %1717 = vmatpush3.bf16.msra.mxu0 %v1870_v41 }
  0x6c   : > { %1741 = vmatpush3.bf16.msra.mxu1 %v1870_v41 }
  0x6e   : > { %1719 = vmatmul.mubr.bf16.vlgmr.msra.gmra.mxu0 %v1873_v42 }
  0x6f   : > { %1723 = vmatmul.mubr.bf16.vlgmr.msra.gmra.mxu1 %v1874_v43 }
  0xed   : > { %v2168_v44 = vpop.f32.mrf.mxu0 }
  0xee   : > { %v2170_v45 = vpop.f32.mrf.mxu1 }
  0xef   : > { %v2172_v46 = vpop.f32.mrf.mxu0 }
  0xf0   : > { %v2174_v47 = vpop.f32.mrf.mxu1 }
  0xf1   : > { %v2176_v48 = vpop.f32.mrf.mxu0 }
  0xf2   : > { %v2178_v49 = vpop.f32.mrf.mxu1 }
  0xf3   : > { %v2180_v50 = vpop.f32.mrf.mxu0 }
  0xf4   : > { %v2182_v51 = vpop.f32.mrf.mxu1 }
  0xf5   : > { %v1552_v52 = vpop.f32.mrf.mxu0 }
  0xf6   : > { %v1592_v53 = vpop.f32.mrf.mxu1 }
  0xf7   : > { %v1553_v54 = vpop.f32.mrf.mxu0 }
  0xf8   : > { %v1593_v55 = vpop.f32.mrf.mxu1  ;;  %v1554_v35 = vadd.f32 %v1553_v54, %v1552_v52  ;;  %v1551_v52 = vadd.f32 %v2180_v50, %v2176_v48 }
  0xf9   : > { %v1555_v56 = vpop.f32.mrf.mxu0  ;;  %v1594_v36 = vadd.f32 %v1593_v55, %v1592_v53  ;;  %v1591_v53 = vadd.f32 %v2182_v51, %v2178_v49 }
  0xfa   : > { %v1595_v57 = vpop.f32.mrf.mxu1 }
  0xfb   : > { %v1556_v58 = vpop.f32.mrf.mxu0  ;;  %v1059_v54 = vadd.f32 %v1594_v36, %v1554_v35  ;;  %v1054_v35 = vadd.f32 %v1591_v53, %v1551_v52 }
  0xfc   : > { %v1596_v59 = vpop.f32.mrf.mxu1  ;;  %v1557_v39 = vadd.f32 %v1556_v58, %v1555_v56 }
  0xfd   : > { %v1558_v60 = vpop.f32.mrf.mxu0  ;;  %v1597_v40 = vadd.f32 %v1596_v59, %v1595_v57 }
  0xfe   : > { %v1598_v61 = vpop.f32.mrf.mxu1 }
  0xff   : > { %v1559_v62 = vpop.f32.mrf.mxu0  ;;  %v1062_v58 = vadd.f32 %v1597_v40, %v1557_v39 }
 0x100   : > { %v1599_v63 = vpop.f32.mrf.mxu1  ;;  %v1560_v59 = vadd.f32 %v1559_v62, %v1558_v60 }
 0x101   : > { %v1561_v0 = vpop.f32.mrf.mxu0 }
 0x102   : > { %v1601_v1 = vpop.f32.mrf.mxu1 }
 0x103   : > { %v1562_v2 = vpop.f32.mrf.mxu0 }
 0x104   : > { %v1602_v3 = vpop.f32.mrf.mxu1 }
 0x105   : > { %v1564_v4 = vpop.f32.mrf.mxu0 }
 0x106   : > { %v1604_v5 = vpop.f32.mrf.mxu1 }
 0x107   : > { %v1565_v6 = vpop.f32.mrf.mxu0 }
 0x108   : > { %v1605_v7 = vpop.f32.mrf.mxu1  ;;  %v1566_v41 = vadd.f32 %v1565_v6, %v1564_v4  ;;  %v1603_v6 = vadd.f32 %v1602_v3, %v1601_v1 }
 0x109   : > { %v1567_v8 = vpop.f32.mrf.mxu0  ;;  %v1606_v42 = vadd.f32 %v1605_v7, %v1604_v5 }
 0x10a   : > { %v1607_v9 = vpop.f32.mrf.mxu1 }
 0x10b   : > { %v1568_v10 = vpop.f32.mrf.mxu0 }
 0x10c   : > { %v1608_v11 = vpop.f32.mrf.mxu1 }
 0x10d   : > { %v1626_v12 = vpop.f32.mrf.mxu0 }
 0x10e   : > { %v2184_v13 = vpop.f32.mrf.mxu1 }
 0x10f   : > { %v1627_v14 = vpop.f32.mrf.mxu0 }
 0x110   : > { %v2186_v15 = vpop.f32.mrf.mxu1 }
 0x111   : > { %v1629_v16 = vpop.f32.mrf.mxu0 }
 0x112   : > { %v2188_v17 = vpop.f32.mrf.mxu1 }
 0x113   : > { %2229 = vst [vmem:[#allocation2_spill] sm:$0xff] %v2188_v17  ;;  %v1630_v18 = vpop.f32.mrf.mxu0  ;;  %v1569_v17 = vadd.f32 %v1568_v10, %v1567_v8 }
 0x114   : > { %v2190_v19 = vpop.f32.mrf.mxu1  ;;  %v1631_v48 = vadd.f32 %v1630_v18, %v1629_v16 }
 0x115   : > { %2230 = vst [vmem:[#allocation3_spill] sm:$0xff] %v2190_v19  ;;  %v1632_v20 = vpop.f32.mrf.mxu0 }
 0x116   : > { %v2192_v21 = vpop.f32.mrf.mxu1  ;;  %v1119_v3 = vadd.f32 %v1631_v48, %v1054_v35 }
 0x117   : > { %v1633_v22 = vpop.f32.mrf.mxu0 }
 0x118   : > { %v1673_v23 = vpop.f32.mrf.mxu1  ;;  %v1634_v4 = vadd.f32 %v1633_v22, %v1632_v20 }
 0x119   : > { %v1635_v24 = vpop.f32.mrf.mxu0 }
 0x11a   : > { %v1675_v25 = vpop.f32.mrf.mxu1  ;;  %v1124_v36 = vadd.f32 %v1634_v4, %v1059_v54 }
 0x11b   : > { %v1636_v26 = vpop.f32.mrf.mxu0 }
 0x11c   : > { %v1676_v27 = vpop.f32.mrf.mxu1  ;;  %v1637_v5 = vadd.f32 %v1636_v26, %v1635_v24 }
 0x11d   : > { %v1638_v28 = vpop.f32.mrf.mxu0 }
 0x11e   : > { %v2194_v29 = vpop.f32.mrf.mxu1  ;;  %v1127_v60 = vadd.f32 %v1637_v5, %v1062_v58 }
 0x11f   : > { %2231 = vst [vmem:[#allocation4_spill] sm:$0xff] %v2194_v29  ;;  %v1639_v30 = vpop.f32.mrf.mxu0  ;;  %v1548_v29 = vadd.f32 %v2172_v46, %v2168_v44  ;;  %v1600_v44 = vadd.f32 %v1599_v63, %v1598_v61  ;;  %v1563_v46 = vadd.f32 %v1562_v2, %v1561_v0 }
 0x120   : > { %v2196_v31 = vpop.f32.mrf.mxu1  ;;  %v1640_v49 = vadd.f32 %v1639_v30, %v1638_v28  ;;  %v1668_v28 = vadd.f32 %v2186_v15, %v2184_v13  ;;  %v2235_v30 = vld [vmem:[#allocation3_spill] sm:$0xff] }
 0x121   : > { %2232 = vst [vmem:[#allocation5_spill] sm:$0xff] %v2196_v31  ;;  %v1641_v32 = vpop.f32.mrf.mxu0  ;;  %v1588_v31 = vadd.f32 %v2174_v47, %v2170_v45  ;;  %v1075_v45 = vadd.f32 %v1606_v42, %v1566_v41  ;;  %v1067_v20 = vadd.f32 %v1600_v44, %v1560_v59  ;;  %v1070_v61 = vadd.f32 %v1603_v6, %v1563_v46 }
 0x122   : > { %v2198_v33 = vpop.f32.mrf.mxu1 }
 0x123   : > { %2233 = vst [vmem:[#allocation6_spill] sm:$0xff] %v2198_v33  ;;  %v1642_v34 = vpop.f32.mrf.mxu0  ;;  %v1609_v33 = vadd.f32 %v1608_v11, %v1607_v9  ;;  %v1628_v9 = vadd.f32 %v1627_v14, %v1626_v12  ;;  %v1051_v10 = vadd.f32 %v1588_v31, %v1548_v29  ;;  %v1674_v12 = vadd.f32 %v1673_v23, %v2192_v21  ;;  %v2234_v29 = vld [vmem:[#allocation2_spill] sm:$0xff] }
 0x124   : > { %v2200_v37 = vpop.f32.mrf.mxu1  ;;  %v1643_v51 = vadd.f32 %v1642_v34, %v1641_v32  ;;  %v1677_v14 = vadd.f32 %v1676_v27, %v1675_v25  ;;  %v1671_v31 = vadd.f32 %v2235_v30, %v2234_v29 }
 0x125   : > { %v1644_v38 = vpop.f32.mrf.mxu0  ;;  %v1078_v8 = vadd.f32 %v1609_v33, %v1569_v17  ;;  %v1116_v2 = vadd.f32 %v1628_v9, %v1051_v10  ;;  %v1132_v17 = vadd.f32 %v1640_v49, %v1067_v20  ;;  %v1189_v32 = vadd.f32 %v1674_v12, %v1124_v36 }
 0x126   : > { %v1684_v43 = vpop.f32.mrf.mxu1  ;;  %v1135_v18 = vadd.f32 %v1643_v51, %v1070_v61  ;;  %v1192_v34 = vadd.f32 %v1677_v14, %v1127_v60  ;;  %v1184_v52 = vadd.f32 %v1671_v31, %v1119_v3 }
 0x127   : > { %v1645_v19 = vpop.f32.mrf.mxu0  ;;  %v1181_v41 = vadd.f32 %v1668_v28, %v1116_v2 }
 0x128   : > { %v1646_v55 = vadd.f32 %v1645_v19, %v1644_v38  ;;  %v1685_v56 = vpop.f32.mrf.mxu1  ;;  %v2236_v38 = vld [vmem:[#allocation4_spill] sm:$0xff]  ;;  %v2237_v39 = vld [vmem:[#allocation5_spill] sm:$0xff] }
 0x129   : > { %v1647_v57 = vpop.f32.mrf.mxu0  ;;  %v1686_v63 = vadd.f32 %v1685_v56, %v1684_v43  ;;  %v1680_v21 = vadd.f32 %v2237_v39, %v2236_v38 }
 0x12a   : > { %v1687_v47 = vpop.f32.mrf.mxu1  ;;  %v1140_v11 = vadd.f32 %v1646_v55, %v1075_v45  ;;  %v2238_v23 = vld [vmem:[#allocation6_spill] sm:$0xff] }
 0x12b   : > { %v1648_v7 = vpop.f32.mrf.mxu0  ;;  %v1683_v25 = vadd.f32 %v2200_v37, %v2238_v23  ;;  %v1197_v15 = vadd.f32 %v1680_v21, %v1132_v17 }
 0x12c   : > { %v1649_v50 = vadd.f32 %v1648_v7, %v1647_v57  ;;  %v1688_v19 = vpop.f32.mrf.mxu1  ;;  %v1205_v22 = vadd.f32 %v1686_v63, %v1140_v11 }
 0x12d   : > { %v1689_v0 = vadd.f32 %v1688_v19, %v1687_v47  ;;  %v1200_v55 = vadd.f32 %v1683_v25, %v1135_v18 }
 0x12e   : > { %v1143_v62 = vadd.f32 %v1649_v50, %v1078_v8  ;;  %v1720_v1 = vpop.f32.mrf.mxu0 }
 0x12f   : > { %v1724_v16 = vpop.f32.mrf.mxu1  ;;  %v1254_v40 = vadd.f32 %v1720_v1, %v1189_v32 }
 0x130   : > { %v1245_v24 = vpop.f32.mrf.mxu0  ;;  %v1208_v26 = vadd.f32 %v1689_v0, %v1143_v62  ;;  %v1270_v13 = vadd.f32 %v1724_v16, %v1205_v22 }
 0x131   : > { %v1261_v33 = vpop.f32.mrf.mxu1  ;;  %v1246_v56 = vadd.f32 %v1245_v24, %v1181_v41 }
 0x132   : > { %v1721_v27 = vpop.f32.mrf.mxu0  ;;  %v1262_v37 = vadd.f32 %v1261_v33, %v1197_v15 }
 0x133   : > { %v1257_v42 = vadd.f32 %v1721_v27, %v1192_v34  ;;  %v1725_v43 = vpop.f32.mrf.mxu1 }
 0x134   : > { %v1273_v53 = vadd.f32 %v1725_v43, %v1208_v26  ;;  %v1248_v54 = vpop.f32.mrf.mxu0 }
 0x135   : > { %v1515_v57 = vpack.c.bf16 %v1257_v42, %v1254_v40  ;;  %v1249_v58 = vadd.f32 %v1248_v54, %v1184_v52  ;;  %v1264_v59 = vpop.f32.mrf.mxu1 }
 0x136   : > { %v1525_v4 = vpack.c.bf16 %v1273_v53, %v1270_v13  ;;  %v1265_v5 = vadd.f32 %v1264_v59, %v1200_v55 }
 0x137   : > { %1527 = vst [vmem:[%s148_s6 + $0x8] sm:$0xff] %v1515_v57   ;;  %v1510_v44 = vpack.c.bf16 %v1249_v58, %v1246_v56 }
 0x138   : > { %1529 = vst [vmem:[%s148_s6 + $0x18] sm:$0xff] %v1525_v4   ;;  %v1520_v46 = vpack.c.bf16 %v1265_v5, %v1262_v37 }
 0x139   : > { %1511 = vst [vmem:[%s148_s6] sm:$0xff] %v1510_v44  }
 0x13a   : > { %1528 = vst [vmem:[%s148_s6 + $0x10] sm:$0xff] %v1520_v46  }
 0x13b PF: > { %s12_s9 = sadd.s32 1, %s1881_s9  }
 0x13c   : > { %p9_p4 = scmp.ge.s32.totalorder %s12_s9, 4  }
 0x13e   :  { %11 = sbr.rel (!%p9_p4) target bundleno = 1 (0x1), region = 58 }

// kernel: densenet121_forward.134
= control target key start
LH: loop header
LB: loop body
LE: loop exit
PB: predicated region body
PF: predicated region fallthrough
CT: control target
= control target key end

     0   :  { %s883_s21 = smov 0   ;;  %s1018_s0 = inlined_call_operand.vmem [shape: bf16[128,256], index: 0, kind: input, shape index: {}]   ;;  %s1019_s1 = inlined_call_operand.vmem [shape: f32[1,256], index: 1, kind: input, shape index: {}]   ;;  %s1020_s2 = inlined_call_operand.vmem [shape: f32[1,256], index: 2, kind: input, shape index: {}]   ;;  %s1021_s3 = inlined_call_operand.vmem [shape: bf16[256,128], index: 3, kind: input, shape index: {}]   ;;  %s1022_s4 = inlined_call_operand.vmem [shape: f32[1,128], index: 4, kind: input, shape index: {}]   ;;  %s1023_s5 = inlined_call_operand.vmem [shape: f32[1,128], index: 5, kind: input, shape index: {}]   ;;  %s1024_s6 = inlined_call_operand.vmem [shape: bf16[128,128], index: 6, kind: output, shape index: {}]  }
   0x1 LB: > { %s690_s22 = sadd.s32 4294967295, %s846_s21   ;;  %p694_p0 = scmp.ge.s32.totalorder %s846_s21, 1  ;;  %s846_s21 = sphi %s883_s21, %s16_s21  }
   0x2   : > { %p214_p1 = scmp.lt.s32.totalorder %s846_s21, 3 }
   0x4   : > { %p215_p2 = pnand %p694_p0, %p214_p1 }
   0x5   : > { %s695_s25 = sshll.u32 (!%p215_p2), %s690_s22, 3 }
   0x6   : > { %218 = sbr.rel (%p215_p2) target bundleno = 262 (0x106), region = 44  ;;  %p246_p3 = scmp.lt.s32.totalorder (!%p215_p2), %s695_s25, 15 }
   0xb   : > { %v824_v0 = vld [vmem:[%s1021_s3 + $0x78] sm:$0xff]   ;;  %v826_v2 = vld [vmem:[%s1021_s3 + $0x70] sm:$0xff]   ;;  %v828_v4 = vld [vmem:[%s1021_s3 + $0x68] sm:$0xff]   ;;  %v285_v5 = vlaneseq  ;;  %s1026_s25 = smov (!%p246_p3, %s695_s25), 15 }
   0xc   : > { %v825_v1 = vld [vmem:[%s1021_s3 + $0x38] sm:$0xff]   ;;  %760 = vmatprep.subr.bf16.mxu0 %v824_v0  ;;  %800 = vmatprep.subr.bf16.mxu1 %v824_v0  ;;  %v827_v3 = vld [vmem:[%s1021_s3 + $0x30] sm:$0xff]   ;;  %v829_v6 = vld [vmem:[%s1021_s3 + $0x28] sm:$0xff]   ;;  %s728_s14 = sshll.u32 %s1026_s25, 3  ;;  %s699_s23 = sshll.u32 %s1026_s25, 2 }
   0xd   : > { %761 = vmatpush3.bf16.msra.mxu0 %v825_v1  ;;  %808 = vmatpush3.bf16.msra.mxu1 %v825_v1  ;;  %v830_v7 = vld [vmem:[%s1021_s3 + $0x60] sm:$0xff]   ;;  %v286_v8 = vshrl.u32 %v285_v5, 7  ;;  %v832_v10 = vld [vmem:[%s1021_s3 + $0x58] sm:$0xff]   ;;  %s924_s22 = scalar_lea.vmem %s1018_s0, %s728_s14  ;;  %v834_v14 = vld [vmem:[%s1021_s3 + $0x50] sm:$0xff]   ;;  %s256_s27 = scalar_lea.vmem %s1024_s6, %s699_s23 }
   0xe   : > { %762 = vmatprep.subr.bf16.mxu0 %v826_v2  ;;  %801 = vmatprep.subr.bf16.mxu1 %v826_v2  ;;  %v831_v9 = vld [vmem:[%s1021_s3 + $0x20] sm:$0xff]   ;;  %v833_v12 = vld [vmem:[%s1021_s3 + $0x18] sm:$0xff]   ;;  %v260_v16 = vld [vmem:[%s924_s22 + $0x8] sm:$0xff] }
   0xf   : > { %v287_v11 = vsub.s32 0, %v286_v8  ;;  %v291_v13 = vsub.s32 1, %v286_v8  ;;  %v259_v15 = vld [vmem:[%s924_s22] sm:$0xff]  ;;  %v269_v20 = vunpack.c.l.bf16 %v260_v16  ;;  %v270_v21 = vunpack.c.h.bf16 %v260_v16  ;;  %v264_v24 = vld [vmem:[%s924_s22 + $0x28] sm:$0xff]  ;;  %v951_v29 = vld [vmem:[%s924_s22 + $0x10] sm:$0xff] }
  0x10   : > { %v283_v17 = vld [vmem:[%s1019_s1] sm:$0x3]  ;;  %v267_v18 = vunpack.c.l.bf16 %v259_v15  ;;  %v268_v19 = vunpack.c.h.bf16 %v259_v15  ;;  %v835_v30 = vld [vmem:[%s1021_s3 + $0x10] sm:$0xff]   ;;  %v277_v33 = vunpack.c.l.bf16 %v264_v24  ;;  %v278_v34 = vunpack.c.h.bf16 %v264_v24  ;;  %v836_v35 = vld [vmem:[%s1021_s3 + $0x48] sm:$0xff]  }
  0x11   : > { %763 = vmatpush3.bf16.msra.mxu0 %v827_v3  ;;  %809 = vmatpush3.bf16.msra.mxu1 %v827_v3  ;;  %v311_v22 = vld [vmem:[%s1020_s2] sm:$0x3]  ;;  %v942_v25 = vrot.slane %v283_v17, %v287_v11  ;;  %v944_v26 = vrot.slane %v283_v17, %v291_v13  ;;  %v262_v39 = vld [vmem:[%s924_s22 + $0x18] sm:$0xff]  ;;  %v272_v40 = vunpack.c.h.bf16 %v951_v29  ;;  %v837_v49 = vld [vmem:[%s1021_s3 + $0x8] sm:$0xff]  }
  0x12   : > { %764 = vmatprep.subr.bf16.mxu0 %v828_v4  ;;  %802 = vmatprep.subr.bf16.mxu1 %v828_v4  ;;  %v263_v23 = vld [vmem:[%s924_s22 + $0x20] sm:$0xff]  ;;  %v946_v27 = vrot.slane %v311_v22, %v287_v11  ;;  %v948_v28 = vrot.slane %v311_v22, %v291_v13  ;;  %v274_v53 = vunpack.c.h.bf16 %v262_v39  ;;  %v265_v59 = vld [vmem:[%s924_s22 + $0x30] sm:$0xff]  ;;  %v266_v0 = vld [vmem:[%s924_s22 + $0x38] sm:$0xff]  ;;  %v271_v13 = vunpack.c.l.bf16 %v951_v29 }
  0x13   : > { %v275_v31 = vunpack.c.l.bf16 %v263_v23  ;;  %v276_v32 = vunpack.c.h.bf16 %v263_v23  ;;  %v296_v36 = vmul.f32 %v944_v26, %v268_v19  ;;  %v298_v37 = vmul.f32 %v944_v26, %v270_v21  ;;  %v838_v54 = vld [vmem:[%s1021_s3 + $0x40] sm:$0xff]  }
  0x14   : > { %v295_v38 = vmul.f32 %v942_v25, %v267_v18  ;;  %v306_v42 = vmul.f32 %v944_v26, %v278_v34  ;;  %v297_v43 = vmul.f32 %v942_v25, %v269_v20  ;;  %v305_v48 = vmul.f32 %v942_v25, %v277_v33  ;;  %v839_v5 = vld [vmem:[%s1021_s3] sm:$0xff]  }
  0x15   : > { %765 = vmatpush3.bf16.msra.mxu0 %v829_v6  ;;  %810 = vmatpush3.bf16.msra.mxu1 %v829_v6  ;;  %v304_v41 = vmul.f32 %v944_v26, %v276_v32  ;;  %v303_v44 = vmul.f32 %v942_v25, %v275_v31  ;;  %v324_v45 = vadd.f32 %v948_v28, %v296_v36  ;;  %v273_v16 = vunpack.c.l.bf16 %v262_v39 }
  0x16   : > { %766 = vmatprep.subr.bf16.mxu0 %v830_v7  ;;  %803 = vmatprep.subr.bf16.mxu1 %v830_v7  ;;  %v326_v46 = vadd.f32 %v948_v28, %v298_v37  ;;  %v323_v47 = vadd.f32 %v946_v27, %v295_v38  ;;  %v334_v51 = vadd.f32 %v948_v28, %v306_v42  ;;  %v279_v17 = vunpack.c.l.bf16 %v265_v59 }
  0x17   : > { %v332_v50 = vadd.f32 %v948_v28, %v304_v41  ;;  %v325_v52 = vadd.f32 %v946_v27, %v297_v43  ;;  %v340_v55 = vmax.f32 %v324_v45, 0.0  ;;  %v331_v58 = vadd.f32 %v946_v27, %v303_v44 }
  0x18   : > { %v342_v56 = vmax.f32 %v326_v46, 0.0  ;;  %v339_v57 = vmax.f32 %v323_v47, 0.0  ;;  %v350_v61 = vmax.f32 %v334_v51, 0.0  ;;  %v333_v63 = vadd.f32 %v946_v27, %v305_v48  ;;  %v716_v46 = vld [vmem:[%s1022_s4] ss:$0 sm:$0xff] }
  0x19   : > { %767 = vmatpush3.bf16.msra.mxu0 %v831_v9  ;;  %811 = vmatpush3.bf16.msra.mxu1 %v831_v9  ;;  %v348_v60 = vmax.f32 %v332_v50, 0.0  ;;  %v341_v62 = vmax.f32 %v325_v52, 0.0  ;;  %v347_v2 = vmax.f32 %v331_v58, 0.0  ;;  %v300_v3 = vmul.f32 %v944_v26, %v272_v40 }
  0x1a   : > { %768 = vmatprep.subr.bf16.mxu0 %v832_v10  ;;  %804 = vmatprep.subr.bf16.mxu1 %v832_v10  ;;  %v356_v1 = vpack.c.bf16 %v342_v56, %v340_v55  ;;  %v302_v4 = vmul.f32 %v944_v26, %v274_v53  ;;  %v349_v8 = vmax.f32 %v333_v63, 0.0  ;;  %v280_v9 = vunpack.c.h.bf16 %v265_v59  ;;  %v717_v53 = vld [vmem:[%s1023_s5] ss:$0 sm:$0xff] }
  0x1b   : > { %v360_v6 = vpack.c.bf16 %v350_v61, %v348_v60  ;;  %v355_v7 = vpack.c.bf16 %v341_v62, %v339_v57  ;;  %v328_v10 = vadd.f32 %v948_v28, %v300_v3  ;;  %v299_v21 = vmul.f32 %v942_v25, %v271_v13 }
  0x1c   : > { %v330_v11 = vadd.f32 %v948_v28, %v302_v4  ;;  %523 = vmatprep.mubr.bf16.mxu0 %v356_v1  ;;  %v308_v15 = vmul.f32 %v944_v26, %v280_v9  ;;  %v301_v23 = vmul.f32 %v942_v25, %v273_v16  ;;  %v281_v24 = vunpack.c.l.bf16 %v266_v0 }
  0x1d   : > { %769 = vmatpush3.bf16.msra.mxu0 %v833_v12  ;;  %812 = vmatpush3.bf16.msra.mxu1 %v833_v12  ;;  %v282_v12 = vunpack.c.h.bf16 %v266_v0  ;;  %v344_v18 = vmax.f32 %v328_v10, 0.0  ;;  %v307_v29 = vmul.f32 %v942_v25, %v279_v17  ;;  %v327_v32 = vadd.f32 %v946_v27, %v299_v21 }
  0x1e   : > { %770 = vmatprep.subr.bf16.mxu0 %v834_v14  ;;  %805 = vmatprep.subr.bf16.mxu1 %v834_v14  ;;  %v359_v14 = vpack.c.bf16 %v349_v8, %v347_v2  ;;  %v346_v19 = vmax.f32 %v330_v11, 0.0  ;;  %v336_v22 = vadd.f32 %v948_v28, %v308_v15  ;;  %v329_v34 = vadd.f32 %v946_v27, %v301_v23 }
  0x1f   : > { %539 = vmatprep.mubr.bf16.mxu1 %v360_v6  ;;  %v310_v20 = vmul.f32 %v944_v26, %v282_v12  ;;  %v309_v26 = vmul.f32 %v942_v25, %v281_v24  ;;  %v343_v37 = vmax.f32 %v327_v32, 0.0 }
  0x20   : > { %v352_v33 = vmax.f32 %v336_v22, 0.0  ;;  %v345_v38 = vmax.f32 %v329_v34, 0.0 }
  0x21   : > { %771 = vmatpush3.bf16.msra.mxu0 %v835_v30  ;;  %813 = vmatpush3.bf16.msra.mxu1 %v835_v30  ;;  %v358_v30 = vpack.c.bf16 %v346_v19, %v344_v18  ;;  %v338_v31 = vadd.f32 %v948_v28, %v310_v20  ;;  %v337_v39 = vadd.f32 %v946_v27, %v309_v26 }
  0x22   : > { %772 = vmatprep.subr.bf16.mxu0 %v836_v35  ;;  %806 = vmatprep.subr.bf16.mxu1 %v836_v35  ;;  %v335_v35 = vadd.f32 %v946_v27, %v307_v29  ;;  %v357_v42 = vpack.c.bf16 %v345_v38, %v343_v37 }
  0x23   : > { %v354_v36 = vmax.f32 %v338_v31, 0.0  ;;  %v353_v28 = vmax.f32 %v337_v39, 0.0 }
  0x24   : > { %v351_v40 = vmax.f32 %v335_v35, 0.0 }
  0x25   : > { %773 = vmatpush3.bf16.msra.mxu0 %v837_v49  ;;  %814 = vmatpush3.bf16.msra.mxu1 %v837_v49  ;;  %v362_v41 = vpack.c.bf16 %v354_v36, %v352_v33 }
  0x26   : > { %774 = vmatprep.subr.bf16.mxu0 %v838_v54  ;;  %807 = vmatprep.subr.bf16.mxu1 %v838_v54  ;;  %v361_v43 = vpack.c.bf16 %v353_v28, %v351_v40 }
  0x29   : > { %775 = vmatpush3.bf16.msra.mxu0 %v839_v5  ;;  %815 = vmatpush3.bf16.msra.mxu1 %v839_v5 }
  0x2c   : > { %524 = vmatmul.mubr.bf16.vlgmr.msra.gmra.mxu0 %v355_v7  ;;  %540 = vmatmul.mubr.bf16.vlgmr.msra.gmra.mxu1 %v359_v14 }
  0x2d   : > { %531 = vmatprep.mubr.bf16.mxu0 %v358_v30  ;;  %547 = vmatprep.mubr.bf16.mxu1 %v362_v41 }
  0x34   : > { %532 = vmatmul.mubr.bf16.gmra.mxu0 %v357_v42  ;;  %548 = vmatmul.mubr.bf16.gmra.mxu1 %v361_v43 }
  0xec   : > { %v776_v44 = vpop.f32.mrf.mxu0  ;;  %v788_v25 = vpop.f32.mrf.mxu1 }
  0xee   : > { %v777_v45 = vpop.f32.mrf.mxu0  ;;  %v789_v47 = vpop.f32.mrf.mxu1 }
  0xef   : > { %v778_v48 = vadd.f32 %v777_v45, %v776_v44  ;;  %v790_v49 = vadd.f32 %v789_v47, %v788_v25 }
  0xf0   : > { %v779_v50 = vpop.f32.mrf.mxu0  ;;  %v791_v27 = vpop.f32.mrf.mxu1 }
  0xf1   : > { %v563_v51 = vmul.f32 %v778_v48, %v716_v46  ;;  %v567_v52 = vmul.f32 %v790_v49, %v716_v46 }
  0xf2   : > { %v780_v54 = vpop.f32.mrf.mxu0  ;;  %v792_v55 = vpop.f32.mrf.mxu1 }
  0xf3   : > { %v781_v56 = vadd.f32 %v780_v54, %v779_v50  ;;  %v793_v57 = vadd.f32 %v792_v55, %v791_v27  ;;  %v578_v60 = vadd.f32 %v717_v53, %v563_v51  ;;  %v582_v61 = vadd.f32 %v717_v53, %v567_v52 }
  0xf4   : > { %v782_v58 = vpop.f32.mrf.mxu0  ;;  %v794_v59 = vpop.f32.mrf.mxu1 }
  0xf5   : > { %v564_v62 = vmul.f32 %v781_v56, %v716_v46  ;;  %v568_v63 = vmul.f32 %v793_v57, %v716_v46  ;;  %v586_v8 = vmax.f32 %v578_v60, 0.0  ;;  %v590_v9 = vmax.f32 %v582_v61, 0.0 }
  0xf6   : > { %v783_v0 = vpop.f32.mrf.mxu0  ;;  %v795_v1 = vpop.f32.mrf.mxu1 }
  0xf7   : > { %v579_v2 = vadd.f32 %v717_v53, %v564_v62  ;;  %v583_v3 = vadd.f32 %v717_v53, %v568_v63  ;;  %v784_v4 = vadd.f32 %v783_v0, %v782_v58  ;;  %v796_v5 = vadd.f32 %v795_v1, %v794_v59 }
  0xf8   : > { %v785_v6 = vpop.f32.mrf.mxu0  ;;  %v797_v7 = vpop.f32.mrf.mxu1 }
  0xf9   : > { %v587_v10 = vmax.f32 %v579_v2, 0.0  ;;  %v591_v11 = vmax.f32 %v583_v3, 0.0  ;;  %v565_v12 = vmul.f32 %v784_v4, %v716_v46  ;;  %v569_v13 = vmul.f32 %v796_v5, %v716_v46 }
  0xfa   : > { %v786_v14 = vpop.f32.mrf.mxu0  ;;  %v798_v15 = vpop.f32.mrf.mxu1 }
  0xfb   : > { %v740_v16 = vpack.c.bf16 %v587_v10, %v586_v8  ;;  %v750_v17 = vpack.c.bf16 %v591_v11, %v590_v9  ;;  %v787_v18 = vadd.f32 %v786_v14, %v785_v6  ;;  %v799_v19 = vadd.f32 %v798_v15, %v797_v7 }
  0xfc   : > { %v580_v20 = vadd.f32 %v717_v53, %v565_v12  ;;  %v584_v21 = vadd.f32 %v717_v53, %v569_v13 }
  0xfd   : > { %741 = vst [vmem:[%s256_s27] sm:$0xff] %v740_v16   ;;  %758 = vst [vmem:[%s256_s27 + $0x10] sm:$0xff] %v750_v17   ;;  %v566_v22 = vmul.f32 %v787_v18, %v716_v46  ;;  %v570_v23 = vmul.f32 %v799_v19, %v716_v46 }
  0xfe   : > { %v588_v30 = vmax.f32 %v580_v20, 0.0  ;;  %v592_v31 = vmax.f32 %v584_v21, 0.0 }
  0xff   : > { %v581_v24 = vadd.f32 %v717_v53, %v566_v22  ;;  %v585_v29 = vadd.f32 %v717_v53, %v570_v23 }
 0x101   : > { %v589_v32 = vmax.f32 %v581_v24, 0.0  ;;  %v593_v33 = vmax.f32 %v585_v29, 0.0 }
 0x103   : > { %v745_v34 = vpack.c.bf16 %v589_v32, %v588_v30  ;;  %v755_v26 = vpack.c.bf16 %v593_v33, %v592_v31 }
 0x105   : > { %757 = vst [vmem:[%s256_s27 + $0x8] sm:$0xff] %v745_v34   ;;  %759 = vst [vmem:[%s256_s27 + $0x18] sm:$0xff] %v755_v26  }
 0x106 PF: > { %s16_s21 = sadd.s32 1, %s846_s21  }
 0x107   : > { %p13_p4 = scmp.ge.s32.totalorder %s16_s21, 4  }
 0x109   :  { %15 = sbr.rel (!%p13_p4) target bundleno = 1 (0x1), region = 74 }

// kernel: densenet121_forward.140
= control target key start
LH: loop header
LB: loop body
LE: loop exit
PB: predicated region body
PF: predicated region fallthrough
CT: control target
= control target key end

     0   :  { %s779_s15 = smov 0   ;;  %s908_s0 = inlined_call_operand.vmem [shape: bf16[128,256], index: 0, kind: input, shape index: {}]   ;;  %s909_s1 = inlined_call_operand.vmem [shape: f32[1,256], index: 1, kind: input, shape index: {}]   ;;  %s910_s2 = inlined_call_operand.vmem [shape: f32[1,256], index: 2, kind: input, shape index: {}]   ;;  %s911_s3 = inlined_call_operand.vmem [shape: bf16[256,128], index: 3, kind: input, shape index: {}]   ;;  %s912_s4 = inlined_call_operand.vmem [shape: bf16[128,128], index: 4, kind: output, shape index: {}]  }
   0x1 LB: > { %s598_s16 = sadd.s32 4294967295, %s752_s15   ;;  %p602_p0 = scmp.ge.s32.totalorder %s752_s15, 1  ;;  %s752_s15 = sphi %s779_s15, %s14_s15  }
   0x2   : > { %p164_p1 = scmp.lt.s32.totalorder %s752_s15, 3 }
   0x4   : > { %p165_p2 = pnand %p602_p0, %p164_p1 }
   0x5   : > { %s603_s19 = sshll.u32 (!%p165_p2), %s598_s16, 3 }
   0x6   : > { %168 = sbr.rel (%p165_p2) target bundleno = 256 (0x100), region = 36  ;;  %p192_p3 = scmp.lt.s32.totalorder (!%p165_p2), %s603_s19, 15 }
   0xb   : > { %v730_v0 = vld [vmem:[%s911_s3 + $0x78] sm:$0xff]   ;;  %v732_v2 = vld [vmem:[%s911_s3 + $0x70] sm:$0xff]   ;;  %v734_v4 = vld [vmem:[%s911_s3 + $0x68] sm:$0xff]   ;;  %v231_v5 = vlaneseq  ;;  %s914_s19 = smov (!%p192_p3, %s603_s19), 15 }
   0xc   : > { %v731_v1 = vld [vmem:[%s911_s3 + $0x38] sm:$0xff]   ;;  %666 = vmatprep.subr.bf16.mxu0 %v730_v0  ;;  %706 = vmatprep.subr.bf16.mxu1 %v730_v0  ;;  %v733_v3 = vld [vmem:[%s911_s3 + $0x30] sm:$0xff]   ;;  %v735_v6 = vld [vmem:[%s911_s3 + $0x28] sm:$0xff]   ;;  %s634_s6 = sshll.u32 %s914_s19, 3  ;;  %s607_s8 = sshll.u32 %s914_s19, 2 }
   0xd   : > { %667 = vmatpush3.bf16.msra.mxu0 %v731_v1  ;;  %714 = vmatpush3.bf16.msra.mxu1 %v731_v1  ;;  %v736_v7 = vld [vmem:[%s911_s3 + $0x60] sm:$0xff]   ;;  %v232_v8 = vshrl.u32 %v231_v5, 7  ;;  %v738_v10 = vld [vmem:[%s911_s3 + $0x58] sm:$0xff]   ;;  %s820_s13 = scalar_lea.vmem %s908_s0, %s634_s6  ;;  %v740_v14 = vld [vmem:[%s911_s3 + $0x50] sm:$0xff]   ;;  %s202_s11 = scalar_lea.vmem %s912_s4, %s607_s8 }
   0xe   : > { %668 = vmatprep.subr.bf16.mxu0 %v732_v2  ;;  %707 = vmatprep.subr.bf16.mxu1 %v732_v2  ;;  %v737_v9 = vld [vmem:[%s911_s3 + $0x20] sm:$0xff]   ;;  %v739_v12 = vld [vmem:[%s911_s3 + $0x18] sm:$0xff]   ;;  %v206_v16 = vld [vmem:[%s820_s13 + $0x8] sm:$0xff] }
   0xf   : > { %v233_v11 = vsub.s32 0, %v232_v8  ;;  %v237_v13 = vsub.s32 1, %v232_v8  ;;  %v205_v15 = vld [vmem:[%s820_s13] sm:$0xff]  ;;  %v215_v20 = vunpack.c.l.bf16 %v206_v16  ;;  %v216_v21 = vunpack.c.h.bf16 %v206_v16  ;;  %v210_v24 = vld [vmem:[%s820_s13 + $0x28] sm:$0xff]  ;;  %v847_v29 = vld [vmem:[%s820_s13 + $0x10] sm:$0xff] }
  0x10   : > { %v229_v17 = vld [vmem:[%s909_s1] sm:$0x3]  ;;  %v213_v18 = vunpack.c.l.bf16 %v205_v15  ;;  %v214_v19 = vunpack.c.h.bf16 %v205_v15  ;;  %v741_v30 = vld [vmem:[%s911_s3 + $0x10] sm:$0xff]   ;;  %v223_v33 = vunpack.c.l.bf16 %v210_v24  ;;  %v224_v34 = vunpack.c.h.bf16 %v210_v24  ;;  %v742_v35 = vld [vmem:[%s911_s3 + $0x48] sm:$0xff]  }
  0x11   : > { %669 = vmatpush3.bf16.msra.mxu0 %v733_v3  ;;  %715 = vmatpush3.bf16.msra.mxu1 %v733_v3  ;;  %v257_v22 = vld [vmem:[%s910_s2] sm:$0x3]  ;;  %v838_v25 = vrot.slane %v229_v17, %v233_v11  ;;  %v840_v26 = vrot.slane %v229_v17, %v237_v13  ;;  %v208_v39 = vld [vmem:[%s820_s13 + $0x18] sm:$0xff]  ;;  %v218_v40 = vunpack.c.h.bf16 %v847_v29  ;;  %v743_v49 = vld [vmem:[%s911_s3 + $0x8] sm:$0xff]  }
  0x12   : > { %670 = vmatprep.subr.bf16.mxu0 %v734_v4  ;;  %708 = vmatprep.subr.bf16.mxu1 %v734_v4  ;;  %v209_v23 = vld [vmem:[%s820_s13 + $0x20] sm:$0xff]  ;;  %v842_v27 = vrot.slane %v257_v22, %v233_v11  ;;  %v844_v28 = vrot.slane %v257_v22, %v237_v13  ;;  %v220_v53 = vunpack.c.h.bf16 %v208_v39  ;;  %v211_v59 = vld [vmem:[%s820_s13 + $0x30] sm:$0xff]  ;;  %v212_v0 = vld [vmem:[%s820_s13 + $0x38] sm:$0xff]  ;;  %v217_v13 = vunpack.c.l.bf16 %v847_v29 }
  0x13   : > { %v221_v31 = vunpack.c.l.bf16 %v209_v23  ;;  %v222_v32 = vunpack.c.h.bf16 %v209_v23  ;;  %v242_v36 = vmul.f32 %v840_v26, %v214_v19  ;;  %v244_v37 = vmul.f32 %v840_v26, %v216_v21  ;;  %v744_v54 = vld [vmem:[%s911_s3 + $0x40] sm:$0xff]  }
  0x14   : > { %v241_v38 = vmul.f32 %v838_v25, %v213_v18  ;;  %v252_v42 = vmul.f32 %v840_v26, %v224_v34  ;;  %v243_v43 = vmul.f32 %v838_v25, %v215_v20  ;;  %v251_v48 = vmul.f32 %v838_v25, %v223_v33  ;;  %v745_v5 = vld [vmem:[%s911_s3] sm:$0xff]  }
  0x15   : > { %671 = vmatpush3.bf16.msra.mxu0 %v735_v6  ;;  %716 = vmatpush3.bf16.msra.mxu1 %v735_v6  ;;  %v250_v41 = vmul.f32 %v840_v26, %v222_v32  ;;  %v249_v44 = vmul.f32 %v838_v25, %v221_v31  ;;  %v270_v45 = vadd.f32 %v844_v28, %v242_v36  ;;  %v219_v16 = vunpack.c.l.bf16 %v208_v39 }
  0x16   : > { %672 = vmatprep.subr.bf16.mxu0 %v736_v7  ;;  %709 = vmatprep.subr.bf16.mxu1 %v736_v7  ;;  %v272_v46 = vadd.f32 %v844_v28, %v244_v37  ;;  %v269_v47 = vadd.f32 %v842_v27, %v241_v38  ;;  %v280_v51 = vadd.f32 %v844_v28, %v252_v42  ;;  %v225_v17 = vunpack.c.l.bf16 %v211_v59 }
  0x17   : > { %v278_v50 = vadd.f32 %v844_v28, %v250_v41  ;;  %v271_v52 = vadd.f32 %v842_v27, %v243_v43  ;;  %v286_v55 = vmax.f32 %v270_v45, 0.0  ;;  %v277_v58 = vadd.f32 %v842_v27, %v249_v44 }
  0x18   : > { %v288_v56 = vmax.f32 %v272_v46, 0.0  ;;  %v285_v57 = vmax.f32 %v269_v47, 0.0  ;;  %v296_v61 = vmax.f32 %v280_v51, 0.0  ;;  %v279_v63 = vadd.f32 %v842_v27, %v251_v48 }
  0x19   : > { %673 = vmatpush3.bf16.msra.mxu0 %v737_v9  ;;  %717 = vmatpush3.bf16.msra.mxu1 %v737_v9  ;;  %v294_v60 = vmax.f32 %v278_v50, 0.0  ;;  %v287_v62 = vmax.f32 %v271_v52, 0.0  ;;  %v293_v2 = vmax.f32 %v277_v58, 0.0  ;;  %v246_v3 = vmul.f32 %v840_v26, %v218_v40 }
  0x1a   : > { %674 = vmatprep.subr.bf16.mxu0 %v738_v10  ;;  %710 = vmatprep.subr.bf16.mxu1 %v738_v10  ;;  %v302_v1 = vpack.c.bf16 %v288_v56, %v286_v55  ;;  %v248_v4 = vmul.f32 %v840_v26, %v220_v53  ;;  %v295_v8 = vmax.f32 %v279_v63, 0.0  ;;  %v226_v9 = vunpack.c.h.bf16 %v211_v59 }
  0x1b   : > { %v306_v6 = vpack.c.bf16 %v296_v61, %v294_v60  ;;  %v301_v7 = vpack.c.bf16 %v287_v62, %v285_v57  ;;  %v274_v10 = vadd.f32 %v844_v28, %v246_v3  ;;  %v245_v21 = vmul.f32 %v838_v25, %v217_v13 }
  0x1c   : > { %v276_v11 = vadd.f32 %v844_v28, %v248_v4  ;;  %469 = vmatprep.mubr.bf16.mxu0 %v302_v1  ;;  %v254_v15 = vmul.f32 %v840_v26, %v226_v9  ;;  %v247_v23 = vmul.f32 %v838_v25, %v219_v16  ;;  %v227_v24 = vunpack.c.l.bf16 %v212_v0 }
  0x1d   : > { %675 = vmatpush3.bf16.msra.mxu0 %v739_v12  ;;  %718 = vmatpush3.bf16.msra.mxu1 %v739_v12  ;;  %v228_v12 = vunpack.c.h.bf16 %v212_v0  ;;  %v290_v18 = vmax.f32 %v274_v10, 0.0  ;;  %v253_v29 = vmul.f32 %v838_v25, %v225_v17  ;;  %v273_v32 = vadd.f32 %v842_v27, %v245_v21 }
  0x1e   : > { %676 = vmatprep.subr.bf16.mxu0 %v740_v14  ;;  %711 = vmatprep.subr.bf16.mxu1 %v740_v14  ;;  %v305_v14 = vpack.c.bf16 %v295_v8, %v293_v2  ;;  %v292_v19 = vmax.f32 %v276_v11, 0.0  ;;  %v282_v22 = vadd.f32 %v844_v28, %v254_v15  ;;  %v275_v34 = vadd.f32 %v842_v27, %v247_v23 }
  0x1f   : > { %485 = vmatprep.mubr.bf16.mxu1 %v306_v6  ;;  %v256_v20 = vmul.f32 %v840_v26, %v228_v12  ;;  %v255_v26 = vmul.f32 %v838_v25, %v227_v24  ;;  %v289_v37 = vmax.f32 %v273_v32, 0.0 }
  0x20   : > { %v298_v33 = vmax.f32 %v282_v22, 0.0  ;;  %v291_v38 = vmax.f32 %v275_v34, 0.0 }
  0x21   : > { %677 = vmatpush3.bf16.msra.mxu0 %v741_v30  ;;  %719 = vmatpush3.bf16.msra.mxu1 %v741_v30  ;;  %v304_v30 = vpack.c.bf16 %v292_v19, %v290_v18  ;;  %v284_v31 = vadd.f32 %v844_v28, %v256_v20  ;;  %v283_v39 = vadd.f32 %v842_v27, %v255_v26 }
  0x22   : > { %678 = vmatprep.subr.bf16.mxu0 %v742_v35  ;;  %712 = vmatprep.subr.bf16.mxu1 %v742_v35  ;;  %v281_v35 = vadd.f32 %v842_v27, %v253_v29  ;;  %v303_v42 = vpack.c.bf16 %v291_v38, %v289_v37 }
  0x23   : > { %v300_v36 = vmax.f32 %v284_v31, 0.0  ;;  %v299_v41 = vmax.f32 %v283_v39, 0.0 }
  0x24   : > { %v297_v40 = vmax.f32 %v281_v35, 0.0 }
  0x25   : > { %679 = vmatpush3.bf16.msra.mxu0 %v743_v49  ;;  %720 = vmatpush3.bf16.msra.mxu1 %v743_v49  ;;  %v308_v28 = vpack.c.bf16 %v300_v36, %v298_v33 }
  0x26   : > { %680 = vmatprep.subr.bf16.mxu0 %v744_v54  ;;  %713 = vmatprep.subr.bf16.mxu1 %v744_v54  ;;  %v307_v43 = vpack.c.bf16 %v299_v41, %v297_v40 }
  0x29   : > { %681 = vmatpush3.bf16.msra.mxu0 %v745_v5  ;;  %721 = vmatpush3.bf16.msra.mxu1 %v745_v5 }
  0x2c   : > { %470 = vmatmul.mubr.bf16.vlgmr.msra.gmra.mxu0 %v301_v7  ;;  %486 = vmatmul.mubr.bf16.vlgmr.msra.gmra.mxu1 %v305_v14 }
  0x2d   : > { %477 = vmatprep.mubr.bf16.mxu0 %v304_v30  ;;  %493 = vmatprep.mubr.bf16.mxu1 %v308_v28 }
  0x34   : > { %478 = vmatmul.mubr.bf16.gmra.mxu0 %v303_v42  ;;  %494 = vmatmul.mubr.bf16.gmra.mxu1 %v307_v43 }
  0xec   : > { %v682_v25 = vpop.f32.mrf.mxu0  ;;  %v694_v44 = vpop.f32.mrf.mxu1 }
  0xee   : > { %v683_v45 = vpop.f32.mrf.mxu0  ;;  %v695_v46 = vpop.f32.mrf.mxu1 }
  0xef   : > { %v684_v51 = vadd.f32 %v683_v45, %v682_v25  ;;  %v696_v52 = vadd.f32 %v695_v46, %v694_v44 }
  0xf0   : > { %v685_v47 = vpop.f32.mrf.mxu0  ;;  %v697_v48 = vpop.f32.mrf.mxu1 }
  0xf2   : > { %v686_v49 = vpop.f32.mrf.mxu0  ;;  %v698_v50 = vpop.f32.mrf.mxu1 }
  0xf3   : > { %v687_v27 = vadd.f32 %v686_v49, %v685_v47  ;;  %v699_v53 = vadd.f32 %v698_v50, %v697_v48 }
  0xf4   : > { %v688_v54 = vpop.f32.mrf.mxu0  ;;  %v700_v55 = vpop.f32.mrf.mxu1 }
  0xf5   : > { %v646_v56 = vpack.c.bf16 %v687_v27, %v684_v51  ;;  %v656_v57 = vpack.c.bf16 %v699_v53, %v696_v52 }
  0xf6   : > { %v689_v58 = vpop.f32.mrf.mxu0  ;;  %v701_v59 = vpop.f32.mrf.mxu1 }
  0xf7   : > { %647 = vst [vmem:[%s202_s11] sm:$0xff] %v646_v56   ;;  %664 = vst [vmem:[%s202_s11 + $0x10] sm:$0xff] %v656_v57   ;;  %v690_v0 = vadd.f32 %v689_v58, %v688_v54  ;;  %v702_v1 = vadd.f32 %v701_v59, %v700_v55 }
  0xf8   : > { %v691_v60 = vpop.f32.mrf.mxu0  ;;  %v703_v61 = vpop.f32.mrf.mxu1 }
  0xfa   : > { %v692_v62 = vpop.f32.mrf.mxu0  ;;  %v704_v63 = vpop.f32.mrf.mxu1 }
  0xfb   : > { %v693_v2 = vadd.f32 %v692_v62, %v691_v60  ;;  %v705_v3 = vadd.f32 %v704_v63, %v703_v61 }
  0xfd   : > { %v651_v4 = vpack.c.bf16 %v693_v2, %v690_v0  ;;  %v661_v5 = vpack.c.bf16 %v705_v3, %v702_v1 }
  0xff   : > { %663 = vst [vmem:[%s202_s11 + $0x8] sm:$0xff] %v651_v4   ;;  %665 = vst [vmem:[%s202_s11 + $0x18] sm:$0xff] %v661_v5  }
 0x100 PF: > { %s14_s15 = sadd.s32 1, %s752_s15  }
 0x101   : > { %p11_p4 = scmp.ge.s32.totalorder %s14_s15, 4  }
 0x103   :  { %13 = sbr.rel (!%p11_p4) target bundleno = 1 (0x1), region = 66 }

// kernel: densenet121_forward.141
= control target key start
LH: loop header
LB: loop body
LE: loop exit
PB: predicated region body
PF: predicated region fallthrough
CT: control target
= control target key end

     0   :  { %s388_s6 = smov 0   ;;  %s390_s7 = smov 0   ;;  %s440_s0 = inlined_call_operand.vmem [shape: bf16[4,32,128], index: 0, kind: input, shape index: {}]   ;;  %s441_s1 = inlined_call_operand.vmem [shape: bf16[32,128], index: 1, kind: output, shape index: {}]  }
   0x1   :  { %s392_s8 = smov 0  }
   0x2 LB: > { %s288_s9 = sadd.s32 4294967295, %s376_s8   ;;  %s405_s10 = sadd.s32 1, %s376_s8   ;;  %s376_s8 = sphi %s392_s8, %s444_s8   ;;  %s372_s7 = sphi %s390_s7, %s443_s7   ;;  %s368_s6 = sphi %s388_s6, %s442_s6  }
   0x3   : > { %s15_s11 = ssub.s32 %s376_s8, %s405_s10  ;;  %s18_s12 = sadd.s32 1, %s372_s7 }
   0x4   : > { %p16_p0 = scmp.eq.s32.totalorder %s15_s11, 0  ;;  %p25_p1 = scmp.ne.s32.totalorder %s372_s7, %s368_s6 }
   0x5   : > { %p26_p2 = scmp.eq.s32.totalorder %s376_s8, 0  ;;  %p291_p4 = scmp.ge.s32.totalorder %s376_s8, 2 }
   0x6   : > { %s414_s13 = scalar_select %p16_p0, %s372_s7, %s18_s12  }
   0x7   : > { %p27_p3 = por %p26_p2, %p25_p1  ;;  %77 = sbr.rel (%p291_p4) target bundleno = 18 (0x12), region = 16 }
   0xc   : > { %80 = sbr.rel (!%p27_p3) target bundleno = 18 (0x12), region = 20  ;;  %s82_s14 = sand.u32 (%p27_p3), 1, %s372_s7  }
   0xd   : > { %s303_s15 = sshll.u32 (%p27_p3), %s376_s8, 3  ;;  %s292_s16 = sshll.u32 (%p27_p3), %s82_s14, 5 }
   0xe   : > { %s87_s19 = scalar_lea.vmem (%p27_p3), %s440_s0, %s303_s15  ;;  %s84_s20 = scalar_lea.vmem (%p27_p3), [#allocation2], %s292_s16 }
   0xf   : > { %v104_v0 = vld [vmem:[%s87_s19] sm:$0xff] (%p27_p3)   ;;  %v108_v1 = vld [vmem:[%s87_s19 + $0x10] sm:$0xff] (%p27_p3)  }
  0x10   : > { %v112_v2 = vld [vmem:[%s87_s19 + $0x20] sm:$0xff] (%p27_p3)   ;;  %105 = vst [vmem:[%s84_s20] sm:$0xff] (%p27_p3), %v104_v0   ;;  %109 = vst [vmem:[%s84_s20 + $0x8] sm:$0xff] (%p27_p3), %v108_v1   ;;  %v116_v3 = vld [vmem:[%s87_s19 + $0x30] sm:$0xff] (%p27_p3)  }
  0x11   : > { %113 = vst [vmem:[%s84_s20 + $0x10] sm:$0xff] %v112_v2   ;;  %117 = vst [vmem:[%s84_s20 + $0x18] sm:$0xff] %v116_v3  }
  0x12 PF: > { %p295_p5 = scmp.ge.s32.totalorder %s376_s8, 1  ;;  %p158_p6 = scmp.lt.s32.totalorder %s376_s8, 3 }
  0x14   : > { %p159_p7 = pnand %p295_p5, %p158_p6 }
  0x15   : > { %s165_s21 = sand.u32 (!%p159_p7), 1, %s368_s6   ;;  %s297_s22 = sshll.u32 (!%p159_p7), %s288_s9, 1 }
  0x16   : > { %162 = sbr.rel (%p159_p7) target bundleno = 41 (0x29), region = 61  ;;  %s296_s23 = sshll.u32 (!%p159_p7), %s165_s21, 5 }
  0x17   : > { %p186_p8 = scmp.lt.s32.totalorder (!%p159_p7), %s297_s22, 3  ;;  %s167_s24 = scalar_lea.vmem (!%p159_p7), [#allocation2], %s296_s23 }
  0x1b   : > { %v307_v4 = vld [vmem:[%s167_s24] sm:$0xff]   ;;  %v327_v5 = vld [vmem:[%s167_s24 + $0x8] sm:$0xff]   ;;  %v328_v6 = vld [vmem:[%s167_s24 + $0x10] sm:$0xff]   ;;  %s446_s22 = smov (!%p186_p8, %s297_s22), 3 }
  0x1c   : > { %v308_v7 = vunpack.c.l.bf16 %v307_v4  ;;  %v309_v8 = vunpack.c.h.bf16 %v307_v4  ;;  %v312_v9 = vunpack.c.l.bf16 %v327_v5  ;;  %v313_v10 = vunpack.c.h.bf16 %v327_v5  ;;  %v329_v11 = vld [vmem:[%s167_s24 + $0x18] sm:$0xff]   ;;  %s298_s25 = sshll.u32 %s446_s22, 2 }
  0x1d   : > { %v316_v12 = vunpack.c.l.bf16 %v328_v6  ;;  %v317_v13 = vunpack.c.h.bf16 %v328_v6  ;;  %v320_v14 = vunpack.c.l.bf16 %v329_v11  ;;  %v321_v15 = vunpack.c.h.bf16 %v329_v11  ;;  %s189_s28 = scalar_lea.vmem %s441_s1, %s298_s25 }
  0x1e   : > { %v207_v16 = vadd.f32 %v312_v9, %v308_v7  ;;  %v210_v17 = vadd.f32 %v313_v10, %v309_v8 }
  0x20   : > { %v208_v18 = vadd.f32 %v316_v12, %v207_v16  ;;  %v211_v19 = vadd.f32 %v317_v13, %v210_v17 }
  0x22   : > { %v209_v20 = vadd.f32 %v320_v14, %v208_v18  ;;  %v212_v21 = vadd.f32 %v321_v15, %v211_v19 }
  0x24   : > { %v214_v22 = vmul.f32 0.25, %v209_v20  ;;  %v215_v23 = vmul.f32 0.25, %v212_v21 }
  0x26   : > { %v325_v24 = vpack.c.bf16 %v215_v23, %v214_v22 }
  0x28   : > { %326 = vst [vmem:[%s189_s28] sm:$0xff] %v325_v24  }
  0x29 PF: > { %p8_p9 = scmp.ge.s32.totalorder %s405_s10, 4   ;;  %s442_s6 = smov %s372_s7 }
  0x2a   : > { %s443_s7 = smov %s414_s13  ;;  %s444_s8 = smov %s405_s10 }
  0x2b   :  { %10 = sbr.rel (!%p8_p9) target bundleno = 2 (0x2), region = 100 }

// kernel: densenet121_forward.142
= control target key start
LH: loop header
LB: loop body
LE: loop exit
PB: predicated region body
PF: predicated region fallthrough
CT: control target
= control target key end

     0   :  { %s691_s21 = smov 0   ;;  %s693_s22 = smov 0   ;;  %s779_s0 = inlined_call_operand.vmem [shape: bf16[32,512], index: 0, kind: input, shape index: {}]   ;;  %s780_s1 = inlined_call_operand.vmem [shape: f32[1,128], index: 1, kind: input, shape index: {}]   ;;  %s781_s2 = inlined_call_operand.vmem [shape: f32[1,128], index: 2, kind: input, shape index: {}]   ;;  %s782_s3 = inlined_call_operand.vmem [shape: bf16[128,128], index: 3, kind: input, shape index: {}]   ;;  %s783_s4 = inlined_call_operand.vmem [shape: f32[1,128], index: 4, kind: input, shape index: {}]   ;;  %s784_s5 = inlined_call_operand.vmem [shape: f32[1,128], index: 5, kind: input, shape index: {}]   ;;  %s785_s6 = inlined_call_operand.vmem [shape: bf16[32,128], index: 6, kind: output, shape index: {}]  }
   0x1   :  { %s695_s23 = smov 0  }
   0x2 LB: > { %s526_s24 = sadd.s32 4294967295, %s652_s23   ;;  %s708_s25 = sadd.s32 1, %s652_s23   ;;  %s652_s23 = sphi %s695_s23, %s788_s23   ;;  %s648_s22 = sphi %s693_s22, %s787_s22   ;;  %s644_s21 = sphi %s691_s21, %s786_s21  }
   0x3   : > { %s20_s26 = ssub.s32 %s652_s23, %s708_s25  ;;  %s23_s27 = sadd.s32 1, %s648_s22 }
   0x4   : > { %p21_p0 = scmp.eq.s32.totalorder %s20_s26, 0  ;;  %p30_p1 = scmp.ne.s32.totalorder %s648_s22, %s644_s21 }
   0x5   : > { %p31_p2 = scmp.eq.s32.totalorder %s652_s23, 0  ;;  %p529_p4 = scmp.ge.s32.totalorder %s652_s23, 2 }
   0x6   : > { %s717_s28 = scalar_select %p21_p0, %s648_s22, %s23_s27  }
   0x7   : > { %p32_p3 = por %p31_p2, %p30_p1  ;;  %202 = sbr.rel (%p529_p4) target bundleno = 17 (0x11), region = 36 }
   0xc   : > { %205 = sbr.rel (!%p32_p3) target bundleno = 17 (0x11), region = 40  ;;  %s207_s29 = sand.u32 (%p32_p3), 1, %s648_s22  }
   0xd   : > { %s555_s30 = sshll.u32 (%p32_p3), %s652_s23, 5  ;;  %s530_s7 = sshll.u32 (%p32_p3), %s207_s29, 3 }
   0xe   : > { %s213_s10 = scalar_lea.vmem (%p32_p3), %s779_s0, %s555_s30  ;;  %s209_s11 = scalar_lea.vmem (%p32_p3), [#allocation2], %s530_s7 }
   0xf   : > { %v230_v0 = vld [vmem:[%s213_s10] sm:$0xf] (%p32_p3)  ;;  %v232_v1 = vld [vmem:[%s213_s10 + $0x10] sm:$0xf] (%p32_p3) }
  0x10   : > { %231 = vst [vmem:[%s209_s11] sm:$0xf] (%p32_p3), %v230_v0  ;;  %233 = vst [vmem:[%s209_s11 + $0x4] sm:$0xf] (%p32_p3), %v232_v1 }
  0x11 PF: > { %p534_p5 = scmp.ge.s32.totalorder %s652_s23, 1  ;;  %p260_p6 = scmp.lt.s32.totalorder %s652_s23, 3 }
  0x13   : > { %p261_p7 = pnand %p534_p5, %p260_p6 }
  0x14   : > { %s267_s16 = sand.u32 (!%p261_p7), 1, %s644_s21  }
  0x15   : > { %264 = sbr.rel (%p261_p7) target bundleno = 265 (0x109), region = 81  ;;  %s535_s17 = sshll.u32 (!%p261_p7), %s267_s16, 3 }
  0x16   : > { %s269_s27 = scalar_lea.vmem (!%p261_p7), [#allocation2], %s535_s17  ;;  %s536_s16 = sshll.u32 (!%p261_p7), %s526_s24, 1 }
  0x17   : > { %p298_p8 = scmp.lt.s32.totalorder (!%p261_p7), %s536_s16, 3 }
  0x1a   : > { %v622_v2 = vld [vmem:[%s782_s3 + $0x38] sm:$0xff]   ;;  %v654_v3 = vmov 0.0   ;;  %v623_v4 = vld [vmem:[%s782_s3 + $0x30] sm:$0xff]   ;;  %vm655_vm0 = vmmov 0   ;;  %v624_v5 = vld [vmem:[%s782_s3 + $0x28] sm:$0xff]   ;;  %s790_s16 = smov (!%p298_p8, %s536_s16), 3 }
  0x1b   : > { %576 = vmatprep.subr.bf16.mxu0 %v654_v3  ;;  %592 = vmatprep.mubr.msk.bf16.mxu0 %vm655_vm0, %v654_v3  ;;  %v625_v6 = vld [vmem:[%s782_s3 + $0x20] sm:$0xff]   ;;  %v626_v10 = vld [vmem:[%s782_s3 + $0x18] sm:$0xff]   ;;  %v627_v14 = vld [vmem:[%s782_s3 + $0x10] sm:$0xff]   ;;  %s537_s26 = sshll.u32 %s790_s16, 2 }
  0x1c   : > { %577 = vmatpush3.bf16.msra.mxu0 %v622_v2  ;;  %v559_v7 = vld [vmem:[%s269_s27] sm:$0xff]   ;;  %s301_s27 = scalar_lea.vmem %s785_s6, %s537_s26 }
  0x1d   : > { %578 = vmatprep.subr.bf16.mxu0 %v654_v3  ;;  %v560_v8 = vunpack.c.l.bf16 %v559_v7  ;;  %v561_v9 = vunpack.c.h.bf16 %v559_v7  ;;  %v538_v11 = vld [vmem:[%s780_s1] ss:$0 sm:$0xff]  ;;  %v628_v18 = vld [vmem:[%s782_s3 + $0x8] sm:$0xff]  }
  0x1e   : > { %v539_v15 = vld [vmem:[%s781_s2] ss:$0 sm:$0xff] }
  0x1f   : > { %v315_v12 = vmul.f32 %v560_v8, %v538_v11  ;;  %v316_v13 = vmul.f32 %v561_v9, %v538_v11  ;;  %v629_v21 = vld [vmem:[%s782_s3] sm:$0xff]  }
  0x20   : > { %579 = vmatpush3.bf16.msra.mxu0 %v623_v4  ;;  %v548_v23 = vld [vmem:[%s783_s4] ss:$0 sm:$0xff] }
  0x21   : > { %580 = vmatprep.subr.bf16.mxu0 %v654_v3  ;;  %v324_v16 = vadd.f32 %v539_v15, %v315_v12  ;;  %v325_v17 = vadd.f32 %v539_v15, %v316_v13  ;;  %v549_v26 = vld [vmem:[%s784_s5] ss:$0 sm:$0xff] }
  0x23   : > { %v326_v19 = vmax.f32 %v324_v16, 0.0  ;;  %v327_v20 = vmax.f32 %v325_v17, 0.0 }
  0x24   : > { %581 = vmatpush3.bf16.msra.mxu0 %v624_v5 }
  0x25   : > { %582 = vmatprep.subr.bf16.mxu0 %v654_v3  ;;  %v328_v22 = vpack.c.bf16 %v327_v20, %v326_v19 }
  0x28   : > { %583 = vmatpush3.bf16.msra.mxu0 %v625_v6 }
  0x29   : > { %584 = vmatprep.subr.bf16.mxu0 %v654_v3 }
  0x2c   : > { %585 = vmatpush3.bf16.msra.mxu0 %v626_v10 }
  0x2d   : > { %586 = vmatprep.subr.bf16.mxu0 %v654_v3 }
  0x30   : > { %587 = vmatpush3.bf16.msra.mxu0 %v627_v14 }
  0x31   : > { %588 = vmatprep.subr.bf16.mxu0 %v654_v3 }
  0x34   : > { %589 = vmatpush3.bf16.msra.mxu0 %v628_v18 }
  0x35   : > { %590 = vmatprep.subr.bf16.mxu0 %v654_v3 }
  0x38   : > { %591 = vmatpush3.bf16.msra.mxu0 %v629_v21 }
  0x3b   : > { %593 = vmatmul.mubr.bf16.vlgmr.msra.gmra.mxu0 %v328_v22 }
  0xfb   : > { %v427_v24 = vpop.f32.mrf.mxu0 }
  0xfc   : > { %v441_v25 = vmul.f32 %v548_v23, %v427_v24 }
  0xfd   : > { %v594_v27 = vpop.f32.mrf.mxu0 }
  0xfe   : > { %v450_v29 = vadd.f32 %v549_v26, %v441_v25 }
  0xff   : > { %v430_v28 = vpop.f32.mrf.mxu0 }
 0x100   : > { %v442_v30 = vmul.f32 %v548_v23, %v430_v28  ;;  %v452_v33 = vmax.f32 %v450_v29, 0.0 }
 0x101   : > { %v595_v31 = vpop.f32.mrf.mxu0 }
 0x102   : > { %v451_v32 = vadd.f32 %v549_v26, %v442_v30 }
 0x104   : > { %v453_v34 = vmax.f32 %v451_v32, 0.0 }
 0x106   : > { %v565_v35 = vpack.c.bf16 %v453_v34, %v452_v33 }
 0x108   : > { %566 = vst [vmem:[%s301_s27] sm:$0xff] %v565_v35  }
 0x109 PF: > { %p13_p9 = scmp.ge.s32.totalorder %s708_s25, 4   ;;  %s786_s21 = smov %s648_s22 }
 0x10a   : > { %s787_s22 = smov %s717_s28  ;;  %s788_s23 = smov %s708_s25 }
 0x10b   :  { %15 = sbr.rel (!%p13_p9) target bundleno = 2 (0x2), region = 120 }

// kernel: densenet121_forward.144
= control target key start
LH: loop header
LB: loop body
LE: loop exit
PB: predicated region body
PF: predicated region fallthrough
CT: control target
= control target key end

     0   :  { %s765_s21 = smov 0   ;;  %s767_s22 = smov 0   ;;  %s877_s0 = inlined_call_operand.vmem [shape: bf16[32,512], index: 0, kind: input, shape index: {}]   ;;  %s878_s1 = inlined_call_operand.vmem [shape: f32[1,256], index: 1, kind: input, shape index: {}]   ;;  %s879_s2 = inlined_call_operand.vmem [shape: f32[1,256], index: 2, kind: input, shape index: {}]   ;;  %s880_s3 = inlined_call_operand.vmem [shape: bf16[256,128], index: 3, kind: input, shape index: {}]   ;;  %s881_s4 = inlined_call_operand.vmem [shape: f32[1,128], index: 4, kind: input, shape index: {}]   ;;  %s882_s5 = inlined_call_operand.vmem [shape: f32[1,128], index: 5, kind: input, shape index: {}]   ;;  %s883_s6 = inlined_call_operand.vmem [shape: bf16[32,128], index: 6, kind: output, shape index: {}]  }
   0x1   :  { %s769_s23 = smov 0  }
   0x2 LB: > { %s601_s24 = sadd.s32 4294967295, %s728_s23   ;;  %s782_s25 = sadd.s32 1, %s728_s23   ;;  %s728_s23 = sphi %s769_s23, %s886_s23   ;;  %s724_s22 = sphi %s767_s22, %s885_s22   ;;  %s720_s21 = sphi %s765_s21, %s884_s21  }
   0x3   : > { %s20_s26 = ssub.s32 %s728_s23, %s782_s25  ;;  %s23_s27 = sadd.s32 1, %s724_s22 }
   0x4   : > { %p21_p0 = scmp.eq.s32.totalorder %s20_s26, 0  ;;  %p30_p1 = scmp.ne.s32.totalorder %s724_s22, %s720_s21 }
   0x5   : > { %p31_p2 = scmp.eq.s32.totalorder %s728_s23, 0  ;;  %p604_p4 = scmp.ge.s32.totalorder %s728_s23, 2 }
   0x6   : > { %s791_s28 = scalar_select %p21_p0, %s724_s22, %s23_s27  }
   0x7   : > { %p32_p3 = por %p31_p2, %p30_p1  ;;  %202 = sbr.rel (%p604_p4) target bundleno = 17 (0x11), region = 36 }
   0xc   : > { %205 = sbr.rel (!%p32_p3) target bundleno = 17 (0x11), region = 40  ;;  %s207_s29 = sand.u32 (%p32_p3), 1, %s724_s22  }
   0xd   : > { %s636_s30 = sshll.u32 (%p32_p3), %s728_s23, 5  ;;  %s605_s7 = sshll.u32 (%p32_p3), %s207_s29, 4 }
   0xe   : > { %s213_s10 = scalar_lea.vmem (%p32_p3), %s877_s0, %s636_s30  ;;  %s209_s11 = scalar_lea.vmem (%p32_p3), [#allocation2], %s605_s7 }
   0xf   : > { %v244_v0 = vld [vmem:[%s213_s10] sm:$0xff] (%p32_p3)  ;;  %v246_v1 = vld [vmem:[%s213_s10 + $0x10] sm:$0xff] (%p32_p3) }
  0x10   : > { %245 = vst [vmem:[%s209_s11] sm:$0xff] (%p32_p3), %v244_v0  ;;  %247 = vst [vmem:[%s209_s11 + $0x8] sm:$0xff] (%p32_p3), %v246_v1 }
  0x11 PF: > { %p609_p5 = scmp.ge.s32.totalorder %s728_s23, 1  ;;  %p252_p6 = scmp.lt.s32.totalorder %s728_s23, 3 }
  0x13   : > { %p253_p7 = pnand %p609_p5, %p252_p6 }
  0x14   : > { %s259_s30 = sand.u32 (!%p253_p7), 1, %s720_s21   ;;  %s611_s14 = sshll.u32 (!%p253_p7), %s601_s24, 1 }
  0x15   : > { %256 = sbr.rel (%p253_p7) target bundleno = 269 (0x10d), region = 78  ;;  %s610_s9 = sshll.u32 (!%p253_p7), %s259_s30, 4 }
  0x16   : > { %s261_s17 = scalar_lea.vmem (!%p253_p7), [#allocation2], %s610_s9  ;;  %p290_p8 = scmp.lt.s32.totalorder (!%p253_p7), %s611_s14, 3 }
  0x1a   : > { %v690_v2 = vld [vmem:[%s880_s3 + $0x78] sm:$0xff]   ;;  %v692_v4 = vld [vmem:[%s880_s3 + $0x70] sm:$0xff]   ;;  %v694_v6 = vld [vmem:[%s880_s3 + $0x68] sm:$0xff]   ;;  %v304_v7 = vlaneseq  ;;  %s888_s14 = smov (!%p290_p8, %s611_s14), 3 }
  0x1b   : > { %v691_v3 = vld [vmem:[%s880_s3 + $0x38] sm:$0xff]   ;;  %644 = vmatprep.subr.bf16.mxu0 %v690_v2  ;;  %v693_v5 = vld [vmem:[%s880_s3 + $0x30] sm:$0xff]   ;;  %v695_v8 = vld [vmem:[%s880_s3 + $0x28] sm:$0xff]   ;;  %s612_s23 = sshll.u32 %s888_s14, 2 }
  0x1c   : > { %645 = vmatpush3.bf16.msra.mxu0 %v691_v3  ;;  %v696_v9 = vld [vmem:[%s880_s3 + $0x60] sm:$0xff]   ;;  %v305_v10 = vshrl.u32 %v304_v7, 7  ;;  %v698_v12 = vld [vmem:[%s880_s3 + $0x58] sm:$0xff]   ;;  %v700_v16 = vld [vmem:[%s880_s3 + $0x50] sm:$0xff]   ;;  %s293_s19 = scalar_lea.vmem %s883_s6, %s612_s23 }
  0x1d   : > { %646 = vmatprep.subr.bf16.mxu0 %v692_v4  ;;  %v697_v11 = vld [vmem:[%s880_s3 + $0x20] sm:$0xff]   ;;  %v699_v14 = vld [vmem:[%s880_s3 + $0x18] sm:$0xff]   ;;  %v701_v29 = vld [vmem:[%s880_s3 + $0x10] sm:$0xff]  }
  0x1e   : > { %v306_v13 = vsub.s32 0, %v305_v10  ;;  %v310_v15 = vsub.s32 1, %v305_v10  ;;  %v296_v17 = vld [vmem:[%s261_s17] sm:$0xff]  ;;  %v297_v18 = vld [vmem:[%s261_s17 + $0x8] sm:$0xff] }
  0x1f   : > { %v302_v19 = vld [vmem:[%s878_s1] sm:$0x3]  ;;  %v298_v20 = vunpack.c.l.bf16 %v296_v17  ;;  %v299_v21 = vunpack.c.h.bf16 %v296_v17  ;;  %v300_v22 = vunpack.c.l.bf16 %v297_v18  ;;  %v301_v23 = vunpack.c.h.bf16 %v297_v18  ;;  %v702_v30 = vld [vmem:[%s880_s3 + $0x48] sm:$0xff]  }
  0x20   : > { %647 = vmatpush3.bf16.msra.mxu0 %v693_v5  ;;  %v318_v24 = vld [vmem:[%s879_s2] sm:$0x3]  ;;  %v307_v25 = vrot.slane %v302_v19, %v306_v13  ;;  %v311_v26 = vrot.slane %v302_v19, %v310_v15  ;;  %v703_v39 = vld [vmem:[%s880_s3 + $0x8] sm:$0xff]  }
  0x21   : > { %648 = vmatprep.subr.bf16.mxu0 %v694_v6  ;;  %v323_v27 = vrot.slane %v318_v24, %v306_v13  ;;  %v327_v28 = vrot.slane %v318_v24, %v310_v15  ;;  %v704_v40 = vld [vmem:[%s880_s3 + $0x40] sm:$0xff]  }
  0x22   : > { %v315_v31 = vmul.f32 %v311_v26, %v299_v21  ;;  %v317_v32 = vmul.f32 %v311_v26, %v301_v23  ;;  %v314_v33 = vmul.f32 %v307_v25, %v298_v20  ;;  %v316_v34 = vmul.f32 %v307_v25, %v300_v22  ;;  %v705_v46 = vld [vmem:[%s880_s3] sm:$0xff]  }
  0x23   : > { %v629_v50 = vld [vmem:[%s881_s4] ss:$0 sm:$0xff] }
  0x24   : > { %649 = vmatpush3.bf16.msra.mxu0 %v695_v8  ;;  %v331_v35 = vadd.f32 %v327_v28, %v315_v31  ;;  %v333_v36 = vadd.f32 %v327_v28, %v317_v32  ;;  %v330_v37 = vadd.f32 %v323_v27, %v314_v33  ;;  %v332_v38 = vadd.f32 %v323_v27, %v316_v34  ;;  %v630_v54 = vld [vmem:[%s882_s5] ss:$0 sm:$0xff] }
  0x25   : > { %650 = vmatprep.subr.bf16.mxu0 %v696_v9 }
  0x26   : > { %v335_v41 = vmax.f32 %v331_v35, 0.0  ;;  %v337_v42 = vmax.f32 %v333_v36, 0.0  ;;  %v334_v44 = vmax.f32 %v330_v37, 0.0  ;;  %v336_v45 = vmax.f32 %v332_v38, 0.0 }
  0x28   : > { %651 = vmatpush3.bf16.msra.mxu0 %v697_v11  ;;  %v339_v43 = vpack.c.bf16 %v337_v42, %v335_v41  ;;  %v338_v47 = vpack.c.bf16 %v336_v45, %v334_v44 }
  0x29   : > { %652 = vmatprep.subr.bf16.mxu0 %v698_v12 }
  0x2a   : > { %500 = vmatprep.mubr.bf16.mxu0 %v339_v43 }
  0x2c   : > { %653 = vmatpush3.bf16.msra.mxu0 %v699_v14 }
  0x2d   : > { %654 = vmatprep.subr.bf16.mxu0 %v700_v16 }
  0x30   : > { %655 = vmatpush3.bf16.msra.mxu0 %v701_v29 }
  0x31   : > { %656 = vmatprep.subr.bf16.mxu0 %v702_v30 }
  0x34   : > { %657 = vmatpush3.bf16.msra.mxu0 %v703_v39 }
  0x35   : > { %658 = vmatprep.subr.bf16.mxu0 %v704_v40 }
  0x38   : > { %659 = vmatpush3.bf16.msra.mxu0 %v705_v46 }
  0x3b   : > { %501 = vmatmul.mubr.bf16.vlgmr.msra.gmra.mxu0 %v338_v47 }
  0xfb   : > { %v660_v48 = vpop.f32.mrf.mxu0 }
  0xfd   : > { %v661_v49 = vpop.f32.mrf.mxu0 }
  0xfe   : > { %v662_v51 = vadd.f32 %v661_v49, %v660_v48 }
  0xff   : > { %v663_v52 = vpop.f32.mrf.mxu0 }
 0x100   : > { %v516_v53 = vmul.f32 %v662_v51, %v629_v50 }
 0x101   : > { %v664_v55 = vpop.f32.mrf.mxu0 }
 0x102   : > { %v665_v56 = vadd.f32 %v664_v55, %v663_v52  ;;  %v525_v57 = vadd.f32 %v630_v54, %v516_v53 }
 0x104   : > { %v517_v58 = vmul.f32 %v665_v56, %v629_v50  ;;  %v527_v60 = vmax.f32 %v525_v57, 0.0 }
 0x106   : > { %v526_v59 = vadd.f32 %v630_v54, %v517_v58 }
 0x108   : > { %v528_v61 = vmax.f32 %v526_v59, 0.0 }
 0x10a   : > { %v642_v62 = vpack.c.bf16 %v528_v61, %v527_v60 }
 0x10c   : > { %643 = vst [vmem:[%s293_s19] sm:$0xff] %v642_v62  }
 0x10d PF: > { %p13_p9 = scmp.ge.s32.totalorder %s782_s25, 4   ;;  %s884_s21 = smov %s724_s22 }
 0x10e   : > { %s885_s22 = smov %s791_s28  ;;  %s886_s23 = smov %s782_s25 }
 0x10f   :  { %15 = sbr.rel (!%p13_p9) target bundleno = 2 (0x2), region = 117 }

// kernel: densenet121_forward.143
= control target key start
LH: loop header
LB: loop body
LE: loop exit
PB: predicated region body
PF: predicated region fallthrough
CT: control target
= control target key end

     0   :  { %s1393_s9 = smov 0   ;;  %s1643_s0 = inlined_call_operand.vmem [shape: bf16[32,1152], index: 0, kind: input, shape index: {}]   ;;  %s1644_s1 = inlined_call_operand.vmem [shape: bf16[1152,128], index: 1, kind: input, shape index: {}]   ;;  %s1645_s2 = inlined_call_operand.vmem [shape: bf16[32,128], index: 2, kind: output, shape index: {}]  }
   0x1 LB: > { %s1054_s10 = sadd.s32 4294967295, %s1374_s9   ;;  %p1058_p0 = scmp.ge.s32.totalorder %s1374_s9, 1  ;;  %s1374_s9 = sphi %s1393_s9, %s12_s9  }
   0x2   : > { %p114_p1 = scmp.lt.s32.totalorder %s1374_s9, 3 }
   0x4   : > { %p115_p2 = pnand %p1058_p0, %p114_p1 }
   0x5   : > { %s1059_s15 = sshll.u32 (!%p115_p2), %s1054_s10, 1 }
   0x6   : > { %118 = sbr.rel (%p115_p2) target bundleno = 311 (0x137), region = 28  ;;  %p138_p3 = scmp.lt.s32.totalorder (!%p115_p2), %s1059_s15, 3 }
   0xb   : > { %v1283_v0 = vld [vmem:[%s1644_s1 + $0x78] sm:$0xff]   ;;  %v1287_v4 = vld [vmem:[%s1644_s1 + $0x70] sm:$0xff]   ;;  %v1291_v8 = vld [vmem:[%s1644_s1 + $0x68] sm:$0xff]   ;;  %s1647_s15 = smov (!%p138_p3, %s1059_s15), 3  ;;  %vm1377_vm0 = vmmov 0  }
   0xc   : > { %v1284_v1 = vld [vmem:[%s1644_s1 + $0xf8] sm:$0xff]   ;;  %1155 = vmatprep.subr.bf16.mxu0 %v1283_v0  ;;  %v1288_v5 = vld [vmem:[%s1644_s1 + $0xf0] sm:$0xff]   ;;  %v1292_v9 = vld [vmem:[%s1644_s1 + $0xe8] sm:$0xff]   ;;  %s1272_s11 = smul.u32 36, %s1647_s15 }
   0xd   : > { %v1285_v2 = vld [vmem:[%s1644_s1 + $0x38] sm:$0xff]   ;;  %1177 = vmatprep.subr.bf16.mxu1 %v1284_v1  ;;  %v1289_v6 = vld [vmem:[%s1644_s1 + $0x30] sm:$0xff]   ;;  %v1293_v10 = vld [vmem:[%s1644_s1 + $0x28] sm:$0xff]  }
   0xe   : > { %v1286_v3 = vld [vmem:[%s1644_s1 + $0xb8] sm:$0xff]   ;;  %1156 = vmatpush3.bf16.msra.mxu0 %v1285_v2  ;;  %v1290_v7 = vld [vmem:[%s1644_s1 + $0xb0] sm:$0xff]   ;;  %v1294_v11 = vld [vmem:[%s1644_s1 + $0xa8] sm:$0xff]   ;;  %s1499_s23 = scalar_lea.vmem %s1643_s0, %s1272_s11 }
   0xf   : > { %1178 = vmatpush3.bf16.msra.mxu1 %v1286_v3  ;;  %1157 = vmatprep.subr.bf16.mxu0 %v1287_v4  ;;  %v1295_v12 = vld [vmem:[%s1644_s1 + $0x60] sm:$0xff]   ;;  %v1299_v16 = vld [vmem:[%s1644_s1 + $0x58] sm:$0xff]   ;;  %v1303_v20 = vld [vmem:[%s1644_s1 + $0x50] sm:$0xff]  }
  0x10   : > { %1179 = vmatprep.subr.bf16.mxu1 %v1288_v5  ;;  %v1296_v13 = vld [vmem:[%s1644_s1 + $0xe0] sm:$0xff]   ;;  %v1300_v17 = vld [vmem:[%s1644_s1 + $0xd8] sm:$0xff]   ;;  %v1304_v21 = vld [vmem:[%s1644_s1 + $0xd0] sm:$0xff]  }
  0x11   : > { %v1297_v14 = vld [vmem:[%s1644_s1 + $0x20] sm:$0xff]   ;;  %v1301_v18 = vld [vmem:[%s1644_s1 + $0x18] sm:$0xff]   ;;  %v1305_v22 = vld [vmem:[%s1644_s1 + $0x10] sm:$0xff]  }
  0x12   : > { %1158 = vmatpush3.bf16.msra.mxu0 %v1289_v6  ;;  %v1298_v15 = vld [vmem:[%s1644_s1 + $0xa0] sm:$0xff]   ;;  %v1302_v19 = vld [vmem:[%s1644_s1 + $0x98] sm:$0xff]   ;;  %v1306_v23 = vld [vmem:[%s1644_s1 + $0x90] sm:$0xff]   ;;  %v1376_v6 = vmov 0.0  }
  0x13   : > { %1180 = vmatpush3.bf16.msra.mxu1 %v1290_v7  ;;  %1159 = vmatprep.subr.bf16.mxu0 %v1291_v8  ;;  %v1307_v24 = vld [vmem:[%s1644_s1 + $0x48] sm:$0xff]   ;;  %v1311_v28 = vld [vmem:[%s1644_s1 + $0x40] sm:$0xff]   ;;  %v1321_v36 = vld [vmem:[%s1644_s1 + $0x178] sm:$0xff]  }
  0x14   : > { %1181 = vmatprep.subr.bf16.mxu1 %v1292_v9  ;;  %v1308_v25 = vld [vmem:[%s1644_s1 + $0xc8] sm:$0xff]   ;;  %v1312_v29 = vld [vmem:[%s1644_s1 + $0xc0] sm:$0xff]   ;;  %v1322_v37 = vld [vmem:[%s1644_s1 + $0x138] sm:$0xff]  }
  0x15   : > { %v1309_v26 = vld [vmem:[%s1644_s1 + $0x8] sm:$0xff]   ;;  %v1313_v30 = vld [vmem:[%s1644_s1] sm:$0xff]   ;;  %v1323_v38 = vld [vmem:[%s1644_s1 + $0x1f8] sm:$0xff]  }
  0x16   : > { %1160 = vmatpush3.bf16.msra.mxu0 %v1293_v10  ;;  %v1310_v27 = vld [vmem:[%s1644_s1 + $0x88] sm:$0xff]   ;;  %v1314_v31 = vld [vmem:[%s1644_s1 + $0x80] sm:$0xff]   ;;  %v1324_v39 = vld [vmem:[%s1644_s1 + $0x1b8] sm:$0xff]  }
  0x17   : > { %1182 = vmatpush3.bf16.msra.mxu1 %v1294_v11  ;;  %1161 = vmatprep.subr.bf16.mxu0 %v1295_v12  ;;  %v1315_v32 = vld [vmem:[%s1499_s23] ss:$36 sps:$4 sm:$0xff]   ;;  %v1318_v34 = vld [vmem:[%s1499_s23 + $0x8] ss:$36 sps:$4 sm:$0xff]   ;;  %v1325_v40 = vld [vmem:[%s1644_s1 + $0x170] sm:$0xff]  }
  0x18   : > { %1183 = vmatprep.subr.bf16.mxu1 %v1296_v13  ;;  %v1317_v33 = vld [vmem:[%s1499_s23 + $0x4] ss:$36 sps:$4 sm:$0xff]   ;;  %v1320_v35 = vld [vmem:[%s1499_s23 + $0xc] ss:$36 sps:$4 sm:$0xff]   ;;  %v1337_v52 = vld [vmem:[%s1644_s1 + $0x158] sm:$0xff]  }
  0x19   : > { %815 = vmatprep.mubr.bf16.mxu0 %v1317_v33  ;;  %856 = vmatprep.mubr.bf16.mxu1 %v1320_v35  ;;  %v1326_v41 = vld [vmem:[%s1644_s1 + $0x130] sm:$0xff]   ;;  %v1329_v44 = vld [vmem:[%s1644_s1 + $0x168] sm:$0xff]   ;;  %v1333_v48 = vld [vmem:[%s1644_s1 + $0x160] sm:$0xff]  }
  0x1a   : > { %1162 = vmatpush3.bf16.msra.mxu0 %v1297_v14  ;;  %v1327_v42 = vld [vmem:[%s1644_s1 + $0x1f0] sm:$0xff]   ;;  %v1330_v45 = vld [vmem:[%s1644_s1 + $0x128] sm:$0xff]   ;;  %v1334_v49 = vld [vmem:[%s1644_s1 + $0x120] sm:$0xff]  }
  0x1b   : > { %1184 = vmatpush3.bf16.msra.mxu1 %v1298_v15  ;;  %1163 = vmatprep.subr.bf16.mxu0 %v1299_v16  ;;  %v1328_v43 = vld [vmem:[%s1644_s1 + $0x1b0] sm:$0xff]   ;;  %v1331_v46 = vld [vmem:[%s1644_s1 + $0x1e8] sm:$0xff]   ;;  %v1335_v50 = vld [vmem:[%s1644_s1 + $0x1e0] sm:$0xff]  }
  0x1c   : > { %1185 = vmatprep.subr.bf16.mxu1 %v1300_v17  ;;  %v1332_v47 = vld [vmem:[%s1644_s1 + $0x1a8] sm:$0xff]   ;;  %v1336_v51 = vld [vmem:[%s1644_s1 + $0x1a0] sm:$0xff]   ;;  %v1338_v53 = vld [vmem:[%s1644_s1 + $0x118] sm:$0xff]  }
  0x1d   : > { %v1339_v54 = vld [vmem:[%s1644_s1 + $0x1d8] sm:$0xff]   ;;  %v1341_v56 = vld [vmem:[%s1644_s1 + $0x150] sm:$0xff]   ;;  %v1345_v60 = vld [vmem:[%s1644_s1 + $0x148] sm:$0xff]  }
  0x1e   : > { %1164 = vmatpush3.bf16.msra.mxu0 %v1301_v18  ;;  %v1340_v55 = vld [vmem:[%s1644_s1 + $0x198] sm:$0xff]   ;;  %v1342_v57 = vld [vmem:[%s1644_s1 + $0x110] sm:$0xff]   ;;  %v1346_v61 = vld [vmem:[%s1644_s1 + $0x108] sm:$0xff]  }
  0x1f   : > { %1186 = vmatpush3.bf16.msra.mxu1 %v1302_v19  ;;  %1165 = vmatprep.subr.bf16.mxu0 %v1303_v20  ;;  %v1343_v58 = vld [vmem:[%s1644_s1 + $0x1d0] sm:$0xff]   ;;  %v1347_v62 = vld [vmem:[%s1644_s1 + $0x1c8] sm:$0xff]   ;;  %v1349_v0 = vld [vmem:[%s1644_s1 + $0x140] sm:$0xff]  }
  0x20   : > { %1187 = vmatprep.subr.bf16.mxu1 %v1304_v21  ;;  %v1344_v59 = vld [vmem:[%s1644_s1 + $0x190] sm:$0xff]   ;;  %v1348_v63 = vld [vmem:[%s1644_s1 + $0x188] sm:$0xff]   ;;  %v1350_v1 = vld [vmem:[%s1644_s1 + $0x100] sm:$0xff]  }
  0x21   : > { %v1351_v2 = vld [vmem:[%s1644_s1 + $0x1c0] sm:$0xff]   ;;  %v1352_v3 = vld [vmem:[%s1499_s23 + $0x10] ss:$36 sps:$4 sm:$0xff]   ;;  %v1356_v7 = vld [vmem:[%s1499_s23 + $0x18] ss:$36 sps:$4 sm:$0xff]  }
  0x22   : > { %1166 = vmatpush3.bf16.msra.mxu0 %v1305_v22  ;;  %v1354_v4 = vld [vmem:[%s1499_s23 + $0x14] ss:$36 sps:$4 sm:$0xff]   ;;  %v1355_v5 = vld [vmem:[%s1644_s1 + $0x180] sm:$0xff]   ;;  %v1361_v11 = vld [vmem:[%s1644_s1 + $0x228] sm:$0xff]  }
  0x23   : > { %1188 = vmatpush3.bf16.msra.mxu1 %v1306_v23  ;;  %1167 = vmatprep.subr.bf16.mxu0 %v1307_v24  ;;  %v1358_v8 = vld [vmem:[%s1499_s23 + $0x1c] ss:$36 sps:$4 sm:$0xff]   ;;  %v1360_v10 = vld [vmem:[%s1644_s1 + $0x230] sm:$0xff]   ;;  %v1365_v15 = vld [vmem:[%s1644_s1 + $0x208] sm:$0xff]  }
  0x24   : > { %1189 = vmatprep.subr.bf16.mxu1 %v1308_v25  ;;  %v1359_v9 = vld [vmem:[%s1644_s1 + $0x238] sm:$0xff]   ;;  %v1362_v12 = vld [vmem:[%s1644_s1 + $0x220] sm:$0xff]   ;;  %v1364_v14 = vld [vmem:[%s1644_s1 + $0x210] sm:$0xff]  }
  0x25   : > { %v1363_v13 = vld [vmem:[%s1644_s1 + $0x218] sm:$0xff]   ;;  %v1366_v16 = vld [vmem:[%s1644_s1 + $0x200] sm:$0xff]  }
  0x26   : > { %1168 = vmatpush3.bf16.msra.mxu0 %v1309_v26  ;;  %v1367_v17 = vld [vmem:[%s1499_s23 + $0x20] ss:$36 sps:$4 sm:$0xff]   ;;  %s1062_s23 = sshll.u32 %s1647_s15, 2 }
  0x27   : > { %1190 = vmatpush3.bf16.msra.mxu1 %v1310_v27  ;;  %1169 = vmatprep.subr.bf16.mxu0 %v1311_v28  ;;  %s148_s6 = scalar_lea.vmem %s1645_s2, %s1062_s23 }
  0x28   : > { %1191 = vmatprep.subr.bf16.mxu1 %v1312_v29 }
  0x2a   : > { %1170 = vmatpush3.bf16.msra.mxu0 %v1313_v30 }
  0x2b   : > { %1192 = vmatpush3.bf16.msra.mxu1 %v1314_v31  ;;  %1199 = vmatprep.subr.bf16.mxu0 %v1321_v36 }
  0x2c   : > { %1221 = vmatprep.subr.bf16.mxu1 %v1323_v38 }
  0x2d   : > { %816 = vmatmul.mubr.bf16.vlgmr.msra.gmra.mxu0 %v1315_v32 }
  0x2e   : > { %857 = vmatmul.mubr.bf16.vlgmr.msra.gmra.mxu1 %v1318_v34  ;;  %1200 = vmatpush3.bf16.msra.mxu0 %v1322_v37 }
  0x2f   : > { %1222 = vmatpush3.bf16.msra.mxu1 %v1324_v39  ;;  %1201 = vmatprep.subr.bf16.mxu0 %v1325_v40 }
  0x30   : > { %1223 = vmatprep.subr.bf16.mxu1 %v1327_v42  ;;  %897 = vmatprep.mubr.bf16.mxu0 %v1354_v4 }
  0x31   : > { %938 = vmatprep.mubr.bf16.mxu1 %v1358_v8 }
  0x32   : > { %1202 = vmatpush3.bf16.msra.mxu0 %v1326_v41 }
  0x33   : > { %1224 = vmatpush3.bf16.msra.mxu1 %v1328_v43  ;;  %1203 = vmatprep.subr.bf16.mxu0 %v1329_v44 }
  0x34   : > { %1225 = vmatprep.subr.bf16.mxu1 %v1331_v46 }
  0x36   : > { %1204 = vmatpush3.bf16.msra.mxu0 %v1330_v45 }
  0x37   : > { %1226 = vmatpush3.bf16.msra.mxu1 %v1332_v47  ;;  %1205 = vmatprep.subr.bf16.mxu0 %v1333_v48 }
  0x38   : > { %1227 = vmatprep.subr.bf16.mxu1 %v1335_v50 }
  0x3a   : > { %1206 = vmatpush3.bf16.msra.mxu0 %v1334_v49 }
  0x3b   : > { %1228 = vmatpush3.bf16.msra.mxu1 %v1336_v51  ;;  %1207 = vmatprep.subr.bf16.mxu0 %v1337_v52 }
  0x3c   : > { %1229 = vmatprep.subr.bf16.mxu1 %v1339_v54 }
  0x3e   : > { %1208 = vmatpush3.bf16.msra.mxu0 %v1338_v53 }
  0x3f   : > { %1230 = vmatpush3.bf16.msra.mxu1 %v1340_v55  ;;  %1209 = vmatprep.subr.bf16.mxu0 %v1341_v56 }
  0x40   : > { %1231 = vmatprep.subr.bf16.mxu1 %v1343_v58 }
  0x42   : > { %1210 = vmatpush3.bf16.msra.mxu0 %v1342_v57 }
  0x43   : > { %1232 = vmatpush3.bf16.msra.mxu1 %v1344_v59  ;;  %1211 = vmatprep.subr.bf16.mxu0 %v1345_v60 }
  0x44   : > { %1233 = vmatprep.subr.bf16.mxu1 %v1347_v62 }
  0x46   : > { %1212 = vmatpush3.bf16.msra.mxu0 %v1346_v61 }
  0x47   : > { %1234 = vmatpush3.bf16.msra.mxu1 %v1348_v63  ;;  %1213 = vmatprep.subr.bf16.mxu0 %v1349_v0 }
  0x48   : > { %1235 = vmatprep.subr.bf16.mxu1 %v1351_v2 }
  0x4a   : > { %1214 = vmatpush3.bf16.msra.mxu0 %v1350_v1 }
  0x4b   : > { %1252 = vmatprep.subr.bf16.mxu0 %v1376_v6  ;;  %1236 = vmatpush3.bf16.msra.mxu1 %v1355_v5 }
  0x4d   : > { %898 = vmatmul.mubr.bf16.vlgmr.msra.gmra.mxu0 %v1352_v3 }
  0x4e   : > { %1268 = vmatprep.mubr.msk.bf16.mxu0 %vm1377_vm0, %v1376_v6  ;;  %1253 = vmatpush3.bf16.msra.mxu0 %v1359_v9 }
  0x4f   : > { %939 = vmatmul.mubr.bf16.vlgmr.msra.gmra.mxu1 %v1356_v7  ;;  %1254 = vmatprep.subr.bf16.mxu0 %v1376_v6 }
  0x52   : > { %1255 = vmatpush3.bf16.msra.mxu0 %v1360_v10 }
  0x53   : > { %1256 = vmatprep.subr.bf16.mxu0 %v1376_v6 }
  0x56   : > { %1257 = vmatpush3.bf16.msra.mxu0 %v1361_v11 }
  0x57   : > { %1258 = vmatprep.subr.bf16.mxu0 %v1376_v6 }
  0x5a   : > { %1259 = vmatpush3.bf16.msra.mxu0 %v1362_v12 }
  0x5b   : > { %1260 = vmatprep.subr.bf16.mxu0 %v1376_v6 }
  0x5e   : > { %1261 = vmatpush3.bf16.msra.mxu0 %v1363_v13 }
  0x5f   : > { %1262 = vmatprep.subr.bf16.mxu0 %v1376_v6 }
  0x62   : > { %1263 = vmatpush3.bf16.msra.mxu0 %v1364_v14 }
  0x63   : > { %1264 = vmatprep.subr.bf16.mxu0 %v1376_v6 }
  0x66   : > { %1265 = vmatpush3.bf16.msra.mxu0 %v1365_v15 }
  0x67   : > { %1266 = vmatprep.subr.bf16.mxu0 %v1376_v6 }
  0x6a   : > { %1267 = vmatpush3.bf16.msra.mxu0 %v1366_v16 }
  0x6d   : > { %1269 = vmatmul.mubr.bf16.vlgmr.msra.gmra.mxu0 %v1367_v17 }
  0xed   : > { %v1171_v18 = vpop.f32.mrf.mxu0 }
  0xee   : > { %v1193_v19 = vpop.f32.mrf.mxu1 }
  0xef   : > { %v1172_v20 = vpop.f32.mrf.mxu0 }
  0xf0   : > { %v1194_v21 = vpop.f32.mrf.mxu1  ;;  %v1173_v33 = vadd.f32 %v1172_v20, %v1171_v18 }
  0xf1   : > { %v1174_v22 = vpop.f32.mrf.mxu0  ;;  %v1195_v34 = vadd.f32 %v1194_v21, %v1193_v19 }
  0xf2   : > { %v1196_v23 = vpop.f32.mrf.mxu1 }
  0xf3   : > { %v1175_v24 = vpop.f32.mrf.mxu0  ;;  %v859_v40 = vadd.f32 %v1195_v34, %v1173_v33 }
  0xf4   : > { %v1197_v26 = vpop.f32.mrf.mxu1  ;;  %v1176_v35 = vadd.f32 %v1175_v24, %v1174_v22 }
  0xf5   : > { %v1198_v36 = vadd.f32 %v1197_v26, %v1196_v23 }
  0xf7   : > { %v862_v41 = vadd.f32 %v1198_v36, %v1176_v35 }
 0x10d   : > { %v1215_v25 = vpop.f32.mrf.mxu0 }
 0x10f   : > { %v1216_v27 = vpop.f32.mrf.mxu0  ;;  %v1237_v28 = vpop.f32.mrf.mxu1 }
 0x110   : > { %v1217_v37 = vadd.f32 %v1216_v27, %v1215_v25 }
 0x111   : > { %v1218_v29 = vpop.f32.mrf.mxu0  ;;  %v1238_v30 = vpop.f32.mrf.mxu1 }
 0x112   : > { %v900_v42 = vadd.f32 %v1217_v37, %v859_v40  ;;  %v1239_v43 = vadd.f32 %v1238_v30, %v1237_v28 }
 0x113   : > { %v1219_v31 = vpop.f32.mrf.mxu0  ;;  %v1240_v32 = vpop.f32.mrf.mxu1 }
 0x114   : > { %v1220_v38 = vadd.f32 %v1219_v31, %v1218_v29  ;;  %v941_v48 = vadd.f32 %v1239_v43, %v900_v42 }
 0x115   : > { %v1241_v39 = vpop.f32.mrf.mxu1 }
 0x116   : > { %v903_v44 = vadd.f32 %v1220_v38, %v862_v41  ;;  %v1242_v45 = vadd.f32 %v1241_v39, %v1240_v32 }
 0x118   : > { %v944_v49 = vadd.f32 %v1242_v45, %v903_v44 }
 0x12d   : > { %v981_v46 = vpop.f32.mrf.mxu0 }
 0x12e   : > { %v982_v51 = vadd.f32 %v981_v46, %v941_v48 }
 0x12f   : > { %v1270_v47 = vpop.f32.mrf.mxu0 }
 0x131   : > { %v984_v50 = vpop.f32.mrf.mxu0 }
 0x132   : > { %v985_v52 = vadd.f32 %v984_v50, %v944_v49 }
 0x133   : > { %v1271_v53 = vpop.f32.mrf.mxu0 }
 0x134   : > { %v1153_v54 = vpack.c.bf16 %v985_v52, %v982_v51 }
 0x136   : > { %1154 = vst [vmem:[%s148_s6] sm:$0xff] %v1153_v54  }
 0x137 PF: > { %s12_s9 = sadd.s32 1, %s1374_s9  }
 0x138   : > { %p9_p4 = scmp.ge.s32.totalorder %s12_s9, 4  }
 0x13a   :  { %11 = sbr.rel (!%p9_p4) target bundleno = 1 (0x1), region = 58 }

// kernel: densenet121_forward.152
= control target key start
LH: loop header
LB: loop body
LE: loop exit
PB: predicated region body
PF: predicated region fallthrough
CT: control target
= control target key end

     0   :  { %s944_s21 = smov 0   ;;  %s946_s22 = smov 0   ;;  %s1089_s0 = inlined_call_operand.vmem [shape: bf16[32,512], index: 0, kind: input, shape index: {}]   ;;  %s1090_s1 = inlined_call_operand.vmem [shape: f32[1,384], index: 1, kind: input, shape index: {}]   ;;  %s1091_s2 = inlined_call_operand.vmem [shape: f32[1,384], index: 2, kind: input, shape index: {}]   ;;  %s1092_s3 = inlined_call_operand.vmem [shape: bf16[384,128], index: 3, kind: input, shape index: {}]   ;;  %s1093_s4 = inlined_call_operand.vmem [shape: f32[1,128], index: 4, kind: input, shape index: {}]   ;;  %s1094_s5 = inlined_call_operand.vmem [shape: f32[1,128], index: 5, kind: input, shape index: {}]   ;;  %s1095_s6 = inlined_call_operand.vmem [shape: bf16[32,128], index: 6, kind: output, shape index: {}]  }
   0x1   :  { %s948_s23 = smov 0  }
   0x2 LB: > { %s727_s24 = sadd.s32 4294967295, %s905_s23   ;;  %s961_s25 = sadd.s32 1, %s905_s23   ;;  %s905_s23 = sphi %s948_s23, %s1098_s23   ;;  %s901_s22 = sphi %s946_s22, %s1097_s22   ;;  %s897_s21 = sphi %s944_s21, %s1096_s21  }
   0x3   : > { %s20_s26 = ssub.s32 %s905_s23, %s961_s25  ;;  %s23_s27 = sadd.s32 1, %s901_s22 }
   0x4   : > { %p21_p0 = scmp.eq.s32.totalorder %s20_s26, 0  ;;  %p30_p1 = scmp.ne.s32.totalorder %s901_s22, %s897_s21 }
   0x5   : > { %p31_p2 = scmp.eq.s32.totalorder %s905_s23, 0  ;;  %p730_p4 = scmp.ge.s32.totalorder %s905_s23, 2 }
   0x6   : > { %s970_s28 = scalar_select %p21_p0, %s901_s22, %s23_s27  }
   0x7   : > { %p32_p3 = por %p31_p2, %p30_p1  ;;  %202 = sbr.rel (%p730_p4) target bundleno = 18 (0x12), region = 36 }
   0xc   : > { %205 = sbr.rel (!%p32_p3) target bundleno = 18 (0x12), region = 40  ;;  %s207_s29 = sand.u32 (%p32_p3), 1, %s901_s22  }
   0xd   : > { %s772_s30 = sshll.u32 (%p32_p3), %s905_s23, 5  ;;  %s831_s7 = smul.u32 (%p32_p3), 24, %s207_s29 }
   0xe   : > { %s213_s10 = scalar_lea.vmem (%p32_p3), %s1089_s0, %s772_s30 }
   0xf   : > { %v228_v0 = vld [vmem:[%s213_s10] sm:$0xff] (%p32_p3)  ;;  %v230_v1 = vld [vmem:[%s213_s10 + $0x10] sm:$0xff] (%p32_p3)  ;;  %v734_v2 = vld [vmem:[%s213_s10 + $0x8] sm:$0xf] (%p32_p3)  ;;  %s209_s11 = scalar_lea.vmem (%p32_p3), [#allocation2], %s831_s7 }
  0x10   : > { %v736_v3 = vld [vmem:[%s213_s10 + $0x18] sm:$0xf] (%p32_p3)  ;;  %229 = vst [vmem:[%s209_s11] sm:$0xff] (%p32_p3), %v228_v0  ;;  %231 = vst [vmem:[%s209_s11 + $0xc] sm:$0xff] (%p32_p3), %v230_v1 }
  0x11   : > { %735 = vst [vmem:[%s209_s11 + $0x8] sm:$0xf] %v734_v2  ;;  %737 = vst [vmem:[%s209_s11 + $0x14] sm:$0xf] %v736_v3 }
  0x12 PF: > { %p738_p5 = scmp.ge.s32.totalorder %s905_s23, 1  ;;  %p248_p6 = scmp.lt.s32.totalorder %s905_s23, 3 }
  0x14   : > { %p249_p7 = pnand %p738_p5, %p248_p6 }
  0x15   : > { %s255_s20 = sand.u32 (!%p249_p7), 1, %s897_s21   ;;  %s739_s11 = sshll.u32 (!%p249_p7), %s727_s24, 1 }
  0x16   : > { %252 = sbr.rel (%p249_p7) target bundleno = 273 (0x111), region = 66  ;;  %p286_p8 = scmp.lt.s32.totalorder (!%p249_p7), %s739_s11, 3 }
  0x17   : > { %s832_s7 = smul.u32 (!%p249_p7), 24, %s255_s20 }
  0x19   : > { %s257_s19 = scalar_lea.vmem (!%p249_p7), [#allocation2], %s832_s7 }
  0x1b   : > { %v859_v4 = vld [vmem:[%s1092_s3 + $0x78] sm:$0xff]   ;;  %v907_v5 = vmov 0.0   ;;  %vm908_vm0 = vmmov 0   ;;  %v862_v8 = vld [vmem:[%s1092_s3 + $0x70] sm:$0xff]   ;;  %v865_v11 = vld [vmem:[%s1092_s3 + $0x68] sm:$0xff]   ;;  %v304_v18 = vlaneseq  ;;  %s1100_s11 = smov (!%p286_p8, %s739_s11), 3 }
  0x1c   : > { %811 = vmatprep.subr.bf16.mxu1 %v907_v5  ;;  %v860_v6 = vld [vmem:[%s1092_s3 + $0xb8] sm:$0xff]   ;;  %780 = vmatprep.subr.bf16.mxu0 %v859_v4  ;;  %v863_v9 = vld [vmem:[%s1092_s3 + $0xb0] sm:$0xff]   ;;  %v866_v12 = vld [vmem:[%s1092_s3 + $0xa8] sm:$0xff]   ;;  %s740_s23 = sshll.u32 %s1100_s11, 2 }
  0x1d   : > { %v861_v7 = vld [vmem:[%s1092_s3 + $0x38] sm:$0xff]   ;;  %827 = vmatprep.mubr.msk.bf16.mxu1 %vm908_vm0, %v907_v5  ;;  %812 = vmatpush3.bf16.msra.mxu1 %v860_v6  ;;  %v864_v10 = vld [vmem:[%s1092_s3 + $0x30] sm:$0xff]   ;;  %v867_v13 = vld [vmem:[%s1092_s3 + $0x28] sm:$0xff]   ;;  %v305_v22 = vshrl.u32 %v304_v18, 7  ;;  %s289_s17 = scalar_lea.vmem %s1095_s6, %s740_s23 }
  0x1e   : > { %781 = vmatpush3.bf16.msra.mxu0 %v861_v7  ;;  %813 = vmatprep.subr.bf16.mxu1 %v907_v5  ;;  %v868_v14 = vld [vmem:[%s1092_s3 + $0x60] sm:$0xff]   ;;  %v871_v17 = vld [vmem:[%s1092_s3 + $0x58] sm:$0xff]   ;;  %v874_v21 = vld [vmem:[%s1092_s3 + $0x50] sm:$0xff]  }
  0x1f   : > { %782 = vmatprep.subr.bf16.mxu0 %v862_v8  ;;  %v869_v15 = vld [vmem:[%s1092_s3 + $0xa0] sm:$0xff]   ;;  %v872_v19 = vld [vmem:[%s1092_s3 + $0x98] sm:$0xff]   ;;  %v875_v23 = vld [vmem:[%s1092_s3 + $0x90] sm:$0xff]   ;;  %v310_v26 = vsub.s32 1, %v305_v22  ;;  %v314_v28 = vsub.s32 2, %v305_v22  ;;  %v306_v30 = vsub.s32 0, %v305_v22 }
  0x20   : > { %v870_v16 = vld [vmem:[%s1092_s3 + $0x20] sm:$0xff]   ;;  %v873_v20 = vld [vmem:[%s1092_s3 + $0x18] sm:$0xff]   ;;  %v876_v24 = vld [vmem:[%s1092_s3 + $0x10] sm:$0xff]  }
  0x21   : > { %814 = vmatpush3.bf16.msra.mxu1 %v863_v9  ;;  %v877_v25 = vld [vmem:[%s1092_s3 + $0x48] sm:$0xff]   ;;  %v292_v31 = vld [vmem:[%s257_s19] sm:$0xff] }
  0x22   : > { %783 = vmatpush3.bf16.msra.mxu0 %v864_v10  ;;  %815 = vmatprep.subr.bf16.mxu1 %v907_v5  ;;  %v878_v27 = vld [vmem:[%s1092_s3 + $0x88] sm:$0xff]   ;;  %v302_v33 = vld [vmem:[%s1090_s1] sm:$0x7]  ;;  %v296_v35 = vunpack.c.l.bf16 %v292_v31  ;;  %v297_v36 = vunpack.c.h.bf16 %v292_v31 }
  0x23   : > { %784 = vmatprep.subr.bf16.mxu0 %v865_v11  ;;  %v879_v29 = vld [vmem:[%s1092_s3 + $0x8] sm:$0xff]   ;;  %v880_v34 = vld [vmem:[%s1092_s3 + $0x40] sm:$0xff]   ;;  %v311_v41 = vrot.slane %v302_v33, %v310_v26  ;;  %v315_v46 = vrot.slane %v302_v33, %v314_v28  ;;  %v307_v48 = vrot.slane %v302_v33, %v306_v30 }
  0x24   : > { %v294_v32 = vld [vmem:[%s257_s19 + $0xc] sm:$0xff]  ;;  %v325_v39 = vld [vmem:[%s1091_s2] sm:$0x7] }
  0x25   : > { %816 = vmatpush3.bf16.msra.mxu1 %v866_v12  ;;  %v299_v37 = vunpack.c.l.bf16 %v294_v32  ;;  %v300_v38 = vunpack.c.h.bf16 %v294_v32  ;;  %v293_v40 = vld [vmem:[%s257_s19 + $0x8] ss:$12 sps:$4 sm:$0xff]   ;;  %v334_v42 = vrot.slane %v325_v39, %v310_v26  ;;  %v338_v47 = vrot.slane %v325_v39, %v314_v28 }
  0x26   : > { %785 = vmatpush3.bf16.msra.mxu0 %v867_v13  ;;  %817 = vmatprep.subr.bf16.mxu1 %v907_v5  ;;  %v298_v43 = vunpack.c.l.bf16 %v293_v40  ;;  %v301_v44 = vunpack.c.h.bf16 %v293_v40  ;;  %v881_v45 = vld [vmem:[%s1092_s3 + $0x80] sm:$0xff]   ;;  %v330_v49 = vrot.slane %v325_v39, %v306_v30  ;;  %v320_v51 = vmul.f32 %v311_v41, %v297_v36 }
  0x27   : > { %786 = vmatprep.subr.bf16.mxu0 %v868_v14  ;;  %v882_v50 = vld [vmem:[%s1092_s3] sm:$0xff]   ;;  %v323_v52 = vmul.f32 %v311_v41, %v300_v38  ;;  %v319_v55 = vmul.f32 %v307_v48, %v296_v35  ;;  %v322_v56 = vmul.f32 %v307_v48, %v299_v37 }
  0x28   : > { %v321_v53 = vmul.f32 %v315_v46, %v298_v43  ;;  %v324_v54 = vmul.f32 %v315_v46, %v301_v44  ;;  %v343_v57 = vadd.f32 %v334_v42, %v320_v51  ;;  %v765_v13 = vld [vmem:[%s1093_s4] ss:$0 sm:$0xff] }
  0x29   : > { %818 = vmatpush3.bf16.msra.mxu1 %v869_v15  ;;  %v346_v58 = vadd.f32 %v334_v42, %v323_v52  ;;  %v342_v61 = vadd.f32 %v330_v49, %v319_v55  ;;  %v345_v62 = vadd.f32 %v330_v49, %v322_v56 }
  0x2a   : > { %787 = vmatpush3.bf16.msra.mxu0 %v870_v16  ;;  %819 = vmatprep.subr.bf16.mxu1 %v907_v5  ;;  %v344_v59 = vadd.f32 %v338_v47, %v321_v53  ;;  %v347_v60 = vadd.f32 %v338_v47, %v324_v54  ;;  %v349_v63 = vmax.f32 %v343_v57, 0.0 }
  0x2b   : > { %788 = vmatprep.subr.bf16.mxu0 %v871_v17  ;;  %v352_v0 = vmax.f32 %v346_v58, 0.0  ;;  %v348_v3 = vmax.f32 %v342_v61, 0.0  ;;  %v351_v4 = vmax.f32 %v345_v62, 0.0 }
  0x2c   : > { %v350_v1 = vmax.f32 %v344_v59, 0.0  ;;  %v353_v2 = vmax.f32 %v347_v60, 0.0 }
  0x2d   : > { %820 = vmatpush3.bf16.msra.mxu1 %v872_v19  ;;  %v354_v7 = vpack.c.bf16 %v351_v4, %v348_v3 }
  0x2e   : > { %789 = vmatpush3.bf16.msra.mxu0 %v873_v20  ;;  %821 = vmatprep.subr.bf16.mxu1 %v907_v5  ;;  %v356_v6 = vpack.c.bf16 %v353_v2, %v350_v1 }
  0x2f   : > { %790 = vmatprep.subr.bf16.mxu0 %v874_v21  ;;  %v766_v21 = vld [vmem:[%s1094_s5] ss:$0 sm:$0xff] }
  0x31   : > { %822 = vmatpush3.bf16.msra.mxu1 %v875_v23 }
  0x32   : > { %791 = vmatpush3.bf16.msra.mxu0 %v876_v24  ;;  %823 = vmatprep.subr.bf16.mxu1 %v907_v5 }
  0x33   : > { %792 = vmatprep.subr.bf16.mxu0 %v877_v25 }
  0x35   : > { %824 = vmatpush3.bf16.msra.mxu1 %v878_v27 }
  0x36   : > { %793 = vmatpush3.bf16.msra.mxu0 %v879_v29  ;;  %825 = vmatprep.subr.bf16.mxu1 %v907_v5  ;;  %v355_v5 = vpack.c.bf16 %v352_v0, %v349_v63 }
  0x37   : > { %794 = vmatprep.subr.bf16.mxu0 %v880_v34 }
  0x38   : > { %581 = vmatprep.mubr.bf16.mxu0 %v355_v5 }
  0x39   : > { %826 = vmatpush3.bf16.msra.mxu1 %v881_v45 }
  0x3a   : > { %795 = vmatpush3.bf16.msra.mxu0 %v882_v50 }
  0x3c   : > { %828 = vmatmul.mubr.bf16.vlgmr.msra.gmra.mxu1 %v356_v6 }
  0x3d   : > { %582 = vmatmul.mubr.bf16.vlgmr.msra.gmra.mxu0 %v354_v7 }
  0xfc   : > { %v624_v8 = vpop.f32.mrf.mxu1 }
  0xfd   : > { %v796_v9 = vpop.f32.mrf.mxu0 }
  0xfe   : > { %v829_v10 = vpop.f32.mrf.mxu1 }
  0xff   : > { %v797_v11 = vpop.f32.mrf.mxu0 }
 0x100   : > { %v798_v12 = vadd.f32 %v797_v11, %v796_v9  ;;  %v627_v14 = vpop.f32.mrf.mxu1 }
 0x101   : > { %v799_v15 = vpop.f32.mrf.mxu0 }
 0x102   : > { %v625_v16 = vadd.f32 %v798_v12, %v624_v8  ;;  %v830_v17 = vpop.f32.mrf.mxu1 }
 0x103   : > { %v800_v18 = vpop.f32.mrf.mxu0 }
 0x104   : > { %v638_v19 = vmul.f32 %v765_v13, %v625_v16  ;;  %v801_v20 = vadd.f32 %v800_v18, %v799_v15 }
 0x106   : > { %v628_v22 = vadd.f32 %v801_v20, %v627_v14  ;;  %v647_v23 = vadd.f32 %v766_v21, %v638_v19 }
 0x108   : > { %v639_v24 = vmul.f32 %v765_v13, %v628_v22  ;;  %v649_v26 = vmax.f32 %v647_v23, 0.0 }
 0x10a   : > { %v648_v25 = vadd.f32 %v766_v21, %v639_v24 }
 0x10c   : > { %v650_v27 = vmax.f32 %v648_v25, 0.0 }
 0x10e   : > { %v778_v28 = vpack.c.bf16 %v650_v27, %v649_v26 }
 0x110   : > { %779 = vst [vmem:[%s289_s17] sm:$0xff] %v778_v28  }
 0x111 PF: > { %p13_p9 = scmp.ge.s32.totalorder %s961_s25, 4   ;;  %s1096_s21 = smov %s901_s22 }
 0x112   : > { %s1097_s22 = smov %s970_s28  ;;  %s1098_s23 = smov %s961_s25 }
 0x113   :  { %15 = sbr.rel (!%p13_p9) target bundleno = 2 (0x2), region = 111 }

// kernel: densenet121_forward.160
= control target key start
LH: loop header
LB: loop body
LE: loop exit
PB: predicated region body
PF: predicated region fallthrough
CT: control target
= control target key end

     0   :  { %s950_s21 = smov 0   ;;  %s1081_s0 = inlined_call_operand.vmem [shape: bf16[32,512], index: 0, kind: input, shape index: {}]   ;;  %s1082_s1 = inlined_call_operand.vmem [shape: f32[1,512], index: 1, kind: input, shape index: {}]   ;;  %s1083_s2 = inlined_call_operand.vmem [shape: f32[1,512], index: 2, kind: input, shape index: {}]   ;;  %s1084_s3 = inlined_call_operand.vmem [shape: bf16[512,128], index: 3, kind: input, shape index: {}]   ;;  %s1085_s4 = inlined_call_operand.vmem [shape: f32[1,128], index: 4, kind: input, shape index: {}]   ;;  %s1086_s5 = inlined_call_operand.vmem [shape: f32[1,128], index: 5, kind: input, shape index: {}]   ;;  %s1087_s6 = inlined_call_operand.vmem [shape: bf16[32,128], index: 6, kind: output, shape index: {}]  }
   0x1 LB: > { %s767_s22 = sadd.s32 4294967295, %s913_s21   ;;  %p771_p0 = scmp.ge.s32.totalorder %s913_s21, 1  ;;  %s913_s21 = sphi %s950_s21, %s16_s21  }
   0x2   : > { %p214_p1 = scmp.lt.s32.totalorder %s913_s21, 3 }
   0x4   : > { %p215_p2 = pnand %p771_p0, %p214_p1 }
   0x5   : > { %s772_s9 = sshll.u32 (!%p215_p2), %s767_s22, 1 }
   0x6   : > { %218 = sbr.rel (%p215_p2) target bundleno = 258 (0x102), region = 44  ;;  %p246_p3 = scmp.lt.s32.totalorder (!%p215_p2), %s772_s9, 3 }
   0xb   : > { %v875_v0 = vld [vmem:[%s1084_s3 + $0x78] sm:$0xff]   ;;  %v879_v4 = vld [vmem:[%s1084_s3 + $0x70] sm:$0xff]   ;;  %v883_v8 = vld [vmem:[%s1084_s3 + $0x68] sm:$0xff]   ;;  %v273_v22 = vlaneseq  ;;  %s1089_s9 = smov (!%p246_p3, %s772_s9), 3 }
   0xc   : > { %v876_v1 = vld [vmem:[%s1084_s3 + $0xf8] sm:$0xff]   ;;  %823 = vmatprep.subr.bf16.mxu0 %v875_v0  ;;  %v880_v5 = vld [vmem:[%s1084_s3 + $0xf0] sm:$0xff]   ;;  %v884_v9 = vld [vmem:[%s1084_s3 + $0xe8] sm:$0xff]   ;;  %s815_s10 = sshll.u32 %s1089_s9, 4 }
   0xd   : > { %v877_v2 = vld [vmem:[%s1084_s3 + $0x38] sm:$0xff]   ;;  %845 = vmatprep.subr.bf16.mxu1 %v876_v1  ;;  %v881_v6 = vld [vmem:[%s1084_s3 + $0x30] sm:$0xff]   ;;  %v885_v10 = vld [vmem:[%s1084_s3 + $0x28] sm:$0xff]   ;;  %v274_v27 = vshrl.u32 %v273_v22, 7  ;;  %s250_s18 = scalar_lea.vmem %s1081_s0, %s815_s10  ;;  %s776_s10 = sshll.u32 %s1089_s9, 2 }
   0xe   : > { %v878_v3 = vld [vmem:[%s1084_s3 + $0xb8] sm:$0xff]   ;;  %824 = vmatpush3.bf16.msra.mxu0 %v877_v2  ;;  %v882_v7 = vld [vmem:[%s1084_s3 + $0xb0] sm:$0xff]   ;;  %v886_v11 = vld [vmem:[%s1084_s3 + $0xa8] sm:$0xff]   ;;  %s256_s13 = scalar_lea.vmem %s1087_s6, %s776_s10 }
   0xf   : > { %846 = vmatpush3.bf16.msra.mxu1 %v878_v3  ;;  %825 = vmatprep.subr.bf16.mxu0 %v879_v4  ;;  %v887_v12 = vld [vmem:[%s1084_s3 + $0x60] sm:$0xff]   ;;  %v891_v16 = vld [vmem:[%s1084_s3 + $0x58] sm:$0xff]   ;;  %v895_v20 = vld [vmem:[%s1084_s3 + $0x50] sm:$0xff]   ;;  %v279_v33 = vsub.s32 1, %v274_v27  ;;  %v287_v35 = vsub.s32 3, %v274_v27  ;;  %v275_v39 = vsub.s32 0, %v274_v27 }
  0x10   : > { %847 = vmatprep.subr.bf16.mxu1 %v880_v5  ;;  %v888_v13 = vld [vmem:[%s1084_s3 + $0xe0] sm:$0xff]   ;;  %v892_v17 = vld [vmem:[%s1084_s3 + $0xd8] sm:$0xff]   ;;  %v896_v21 = vld [vmem:[%s1084_s3 + $0xd0] sm:$0xff]   ;;  %v283_v40 = vsub.s32 2, %v274_v27 }
  0x11   : > { %v889_v14 = vld [vmem:[%s1084_s3 + $0x20] sm:$0xff]   ;;  %v893_v18 = vld [vmem:[%s1084_s3 + $0x18] sm:$0xff]   ;;  %v897_v23 = vld [vmem:[%s1084_s3 + $0x10] sm:$0xff]  }
  0x12   : > { %826 = vmatpush3.bf16.msra.mxu0 %v881_v6  ;;  %v890_v15 = vld [vmem:[%s1084_s3 + $0xa0] sm:$0xff]   ;;  %v894_v19 = vld [vmem:[%s1084_s3 + $0x98] sm:$0xff]   ;;  %v898_v24 = vld [vmem:[%s1084_s3 + $0x90] sm:$0xff]  }
  0x13   : > { %848 = vmatpush3.bf16.msra.mxu1 %v882_v7  ;;  %827 = vmatprep.subr.bf16.mxu0 %v883_v8  ;;  %v899_v25 = vld [vmem:[%s1084_s3 + $0x48] sm:$0xff]   ;;  %v903_v30 = vld [vmem:[%s1084_s3 + $0x40] sm:$0xff]   ;;  %v261_v37 = vld [vmem:[%s250_s18 + $0x10] sm:$0xff] }
  0x14   : > { %849 = vmatprep.subr.bf16.mxu1 %v884_v9  ;;  %v900_v26 = vld [vmem:[%s1084_s3 + $0xc8] sm:$0xff]   ;;  %v904_v31 = vld [vmem:[%s1084_s3 + $0xc0] sm:$0xff]   ;;  %v267_v43 = vunpack.c.l.bf16 %v261_v37  ;;  %v268_v44 = vunpack.c.h.bf16 %v261_v37  ;;  %v262_v47 = vld [vmem:[%s250_s18 + $0x18] sm:$0xff] }
  0x15   : > { %v901_v28 = vld [vmem:[%s1084_s3 + $0x8] sm:$0xff]   ;;  %v905_v32 = vld [vmem:[%s1084_s3] sm:$0xff]   ;;  %v269_v52 = vunpack.c.l.bf16 %v262_v47  ;;  %v270_v53 = vunpack.c.h.bf16 %v262_v47 }
  0x16   : > { %828 = vmatpush3.bf16.msra.mxu0 %v885_v10  ;;  %v902_v29 = vld [vmem:[%s1084_s3 + $0x88] sm:$0xff]   ;;  %v906_v34 = vld [vmem:[%s1084_s3 + $0x80] sm:$0xff]  }
  0x17   : > { %850 = vmatpush3.bf16.msra.mxu1 %v886_v11  ;;  %829 = vmatprep.subr.bf16.mxu0 %v887_v12  ;;  %v259_v36 = vld [vmem:[%s250_s18] sm:$0xff]  ;;  %v260_v46 = vld [vmem:[%s250_s18 + $0x8] sm:$0xff] }
  0x18   : > { %851 = vmatprep.subr.bf16.mxu1 %v888_v13  ;;  %v271_v38 = vld [vmem:[%s1082_s1] sm:$0xf]  ;;  %v263_v41 = vunpack.c.l.bf16 %v259_v36  ;;  %v264_v42 = vunpack.c.h.bf16 %v259_v36  ;;  %v265_v50 = vunpack.c.l.bf16 %v260_v46  ;;  %v266_v51 = vunpack.c.h.bf16 %v260_v46 }
  0x19   : > { %v301_v45 = vld [vmem:[%s1083_s2] sm:$0xf]  ;;  %v280_v48 = vrot.slane %v271_v38, %v279_v33  ;;  %v288_v54 = vrot.slane %v271_v38, %v287_v35  ;;  %v276_v58 = vrot.slane %v271_v38, %v275_v39  ;;  %v284_v62 = vrot.slane %v271_v38, %v283_v40 }
  0x1a   : > { %830 = vmatpush3.bf16.msra.mxu0 %v889_v14  ;;  %v310_v49 = vrot.slane %v301_v45, %v279_v33  ;;  %v318_v55 = vrot.slane %v301_v45, %v287_v35  ;;  %v306_v59 = vrot.slane %v301_v45, %v275_v39  ;;  %v314_v63 = vrot.slane %v301_v45, %v283_v40  ;;  %v810_v39 = vld [vmem:[%s1086_s5] ss:$0 sm:$0xff] }
  0x1b   : > { %852 = vmatpush3.bf16.msra.mxu1 %v890_v15  ;;  %831 = vmatprep.subr.bf16.mxu0 %v891_v16  ;;  %v294_v56 = vmul.f32 %v280_v48, %v264_v42  ;;  %v298_v57 = vmul.f32 %v280_v48, %v268_v44  ;;  %v296_v60 = vmul.f32 %v288_v54, %v266_v51 }
  0x1c   : > { %853 = vmatprep.subr.bf16.mxu1 %v892_v17  ;;  %v300_v61 = vmul.f32 %v288_v54, %v270_v53  ;;  %v293_v2 = vmul.f32 %v276_v58, %v263_v41  ;;  %v297_v3 = vmul.f32 %v276_v58, %v267_v43  ;;  %v295_v6 = vmul.f32 %v284_v62, %v265_v50 }
  0x1d   : > { %v324_v0 = vadd.f32 %v310_v49, %v294_v56  ;;  %v328_v1 = vadd.f32 %v310_v49, %v298_v57  ;;  %v326_v4 = vadd.f32 %v318_v55, %v296_v60  ;;  %v299_v7 = vmul.f32 %v284_v62, %v269_v52 }
  0x1e   : > { %832 = vmatpush3.bf16.msra.mxu0 %v893_v18  ;;  %v330_v5 = vadd.f32 %v318_v55, %v300_v61  ;;  %v323_v10 = vadd.f32 %v306_v59, %v293_v2  ;;  %v327_v11 = vadd.f32 %v306_v59, %v297_v3  ;;  %v325_v14 = vadd.f32 %v314_v63, %v295_v6 }
  0x1f   : > { %854 = vmatpush3.bf16.msra.mxu1 %v894_v19  ;;  %833 = vmatprep.subr.bf16.mxu0 %v895_v20  ;;  %v332_v8 = vmax.f32 %v324_v0, 0.0  ;;  %v336_v9 = vmax.f32 %v328_v1, 0.0  ;;  %v334_v12 = vmax.f32 %v326_v4, 0.0  ;;  %v329_v15 = vadd.f32 %v314_v63, %v299_v7 }
  0x20   : > { %855 = vmatprep.subr.bf16.mxu1 %v896_v21  ;;  %v338_v13 = vmax.f32 %v330_v5, 0.0  ;;  %v331_v17 = vmax.f32 %v323_v10, 0.0  ;;  %v335_v18 = vmax.f32 %v327_v11, 0.0  ;;  %v333_v20 = vmax.f32 %v325_v14, 0.0 }
  0x21   : > { %v340_v16 = vpack.c.bf16 %v336_v9, %v332_v8  ;;  %v337_v21 = vmax.f32 %v329_v15, 0.0 }
  0x22   : > { %834 = vmatpush3.bf16.msra.mxu0 %v897_v23  ;;  %v342_v19 = vpack.c.bf16 %v338_v13, %v334_v12  ;;  %v339_v22 = vpack.c.bf16 %v335_v18, %v331_v17 }
  0x23   : > { %856 = vmatpush3.bf16.msra.mxu1 %v898_v24  ;;  %835 = vmatprep.subr.bf16.mxu0 %v899_v25  ;;  %v341_v23 = vpack.c.bf16 %v337_v21, %v333_v20 }
  0x24   : > { %857 = vmatprep.subr.bf16.mxu1 %v900_v26  ;;  %631 = vmatprep.mubr.bf16.mxu0 %v340_v16 }
  0x25   : > { %672 = vmatprep.mubr.bf16.mxu1 %v342_v19 }
  0x26   : > { %836 = vmatpush3.bf16.msra.mxu0 %v901_v28 }
  0x27   : > { %858 = vmatpush3.bf16.msra.mxu1 %v902_v29  ;;  %837 = vmatprep.subr.bf16.mxu0 %v903_v30 }
  0x28   : > { %859 = vmatprep.subr.bf16.mxu1 %v904_v31  ;;  %v809_v31 = vld [vmem:[%s1085_s4] ss:$0 sm:$0xff] }
  0x2a   : > { %838 = vmatpush3.bf16.msra.mxu0 %v905_v32 }
  0x2b   : > { %860 = vmatpush3.bf16.msra.mxu1 %v906_v34 }
  0x2d   : > { %632 = vmatmul.mubr.bf16.vlgmr.msra.gmra.mxu0 %v339_v22 }
  0x2e   : > { %673 = vmatmul.mubr.bf16.vlgmr.msra.gmra.mxu1 %v341_v23 }
  0xed   : > { %v839_v24 = vpop.f32.mrf.mxu0 }
  0xee   : > { %v861_v25 = vpop.f32.mrf.mxu1 }
  0xef   : > { %v840_v26 = vpop.f32.mrf.mxu0 }
  0xf0   : > { %v841_v27 = vadd.f32 %v840_v26, %v839_v24  ;;  %v862_v28 = vpop.f32.mrf.mxu1 }
  0xf1   : > { %v863_v29 = vadd.f32 %v862_v28, %v861_v25  ;;  %v842_v30 = vpop.f32.mrf.mxu0 }
  0xf2   : > { %v864_v32 = vpop.f32.mrf.mxu1 }
  0xf3   : > { %v675_v33 = vadd.f32 %v863_v29, %v841_v27  ;;  %v843_v34 = vpop.f32.mrf.mxu0 }
  0xf4   : > { %v844_v35 = vadd.f32 %v843_v34, %v842_v30  ;;  %v865_v36 = vpop.f32.mrf.mxu1 }
  0xf5   : > { %v688_v37 = vmul.f32 %v809_v31, %v675_v33  ;;  %v866_v38 = vadd.f32 %v865_v36, %v864_v32 }
  0xf7   : > { %v678_v40 = vadd.f32 %v866_v38, %v844_v35  ;;  %v697_v41 = vadd.f32 %v810_v39, %v688_v37 }
  0xf9   : > { %v689_v42 = vmul.f32 %v809_v31, %v678_v40  ;;  %v699_v44 = vmax.f32 %v697_v41, 0.0 }
  0xfb   : > { %v698_v43 = vadd.f32 %v810_v39, %v689_v42 }
  0xfd   : > { %v700_v45 = vmax.f32 %v698_v43, 0.0 }
  0xff   : > { %v821_v46 = vpack.c.bf16 %v700_v45, %v699_v44 }
 0x101   : > { %822 = vst [vmem:[%s256_s13] sm:$0xff] %v821_v46  }
 0x102 PF: > { %s16_s21 = sadd.s32 1, %s913_s21  }
 0x103   : > { %p13_p4 = scmp.ge.s32.totalorder %s16_s21, 4  }
 0x105   :  { %15 = sbr.rel (!%p13_p4) target bundleno = 1 (0x1), region = 74 }

// kernel: densenet121_forward.166
= control target key start
LH: loop header
LB: loop body
LE: loop exit
PB: predicated region body
PF: predicated region fallthrough
CT: control target
= control target key end

     0   :  { %s1052_s15 = smov 0   ;;  %s1279_s0 = inlined_call_operand.vmem [shape: bf16[32,512], index: 0, kind: input, shape index: {}]   ;;  %s1280_s1 = inlined_call_operand.vmem [shape: f32[1,512], index: 1, kind: input, shape index: {}]   ;;  %s1281_s2 = inlined_call_operand.vmem [shape: f32[1,512], index: 2, kind: input, shape index: {}]   ;;  %s1282_s3 = inlined_call_operand.vmem [shape: bf16[512,256], index: 3, kind: input, shape index: {}]   ;;  %s1283_s4 = inlined_call_operand.vmem [shape: bf16[32,256], index: 4, kind: output, shape index: {}]  }
   0x1 LB: > { %s832_s16 = sadd.s32 4294967295, %s1025_s15   ;;  %p836_p0 = scmp.ge.s32.totalorder %s1025_s15, 1  ;;  %s1025_s15 = sphi %s1052_s15, %s14_s15  }
   0x2   : > { %p164_p1 = scmp.lt.s32.totalorder %s1025_s15, 3 }
   0x4   : > { %p165_p2 = pnand %p836_p0, %p164_p1 }
   0x5   : > { %s837_s29 = sshll.u32 (!%p165_p2), %s832_s16, 1 }
   0x6   : > { %168 = sbr.rel (%p165_p2) target bundleno = 281 (0x119), region = 36  ;;  %p193_p3 = scmp.lt.s32.totalorder (!%p165_p2), %s837_s29, 3 }
   0xb   : > { %v923_v0 = vld [vmem:[%s1282_s3 + $0x74] ss:$8 sps:$4 sm:$0xff]   ;;  %v927_v2 = vld [vmem:[%s1282_s3 + $0x70] ss:$8 sps:$4 sm:$0xff]   ;;  %v929_v4 = vld [vmem:[%s1282_s3 + $0x64] ss:$8 sps:$4 sm:$0xff]   ;;  %v220_v36 = vlaneseq }
   0xc   : > { %v925_v1 = vld [vmem:[%s1282_s3 + $0x174] ss:$8 sps:$4 sm:$0xff]   ;;  %674 = vmatprep.subr.bf16.mxu0 %v923_v0  ;;  %v928_v3 = vld [vmem:[%s1282_s3 + $0x170] ss:$8 sps:$4 sm:$0xff]   ;;  %v931_v5 = vld [vmem:[%s1282_s3 + $0x164] ss:$8 sps:$4 sm:$0xff]  }
   0xd   : > { %717 = vmatprep.subr.bf16.mxu1 %v925_v1  ;;  %675 = vmatpush1.bf16.msra.mxu0 %v927_v2  ;;  %v933_v6 = vld [vmem:[%s1282_s3 + $0x60] ss:$8 sps:$4 sm:$0xff]   ;;  %v935_v8 = vld [vmem:[%s1282_s3 + $0x54] ss:$8 sps:$4 sm:$0xff]   ;;  %v939_v10 = vld [vmem:[%s1282_s3 + $0x50] ss:$8 sps:$4 sm:$0xff]  }
   0xe   : > { %718 = vmatpush1.bf16.msra.mxu1 %v928_v3  ;;  %676 = vmatprep.subr.bf16.mxu0 %v929_v4  ;;  %v934_v7 = vld [vmem:[%s1282_s3 + $0x160] ss:$8 sps:$4 sm:$0xff]   ;;  %v937_v9 = vld [vmem:[%s1282_s3 + $0x154] ss:$8 sps:$4 sm:$0xff]   ;;  %v940_v11 = vld [vmem:[%s1282_s3 + $0x150] ss:$8 sps:$4 sm:$0xff]  }
   0xf   : > { %719 = vmatprep.subr.bf16.mxu1 %v931_v5  ;;  %v941_v12 = vld [vmem:[%s1282_s3 + $0x44] ss:$8 sps:$4 sm:$0xff]   ;;  %v945_v14 = vld [vmem:[%s1282_s3 + $0x40] ss:$8 sps:$4 sm:$0xff]   ;;  %v947_v16 = vld [vmem:[%s1282_s3 + $0x34] ss:$8 sps:$4 sm:$0xff]  }
  0x10   : > { %v943_v13 = vld [vmem:[%s1282_s3 + $0x144] ss:$8 sps:$4 sm:$0xff]   ;;  %v946_v15 = vld [vmem:[%s1282_s3 + $0x140] ss:$8 sps:$4 sm:$0xff]   ;;  %v949_v17 = vld [vmem:[%s1282_s3 + $0x134] ss:$8 sps:$4 sm:$0xff]  }
  0x11   : > { %677 = vmatpush1.bf16.msra.mxu0 %v933_v6  ;;  %v951_v18 = vld [vmem:[%s1282_s3 + $0x30] ss:$8 sps:$4 sm:$0xff]   ;;  %v953_v20 = vld [vmem:[%s1282_s3 + $0x24] ss:$8 sps:$4 sm:$0xff]   ;;  %v957_v22 = vld [vmem:[%s1282_s3 + $0x20] ss:$8 sps:$4 sm:$0xff]  }
  0x12   : > { %720 = vmatpush1.bf16.msra.mxu1 %v934_v7  ;;  %678 = vmatprep.subr.bf16.mxu0 %v935_v8  ;;  %v952_v19 = vld [vmem:[%s1282_s3 + $0x130] ss:$8 sps:$4 sm:$0xff]   ;;  %v955_v21 = vld [vmem:[%s1282_s3 + $0x124] ss:$8 sps:$4 sm:$0xff]   ;;  %v958_v23 = vld [vmem:[%s1282_s3 + $0x120] ss:$8 sps:$4 sm:$0xff]  }
  0x13   : > { %721 = vmatprep.subr.bf16.mxu1 %v937_v9  ;;  %v959_v24 = vld [vmem:[%s1282_s3 + $0x14] ss:$8 sps:$4 sm:$0xff]   ;;  %v963_v26 = vld [vmem:[%s1282_s3 + $0x10] ss:$8 sps:$4 sm:$0xff]   ;;  %v965_v28 = vld [vmem:[%s1282_s3 + $0x4] ss:$8 sps:$4 sm:$0xff]  }
  0x14   : > { %v961_v25 = vld [vmem:[%s1282_s3 + $0x114] ss:$8 sps:$4 sm:$0xff]   ;;  %v964_v27 = vld [vmem:[%s1282_s3 + $0x110] ss:$8 sps:$4 sm:$0xff]   ;;  %v967_v29 = vld [vmem:[%s1282_s3 + $0x104] ss:$8 sps:$4 sm:$0xff]  }
  0x15   : > { %679 = vmatpush1.bf16.msra.mxu0 %v939_v10  ;;  %v969_v30 = vld [vmem:[%s1282_s3] ss:$8 sps:$4 sm:$0xff]   ;;  %v971_v32 = vld [vmem:[%s1282_s3 + $0xf4] ss:$8 sps:$4 sm:$0xff]   ;;  %v975_v34 = vld [vmem:[%s1282_s3 + $0xf0] ss:$8 sps:$4 sm:$0xff]  }
  0x16   : > { %722 = vmatpush1.bf16.msra.mxu1 %v940_v11  ;;  %680 = vmatprep.subr.bf16.mxu0 %v941_v12  ;;  %v970_v31 = vld [vmem:[%s1282_s3 + $0x100] ss:$8 sps:$4 sm:$0xff]   ;;  %v973_v33 = vld [vmem:[%s1282_s3 + $0x1f4] ss:$8 sps:$4 sm:$0xff]   ;;  %v976_v35 = vld [vmem:[%s1282_s3 + $0x1f0] ss:$8 sps:$4 sm:$0xff]  }
  0x17   : > { %723 = vmatprep.subr.bf16.mxu1 %v943_v13  ;;  %v977_v37 = vld [vmem:[%s1282_s3 + $0xe4] ss:$8 sps:$4 sm:$0xff]   ;;  %s1285_s29 = smov (!%p193_p3, %s837_s29), 3  ;;  %v981_v39 = vld [vmem:[%s1282_s3 + $0xe0] ss:$8 sps:$4 sm:$0xff]   ;;  %v1181_v40 = vshrl.u32 %v220_v36, 7 }
  0x18   : > { %v979_v38 = vld [vmem:[%s1282_s3 + $0x1e4] ss:$8 sps:$4 sm:$0xff]   ;;  %v982_v41 = vld [vmem:[%s1282_s3 + $0x1e0] ss:$8 sps:$4 sm:$0xff]   ;;  %v983_v42 = vld [vmem:[%s1282_s3 + $0xd4] ss:$8 sps:$4 sm:$0xff]  }
  0x19   : > { %681 = vmatpush1.bf16.msra.mxu0 %v945_v14  ;;  %s911_s27 = sshll.u32 %s1285_s29, 4  ;;  %v985_v43 = vld [vmem:[%s1282_s3 + $0x1d4] ss:$8 sps:$4 sm:$0xff]   ;;  %v987_v44 = vld [vmem:[%s1282_s3 + $0xd0] ss:$8 sps:$4 sm:$0xff]   ;;  %v226_v47 = vsub.s32 1, %v1181_v40 }
  0x1a   : > { %724 = vmatpush1.bf16.msra.mxu1 %v946_v15  ;;  %682 = vmatprep.subr.bf16.mxu0 %v947_v16  ;;  %v988_v45 = vld [vmem:[%s1282_s3 + $0x1d0] ss:$8 sps:$4 sm:$0xff]   ;;  %s197_s11 = scalar_lea.vmem %s1279_s0, %s911_s27  ;;  %v989_v46 = vld [vmem:[%s1282_s3 + $0xc4] ss:$8 sps:$4 sm:$0xff]   ;;  %v993_v49 = vld [vmem:[%s1282_s3 + $0xc0] ss:$8 sps:$4 sm:$0xff]  }
  0x1b   : > { %725 = vmatprep.subr.bf16.mxu1 %v949_v17  ;;  %v991_v48 = vld [vmem:[%s1282_s3 + $0x1c4] ss:$8 sps:$4 sm:$0xff]   ;;  %v234_v51 = vsub.s32 3, %v1181_v40  ;;  %v222_v52 = vsub.s32 0, %v1181_v40  ;;  %v208_v53 = vld [vmem:[%s197_s11 + $0x10] sm:$0xff]  ;;  %v230_v57 = vsub.s32 2, %v1181_v40 }
  0x1c   : > { %v206_v50 = vld [vmem:[%s197_s11] sm:$0xff]  ;;  %v215_v59 = vunpack.c.h.bf16 %v208_v53  ;;  %v207_v62 = vld [vmem:[%s197_s11 + $0x8] sm:$0xff]  ;;  %v209_v63 = vld [vmem:[%s197_s11 + $0x18] sm:$0xff]  ;;  %v214_v3 = vunpack.c.l.bf16 %v208_v53  ;;  %s912_s8 = sshll.u32 %s1285_s29, 3 }
  0x1d   : > { %683 = vmatpush1.bf16.msra.mxu0 %v951_v18  ;;  %v211_v54 = vunpack.c.h.bf16 %v206_v50  ;;  %v218_v55 = vld [vmem:[%s1280_s1] sm:$0xf]  ;;  %v995_v0 = vld [vmem:[%s1282_s3 + $0xb4] ss:$8 sps:$4 sm:$0xff]   ;;  %v210_v2 = vunpack.c.l.bf16 %v206_v50  ;;  %v213_v4 = vunpack.c.h.bf16 %v207_v62  ;;  %v217_v5 = vunpack.c.h.bf16 %v209_v63  ;;  %v999_v14 = vld [vmem:[%s1282_s3 + $0xb0] ss:$8 sps:$4 sm:$0xff]   ;;  %s204_s11 = scalar_lea.vmem %s1283_s4, %s912_s8 }
  0x1e   : > { %726 = vmatpush1.bf16.msra.mxu1 %v952_v19  ;;  %684 = vmatprep.subr.bf16.mxu0 %v953_v20  ;;  %v248_v56 = vld [vmem:[%s1281_s2] sm:$0xf]  ;;  %v227_v60 = vrot.slane %v218_v55, %v226_v47  ;;  %v997_v1 = vld [vmem:[%s1282_s3 + $0x1b4] ss:$8 sps:$4 sm:$0xff]   ;;  %v235_v8 = vrot.slane %v218_v55, %v234_v51  ;;  %v212_v10 = vunpack.c.l.bf16 %v207_v62  ;;  %v216_v11 = vunpack.c.l.bf16 %v209_v63  ;;  %v1000_v15 = vld [vmem:[%s1282_s3 + $0x1b0] ss:$8 sps:$4 sm:$0xff]  }
  0x1f   : > { %727 = vmatprep.subr.bf16.mxu1 %v955_v21  ;;  %v994_v58 = vld [vmem:[%s1282_s3 + $0x1c0] ss:$8 sps:$4 sm:$0xff]   ;;  %v257_v61 = vrot.slane %v248_v56, %v226_v47  ;;  %v265_v9 = vrot.slane %v248_v56, %v234_v51  ;;  %v223_v12 = vrot.slane %v218_v55, %v222_v52  ;;  %v231_v13 = vrot.slane %v218_v55, %v230_v57  ;;  %v1001_v19 = vld [vmem:[%s1282_s3 + $0xa4] ss:$8 sps:$4 sm:$0xff]   ;;  %v1007_v36 = vld [vmem:[%s1282_s3 + $0x94] ss:$8 sps:$4 sm:$0xff]  }
  0x20   : > { %v241_v6 = vmul.f32 %v227_v60, %v211_v54  ;;  %v245_v7 = vmul.f32 %v227_v60, %v215_v59  ;;  %v243_v18 = vmul.f32 %v235_v8, %v213_v4  ;;  %v1003_v20 = vld [vmem:[%s1282_s3 + $0x1a4] ss:$8 sps:$4 sm:$0xff]   ;;  %v247_v21 = vmul.f32 %v235_v8, %v217_v5  ;;  %v1018_v53 = vld [vmem:[%s1282_s3 + $0x180] ss:$8 sps:$4 sm:$0xff]  }
  0x21   : > { %685 = vmatpush1.bf16.msra.mxu0 %v957_v22  ;;  %v253_v22 = vrot.slane %v248_v56, %v222_v52  ;;  %v1015_v47 = vld [vmem:[%s1282_s3 + $0x184] ss:$8 sps:$4 sm:$0xff]   ;;  %v1017_v52 = vld [vmem:[%s1282_s3 + $0x80] ss:$8 sps:$4 sm:$0xff]  }
  0x22   : > { %728 = vmatpush1.bf16.msra.mxu1 %v958_v23  ;;  %686 = vmatprep.subr.bf16.mxu0 %v959_v24  ;;  %v271_v16 = vadd.f32 %v257_v61, %v241_v6  ;;  %v275_v17 = vadd.f32 %v257_v61, %v245_v7  ;;  %v261_v23 = vrot.slane %v248_v56, %v230_v57 }
  0x23   : > { %729 = vmatprep.subr.bf16.mxu1 %v961_v25 }
  0x24   : > { %v279_v24 = vmax.f32 %v271_v16, 0.0  ;;  %v283_v25 = vmax.f32 %v275_v17, 0.0 }
  0x25   : > { %687 = vmatpush1.bf16.msra.mxu0 %v963_v26  ;;  %v273_v26 = vadd.f32 %v265_v9, %v243_v18 }
  0x26   : > { %730 = vmatpush1.bf16.msra.mxu1 %v964_v27  ;;  %688 = vmatprep.subr.bf16.mxu0 %v965_v28  ;;  %v240_v27 = vmul.f32 %v223_v12, %v210_v2  ;;  %v277_v28 = vadd.f32 %v265_v9, %v247_v21 }
  0x27   : > { %731 = vmatprep.subr.bf16.mxu1 %v967_v29  ;;  %v244_v29 = vmul.f32 %v223_v12, %v214_v3 }
  0x29   : > { %689 = vmatpush1.bf16.msra.mxu0 %v969_v30  ;;  %v242_v30 = vmul.f32 %v231_v13, %v212_v10 }
  0x2a   : > { %732 = vmatpush1.bf16.msra.mxu1 %v970_v31  ;;  %690 = vmatprep.subr.bf16.mxu0 %v971_v32  ;;  %v246_v31 = vmul.f32 %v231_v13, %v216_v11  ;;  %v1005_v32 = vld [vmem:[%s1282_s3 + $0xa0] ss:$8 sps:$4 sm:$0xff]  }
  0x2b   : > { %733 = vmatprep.subr.bf16.mxu1 %v973_v33  ;;  %v1006_v33 = vld [vmem:[%s1282_s3 + $0x1a0] ss:$8 sps:$4 sm:$0xff]  }
  0x2d   : > { %691 = vmatpush2.bf16.msra.mxu0 %v975_v34  ;;  %v287_v34 = vpack.c.bf16 %v283_v25, %v279_v24 }
  0x2e   : > { %734 = vmatpush2.bf16.msra.mxu1 %v976_v35  ;;  %692 = vmatprep.subr.bf16.mxu0 %v977_v37  ;;  %v281_v35 = vmax.f32 %v273_v26, 0.0  ;;  %v1009_v37 = vld [vmem:[%s1282_s3 + $0x194] ss:$8 sps:$4 sm:$0xff]  }
  0x2f   : > { %735 = vmatprep.subr.bf16.mxu1 %v979_v38  ;;  %v285_v38 = vmax.f32 %v277_v28, 0.0  ;;  %706 = vmatprep.mubr.bf16.mxu0 %v287_v34 }
  0x31   : > { %693 = vmatpush2.bf16.msra.mxu0 %v981_v39  ;;  %v270_v39 = vadd.f32 %v253_v22, %v240_v27  ;;  %v289_v40 = vpack.c.bf16 %v285_v38, %v281_v35 }
  0x32   : > { %736 = vmatpush2.bf16.msra.mxu1 %v982_v41  ;;  %694 = vmatprep.subr.bf16.mxu0 %v983_v42  ;;  %v274_v41 = vadd.f32 %v253_v22, %v244_v29  ;;  %v272_v42 = vadd.f32 %v261_v23, %v242_v30 }
  0x33   : > { %737 = vmatprep.subr.bf16.mxu1 %v985_v43  ;;  %v276_v43 = vadd.f32 %v261_v23, %v246_v31  ;;  %749 = vmatprep.mubr.bf16.mxu1 %v289_v40 }
  0x34   : > { %v280_v50 = vmax.f32 %v272_v42, 0.0 }
  0x35   : > { %695 = vmatpush2.bf16.msra.mxu0 %v987_v44  ;;  %v1011_v44 = vld [vmem:[%s1282_s3 + $0x90] ss:$8 sps:$4 sm:$0xff]   ;;  %v284_v51 = vmax.f32 %v276_v43, 0.0 }
  0x36   : > { %738 = vmatpush2.bf16.msra.mxu1 %v988_v45  ;;  %696 = vmatprep.subr.bf16.mxu0 %v989_v46  ;;  %v1012_v45 = vld [vmem:[%s1282_s3 + $0x190] ss:$8 sps:$4 sm:$0xff]   ;;  %v1013_v46 = vld [vmem:[%s1282_s3 + $0x84] ss:$8 sps:$4 sm:$0xff]  }
  0x37   : > { %739 = vmatprep.subr.bf16.mxu1 %v991_v48  ;;  %v278_v48 = vmax.f32 %v270_v39, 0.0  ;;  %v288_v55 = vpack.c.bf16 %v284_v51, %v280_v50 }
  0x39   : > { %697 = vmatpush2.bf16.msra.mxu0 %v993_v49  ;;  %v282_v49 = vmax.f32 %v274_v41, 0.0 }
  0x3a   : > { %740 = vmatpush2.bf16.msra.mxu1 %v994_v58  ;;  %698 = vmatprep.subr.bf16.mxu0 %v995_v0 }
  0x3b   : > { %741 = vmatprep.subr.bf16.mxu1 %v997_v1  ;;  %v286_v54 = vpack.c.bf16 %v282_v49, %v278_v48 }
  0x3d   : > { %699 = vmatpush2.bf16.msra.mxu0 %v999_v14 }
  0x3e   : > { %742 = vmatpush2.bf16.msra.mxu1 %v1000_v15  ;;  %700 = vmatprep.subr.bf16.mxu0 %v1001_v19 }
  0x3f   : > { %743 = vmatprep.subr.bf16.mxu1 %v1003_v20 }
  0x41   : > { %701 = vmatpush2.bf16.msra.mxu0 %v1005_v32 }
  0x42   : > { %744 = vmatpush2.bf16.msra.mxu1 %v1006_v33  ;;  %702 = vmatprep.subr.bf16.mxu0 %v1007_v36 }
  0x43   : > { %745 = vmatprep.subr.bf16.mxu1 %v1009_v37 }
  0x45   : > { %703 = vmatpush2.bf16.msra.mxu0 %v1011_v44 }
  0x46   : > { %746 = vmatpush2.bf16.msra.mxu1 %v1012_v45  ;;  %704 = vmatprep.subr.bf16.mxu0 %v1013_v46 }
  0x47   : > { %747 = vmatprep.subr.bf16.mxu1 %v1015_v47 }
  0x49   : > { %705 = vmatpush2.bf16.msra.mxu0 %v1017_v52 }
  0x4a   : > { %748 = vmatpush2.bf16.msra.mxu1 %v1018_v53 }
  0x4c   : > { %707 = vmatmul.mubr.bf16.vlgmr.msra.gmra.mxu0 %v286_v54 }
  0x4d   : > { %750 = vmatmul.mubr.bf16.vlgmr.msra.gmra.mxu1 %v288_v55 }
 0x10c   : > { %v708_v56 = vpop.f32.mrf.mxu0 }
 0x10d   : > { %v751_v57 = vpop.f32.mrf.mxu1 }
 0x10e   : > { %v710_v58 = vpop.f32.mrf.mxu0  ;;  %v752_v60 = vadd.f32 %v751_v57, %v708_v56 }
 0x10f   : > { %v753_v59 = vpop.f32.mrf.mxu1 }
 0x110   : > { %v754_v61 = vadd.f32 %v753_v59, %v710_v58  ;;  %v712_v62 = vpop.f32.mrf.mxu0 }
 0x111   : > { %v755_v63 = vpop.f32.mrf.mxu1 }
 0x112   : > { %v913_v0 = vpack.c.bf16 %v754_v61, %v752_v60  ;;  %v714_v1 = vpop.f32.mrf.mxu0  ;;  %v756_v3 = vadd.f32 %v755_v63, %v712_v62 }
 0x113   : > { %v757_v2 = vpop.f32.mrf.mxu1 }
 0x114   : > { %772 = vst [vmem:[%s204_s11] sm:$0xff] %v913_v0  ;;  %v758_v4 = vadd.f32 %v757_v2, %v714_v1 }
 0x116   : > { %v914_v5 = vpack.c.bf16 %v758_v4, %v756_v3 }
 0x118   : > { %773 = vst [vmem:[%s204_s11 + $0x8] sm:$0xff] %v914_v5 }
 0x119 PF: > { %s14_s15 = sadd.s32 1, %s1025_s15  }
 0x11a   : > { %p11_p4 = scmp.ge.s32.totalorder %s14_s15, 4  }
 0x11c   :  { %13 = sbr.rel (!%p11_p4) target bundleno = 1 (0x1), region = 66 }

// kernel: densenet121_forward.167
= control target key start
LH: loop header
LB: loop body
LE: loop exit
PB: predicated region body
PF: predicated region fallthrough
CT: control target
= control target key end

     0   :  { %s69_s0 = inlined_call_operand.vmem [shape: bf16[4,8,256], index: 0, kind: input, shape index: {}]   ;;  %s70_s1 = inlined_call_operand.vmem [shape: bf16[8,256], index: 1, kind: output, shape index: {}]  }
   0x1   :  { %v8_v0 = vld [vmem:[%s69_s0] sm:$0xff]  ;;  %v9_v1 = vld [vmem:[%s69_s0 + $0x8] sm:$0xff]  ;;  %v10_v2 = vld [vmem:[%s69_s0 + $0x10] sm:$0xff] }
   0x2   :  { %v11_v3 = vld [vmem:[%s69_s0 + $0x18] sm:$0xff]  ;;  %v12_v4 = vunpack.c.l.bf16 %v8_v0  ;;  %v13_v5 = vunpack.c.h.bf16 %v8_v0  ;;  %v14_v6 = vunpack.c.l.bf16 %v9_v1  ;;  %v15_v7 = vunpack.c.h.bf16 %v9_v1 }
   0x3   :  { %v16_v8 = vunpack.c.l.bf16 %v10_v2  ;;  %v17_v9 = vunpack.c.h.bf16 %v10_v2  ;;  %v18_v10 = vunpack.c.l.bf16 %v11_v3  ;;  %v19_v11 = vunpack.c.h.bf16 %v11_v3 }
   0x4   :  { %v20_v12 = vadd.f32 %v14_v6, %v12_v4  ;;  %v23_v13 = vadd.f32 %v15_v7, %v13_v5 }
   0x6   :  { %v21_v14 = vadd.f32 %v20_v12, %v16_v8  ;;  %v24_v15 = vadd.f32 %v23_v13, %v17_v9 }
   0x8   :  { %v22_v16 = vadd.f32 %v21_v14, %v18_v10  ;;  %v25_v17 = vadd.f32 %v24_v15, %v19_v11 }
   0xa   :  { %v27_v18 = vmul.f32 0.25, %v22_v16  ;;  %v28_v19 = vmul.f32 0.25, %v25_v17 }
   0xc   :  { %v43_v20 = vpack.c.bf16 %v28_v19, %v27_v18 }
   0xe   :  { %37 = vst [vmem:[%s70_s1] sm:$0xff] %v43_v20 }

// kernel: densenet121_forward.168
= control target key start
LH: loop header
LB: loop body
LE: loop exit
PB: predicated region body
PF: predicated region fallthrough
CT: control target
= control target key end

     0   :  { %v71_v5 = vlaneseq  ;;  %s483_s0 = inlined_call_operand.vmem [shape: bf16[16,1024], index: 0, kind: input, shape index: {}]   ;;  %s484_s1 = inlined_call_operand.vmem [shape: f32[1,256], index: 1, kind: input, shape index: {}]   ;;  %s485_s2 = inlined_call_operand.vmem [shape: f32[1,256], index: 2, kind: input, shape index: {}]   ;;  %s486_s3 = inlined_call_operand.vmem [shape: bf16[256,128], index: 3, kind: input, shape index: {}]   ;;  %s487_s4 = inlined_call_operand.vmem [shape: f32[1,128], index: 4, kind: input, shape index: {}]   ;;  %s488_s5 = inlined_call_operand.vmem [shape: f32[1,128], index: 5, kind: input, shape index: {}]   ;;  %s489_s6 = inlined_call_operand.vmem [shape: bf16[16,128], index: 6, kind: output, shape index: {}]  }
   0x1   :  { %v363_v0 = vld [vmem:[%s486_s3 + $0x78] sm:$0xff]   ;;  %v365_v2 = vld [vmem:[%s486_s3 + $0x70] sm:$0xff]   ;;  %v367_v4 = vld [vmem:[%s486_s3 + $0x68] sm:$0xff]  }
   0x2   :  { %v364_v1 = vld [vmem:[%s486_s3 + $0x38] sm:$0xff]   ;;  %341 = vmatprep.subr.bf16.mxu0 %v363_v0  ;;  %v366_v3 = vld [vmem:[%s486_s3 + $0x30] sm:$0xff]   ;;  %v368_v6 = vld [vmem:[%s486_s3 + $0x28] sm:$0xff]   ;;  %v72_v8 = vshrl.u32 %v71_v5, 7 }
   0x3   :  { %342 = vmatpush3.bf16.msra.mxu0 %v364_v1  ;;  %v369_v7 = vld [vmem:[%s486_s3 + $0x60] sm:$0xff]   ;;  %v371_v10 = vld [vmem:[%s486_s3 + $0x58] sm:$0xff]   ;;  %v373_v14 = vld [vmem:[%s486_s3 + $0x50] sm:$0xff]  }
   0x4   :  { %343 = vmatprep.subr.bf16.mxu0 %v365_v2  ;;  %v370_v9 = vld [vmem:[%s486_s3 + $0x20] sm:$0xff]   ;;  %v73_v11 = vsub.s32 0, %v72_v8  ;;  %v372_v12 = vld [vmem:[%s486_s3 + $0x18] sm:$0xff]   ;;  %v77_v13 = vsub.s32 1, %v72_v8  ;;  %v374_v27 = vld [vmem:[%s486_s3 + $0x10] sm:$0xff]  }
   0x5   :  { %v43_v15 = vld [vmem:[%s483_s0] sm:$0xff]  ;;  %v375_v28 = vld [vmem:[%s486_s3 + $0x48] sm:$0xff]  }
   0x6   :  { %v45_v16 = vld [vmem:[%s483_s0 + $0x20] sm:$0xff]  ;;  %v65_v18 = vunpack.c.l.bf16 %v43_v15  ;;  %v66_v19 = vunpack.c.h.bf16 %v43_v15  ;;  %v376_v37 = vld [vmem:[%s486_s3 + $0x8] sm:$0xff]  }
   0x7   :  { %344 = vmatpush3.bf16.msra.mxu0 %v366_v3  ;;  %v69_v17 = vld [vmem:[%s484_s1] sm:$0x3]  ;;  %v67_v20 = vunpack.c.l.bf16 %v45_v16  ;;  %v68_v21 = vunpack.c.h.bf16 %v45_v16 }
   0x8   :  { %345 = vmatprep.subr.bf16.mxu0 %v367_v4  ;;  %v85_v22 = vld [vmem:[%s485_s2] sm:$0x3]  ;;  %v74_v23 = vrot.slane %v69_v17, %v73_v11  ;;  %v78_v24 = vrot.slane %v69_v17, %v77_v13 }
   0x9   :  { %v90_v25 = vrot.slane %v85_v22, %v73_v11  ;;  %v94_v26 = vrot.slane %v85_v22, %v77_v13  ;;  %v377_v38 = vld [vmem:[%s486_s3 + $0x40] sm:$0xff]  }
   0xa   :  { %v82_v29 = vmul.f32 %v78_v24, %v66_v19  ;;  %v84_v30 = vmul.f32 %v78_v24, %v68_v21  ;;  %v81_v31 = vmul.f32 %v74_v23, %v65_v18  ;;  %v83_v32 = vmul.f32 %v74_v23, %v67_v20  ;;  %v378_v44 = vld [vmem:[%s486_s3] sm:$0xff]  }
   0xb   :  { %346 = vmatpush3.bf16.msra.mxu0 %v368_v6  ;;  %v330_v48 = vld [vmem:[%s487_s4] ss:$0 sm:$0xff] }
   0xc   :  { %347 = vmatprep.subr.bf16.mxu0 %v369_v7  ;;  %v98_v33 = vadd.f32 %v94_v26, %v82_v29  ;;  %v100_v34 = vadd.f32 %v94_v26, %v84_v30  ;;  %v97_v35 = vadd.f32 %v90_v25, %v81_v31  ;;  %v99_v36 = vadd.f32 %v90_v25, %v83_v32  ;;  %v331_v52 = vld [vmem:[%s488_s5] ss:$0 sm:$0xff] }
   0xe   :  { %v102_v39 = vmax.f32 %v98_v33, 0.0  ;;  %v104_v40 = vmax.f32 %v100_v34, 0.0  ;;  %v101_v42 = vmax.f32 %v97_v35, 0.0  ;;  %v103_v43 = vmax.f32 %v99_v36, 0.0 }
   0xf   :  { %348 = vmatpush3.bf16.msra.mxu0 %v370_v9 }
  0x10   :  { %349 = vmatprep.subr.bf16.mxu0 %v371_v10  ;;  %v106_v41 = vpack.c.bf16 %v104_v40, %v102_v39  ;;  %v105_v45 = vpack.c.bf16 %v103_v43, %v101_v42 }
  0x12   :  { %267 = vmatprep.mubr.bf16.mxu0 %v106_v41 }
  0x13   :  { %350 = vmatpush3.bf16.msra.mxu0 %v372_v12 }
  0x14   :  { %351 = vmatprep.subr.bf16.mxu0 %v373_v14 }
  0x17   :  { %352 = vmatpush3.bf16.msra.mxu0 %v374_v27 }
  0x18   :  { %353 = vmatprep.subr.bf16.mxu0 %v375_v28 }
  0x1b   :  { %354 = vmatpush3.bf16.msra.mxu0 %v376_v37 }
  0x1c   :  { %355 = vmatprep.subr.bf16.mxu0 %v377_v38 }
  0x1f   :  { %356 = vmatpush3.bf16.msra.mxu0 %v378_v44 }
  0x22   :  { %268 = vmatmul.mubr.bf16.vlgmr.msra.gmra.mxu0 %v105_v45 }
  0xe2   :  { %v357_v46 = vpop.f32.mrf.mxu0 }
  0xe4   :  { %v358_v47 = vpop.f32.mrf.mxu0 }
  0xe5   :  { %v359_v49 = vadd.f32 %v358_v47, %v357_v46 }
  0xe6   :  { %v360_v50 = vpop.f32.mrf.mxu0 }
  0xe7   :  { %v283_v51 = vmul.f32 %v359_v49, %v330_v48 }
  0xe8   :  { %v361_v53 = vpop.f32.mrf.mxu0 }
  0xe9   :  { %v362_v54 = vadd.f32 %v361_v53, %v360_v50  ;;  %v292_v55 = vadd.f32 %v331_v52, %v283_v51 }
  0xeb   :  { %v284_v56 = vmul.f32 %v362_v54, %v330_v48  ;;  %v294_v58 = vmax.f32 %v292_v55, 0.0 }
  0xed   :  { %v293_v57 = vadd.f32 %v331_v52, %v284_v56 }
  0xef   :  { %v295_v59 = vmax.f32 %v293_v57, 0.0 }
  0xf1   :  { %v339_v60 = vpack.c.bf16 %v295_v59, %v294_v58 }
  0xf3   :  { %340 = vst [vmem:[%s489_s6] sm:$0xff] %v339_v60  }

// kernel: densenet121_forward.170
= control target key start
LH: loop header
LB: loop body
LE: loop exit
PB: predicated region body
PF: predicated region fallthrough
CT: control target
= control target key end

     0   :  { %v554_v1 = vmov 0.0   ;;  %vm555_vm0 = vmmov 0   ;;  %v71_v14 = vlaneseq  ;;  %s699_s0 = inlined_call_operand.vmem [shape: bf16[16,1024], index: 0, kind: input, shape index: {}]   ;;  %s700_s1 = inlined_call_operand.vmem [shape: f32[1,384], index: 1, kind: input, shape index: {}]   ;;  %s701_s2 = inlined_call_operand.vmem [shape: f32[1,384], index: 2, kind: input, shape index: {}]   ;;  %s702_s3 = inlined_call_operand.vmem [shape: bf16[384,128], index: 3, kind: input, shape index: {}]   ;;  %s703_s4 = inlined_call_operand.vmem [shape: f32[1,128], index: 4, kind: input, shape index: {}]   ;;  %s704_s5 = inlined_call_operand.vmem [shape: f32[1,128], index: 5, kind: input, shape index: {}]   ;;  %s705_s6 = inlined_call_operand.vmem [shape: bf16[16,128], index: 6, kind: output, shape index: {}]  }
   0x1   :  { %v530_v0 = vld [vmem:[%s702_s3 + $0x78] sm:$0xff]   ;;  %508 = vmatprep.subr.bf16.mxu1 %v554_v1  ;;  %524 = vmatprep.mubr.msk.bf16.mxu1 %vm555_vm0, %v554_v1  ;;  %v533_v4 = vld [vmem:[%s702_s3 + $0x70] sm:$0xff]   ;;  %v536_v7 = vld [vmem:[%s702_s3 + $0x68] sm:$0xff]  }
   0x2   :  { %v531_v2 = vld [vmem:[%s702_s3 + $0xb8] sm:$0xff]   ;;  %477 = vmatprep.subr.bf16.mxu0 %v530_v0  ;;  %v534_v5 = vld [vmem:[%s702_s3 + $0xb0] sm:$0xff]   ;;  %v537_v8 = vld [vmem:[%s702_s3 + $0xa8] sm:$0xff]   ;;  %v72_v19 = vshrl.u32 %v71_v14, 7 }
   0x3   :  { %v532_v3 = vld [vmem:[%s702_s3 + $0x38] sm:$0xff]   ;;  %509 = vmatpush3.bf16.msra.mxu1 %v531_v2  ;;  %v535_v6 = vld [vmem:[%s702_s3 + $0x30] sm:$0xff]   ;;  %v538_v9 = vld [vmem:[%s702_s3 + $0x28] sm:$0xff]  }
   0x4   :  { %478 = vmatpush3.bf16.msra.mxu0 %v532_v3  ;;  %510 = vmatprep.subr.bf16.mxu1 %v554_v1  ;;  %v539_v10 = vld [vmem:[%s702_s3 + $0x60] sm:$0xff]   ;;  %v542_v13 = vld [vmem:[%s702_s3 + $0x58] sm:$0xff]   ;;  %v545_v17 = vld [vmem:[%s702_s3 + $0x50] sm:$0xff]   ;;  %v77_v24 = vsub.s32 1, %v72_v19  ;;  %v73_v26 = vsub.s32 0, %v72_v19  ;;  %v81_v45 = vsub.s32 2, %v72_v19 }
   0x5   :  { %479 = vmatprep.subr.bf16.mxu0 %v533_v4  ;;  %v540_v11 = vld [vmem:[%s702_s3 + $0xa0] sm:$0xff]   ;;  %v543_v15 = vld [vmem:[%s702_s3 + $0x98] sm:$0xff]   ;;  %v546_v18 = vld [vmem:[%s702_s3 + $0x90] sm:$0xff]  }
   0x6   :  { %v541_v12 = vld [vmem:[%s702_s3 + $0x20] sm:$0xff]   ;;  %v544_v16 = vld [vmem:[%s702_s3 + $0x18] sm:$0xff]   ;;  %v547_v20 = vld [vmem:[%s702_s3 + $0x10] sm:$0xff]  }
   0x7   :  { %511 = vmatpush3.bf16.msra.mxu1 %v534_v5  ;;  %v548_v21 = vld [vmem:[%s702_s3 + $0x48] sm:$0xff]   ;;  %v551_v25 = vld [vmem:[%s702_s3 + $0x40] sm:$0xff]  }
   0x8   :  { %480 = vmatpush3.bf16.msra.mxu0 %v535_v6  ;;  %512 = vmatprep.subr.bf16.mxu1 %v554_v1  ;;  %v549_v22 = vld [vmem:[%s702_s3 + $0x88] sm:$0xff]   ;;  %v27_v27 = vld [vmem:[%s699_s0] sm:$0xff] }
   0x9   :  { %481 = vmatprep.subr.bf16.mxu0 %v536_v7  ;;  %v550_v23 = vld [vmem:[%s702_s3 + $0x8] sm:$0xff]   ;;  %v29_v28 = vld [vmem:[%s699_s0 + $0x20] sm:$0xff]  ;;  %v63_v30 = vunpack.c.l.bf16 %v27_v27  ;;  %v64_v31 = vunpack.c.h.bf16 %v27_v27 }
   0xa   :  { %v69_v29 = vld [vmem:[%s700_s1] sm:$0x7]  ;;  %v66_v32 = vunpack.c.l.bf16 %v29_v28  ;;  %v67_v33 = vunpack.c.h.bf16 %v29_v28  ;;  %v440_v35 = vld [vmem:[%s699_s0 + $0x8] sm:$0xf] }
   0xb   :  { %513 = vmatpush3.bf16.msra.mxu1 %v537_v8  ;;  %v92_v34 = vld [vmem:[%s701_s2] sm:$0x7]  ;;  %v441_v36 = vld [vmem:[%s699_s0 + $0x28] sm:$0xf]  ;;  %v78_v37 = vrot.slane %v69_v29, %v77_v24  ;;  %42 = vst [vmem:[#allocation2 + $0x8] sm:$0xf] %v440_v35  ;;  %v74_v40 = vrot.slane %v69_v29, %v73_v26  ;;  %v82_v54 = vrot.slane %v69_v29, %v81_v45 }
   0xc   :  { %482 = vmatpush3.bf16.msra.mxu0 %v538_v9  ;;  %514 = vmatprep.subr.bf16.mxu1 %v554_v1  ;;  %v101_v38 = vrot.slane %v92_v34, %v77_v24  ;;  %44 = vst [vmem:[#allocation2 + $0x14] sm:$0xf] %v441_v36  ;;  %v552_v39 = vld [vmem:[%s702_s3 + $0x80] sm:$0xff]   ;;  %v97_v41 = vrot.slane %v92_v34, %v73_v26 }
   0xd   :  { %483 = vmatprep.subr.bf16.mxu0 %v539_v10  ;;  %v553_v42 = vld [vmem:[%s702_s3] sm:$0xff]   ;;  %v87_v43 = vmul.f32 %v78_v37, %v64_v31  ;;  %v90_v44 = vmul.f32 %v78_v37, %v67_v33  ;;  %v86_v46 = vmul.f32 %v74_v40, %v63_v30  ;;  %v89_v47 = vmul.f32 %v74_v40, %v66_v32 }
   0xe   :  { %v105_v61 = vrot.slane %v92_v34, %v81_v45 }
   0xf   :  { %515 = vmatpush3.bf16.msra.mxu1 %v540_v11  ;;  %v110_v48 = vadd.f32 %v101_v38, %v87_v43  ;;  %v113_v49 = vadd.f32 %v101_v38, %v90_v44  ;;  %v109_v50 = vadd.f32 %v97_v41, %v86_v46  ;;  %v112_v51 = vadd.f32 %v97_v41, %v89_v47 }
  0x10   :  { %484 = vmatpush3.bf16.msra.mxu0 %v541_v12  ;;  %516 = vmatprep.subr.bf16.mxu1 %v554_v1  ;;  %v466_v12 = vld [vmem:[%s703_s4] ss:$0 sm:$0xff] }
  0x11   :  { %485 = vmatprep.subr.bf16.mxu0 %v542_v13  ;;  %v116_v52 = vmax.f32 %v110_v48, 0.0  ;;  %v119_v53 = vmax.f32 %v113_v49, 0.0  ;;  %v115_v56 = vmax.f32 %v109_v50, 0.0  ;;  %v118_v57 = vmax.f32 %v112_v51, 0.0 }
  0x13   :  { %517 = vmatpush3.bf16.msra.mxu1 %v543_v15  ;;  %v60_v55 = vld [vmem:[#allocation2 + $0x8] ss:$12 sps:$4 sm:$0xff]   ;;  %v122_v58 = vpack.c.bf16 %v119_v53, %v116_v52  ;;  %v121_v62 = vpack.c.bf16 %v118_v57, %v115_v56 }
  0x14   :  { %486 = vmatpush3.bf16.msra.mxu0 %v544_v16  ;;  %518 = vmatprep.subr.bf16.mxu1 %v554_v1  ;;  %v65_v59 = vunpack.c.l.bf16 %v60_v55  ;;  %v68_v60 = vunpack.c.h.bf16 %v60_v55 }
  0x15   :  { %487 = vmatprep.subr.bf16.mxu0 %v545_v17  ;;  %348 = vmatprep.mubr.bf16.mxu0 %v122_v58  ;;  %v467_v17 = vld [vmem:[%s704_s5] ss:$0 sm:$0xff] }
  0x16   :  { %v88_v63 = vmul.f32 %v82_v54, %v65_v59  ;;  %v91_v0 = vmul.f32 %v82_v54, %v68_v60 }
  0x17   :  { %519 = vmatpush3.bf16.msra.mxu1 %v546_v18 }
  0x18   :  { %488 = vmatpush3.bf16.msra.mxu0 %v547_v20  ;;  %520 = vmatprep.subr.bf16.mxu1 %v554_v1  ;;  %v114_v2 = vadd.f32 %v105_v61, %v91_v0 }
  0x19   :  { %489 = vmatprep.subr.bf16.mxu0 %v548_v21 }
  0x1a   :  { %v120_v4 = vmax.f32 %v114_v2, 0.0 }
  0x1b   :  { %521 = vmatpush3.bf16.msra.mxu1 %v549_v22 }
  0x1c   :  { %490 = vmatpush3.bf16.msra.mxu0 %v550_v23  ;;  %522 = vmatprep.subr.bf16.mxu1 %v554_v1  ;;  %v111_v1 = vadd.f32 %v105_v61, %v88_v63 }
  0x1d   :  { %491 = vmatprep.subr.bf16.mxu0 %v551_v25 }
  0x1e   :  { %v117_v3 = vmax.f32 %v111_v1, 0.0 }
  0x1f   :  { %523 = vmatpush3.bf16.msra.mxu1 %v552_v39 }
  0x20   :  { %492 = vmatpush3.bf16.msra.mxu0 %v553_v42  ;;  %v123_v5 = vpack.c.bf16 %v120_v4, %v117_v3 }
  0x22   :  { %525 = vmatmul.mubr.bf16.vlgmr.msra.gmra.mxu1 %v123_v5 }
  0x23   :  { %349 = vmatmul.mubr.bf16.vlgmr.msra.gmra.mxu0 %v121_v62 }
  0xe2   :  { %v391_v11 = vpop.f32.mrf.mxu1 }
  0xe3   :  { %v493_v6 = vpop.f32.mrf.mxu0 }
  0xe4   :  { %v526_v15 = vpop.f32.mrf.mxu1 }
  0xe5   :  { %v494_v7 = vpop.f32.mrf.mxu0 }
  0xe6   :  { %v495_v8 = vadd.f32 %v494_v7, %v493_v6  ;;  %v394_v18 = vpop.f32.mrf.mxu1 }
  0xe7   :  { %v496_v9 = vpop.f32.mrf.mxu0 }
  0xe8   :  { %v392_v13 = vadd.f32 %v495_v8, %v391_v11  ;;  %v527_v20 = vpop.f32.mrf.mxu1 }
  0xe9   :  { %v497_v10 = vpop.f32.mrf.mxu0 }
  0xea   :  { %v498_v14 = vadd.f32 %v497_v10, %v496_v9  ;;  %v405_v16 = vmul.f32 %v466_v12, %v392_v13 }
  0xec   :  { %v395_v19 = vadd.f32 %v498_v14, %v394_v18  ;;  %v414_v21 = vadd.f32 %v467_v17, %v405_v16 }
  0xee   :  { %v406_v22 = vmul.f32 %v466_v12, %v395_v19  ;;  %v416_v24 = vmax.f32 %v414_v21, 0.0 }
  0xf0   :  { %v415_v23 = vadd.f32 %v467_v17, %v406_v22 }
  0xf2   :  { %v417_v25 = vmax.f32 %v415_v23, 0.0 }
  0xf4   :  { %v475_v26 = vpack.c.bf16 %v417_v25, %v416_v24 }
  0xf6   :  { %476 = vst [vmem:[%s705_s6] sm:$0xff] %v475_v26  }

// kernel: densenet121_forward.169
= control target key start
LH: loop header
LB: loop body
LE: loop exit
PB: predicated region body
PF: predicated region fallthrough
CT: control target
= control target key end

     0   :  { %vm1158_vm0 = vmmov 0   ;;  %s1420_s1 = inlined_call_operand.vmem [shape: bf16[1152,128], index: 1, kind: input, shape index: {}]   ;;  %s1421_s0 = inlined_call_operand.vmem [shape: bf16[16,1152], index: 0, kind: input, shape index: {}]   ;;  %s1422_s2 = inlined_call_operand.vmem [shape: bf16[16,128], index: 2, kind: output, shape index: {}]  }
   0x1   :  { %v1072_v0 = vld [vmem:[%s1420_s1 + $0x78] sm:$0xff]   ;;  %v1076_v4 = vld [vmem:[%s1420_s1 + $0x70] sm:$0xff]   ;;  %v1080_v8 = vld [vmem:[%s1420_s1 + $0x68] sm:$0xff]  }
   0x2   :  { %v1073_v1 = vld [vmem:[%s1420_s1 + $0xf8] sm:$0xff]   ;;  %953 = vmatprep.subr.bf16.mxu0 %v1072_v0  ;;  %v1077_v5 = vld [vmem:[%s1420_s1 + $0xf0] sm:$0xff]   ;;  %v1081_v9 = vld [vmem:[%s1420_s1 + $0xe8] sm:$0xff]  }
   0x3   :  { %v1074_v2 = vld [vmem:[%s1420_s1 + $0x38] sm:$0xff]   ;;  %975 = vmatprep.subr.bf16.mxu1 %v1073_v1  ;;  %v1078_v6 = vld [vmem:[%s1420_s1 + $0x30] sm:$0xff]   ;;  %v1082_v10 = vld [vmem:[%s1420_s1 + $0x28] sm:$0xff]  }
   0x4   :  { %v1075_v3 = vld [vmem:[%s1420_s1 + $0xb8] sm:$0xff]   ;;  %954 = vmatpush3.bf16.msra.mxu0 %v1074_v2  ;;  %v1079_v7 = vld [vmem:[%s1420_s1 + $0xb0] sm:$0xff]   ;;  %v1083_v11 = vld [vmem:[%s1420_s1 + $0xa8] sm:$0xff]  }
   0x5   :  { %976 = vmatpush3.bf16.msra.mxu1 %v1075_v3  ;;  %955 = vmatprep.subr.bf16.mxu0 %v1076_v4  ;;  %v1084_v12 = vld [vmem:[%s1420_s1 + $0x60] sm:$0xff]   ;;  %v1088_v16 = vld [vmem:[%s1420_s1 + $0x58] sm:$0xff]   ;;  %v1092_v20 = vld [vmem:[%s1420_s1 + $0x50] sm:$0xff]  }
   0x6   :  { %977 = vmatprep.subr.bf16.mxu1 %v1077_v5  ;;  %v1085_v13 = vld [vmem:[%s1420_s1 + $0xe0] sm:$0xff]   ;;  %v1089_v17 = vld [vmem:[%s1420_s1 + $0xd8] sm:$0xff]   ;;  %v1093_v21 = vld [vmem:[%s1420_s1 + $0xd0] sm:$0xff]  }
   0x7   :  { %v1086_v14 = vld [vmem:[%s1420_s1 + $0x20] sm:$0xff]   ;;  %v1090_v18 = vld [vmem:[%s1420_s1 + $0x18] sm:$0xff]   ;;  %v1094_v22 = vld [vmem:[%s1420_s1 + $0x10] sm:$0xff]  }
   0x8   :  { %956 = vmatpush3.bf16.msra.mxu0 %v1078_v6  ;;  %v1087_v15 = vld [vmem:[%s1420_s1 + $0xa0] sm:$0xff]   ;;  %v1091_v19 = vld [vmem:[%s1420_s1 + $0x98] sm:$0xff]   ;;  %v1095_v23 = vld [vmem:[%s1420_s1 + $0x90] sm:$0xff]   ;;  %v1157_v6 = vmov 0.0  }
   0x9   :  { %978 = vmatpush3.bf16.msra.mxu1 %v1079_v7  ;;  %957 = vmatprep.subr.bf16.mxu0 %v1080_v8  ;;  %v1096_v24 = vld [vmem:[%s1420_s1 + $0x48] sm:$0xff]   ;;  %v1100_v28 = vld [vmem:[%s1420_s1 + $0x40] sm:$0xff]   ;;  %v1110_v36 = vld [vmem:[%s1420_s1 + $0x178] sm:$0xff]  }
   0xa   :  { %979 = vmatprep.subr.bf16.mxu1 %v1081_v9  ;;  %v1097_v25 = vld [vmem:[%s1420_s1 + $0xc8] sm:$0xff]   ;;  %v1101_v29 = vld [vmem:[%s1420_s1 + $0xc0] sm:$0xff]   ;;  %v1111_v37 = vld [vmem:[%s1420_s1 + $0x138] sm:$0xff]  }
   0xb   :  { %v1098_v26 = vld [vmem:[%s1420_s1 + $0x8] sm:$0xff]   ;;  %v1102_v30 = vld [vmem:[%s1420_s1] sm:$0xff]   ;;  %v1112_v38 = vld [vmem:[%s1420_s1 + $0x1f8] sm:$0xff]  }
   0xc   :  { %958 = vmatpush3.bf16.msra.mxu0 %v1082_v10  ;;  %v1099_v27 = vld [vmem:[%s1420_s1 + $0x88] sm:$0xff]   ;;  %v1103_v31 = vld [vmem:[%s1420_s1 + $0x80] sm:$0xff]   ;;  %v1113_v39 = vld [vmem:[%s1420_s1 + $0x1b8] sm:$0xff]  }
   0xd   :  { %980 = vmatpush3.bf16.msra.mxu1 %v1083_v11  ;;  %959 = vmatprep.subr.bf16.mxu0 %v1084_v12  ;;  %v1104_v32 = vld [vmem:[%s1421_s0] ss:$36 sps:$4 sm:$0xff]   ;;  %v1107_v34 = vld [vmem:[%s1421_s0 + $0x8] ss:$36 sps:$4 sm:$0xff]   ;;  %v1114_v40 = vld [vmem:[%s1420_s1 + $0x170] sm:$0xff]  }
   0xe   :  { %981 = vmatprep.subr.bf16.mxu1 %v1085_v13  ;;  %v1106_v33 = vld [vmem:[%s1421_s0 + $0x4] ss:$36 sps:$4 sm:$0xff]   ;;  %v1109_v35 = vld [vmem:[%s1421_s0 + $0xc] ss:$36 sps:$4 sm:$0xff]   ;;  %v1126_v52 = vld [vmem:[%s1420_s1 + $0x158] sm:$0xff]  }
   0xf   :  { %676 = vmatprep.mubr.bf16.mxu0 %v1106_v33  ;;  %717 = vmatprep.mubr.bf16.mxu1 %v1109_v35  ;;  %v1115_v41 = vld [vmem:[%s1420_s1 + $0x130] sm:$0xff]   ;;  %v1118_v44 = vld [vmem:[%s1420_s1 + $0x168] sm:$0xff]   ;;  %v1122_v48 = vld [vmem:[%s1420_s1 + $0x160] sm:$0xff]  }
  0x10   :  { %960 = vmatpush3.bf16.msra.mxu0 %v1086_v14  ;;  %v1116_v42 = vld [vmem:[%s1420_s1 + $0x1f0] sm:$0xff]   ;;  %v1119_v45 = vld [vmem:[%s1420_s1 + $0x128] sm:$0xff]   ;;  %v1123_v49 = vld [vmem:[%s1420_s1 + $0x120] sm:$0xff]  }
  0x11   :  { %982 = vmatpush3.bf16.msra.mxu1 %v1087_v15  ;;  %961 = vmatprep.subr.bf16.mxu0 %v1088_v16  ;;  %v1117_v43 = vld [vmem:[%s1420_s1 + $0x1b0] sm:$0xff]   ;;  %v1120_v46 = vld [vmem:[%s1420_s1 + $0x1e8] sm:$0xff]   ;;  %v1124_v50 = vld [vmem:[%s1420_s1 + $0x1e0] sm:$0xff]  }
  0x12   :  { %983 = vmatprep.subr.bf16.mxu1 %v1089_v17  ;;  %v1121_v47 = vld [vmem:[%s1420_s1 + $0x1a8] sm:$0xff]   ;;  %v1125_v51 = vld [vmem:[%s1420_s1 + $0x1a0] sm:$0xff]   ;;  %v1127_v53 = vld [vmem:[%s1420_s1 + $0x118] sm:$0xff]  }
  0x13   :  { %v1128_v54 = vld [vmem:[%s1420_s1 + $0x1d8] sm:$0xff]   ;;  %v1130_v56 = vld [vmem:[%s1420_s1 + $0x150] sm:$0xff]   ;;  %v1134_v60 = vld [vmem:[%s1420_s1 + $0x148] sm:$0xff]  }
  0x14   :  { %962 = vmatpush3.bf16.msra.mxu0 %v1090_v18  ;;  %v1129_v55 = vld [vmem:[%s1420_s1 + $0x198] sm:$0xff]   ;;  %v1131_v57 = vld [vmem:[%s1420_s1 + $0x110] sm:$0xff]   ;;  %v1135_v61 = vld [vmem:[%s1420_s1 + $0x108] sm:$0xff]  }
  0x15   :  { %984 = vmatpush3.bf16.msra.mxu1 %v1091_v19  ;;  %963 = vmatprep.subr.bf16.mxu0 %v1092_v20  ;;  %v1132_v58 = vld [vmem:[%s1420_s1 + $0x1d0] sm:$0xff]   ;;  %v1136_v62 = vld [vmem:[%s1420_s1 + $0x1c8] sm:$0xff]   ;;  %v1138_v0 = vld [vmem:[%s1420_s1 + $0x140] sm:$0xff]  }
  0x16   :  { %985 = vmatprep.subr.bf16.mxu1 %v1093_v21  ;;  %v1133_v59 = vld [vmem:[%s1420_s1 + $0x190] sm:$0xff]   ;;  %v1137_v63 = vld [vmem:[%s1420_s1 + $0x188] sm:$0xff]   ;;  %v1139_v1 = vld [vmem:[%s1420_s1 + $0x100] sm:$0xff]  }
  0x17   :  { %v1140_v2 = vld [vmem:[%s1420_s1 + $0x1c0] sm:$0xff]   ;;  %v1141_v3 = vld [vmem:[%s1421_s0 + $0x10] ss:$36 sps:$4 sm:$0xff]   ;;  %v1145_v7 = vld [vmem:[%s1421_s0 + $0x18] ss:$36 sps:$4 sm:$0xff]  }
  0x18   :  { %964 = vmatpush3.bf16.msra.mxu0 %v1094_v22  ;;  %v1143_v4 = vld [vmem:[%s1421_s0 + $0x14] ss:$36 sps:$4 sm:$0xff]   ;;  %v1144_v5 = vld [vmem:[%s1420_s1 + $0x180] sm:$0xff]   ;;  %v1150_v11 = vld [vmem:[%s1420_s1 + $0x228] sm:$0xff]  }
  0x19   :  { %986 = vmatpush3.bf16.msra.mxu1 %v1095_v23  ;;  %965 = vmatprep.subr.bf16.mxu0 %v1096_v24  ;;  %v1147_v8 = vld [vmem:[%s1421_s0 + $0x1c] ss:$36 sps:$4 sm:$0xff]   ;;  %v1149_v10 = vld [vmem:[%s1420_s1 + $0x230] sm:$0xff]   ;;  %v1154_v15 = vld [vmem:[%s1420_s1 + $0x208] sm:$0xff]  }
  0x1a   :  { %987 = vmatprep.subr.bf16.mxu1 %v1097_v25  ;;  %v1148_v9 = vld [vmem:[%s1420_s1 + $0x238] sm:$0xff]   ;;  %v1151_v12 = vld [vmem:[%s1420_s1 + $0x220] sm:$0xff]   ;;  %v1153_v14 = vld [vmem:[%s1420_s1 + $0x210] sm:$0xff]  }
  0x1b   :  { %v1152_v13 = vld [vmem:[%s1420_s1 + $0x218] sm:$0xff]   ;;  %v1155_v16 = vld [vmem:[%s1420_s1 + $0x200] sm:$0xff]  }
  0x1c   :  { %966 = vmatpush3.bf16.msra.mxu0 %v1098_v26  ;;  %v1156_v17 = vld [vmem:[%s1421_s0 + $0x20] ss:$36 sps:$4 sm:$0xff]  }
  0x1d   :  { %988 = vmatpush3.bf16.msra.mxu1 %v1099_v27  ;;  %967 = vmatprep.subr.bf16.mxu0 %v1100_v28 }
  0x1e   :  { %989 = vmatprep.subr.bf16.mxu1 %v1101_v29 }
  0x20   :  { %968 = vmatpush3.bf16.msra.mxu0 %v1102_v30 }
  0x21   :  { %990 = vmatpush3.bf16.msra.mxu1 %v1103_v31  ;;  %997 = vmatprep.subr.bf16.mxu0 %v1110_v36 }
  0x22   :  { %1019 = vmatprep.subr.bf16.mxu1 %v1112_v38 }
  0x23   :  { %677 = vmatmul.mubr.bf16.vlgmr.msra.gmra.mxu0 %v1104_v32 }
  0x24   :  { %718 = vmatmul.mubr.bf16.vlgmr.msra.gmra.mxu1 %v1107_v34  ;;  %998 = vmatpush3.bf16.msra.mxu0 %v1111_v37 }
  0x25   :  { %1020 = vmatpush3.bf16.msra.mxu1 %v1113_v39  ;;  %999 = vmatprep.subr.bf16.mxu0 %v1114_v40 }
  0x26   :  { %1021 = vmatprep.subr.bf16.mxu1 %v1116_v42  ;;  %758 = vmatprep.mubr.bf16.mxu0 %v1143_v4 }
  0x27   :  { %799 = vmatprep.mubr.bf16.mxu1 %v1147_v8 }
  0x28   :  { %1000 = vmatpush3.bf16.msra.mxu0 %v1115_v41 }
  0x29   :  { %1022 = vmatpush3.bf16.msra.mxu1 %v1117_v43  ;;  %1001 = vmatprep.subr.bf16.mxu0 %v1118_v44 }
  0x2a   :  { %1023 = vmatprep.subr.bf16.mxu1 %v1120_v46 }
  0x2c   :  { %1002 = vmatpush3.bf16.msra.mxu0 %v1119_v45 }
  0x2d   :  { %1024 = vmatpush3.bf16.msra.mxu1 %v1121_v47  ;;  %1003 = vmatprep.subr.bf16.mxu0 %v1122_v48 }
  0x2e   :  { %1025 = vmatprep.subr.bf16.mxu1 %v1124_v50 }
  0x30   :  { %1004 = vmatpush3.bf16.msra.mxu0 %v1123_v49 }
  0x31   :  { %1026 = vmatpush3.bf16.msra.mxu1 %v1125_v51  ;;  %1005 = vmatprep.subr.bf16.mxu0 %v1126_v52 }
  0x32   :  { %1027 = vmatprep.subr.bf16.mxu1 %v1128_v54 }
  0x34   :  { %1006 = vmatpush3.bf16.msra.mxu0 %v1127_v53 }
  0x35   :  { %1028 = vmatpush3.bf16.msra.mxu1 %v1129_v55  ;;  %1007 = vmatprep.subr.bf16.mxu0 %v1130_v56 }
  0x36   :  { %1029 = vmatprep.subr.bf16.mxu1 %v1132_v58 }
  0x38   :  { %1008 = vmatpush3.bf16.msra.mxu0 %v1131_v57 }
  0x39   :  { %1030 = vmatpush3.bf16.msra.mxu1 %v1133_v59  ;;  %1009 = vmatprep.subr.bf16.mxu0 %v1134_v60 }
  0x3a   :  { %1031 = vmatprep.subr.bf16.mxu1 %v1136_v62 }
  0x3c   :  { %1010 = vmatpush3.bf16.msra.mxu0 %v1135_v61 }
  0x3d   :  { %1032 = vmatpush3.bf16.msra.mxu1 %v1137_v63  ;;  %1011 = vmatprep.subr.bf16.mxu0 %v1138_v0 }
  0x3e   :  { %1033 = vmatprep.subr.bf16.mxu1 %v1140_v2 }
  0x40   :  { %1012 = vmatpush3.bf16.msra.mxu0 %v1139_v1 }
  0x41   :  { %1050 = vmatprep.subr.bf16.mxu0 %v1157_v6  ;;  %1034 = vmatpush3.bf16.msra.mxu1 %v1144_v5 }
  0x43   :  { %759 = vmatmul.mubr.bf16.vlgmr.msra.gmra.mxu0 %v1141_v3 }
  0x44   :  { %1066 = vmatprep.mubr.msk.bf16.mxu0 %vm1158_vm0, %v1157_v6  ;;  %1051 = vmatpush3.bf16.msra.mxu0 %v1148_v9 }
  0x45   :  { %800 = vmatmul.mubr.bf16.vlgmr.msra.gmra.mxu1 %v1145_v7  ;;  %1052 = vmatprep.subr.bf16.mxu0 %v1157_v6 }
  0x48   :  { %1053 = vmatpush3.bf16.msra.mxu0 %v1149_v10 }
  0x49   :  { %1054 = vmatprep.subr.bf16.mxu0 %v1157_v6 }
  0x4c   :  { %1055 = vmatpush3.bf16.msra.mxu0 %v1150_v11 }
  0x4d   :  { %1056 = vmatprep.subr.bf16.mxu0 %v1157_v6 }
  0x50   :  { %1057 = vmatpush3.bf16.msra.mxu0 %v1151_v12 }
  0x51   :  { %1058 = vmatprep.subr.bf16.mxu0 %v1157_v6 }
  0x54   :  { %1059 = vmatpush3.bf16.msra.mxu0 %v1152_v13 }
  0x55   :  { %1060 = vmatprep.subr.bf16.mxu0 %v1157_v6 }
  0x58   :  { %1061 = vmatpush3.bf16.msra.mxu0 %v1153_v14 }
  0x59   :  { %1062 = vmatprep.subr.bf16.mxu0 %v1157_v6 }
  0x5c   :  { %1063 = vmatpush3.bf16.msra.mxu0 %v1154_v15 }
  0x5d   :  { %1064 = vmatprep.subr.bf16.mxu0 %v1157_v6 }
  0x60   :  { %1065 = vmatpush3.bf16.msra.mxu0 %v1155_v16 }
  0x63   :  { %1067 = vmatmul.mubr.bf16.vlgmr.msra.gmra.mxu0 %v1156_v17 }
  0xe3   :  { %v969_v18 = vpop.f32.mrf.mxu0 }
  0xe4   :  { %v991_v19 = vpop.f32.mrf.mxu1 }
  0xe5   :  { %v970_v20 = vpop.f32.mrf.mxu0 }
  0xe6   :  { %v992_v21 = vpop.f32.mrf.mxu1  ;;  %v971_v33 = vadd.f32 %v970_v20, %v969_v18 }
  0xe7   :  { %v972_v22 = vpop.f32.mrf.mxu0  ;;  %v993_v34 = vadd.f32 %v992_v21, %v991_v19 }
  0xe8   :  { %v994_v23 = vpop.f32.mrf.mxu1 }
  0xe9   :  { %v973_v24 = vpop.f32.mrf.mxu0  ;;  %v720_v40 = vadd.f32 %v993_v34, %v971_v33 }
  0xea   :  { %v995_v26 = vpop.f32.mrf.mxu1  ;;  %v974_v35 = vadd.f32 %v973_v24, %v972_v22 }
  0xeb   :  { %v996_v36 = vadd.f32 %v995_v26, %v994_v23 }
  0xed   :  { %v723_v41 = vadd.f32 %v996_v36, %v974_v35 }
 0x103   :  { %v1013_v25 = vpop.f32.mrf.mxu0 }
 0x105   :  { %v1014_v27 = vpop.f32.mrf.mxu0  ;;  %v1035_v28 = vpop.f32.mrf.mxu1 }
 0x106   :  { %v1015_v37 = vadd.f32 %v1014_v27, %v1013_v25 }
 0x107   :  { %v1016_v29 = vpop.f32.mrf.mxu0  ;;  %v1036_v30 = vpop.f32.mrf.mxu1 }
 0x108   :  { %v761_v42 = vadd.f32 %v1015_v37, %v720_v40  ;;  %v1037_v43 = vadd.f32 %v1036_v30, %v1035_v28 }
 0x109   :  { %v1017_v31 = vpop.f32.mrf.mxu0  ;;  %v1038_v32 = vpop.f32.mrf.mxu1 }
 0x10a   :  { %v1018_v38 = vadd.f32 %v1017_v31, %v1016_v29  ;;  %v802_v48 = vadd.f32 %v1037_v43, %v761_v42 }
 0x10b   :  { %v1039_v39 = vpop.f32.mrf.mxu1 }
 0x10c   :  { %v764_v44 = vadd.f32 %v1018_v38, %v723_v41  ;;  %v1040_v45 = vadd.f32 %v1039_v39, %v1038_v32 }
 0x10e   :  { %v805_v49 = vadd.f32 %v1040_v45, %v764_v44 }
 0x123   :  { %v842_v46 = vpop.f32.mrf.mxu0 }
 0x124   :  { %v843_v51 = vadd.f32 %v842_v46, %v802_v48 }
 0x125   :  { %v1068_v47 = vpop.f32.mrf.mxu0 }
 0x127   :  { %v845_v50 = vpop.f32.mrf.mxu0 }
 0x128   :  { %v846_v52 = vadd.f32 %v845_v50, %v805_v49 }
 0x129   :  { %v1069_v53 = vpop.f32.mrf.mxu0 }
 0x12a   :  { %v951_v54 = vpack.c.bf16 %v846_v52, %v843_v51 }
 0x12c   :  { %952 = vst [vmem:[%s1422_s2] sm:$0xff] %v951_v54  }

// kernel: densenet121_forward.178
= control target key start
LH: loop header
LB: loop body
LE: loop exit
PB: predicated region body
PF: predicated region fallthrough
CT: control target
= control target key end

     0   :  { %v63_v23 = vlaneseq  ;;  %s786_s0 = inlined_call_operand.vmem [shape: bf16[16,1024], index: 0, kind: input, shape index: {}]   ;;  %s787_s1 = inlined_call_operand.vmem [shape: f32[1,512], index: 1, kind: input, shape index: {}]   ;;  %s788_s2 = inlined_call_operand.vmem [shape: f32[1,512], index: 2, kind: input, shape index: {}]   ;;  %s789_s3 = inlined_call_operand.vmem [shape: bf16[512,128], index: 3, kind: input, shape index: {}]   ;;  %s790_s4 = inlined_call_operand.vmem [shape: f32[1,128], index: 4, kind: input, shape index: {}]   ;;  %s791_s5 = inlined_call_operand.vmem [shape: f32[1,128], index: 5, kind: input, shape index: {}]   ;;  %s792_s6 = inlined_call_operand.vmem [shape: bf16[16,128], index: 6, kind: output, shape index: {}]  }
   0x1   :  { %v596_v0 = vld [vmem:[%s789_s3 + $0x78] sm:$0xff]   ;;  %v600_v4 = vld [vmem:[%s789_s3 + $0x70] sm:$0xff]   ;;  %v604_v8 = vld [vmem:[%s789_s3 + $0x68] sm:$0xff]  }
   0x2   :  { %v597_v1 = vld [vmem:[%s789_s3 + $0xf8] sm:$0xff]   ;;  %552 = vmatprep.subr.bf16.mxu0 %v596_v0  ;;  %v601_v5 = vld [vmem:[%s789_s3 + $0xf0] sm:$0xff]   ;;  %v605_v9 = vld [vmem:[%s789_s3 + $0xe8] sm:$0xff]   ;;  %v64_v28 = vshrl.u32 %v63_v23, 7 }
   0x3   :  { %v598_v2 = vld [vmem:[%s789_s3 + $0x38] sm:$0xff]   ;;  %574 = vmatprep.subr.bf16.mxu1 %v597_v1  ;;  %v602_v6 = vld [vmem:[%s789_s3 + $0x30] sm:$0xff]   ;;  %v606_v10 = vld [vmem:[%s789_s3 + $0x28] sm:$0xff]  }
   0x4   :  { %v599_v3 = vld [vmem:[%s789_s3 + $0xb8] sm:$0xff]   ;;  %553 = vmatpush3.bf16.msra.mxu0 %v598_v2  ;;  %v603_v7 = vld [vmem:[%s789_s3 + $0xb0] sm:$0xff]   ;;  %v607_v11 = vld [vmem:[%s789_s3 + $0xa8] sm:$0xff]   ;;  %v69_v33 = vsub.s32 1, %v64_v28  ;;  %v77_v35 = vsub.s32 3, %v64_v28  ;;  %v65_v39 = vsub.s32 0, %v64_v28 }
   0x5   :  { %575 = vmatpush3.bf16.msra.mxu1 %v599_v3  ;;  %554 = vmatprep.subr.bf16.mxu0 %v600_v4  ;;  %v608_v12 = vld [vmem:[%s789_s3 + $0x60] sm:$0xff]   ;;  %v612_v16 = vld [vmem:[%s789_s3 + $0x58] sm:$0xff]   ;;  %v616_v20 = vld [vmem:[%s789_s3 + $0x50] sm:$0xff]   ;;  %v73_v40 = vsub.s32 2, %v64_v28 }
   0x6   :  { %576 = vmatprep.subr.bf16.mxu1 %v601_v5  ;;  %v609_v13 = vld [vmem:[%s789_s3 + $0xe0] sm:$0xff]   ;;  %v613_v17 = vld [vmem:[%s789_s3 + $0xd8] sm:$0xff]   ;;  %v617_v21 = vld [vmem:[%s789_s3 + $0xd0] sm:$0xff]  }
   0x7   :  { %v610_v14 = vld [vmem:[%s789_s3 + $0x20] sm:$0xff]   ;;  %v614_v18 = vld [vmem:[%s789_s3 + $0x18] sm:$0xff]   ;;  %v618_v22 = vld [vmem:[%s789_s3 + $0x10] sm:$0xff]  }
   0x8   :  { %555 = vmatpush3.bf16.msra.mxu0 %v602_v6  ;;  %v611_v15 = vld [vmem:[%s789_s3 + $0xa0] sm:$0xff]   ;;  %v615_v19 = vld [vmem:[%s789_s3 + $0x98] sm:$0xff]   ;;  %v619_v24 = vld [vmem:[%s789_s3 + $0x90] sm:$0xff]  }
   0x9   :  { %577 = vmatpush3.bf16.msra.mxu1 %v603_v7  ;;  %556 = vmatprep.subr.bf16.mxu0 %v604_v8  ;;  %v620_v25 = vld [vmem:[%s789_s3 + $0x48] sm:$0xff]   ;;  %v624_v30 = vld [vmem:[%s789_s3 + $0x40] sm:$0xff]  }
   0xa   :  { %578 = vmatprep.subr.bf16.mxu1 %v605_v9  ;;  %v621_v26 = vld [vmem:[%s789_s3 + $0xc8] sm:$0xff]   ;;  %v625_v31 = vld [vmem:[%s789_s3 + $0xc0] sm:$0xff]  }
   0xb   :  { %v622_v27 = vld [vmem:[%s789_s3 + $0x8] sm:$0xff]   ;;  %v626_v32 = vld [vmem:[%s789_s3] sm:$0xff]  }
   0xc   :  { %557 = vmatpush3.bf16.msra.mxu0 %v606_v10  ;;  %v623_v29 = vld [vmem:[%s789_s3 + $0x88] sm:$0xff]   ;;  %v627_v34 = vld [vmem:[%s789_s3 + $0x80] sm:$0xff]  }
   0xd   :  { %579 = vmatpush3.bf16.msra.mxu1 %v607_v11  ;;  %558 = vmatprep.subr.bf16.mxu0 %v608_v12  ;;  %v25_v36 = vld [vmem:[%s786_s0] sm:$0xff]  ;;  %v27_v46 = vld [vmem:[%s786_s0 + $0x8] sm:$0xff] }
   0xe   :  { %580 = vmatprep.subr.bf16.mxu1 %v609_v13  ;;  %v29_v37 = vld [vmem:[%s786_s0 + $0x20] sm:$0xff]  ;;  %v53_v41 = vunpack.c.l.bf16 %v25_v36  ;;  %v54_v42 = vunpack.c.h.bf16 %v25_v36  ;;  %v31_v47 = vld [vmem:[%s786_s0 + $0x28] sm:$0xff]  ;;  %v55_v50 = vunpack.c.l.bf16 %v27_v46  ;;  %v56_v51 = vunpack.c.h.bf16 %v27_v46 }
   0xf   :  { %v61_v38 = vld [vmem:[%s787_s1] sm:$0xf]  ;;  %v57_v43 = vunpack.c.l.bf16 %v29_v37  ;;  %v58_v44 = vunpack.c.h.bf16 %v29_v37  ;;  %v59_v52 = vunpack.c.l.bf16 %v31_v47  ;;  %v60_v53 = vunpack.c.h.bf16 %v31_v47 }
  0x10   :  { %559 = vmatpush3.bf16.msra.mxu0 %v610_v14  ;;  %v91_v45 = vld [vmem:[%s788_s2] sm:$0xf]  ;;  %v70_v48 = vrot.slane %v61_v38, %v69_v33  ;;  %v78_v54 = vrot.slane %v61_v38, %v77_v35  ;;  %v66_v58 = vrot.slane %v61_v38, %v65_v39  ;;  %v74_v62 = vrot.slane %v61_v38, %v73_v40 }
  0x11   :  { %581 = vmatpush3.bf16.msra.mxu1 %v611_v15  ;;  %560 = vmatprep.subr.bf16.mxu0 %v612_v16  ;;  %v100_v49 = vrot.slane %v91_v45, %v69_v33  ;;  %v108_v55 = vrot.slane %v91_v45, %v77_v35  ;;  %v96_v59 = vrot.slane %v91_v45, %v65_v39  ;;  %v542_v39 = vld [vmem:[%s791_s5] ss:$0 sm:$0xff] }
  0x12   :  { %582 = vmatprep.subr.bf16.mxu1 %v613_v17  ;;  %v84_v56 = vmul.f32 %v70_v48, %v54_v42  ;;  %v88_v57 = vmul.f32 %v70_v48, %v58_v44  ;;  %v86_v60 = vmul.f32 %v78_v54, %v56_v51  ;;  %v90_v61 = vmul.f32 %v78_v54, %v60_v53 }
  0x13   :  { %v104_v63 = vrot.slane %v91_v45, %v73_v40  ;;  %v83_v2 = vmul.f32 %v66_v58, %v53_v41  ;;  %v87_v3 = vmul.f32 %v66_v58, %v57_v43  ;;  %v85_v6 = vmul.f32 %v74_v62, %v55_v50 }
  0x14   :  { %561 = vmatpush3.bf16.msra.mxu0 %v614_v18  ;;  %v114_v0 = vadd.f32 %v100_v49, %v84_v56  ;;  %v118_v1 = vadd.f32 %v100_v49, %v88_v57  ;;  %v116_v4 = vadd.f32 %v108_v55, %v86_v60  ;;  %v120_v5 = vadd.f32 %v108_v55, %v90_v61 }
  0x15   :  { %583 = vmatpush3.bf16.msra.mxu1 %v615_v19  ;;  %562 = vmatprep.subr.bf16.mxu0 %v616_v20  ;;  %v89_v7 = vmul.f32 %v74_v62, %v59_v52  ;;  %v113_v10 = vadd.f32 %v96_v59, %v83_v2  ;;  %v117_v11 = vadd.f32 %v96_v59, %v87_v3 }
  0x16   :  { %584 = vmatprep.subr.bf16.mxu1 %v617_v21  ;;  %v122_v8 = vmax.f32 %v114_v0, 0.0  ;;  %v126_v9 = vmax.f32 %v118_v1, 0.0  ;;  %v124_v12 = vmax.f32 %v116_v4, 0.0  ;;  %v128_v13 = vmax.f32 %v120_v5, 0.0 }
  0x17   :  { %v115_v14 = vadd.f32 %v104_v63, %v85_v6  ;;  %v119_v15 = vadd.f32 %v104_v63, %v89_v7  ;;  %v121_v17 = vmax.f32 %v113_v10, 0.0  ;;  %v125_v18 = vmax.f32 %v117_v11, 0.0 }
  0x18   :  { %563 = vmatpush3.bf16.msra.mxu0 %v618_v22  ;;  %v130_v16 = vpack.c.bf16 %v126_v9, %v122_v8  ;;  %v132_v19 = vpack.c.bf16 %v128_v13, %v124_v12 }
  0x19   :  { %585 = vmatpush3.bf16.msra.mxu1 %v619_v24  ;;  %564 = vmatprep.subr.bf16.mxu0 %v620_v25  ;;  %v123_v20 = vmax.f32 %v115_v14, 0.0  ;;  %v127_v21 = vmax.f32 %v119_v15, 0.0  ;;  %v129_v22 = vpack.c.bf16 %v125_v18, %v121_v17 }
  0x1a   :  { %586 = vmatprep.subr.bf16.mxu1 %v621_v26  ;;  %421 = vmatprep.mubr.bf16.mxu0 %v130_v16 }
  0x1b   :  { %462 = vmatprep.mubr.bf16.mxu1 %v132_v19  ;;  %v131_v23 = vpack.c.bf16 %v127_v21, %v123_v20 }
  0x1c   :  { %565 = vmatpush3.bf16.msra.mxu0 %v622_v27 }
  0x1d   :  { %587 = vmatpush3.bf16.msra.mxu1 %v623_v29  ;;  %566 = vmatprep.subr.bf16.mxu0 %v624_v30 }
  0x1e   :  { %588 = vmatprep.subr.bf16.mxu1 %v625_v31  ;;  %v541_v31 = vld [vmem:[%s790_s4] ss:$0 sm:$0xff] }
  0x20   :  { %567 = vmatpush3.bf16.msra.mxu0 %v626_v32 }
  0x21   :  { %589 = vmatpush3.bf16.msra.mxu1 %v627_v34 }
  0x23   :  { %422 = vmatmul.mubr.bf16.vlgmr.msra.gmra.mxu0 %v129_v22 }
  0x24   :  { %463 = vmatmul.mubr.bf16.vlgmr.msra.gmra.mxu1 %v131_v23 }
  0xe3   :  { %v568_v24 = vpop.f32.mrf.mxu0 }
  0xe4   :  { %v590_v25 = vpop.f32.mrf.mxu1 }
  0xe5   :  { %v569_v26 = vpop.f32.mrf.mxu0 }
  0xe6   :  { %v570_v27 = vadd.f32 %v569_v26, %v568_v24  ;;  %v591_v28 = vpop.f32.mrf.mxu1 }
  0xe7   :  { %v592_v29 = vadd.f32 %v591_v28, %v590_v25  ;;  %v571_v30 = vpop.f32.mrf.mxu0 }
  0xe8   :  { %v593_v32 = vpop.f32.mrf.mxu1 }
  0xe9   :  { %v465_v33 = vadd.f32 %v592_v29, %v570_v27  ;;  %v572_v34 = vpop.f32.mrf.mxu0 }
  0xea   :  { %v573_v35 = vadd.f32 %v572_v34, %v571_v30  ;;  %v594_v36 = vpop.f32.mrf.mxu1 }
  0xeb   :  { %v478_v37 = vmul.f32 %v541_v31, %v465_v33  ;;  %v595_v38 = vadd.f32 %v594_v36, %v593_v32 }
  0xed   :  { %v468_v40 = vadd.f32 %v595_v38, %v573_v35  ;;  %v487_v41 = vadd.f32 %v542_v39, %v478_v37 }
  0xef   :  { %v479_v42 = vmul.f32 %v541_v31, %v468_v40  ;;  %v489_v44 = vmax.f32 %v487_v41, 0.0 }
  0xf1   :  { %v488_v43 = vadd.f32 %v542_v39, %v479_v42 }
  0xf3   :  { %v490_v45 = vmax.f32 %v488_v43, 0.0 }
  0xf5   :  { %v550_v46 = vpack.c.bf16 %v490_v45, %v489_v44 }
  0xf7   :  { %551 = vst [vmem:[%s792_s6] sm:$0xff] %v550_v46  }

// kernel: densenet121_forward.186
= control target key start
LH: loop header
LB: loop body
LE: loop exit
PB: predicated region body
PF: predicated region fallthrough
CT: control target
= control target key end

     0   :  { %v81_v23 = vlaneseq  ;;  %v821_v48 = vmov 0.0   ;;  %vm822_vm0 = vmmov 0   ;;  %s1041_s0 = inlined_call_operand.vmem [shape: bf16[16,1024], index: 0, kind: input, shape index: {}]   ;;  %s1042_s1 = inlined_call_operand.vmem [shape: f32[1,640], index: 1, kind: input, shape index: {}]   ;;  %s1043_s2 = inlined_call_operand.vmem [shape: f32[1,640], index: 2, kind: input, shape index: {}]   ;;  %s1044_s3 = inlined_call_operand.vmem [shape: bf16[640,128], index: 3, kind: input, shape index: {}]   ;;  %s1045_s4 = inlined_call_operand.vmem [shape: f32[1,128], index: 4, kind: input, shape index: {}]   ;;  %s1046_s5 = inlined_call_operand.vmem [shape: f32[1,128], index: 5, kind: input, shape index: {}]   ;;  %s1047_s6 = inlined_call_operand.vmem [shape: bf16[16,128], index: 6, kind: output, shape index: {}]  }
   0x1   :  { %v781_v0 = vld [vmem:[%s1044_s3 + $0x78] sm:$0xff]   ;;  %v785_v4 = vld [vmem:[%s1044_s3 + $0x70] sm:$0xff]   ;;  %v789_v8 = vld [vmem:[%s1044_s3 + $0x68] sm:$0xff]  }
   0x2   :  { %v782_v1 = vld [vmem:[%s1044_s3 + $0xf8] sm:$0xff]   ;;  %706 = vmatprep.subr.bf16.mxu0 %v781_v0  ;;  %v786_v5 = vld [vmem:[%s1044_s3 + $0xf0] sm:$0xff]   ;;  %v790_v9 = vld [vmem:[%s1044_s3 + $0xe8] sm:$0xff]   ;;  %v939_v28 = vshrl.u32 %v81_v23, 7 }
   0x3   :  { %v783_v2 = vld [vmem:[%s1044_s3 + $0x38] sm:$0xff]   ;;  %728 = vmatprep.subr.bf16.mxu1 %v782_v1  ;;  %v787_v6 = vld [vmem:[%s1044_s3 + $0x30] sm:$0xff]   ;;  %v791_v10 = vld [vmem:[%s1044_s3 + $0x28] sm:$0xff]  }
   0x4   :  { %v784_v3 = vld [vmem:[%s1044_s3 + $0xb8] sm:$0xff]   ;;  %707 = vmatpush3.bf16.msra.mxu0 %v783_v2  ;;  %v788_v7 = vld [vmem:[%s1044_s3 + $0xb0] sm:$0xff]   ;;  %v792_v11 = vld [vmem:[%s1044_s3 + $0xa8] sm:$0xff]   ;;  %v87_v33 = vsub.s32 1, %v939_v28  ;;  %v95_v35 = vsub.s32 3, %v939_v28  ;;  %v83_v39 = vsub.s32 0, %v939_v28 }
   0x5   :  { %729 = vmatpush3.bf16.msra.mxu1 %v784_v3  ;;  %708 = vmatprep.subr.bf16.mxu0 %v785_v4  ;;  %v793_v12 = vld [vmem:[%s1044_s3 + $0x60] sm:$0xff]   ;;  %v797_v16 = vld [vmem:[%s1044_s3 + $0x58] sm:$0xff]   ;;  %v801_v20 = vld [vmem:[%s1044_s3 + $0x50] sm:$0xff]   ;;  %v91_v40 = vsub.s32 2, %v939_v28 }
   0x6   :  { %730 = vmatprep.subr.bf16.mxu1 %v786_v5  ;;  %v794_v13 = vld [vmem:[%s1044_s3 + $0xe0] sm:$0xff]   ;;  %v798_v17 = vld [vmem:[%s1044_s3 + $0xd8] sm:$0xff]   ;;  %v802_v21 = vld [vmem:[%s1044_s3 + $0xd0] sm:$0xff]  }
   0x7   :  { %v795_v14 = vld [vmem:[%s1044_s3 + $0x20] sm:$0xff]   ;;  %v799_v18 = vld [vmem:[%s1044_s3 + $0x18] sm:$0xff]   ;;  %v803_v22 = vld [vmem:[%s1044_s3 + $0x10] sm:$0xff]  }
   0x8   :  { %709 = vmatpush3.bf16.msra.mxu0 %v787_v6  ;;  %v796_v15 = vld [vmem:[%s1044_s3 + $0xa0] sm:$0xff]   ;;  %v800_v19 = vld [vmem:[%s1044_s3 + $0x98] sm:$0xff]   ;;  %v804_v24 = vld [vmem:[%s1044_s3 + $0x90] sm:$0xff]  }
   0x9   :  { %731 = vmatpush3.bf16.msra.mxu1 %v788_v7  ;;  %710 = vmatprep.subr.bf16.mxu0 %v789_v8  ;;  %v805_v25 = vld [vmem:[%s1044_s3 + $0x48] sm:$0xff]   ;;  %v809_v30 = vld [vmem:[%s1044_s3 + $0x40] sm:$0xff]  }
   0xa   :  { %732 = vmatprep.subr.bf16.mxu1 %v790_v9  ;;  %v806_v26 = vld [vmem:[%s1044_s3 + $0xc8] sm:$0xff]   ;;  %v810_v31 = vld [vmem:[%s1044_s3 + $0xc0] sm:$0xff]  }
   0xb   :  { %v807_v27 = vld [vmem:[%s1044_s3 + $0x8] sm:$0xff]   ;;  %v811_v32 = vld [vmem:[%s1044_s3] sm:$0xff]  }
   0xc   :  { %711 = vmatpush3.bf16.msra.mxu0 %v791_v10  ;;  %v808_v29 = vld [vmem:[%s1044_s3 + $0x88] sm:$0xff]   ;;  %v812_v34 = vld [vmem:[%s1044_s3 + $0x80] sm:$0xff]  }
   0xd   :  { %733 = vmatpush3.bf16.msra.mxu1 %v792_v11  ;;  %712 = vmatprep.subr.bf16.mxu0 %v793_v12  ;;  %v27_v36 = vld [vmem:[%s1041_s0] sm:$0xff]  ;;  %v29_v46 = vld [vmem:[%s1041_s0 + $0x8] sm:$0xff] }
   0xe   :  { %734 = vmatprep.subr.bf16.mxu1 %v794_v13  ;;  %v31_v37 = vld [vmem:[%s1041_s0 + $0x20] sm:$0xff]  ;;  %v69_v41 = vunpack.c.l.bf16 %v27_v36  ;;  %v70_v42 = vunpack.c.h.bf16 %v27_v36  ;;  %v33_v47 = vld [vmem:[%s1041_s0 + $0x28] sm:$0xff]  ;;  %v71_v51 = vunpack.c.l.bf16 %v29_v46  ;;  %v72_v52 = vunpack.c.h.bf16 %v29_v46 }
   0xf   :  { %v967_v38 = vld [vmem:[%s1042_s1] sm:$0x1f]  ;;  %v74_v43 = vunpack.c.l.bf16 %v31_v37  ;;  %v75_v44 = vunpack.c.h.bf16 %v31_v37  ;;  %v76_v53 = vunpack.c.l.bf16 %v33_v47  ;;  %v77_v54 = vunpack.c.h.bf16 %v33_v47  ;;  %v817_v37 = vld [vmem:[%s1044_s3 + $0x118] sm:$0xff]  }
  0x10   :  { %713 = vmatpush3.bf16.msra.mxu0 %v795_v14  ;;  %v974_v45 = vld [vmem:[%s1043_s2] sm:$0x1f]  ;;  %v88_v49 = vrot.slane %v967_v38, %v87_v33  ;;  %v96_v55 = vrot.slane %v967_v38, %v95_v35  ;;  %v84_v59 = vrot.slane %v967_v38, %v83_v39  ;;  %v92_v63 = vrot.slane %v967_v38, %v91_v40 }
  0x11   :  { %735 = vmatpush3.bf16.msra.mxu1 %v796_v15  ;;  %714 = vmatprep.subr.bf16.mxu0 %v797_v16  ;;  %v125_v50 = vrot.slane %v974_v45, %v87_v33  ;;  %v133_v56 = vrot.slane %v974_v45, %v95_v35  ;;  %v121_v60 = vrot.slane %v974_v45, %v83_v39 }
  0x12   :  { %736 = vmatprep.subr.bf16.mxu1 %v798_v17  ;;  %v107_v57 = vmul.f32 %v88_v49, %v70_v42  ;;  %v112_v58 = vmul.f32 %v88_v49, %v75_v44  ;;  %v109_v61 = vmul.f32 %v96_v55, %v72_v52  ;;  %v114_v62 = vmul.f32 %v96_v55, %v77_v54 }
  0x13   :  { %v129_v0 = vrot.slane %v974_v45, %v91_v40  ;;  %v106_v3 = vmul.f32 %v84_v59, %v69_v41  ;;  %v111_v4 = vmul.f32 %v84_v59, %v74_v43  ;;  %v108_v7 = vmul.f32 %v92_v63, %v71_v51  ;;  %v818_v41 = vld [vmem:[%s1044_s3 + $0x110] sm:$0xff]   ;;  %v819_v43 = vld [vmem:[%s1044_s3 + $0x108] sm:$0xff]  }
  0x14   :  { %715 = vmatpush3.bf16.msra.mxu0 %v799_v18  ;;  %v144_v1 = vadd.f32 %v125_v50, %v107_v57  ;;  %v149_v2 = vadd.f32 %v125_v50, %v112_v58  ;;  %v146_v5 = vadd.f32 %v133_v56, %v109_v61  ;;  %v151_v6 = vadd.f32 %v133_v56, %v114_v62 }
  0x15   :  { %737 = vmatpush3.bf16.msra.mxu1 %v800_v19  ;;  %716 = vmatprep.subr.bf16.mxu0 %v801_v20  ;;  %v113_v8 = vmul.f32 %v92_v63, %v76_v53  ;;  %v143_v11 = vadd.f32 %v121_v60, %v106_v3  ;;  %v148_v12 = vadd.f32 %v121_v60, %v111_v4  ;;  %v653_v20 = vld [vmem:[%s1041_s0 + $0x10] sm:$0xf]  ;;  %v696_v3 = vld [vmem:[%s1046_s5] ss:$0 sm:$0xff] }
  0x16   :  { %738 = vmatprep.subr.bf16.mxu1 %v802_v21  ;;  %v154_v9 = vmax.f32 %v144_v1, 0.0  ;;  %v159_v10 = vmax.f32 %v149_v2, 0.0  ;;  %v156_v13 = vmax.f32 %v146_v5, 0.0  ;;  %v161_v14 = vmax.f32 %v151_v6, 0.0  ;;  %46 = vst [vmem:[#allocation2 + $0x10] sm:$0xf] %v653_v20 }
  0x17   :  { %v145_v15 = vadd.f32 %v129_v0, %v108_v7  ;;  %v150_v16 = vadd.f32 %v129_v0, %v113_v8  ;;  %v153_v18 = vmax.f32 %v143_v11, 0.0  ;;  %v158_v19 = vmax.f32 %v148_v12, 0.0 }
  0x18   :  { %717 = vmatpush3.bf16.msra.mxu0 %v803_v22  ;;  %v164_v17 = vpack.c.bf16 %v159_v10, %v154_v9  ;;  %v166_v21 = vpack.c.bf16 %v161_v14, %v156_v13 }
  0x19   :  { %739 = vmatpush3.bf16.msra.mxu1 %v804_v24  ;;  %718 = vmatprep.subr.bf16.mxu0 %v805_v25  ;;  %v155_v22 = vmax.f32 %v145_v15, 0.0  ;;  %v160_v23 = vmax.f32 %v150_v16, 0.0  ;;  %v813_v24 = vld [vmem:[%s1044_s3 + $0x138] sm:$0xff]   ;;  %v654_v25 = vld [vmem:[%s1041_s0 + $0x30] sm:$0xf] }
  0x1a   :  { %740 = vmatprep.subr.bf16.mxu1 %v806_v26  ;;  %520 = vmatprep.mubr.bf16.mxu0 %v164_v17  ;;  %v163_v26 = vpack.c.bf16 %v158_v19, %v153_v18  ;;  %48 = vst [vmem:[#allocation2 + $0x24] sm:$0xf] %v654_v25 }
  0x1b   :  { %561 = vmatprep.mubr.bf16.mxu1 %v166_v21 }
  0x1c   :  { %719 = vmatpush3.bf16.msra.mxu0 %v807_v27  ;;  %v165_v27 = vpack.c.bf16 %v160_v23, %v155_v22 }
  0x1d   :  { %741 = vmatpush3.bf16.msra.mxu1 %v808_v29  ;;  %720 = vmatprep.subr.bf16.mxu0 %v809_v30  ;;  %v814_v29 = vld [vmem:[%s1044_s3 + $0x130] sm:$0xff]   ;;  %v815_v30 = vld [vmem:[%s1044_s3 + $0x128] sm:$0xff]  }
  0x1e   :  { %742 = vmatprep.subr.bf16.mxu1 %v810_v31  ;;  %v99_v31 = vsub.s32 4, %v939_v28 }
  0x20   :  { %721 = vmatpush3.bf16.msra.mxu0 %v811_v32  ;;  %v816_v32 = vld [vmem:[%s1044_s3 + $0x120] sm:$0xff]   ;;  %v100_v36 = vrot.slane %v967_v38, %v99_v31  ;;  %v137_v40 = vrot.slane %v974_v45, %v99_v31 }
  0x21   :  { %743 = vmatpush3.bf16.msra.mxu1 %v812_v34  ;;  %759 = vmatprep.subr.bf16.mxu0 %v821_v48  ;;  %v65_v33 = vld [vmem:[#allocation2 + $0x10] ss:$20 sps:$4 sm:$0xff]  }
  0x22   :  { %v73_v34 = vunpack.c.l.bf16 %v65_v33  ;;  %v78_v35 = vunpack.c.h.bf16 %v65_v33  ;;  %v820_v45 = vld [vmem:[%s1044_s3 + $0x100] sm:$0xff]  }
  0x23   :  { %521 = vmatmul.mubr.bf16.vlgmr.msra.gmra.mxu0 %v163_v26 }
  0x24   :  { %562 = vmatmul.mubr.bf16.vlgmr.msra.gmra.mxu1 %v165_v27  ;;  %760 = vmatpush3.bf16.msra.mxu0 %v813_v24  ;;  %v110_v28 = vmul.f32 %v100_v36, %v73_v34  ;;  %v115_v39 = vmul.f32 %v100_v36, %v78_v35 }
  0x25   :  { %761 = vmatprep.subr.bf16.mxu0 %v821_v48  ;;  %775 = vmatprep.mubr.msk.bf16.mxu0 %vm822_vm0, %v821_v48 }
  0x26   :  { %v147_v42 = vadd.f32 %v137_v40, %v110_v28  ;;  %v152_v38 = vadd.f32 %v137_v40, %v115_v39 }
  0x28   :  { %762 = vmatpush3.bf16.msra.mxu0 %v814_v29  ;;  %v157_v44 = vmax.f32 %v147_v42, 0.0  ;;  %v162_v46 = vmax.f32 %v152_v38, 0.0 }
  0x29   :  { %763 = vmatprep.subr.bf16.mxu0 %v821_v48 }
  0x2a   :  { %v167_v47 = vpack.c.bf16 %v162_v46, %v157_v44 }
  0x2c   :  { %764 = vmatpush3.bf16.msra.mxu0 %v815_v30 }
  0x2d   :  { %765 = vmatprep.subr.bf16.mxu0 %v821_v48 }
  0x30   :  { %766 = vmatpush3.bf16.msra.mxu0 %v816_v32 }
  0x31   :  { %767 = vmatprep.subr.bf16.mxu0 %v821_v48 }
  0x34   :  { %768 = vmatpush3.bf16.msra.mxu0 %v817_v37 }
  0x35   :  { %769 = vmatprep.subr.bf16.mxu0 %v821_v48 }
  0x38   :  { %770 = vmatpush3.bf16.msra.mxu0 %v818_v41 }
  0x39   :  { %771 = vmatprep.subr.bf16.mxu0 %v821_v48 }
  0x3c   :  { %772 = vmatpush3.bf16.msra.mxu0 %v819_v43 }
  0x3d   :  { %773 = vmatprep.subr.bf16.mxu0 %v821_v48  ;;  %v695_v48 = vld [vmem:[%s1045_s4] ss:$0 sm:$0xff] }
  0x40   :  { %774 = vmatpush3.bf16.msra.mxu0 %v820_v45 }
  0x43   :  { %776 = vmatmul.mubr.bf16.vlgmr.msra.gmra.mxu0 %v167_v47 }
  0xe3   :  { %v722_v49 = vpop.f32.mrf.mxu0 }
  0xe4   :  { %v744_v50 = vpop.f32.mrf.mxu1 }
  0xe5   :  { %v723_v51 = vpop.f32.mrf.mxu0 }
  0xe6   :  { %v745_v52 = vpop.f32.mrf.mxu1  ;;  %v724_v55 = vadd.f32 %v723_v51, %v722_v49 }
  0xe7   :  { %v725_v53 = vpop.f32.mrf.mxu0  ;;  %v746_v56 = vadd.f32 %v745_v52, %v744_v50 }
  0xe8   :  { %v747_v54 = vpop.f32.mrf.mxu1 }
  0xe9   :  { %v726_v57 = vpop.f32.mrf.mxu0  ;;  %v564_v61 = vadd.f32 %v746_v56, %v724_v55 }
  0xea   :  { %v748_v58 = vpop.f32.mrf.mxu1  ;;  %v727_v59 = vadd.f32 %v726_v57, %v725_v53 }
  0xeb   :  { %v749_v60 = vadd.f32 %v748_v58, %v747_v54 }
  0xed   :  { %v567_v2 = vadd.f32 %v749_v60, %v727_v59 }
 0x103   :  { %v604_v62 = vpop.f32.mrf.mxu0 }
 0x104   :  { %v605_v63 = vadd.f32 %v604_v62, %v564_v61 }
 0x105   :  { %v777_v0 = vpop.f32.mrf.mxu0 }
 0x106   :  { %v618_v1 = vmul.f32 %v695_v48, %v605_v63 }
 0x107   :  { %v607_v4 = vpop.f32.mrf.mxu0 }
 0x108   :  { %v608_v5 = vadd.f32 %v607_v4, %v567_v2  ;;  %v627_v7 = vadd.f32 %v696_v3, %v618_v1 }
 0x109   :  { %v778_v6 = vpop.f32.mrf.mxu0 }
 0x10a   :  { %v619_v8 = vmul.f32 %v695_v48, %v608_v5  ;;  %v629_v10 = vmax.f32 %v627_v7, 0.0 }
 0x10c   :  { %v628_v9 = vadd.f32 %v696_v3, %v619_v8 }
 0x10e   :  { %v630_v11 = vmax.f32 %v628_v9, 0.0 }
 0x110   :  { %v704_v12 = vpack.c.bf16 %v630_v11, %v629_v10 }
 0x112   :  { %705 = vst [vmem:[%s1047_s6] sm:$0xff] %v704_v12  }

// kernel: densenet121_forward.194
= control target key start
LH: loop header
LB: loop body
LE: loop exit
PB: predicated region body
PF: predicated region fallthrough
CT: control target
= control target key end

     0   :  { %v73_v23 = vlaneseq  ;;  %s1131_s0 = inlined_call_operand.vmem [shape: bf16[16,1024], index: 0, kind: input, shape index: {}]   ;;  %s1132_s1 = inlined_call_operand.vmem [shape: f32[1,768], index: 1, kind: input, shape index: {}]   ;;  %s1133_s2 = inlined_call_operand.vmem [shape: f32[1,768], index: 2, kind: input, shape index: {}]   ;;  %s1134_s3 = inlined_call_operand.vmem [shape: bf16[768,128], index: 3, kind: input, shape index: {}]   ;;  %s1135_s4 = inlined_call_operand.vmem [shape: f32[1,128], index: 4, kind: input, shape index: {}]   ;;  %s1136_s5 = inlined_call_operand.vmem [shape: f32[1,128], index: 5, kind: input, shape index: {}]   ;;  %s1137_s6 = inlined_call_operand.vmem [shape: bf16[16,128], index: 6, kind: output, shape index: {}]  }
   0x1   :  { %v847_v0 = vld [vmem:[%s1134_s3 + $0x78] sm:$0xff]   ;;  %v851_v4 = vld [vmem:[%s1134_s3 + $0x70] sm:$0xff]   ;;  %v855_v8 = vld [vmem:[%s1134_s3 + $0x68] sm:$0xff]  }
   0x2   :  { %v848_v1 = vld [vmem:[%s1134_s3 + $0xf8] sm:$0xff]   ;;  %781 = vmatprep.subr.bf16.mxu0 %v847_v0  ;;  %v852_v5 = vld [vmem:[%s1134_s3 + $0xf0] sm:$0xff]   ;;  %v856_v9 = vld [vmem:[%s1134_s3 + $0xe8] sm:$0xff]   ;;  %v1011_v28 = vshrl.u32 %v73_v23, 7 }
   0x3   :  { %v849_v2 = vld [vmem:[%s1134_s3 + $0x38] sm:$0xff]   ;;  %803 = vmatprep.subr.bf16.mxu1 %v848_v1  ;;  %v853_v6 = vld [vmem:[%s1134_s3 + $0x30] sm:$0xff]   ;;  %v857_v10 = vld [vmem:[%s1134_s3 + $0x28] sm:$0xff]  }
   0x4   :  { %v850_v3 = vld [vmem:[%s1134_s3 + $0xb8] sm:$0xff]   ;;  %782 = vmatpush3.bf16.msra.mxu0 %v849_v2  ;;  %v854_v7 = vld [vmem:[%s1134_s3 + $0xb0] sm:$0xff]   ;;  %v858_v11 = vld [vmem:[%s1134_s3 + $0xa8] sm:$0xff]   ;;  %v79_v33 = vsub.s32 1, %v1011_v28  ;;  %v87_v35 = vsub.s32 3, %v1011_v28  ;;  %v75_v39 = vsub.s32 0, %v1011_v28 }
   0x5   :  { %804 = vmatpush3.bf16.msra.mxu1 %v850_v3  ;;  %783 = vmatprep.subr.bf16.mxu0 %v851_v4  ;;  %v859_v12 = vld [vmem:[%s1134_s3 + $0x60] sm:$0xff]   ;;  %v863_v16 = vld [vmem:[%s1134_s3 + $0x58] sm:$0xff]   ;;  %v867_v20 = vld [vmem:[%s1134_s3 + $0x50] sm:$0xff]   ;;  %v83_v40 = vsub.s32 2, %v1011_v28 }
   0x6   :  { %805 = vmatprep.subr.bf16.mxu1 %v852_v5  ;;  %v860_v13 = vld [vmem:[%s1134_s3 + $0xe0] sm:$0xff]   ;;  %v864_v17 = vld [vmem:[%s1134_s3 + $0xd8] sm:$0xff]   ;;  %v868_v21 = vld [vmem:[%s1134_s3 + $0xd0] sm:$0xff]  }
   0x7   :  { %v861_v14 = vld [vmem:[%s1134_s3 + $0x20] sm:$0xff]   ;;  %v865_v18 = vld [vmem:[%s1134_s3 + $0x18] sm:$0xff]   ;;  %v869_v22 = vld [vmem:[%s1134_s3 + $0x10] sm:$0xff]  }
   0x8   :  { %784 = vmatpush3.bf16.msra.mxu0 %v853_v6  ;;  %v862_v15 = vld [vmem:[%s1134_s3 + $0xa0] sm:$0xff]   ;;  %v866_v19 = vld [vmem:[%s1134_s3 + $0x98] sm:$0xff]   ;;  %v870_v24 = vld [vmem:[%s1134_s3 + $0x90] sm:$0xff]  }
   0x9   :  { %806 = vmatpush3.bf16.msra.mxu1 %v854_v7  ;;  %785 = vmatprep.subr.bf16.mxu0 %v855_v8  ;;  %v871_v25 = vld [vmem:[%s1134_s3 + $0x48] sm:$0xff]   ;;  %v875_v30 = vld [vmem:[%s1134_s3 + $0x40] sm:$0xff]   ;;  %v879_v52 = vld [vmem:[%s1134_s3 + $0x178] sm:$0xff]  }
   0xa   :  { %807 = vmatprep.subr.bf16.mxu1 %v856_v9  ;;  %v872_v26 = vld [vmem:[%s1134_s3 + $0xc8] sm:$0xff]   ;;  %v876_v31 = vld [vmem:[%s1134_s3 + $0xc0] sm:$0xff]   ;;  %v880_v23 = vld [vmem:[%s1134_s3 + $0x138] sm:$0xff]  }
   0xb   :  { %v873_v27 = vld [vmem:[%s1134_s3 + $0x8] sm:$0xff]   ;;  %v877_v32 = vld [vmem:[%s1134_s3] sm:$0xff]  }
   0xc   :  { %786 = vmatpush3.bf16.msra.mxu0 %v857_v10  ;;  %v874_v29 = vld [vmem:[%s1134_s3 + $0x88] sm:$0xff]   ;;  %v878_v34 = vld [vmem:[%s1134_s3 + $0x80] sm:$0xff]  }
   0xd   :  { %808 = vmatpush3.bf16.msra.mxu1 %v858_v11  ;;  %787 = vmatprep.subr.bf16.mxu0 %v859_v12  ;;  %v25_v36 = vld [vmem:[%s1131_s0] sm:$0xff]  ;;  %v27_v46 = vld [vmem:[%s1131_s0 + $0x8] sm:$0xff] }
   0xe   :  { %809 = vmatprep.subr.bf16.mxu1 %v860_v13  ;;  %v31_v37 = vld [vmem:[%s1131_s0 + $0x20] sm:$0xff]  ;;  %v59_v41 = vunpack.c.l.bf16 %v25_v36  ;;  %v60_v42 = vunpack.c.h.bf16 %v25_v36  ;;  %v33_v47 = vld [vmem:[%s1131_s0 + $0x28] sm:$0xff]  ;;  %v61_v50 = vunpack.c.l.bf16 %v27_v46  ;;  %v62_v51 = vunpack.c.h.bf16 %v27_v46  ;;  %v887_v46 = vld [vmem:[%s1134_s3 + $0x158] sm:$0xff]  }
   0xf   :  { %v1039_v38 = vld [vmem:[%s1132_s1] sm:$0x3f]  ;;  %v65_v43 = vunpack.c.l.bf16 %v31_v37  ;;  %v66_v44 = vunpack.c.h.bf16 %v31_v37  ;;  %v67_v53 = vunpack.c.l.bf16 %v33_v47  ;;  %v68_v54 = vunpack.c.h.bf16 %v33_v47 }
  0x10   :  { %788 = vmatpush3.bf16.msra.mxu0 %v861_v14  ;;  %v1046_v45 = vld [vmem:[%s1133_s2] sm:$0x3f]  ;;  %v80_v48 = vrot.slane %v1039_v38, %v79_v33  ;;  %v88_v55 = vrot.slane %v1039_v38, %v87_v35  ;;  %v76_v59 = vrot.slane %v1039_v38, %v75_v39  ;;  %v84_v63 = vrot.slane %v1039_v38, %v83_v40 }
  0x11   :  { %810 = vmatpush3.bf16.msra.mxu1 %v862_v15  ;;  %789 = vmatprep.subr.bf16.mxu0 %v863_v16  ;;  %v124_v49 = vrot.slane %v1046_v45, %v79_v33  ;;  %v132_v56 = vrot.slane %v1046_v45, %v87_v35  ;;  %v120_v60 = vrot.slane %v1046_v45, %v75_v39  ;;  %v884_v33 = vld [vmem:[%s1134_s3 + $0x128] sm:$0xff]   ;;  %v885_v37 = vld [vmem:[%s1134_s3 + $0x160] sm:$0xff]  }
  0x12   :  { %811 = vmatprep.subr.bf16.mxu1 %v864_v17  ;;  %v104_v57 = vmul.f32 %v80_v48, %v60_v42  ;;  %v110_v58 = vmul.f32 %v80_v48, %v66_v44  ;;  %v106_v61 = vmul.f32 %v88_v55, %v62_v51  ;;  %v112_v62 = vmul.f32 %v88_v55, %v68_v54 }
  0x13   :  { %v128_v0 = vrot.slane %v1046_v45, %v83_v40  ;;  %v103_v3 = vmul.f32 %v76_v59, %v59_v41  ;;  %v109_v4 = vmul.f32 %v76_v59, %v65_v43  ;;  %v105_v7 = vmul.f32 %v84_v63, %v61_v50  ;;  %v886_v43 = vld [vmem:[%s1134_s3 + $0x120] sm:$0xff]  }
  0x14   :  { %790 = vmatpush3.bf16.msra.mxu0 %v865_v18  ;;  %v148_v1 = vadd.f32 %v124_v49, %v104_v57  ;;  %v154_v2 = vadd.f32 %v124_v49, %v110_v58  ;;  %v150_v5 = vadd.f32 %v132_v56, %v106_v61  ;;  %v156_v6 = vadd.f32 %v132_v56, %v112_v62  ;;  %v891_v58 = vld [vmem:[%s1134_s3 + $0x148] sm:$0xff]  }
  0x15   :  { %812 = vmatpush3.bf16.msra.mxu1 %v866_v19  ;;  %791 = vmatprep.subr.bf16.mxu0 %v867_v20  ;;  %v111_v8 = vmul.f32 %v84_v63, %v67_v53  ;;  %v147_v11 = vadd.f32 %v120_v60, %v103_v3  ;;  %v153_v12 = vadd.f32 %v120_v60, %v109_v4  ;;  %v91_v42 = vsub.s32 4, %v1011_v28  ;;  %v889_v53 = vld [vmem:[%s1134_s3 + $0x150] sm:$0xff]   ;;  %v892_v61 = vld [vmem:[%s1134_s3 + $0x108] sm:$0xff]  }
  0x16   :  { %813 = vmatprep.subr.bf16.mxu1 %v868_v21  ;;  %v160_v9 = vmax.f32 %v148_v1, 0.0  ;;  %v166_v10 = vmax.f32 %v154_v2, 0.0  ;;  %v162_v13 = vmax.f32 %v150_v5, 0.0  ;;  %v168_v14 = vmax.f32 %v156_v6, 0.0 }
  0x17   :  { %v149_v15 = vadd.f32 %v128_v0, %v105_v7  ;;  %v155_v16 = vadd.f32 %v128_v0, %v111_v8  ;;  %v159_v18 = vmax.f32 %v147_v11, 0.0  ;;  %v165_v19 = vmax.f32 %v153_v12, 0.0  ;;  %v894_v0 = vld [vmem:[%s1134_s3 + $0x100] sm:$0xff]  }
  0x18   :  { %792 = vmatpush3.bf16.msra.mxu0 %v869_v22  ;;  %v172_v17 = vpack.c.bf16 %v166_v10, %v160_v9  ;;  %v174_v20 = vpack.c.bf16 %v168_v14, %v162_v13  ;;  %v136_v57 = vrot.slane %v1046_v45, %v91_v42 }
  0x19   :  { %814 = vmatpush3.bf16.msra.mxu1 %v870_v24  ;;  %793 = vmatprep.subr.bf16.mxu0 %v871_v25  ;;  %v161_v21 = vmax.f32 %v149_v15, 0.0  ;;  %v167_v22 = vmax.f32 %v155_v16, 0.0  ;;  %v881_v24 = vld [vmem:[%s1134_s3 + $0x170] sm:$0xff]   ;;  %v171_v25 = vpack.c.bf16 %v165_v19, %v159_v18  ;;  %v770_v18 = vld [vmem:[%s1135_s4] ss:$0 sm:$0xff] }
  0x1a   :  { %815 = vmatprep.subr.bf16.mxu1 %v872_v26  ;;  %593 = vmatprep.mubr.bf16.mxu0 %v172_v17 }
  0x1b   :  { %634 = vmatprep.mubr.bf16.mxu1 %v174_v20  ;;  %v173_v26 = vpack.c.bf16 %v167_v22, %v161_v21 }
  0x1c   :  { %794 = vmatpush3.bf16.msra.mxu0 %v873_v27  ;;  %v95_v27 = vsub.s32 5, %v1011_v28  ;;  %v888_v28 = vld [vmem:[%s1134_s3 + $0x118] sm:$0xff]  }
  0x1d   :  { %816 = vmatpush3.bf16.msra.mxu1 %v874_v29  ;;  %795 = vmatprep.subr.bf16.mxu0 %v875_v30  ;;  %v882_v29 = vld [vmem:[%s1134_s3 + $0x130] sm:$0xff]   ;;  %v883_v30 = vld [vmem:[%s1134_s3 + $0x168] sm:$0xff]  }
  0x1e   :  { %817 = vmatprep.subr.bf16.mxu1 %v876_v31  ;;  %v96_v31 = vrot.slane %v1039_v38, %v95_v27  ;;  %v140_v36 = vrot.slane %v1046_v45, %v95_v27  ;;  %v893_v45 = vld [vmem:[%s1134_s3 + $0x140] sm:$0xff]  }
  0x20   :  { %796 = vmatpush3.bf16.msra.mxu0 %v877_v32  ;;  %v29_v32 = vld [vmem:[%s1131_s0 + $0x10] sm:$0xff] }
  0x21   :  { %818 = vmatpush3.bf16.msra.mxu1 %v878_v34  ;;  %825 = vmatprep.subr.bf16.mxu0 %v879_v52  ;;  %v35_v34 = vld [vmem:[%s1131_s0 + $0x30] sm:$0xff]  ;;  %v64_v35 = vunpack.c.h.bf16 %v29_v32  ;;  %v63_v49 = vunpack.c.l.bf16 %v29_v32  ;;  %v92_v52 = vrot.slane %v1039_v38, %v91_v42 }
  0x22   :  { %v70_v39 = vunpack.c.h.bf16 %v35_v34  ;;  %v69_v50 = vunpack.c.l.bf16 %v35_v34  ;;  %v890_v38 = vld [vmem:[%s1134_s3 + $0x110] sm:$0xff]  }
  0x23   :  { %594 = vmatmul.mubr.bf16.vlgmr.msra.gmra.mxu0 %v171_v25  ;;  %v108_v40 = vmul.f32 %v96_v31, %v64_v35  ;;  %v107_v55 = vmul.f32 %v92_v52, %v63_v49  ;;  %v771_v25 = vld [vmem:[%s1136_s5] ss:$0 sm:$0xff] }
  0x24   :  { %635 = vmatmul.mubr.bf16.vlgmr.msra.gmra.mxu1 %v173_v26  ;;  %826 = vmatpush3.bf16.msra.mxu0 %v880_v23  ;;  %v114_v41 = vmul.f32 %v96_v31, %v70_v39  ;;  %v113_v56 = vmul.f32 %v92_v52, %v69_v50 }
  0x25   :  { %827 = vmatprep.subr.bf16.mxu0 %v881_v24  ;;  %v152_v44 = vadd.f32 %v140_v36, %v108_v40  ;;  %v151_v59 = vadd.f32 %v136_v57, %v107_v55 }
  0x26   :  { %v158_v47 = vadd.f32 %v140_v36, %v114_v41  ;;  %v157_v60 = vadd.f32 %v136_v57, %v113_v56 }
  0x27   :  { %v164_v48 = vmax.f32 %v152_v44, 0.0  ;;  %v163_v62 = vmax.f32 %v151_v59, 0.0 }
  0x28   :  { %828 = vmatpush3.bf16.msra.mxu0 %v882_v29  ;;  %v170_v51 = vmax.f32 %v158_v47, 0.0  ;;  %v169_v63 = vmax.f32 %v157_v60, 0.0 }
  0x29   :  { %829 = vmatprep.subr.bf16.mxu0 %v883_v30 }
  0x2a   :  { %v176_v54 = vpack.c.bf16 %v170_v51, %v164_v48  ;;  %v175_v1 = vpack.c.bf16 %v169_v63, %v163_v62 }
  0x2c   :  { %830 = vmatpush3.bf16.msra.mxu0 %v884_v33  ;;  %675 = vmatprep.mubr.bf16.mxu0 %v176_v54 }
  0x2d   :  { %831 = vmatprep.subr.bf16.mxu0 %v885_v37 }
  0x30   :  { %832 = vmatpush3.bf16.msra.mxu0 %v886_v43 }
  0x31   :  { %833 = vmatprep.subr.bf16.mxu0 %v887_v46 }
  0x34   :  { %834 = vmatpush3.bf16.msra.mxu0 %v888_v28 }
  0x35   :  { %835 = vmatprep.subr.bf16.mxu0 %v889_v53 }
  0x38   :  { %836 = vmatpush3.bf16.msra.mxu0 %v890_v38 }
  0x39   :  { %837 = vmatprep.subr.bf16.mxu0 %v891_v58 }
  0x3c   :  { %838 = vmatpush3.bf16.msra.mxu0 %v892_v61 }
  0x3d   :  { %839 = vmatprep.subr.bf16.mxu0 %v893_v45 }
  0x40   :  { %840 = vmatpush3.bf16.msra.mxu0 %v894_v0 }
  0x43   :  { %676 = vmatmul.mubr.bf16.vlgmr.msra.gmra.mxu0 %v175_v1 }
  0xe3   :  { %v797_v2 = vpop.f32.mrf.mxu0 }
  0xe4   :  { %v819_v3 = vpop.f32.mrf.mxu1 }
  0xe5   :  { %v798_v4 = vpop.f32.mrf.mxu0 }
  0xe6   :  { %v820_v5 = vpop.f32.mrf.mxu1  ;;  %v799_v9 = vadd.f32 %v798_v4, %v797_v2 }
  0xe7   :  { %v800_v6 = vpop.f32.mrf.mxu0  ;;  %v821_v10 = vadd.f32 %v820_v5, %v819_v3 }
  0xe8   :  { %v822_v7 = vpop.f32.mrf.mxu1 }
  0xe9   :  { %v801_v8 = vpop.f32.mrf.mxu0  ;;  %v637_v14 = vadd.f32 %v821_v10, %v799_v9 }
  0xea   :  { %v823_v11 = vpop.f32.mrf.mxu1  ;;  %v802_v15 = vadd.f32 %v801_v8, %v800_v6 }
  0xeb   :  { %v824_v16 = vadd.f32 %v823_v11, %v822_v7 }
  0xed   :  { %v640_v22 = vadd.f32 %v824_v16, %v802_v15 }
 0x103   :  { %v841_v12 = vpop.f32.mrf.mxu0 }
 0x105   :  { %v842_v13 = vpop.f32.mrf.mxu0 }
 0x106   :  { %v843_v17 = vadd.f32 %v842_v13, %v841_v12 }
 0x107   :  { %v844_v19 = vpop.f32.mrf.mxu0 }
 0x108   :  { %v678_v20 = vadd.f32 %v843_v17, %v637_v14 }
 0x109   :  { %v845_v21 = vpop.f32.mrf.mxu0 }
 0x10a   :  { %v691_v23 = vmul.f32 %v770_v18, %v678_v20  ;;  %v846_v24 = vadd.f32 %v845_v21, %v844_v19 }
 0x10c   :  { %v681_v26 = vadd.f32 %v846_v24, %v640_v22  ;;  %v700_v27 = vadd.f32 %v771_v25, %v691_v23 }
 0x10e   :  { %v692_v29 = vmul.f32 %v770_v18, %v681_v26  ;;  %v702_v31 = vmax.f32 %v700_v27, 0.0 }
 0x110   :  { %v701_v30 = vadd.f32 %v771_v25, %v692_v29 }
 0x112   :  { %v703_v32 = vmax.f32 %v701_v30, 0.0 }
 0x114   :  { %v779_v33 = vpack.c.bf16 %v703_v32, %v702_v31 }
 0x116   :  { %780 = vst [vmem:[%s1137_s6] sm:$0xff] %v779_v33  }

// kernel: densenet121_forward.202
= control target key start
LH: loop header
LB: loop body
LE: loop exit
PB: predicated region body
PF: predicated region fallthrough
CT: control target
= control target key end

     0   :  { %v91_v23 = vlaneseq  ;;  %v1088_v53 = vmov 0.0   ;;  %vm1089_vm0 = vmmov 0   ;;  %s1368_s0 = inlined_call_operand.vmem [shape: bf16[16,1024], index: 0, kind: input, shape index: {}]   ;;  %s1369_s1 = inlined_call_operand.vmem [shape: f32[1,896], index: 1, kind: input, shape index: {}]   ;;  %s1370_s2 = inlined_call_operand.vmem [shape: f32[1,896], index: 2, kind: input, shape index: {}]   ;;  %s1371_s3 = inlined_call_operand.vmem [shape: bf16[896,128], index: 3, kind: input, shape index: {}]   ;;  %s1372_s4 = inlined_call_operand.vmem [shape: f32[1,128], index: 4, kind: input, shape index: {}]   ;;  %s1373_s5 = inlined_call_operand.vmem [shape: f32[1,128], index: 5, kind: input, shape index: {}]   ;;  %s1374_s6 = inlined_call_operand.vmem [shape: bf16[16,128], index: 6, kind: output, shape index: {}]  }
   0x1   :  { %v1032_v0 = vld [vmem:[%s1371_s3 + $0x78] sm:$0xff]   ;;  %v1036_v4 = vld [vmem:[%s1371_s3 + $0x70] sm:$0xff]   ;;  %v1040_v8 = vld [vmem:[%s1371_s3 + $0x68] sm:$0xff]  }
   0x2   :  { %v1033_v1 = vld [vmem:[%s1371_s3 + $0xf8] sm:$0xff]   ;;  %935 = vmatprep.subr.bf16.mxu0 %v1032_v0  ;;  %v1037_v5 = vld [vmem:[%s1371_s3 + $0xf0] sm:$0xff]   ;;  %v1041_v9 = vld [vmem:[%s1371_s3 + $0xe8] sm:$0xff]   ;;  %v1206_v28 = vshrl.u32 %v91_v23, 7 }
   0x3   :  { %v1034_v2 = vld [vmem:[%s1371_s3 + $0x38] sm:$0xff]   ;;  %957 = vmatprep.subr.bf16.mxu1 %v1033_v1  ;;  %v1038_v6 = vld [vmem:[%s1371_s3 + $0x30] sm:$0xff]   ;;  %v1042_v10 = vld [vmem:[%s1371_s3 + $0x28] sm:$0xff]  }
   0x4   :  { %v1035_v3 = vld [vmem:[%s1371_s3 + $0xb8] sm:$0xff]   ;;  %936 = vmatpush3.bf16.msra.mxu0 %v1034_v2  ;;  %v1039_v7 = vld [vmem:[%s1371_s3 + $0xb0] sm:$0xff]   ;;  %v1043_v11 = vld [vmem:[%s1371_s3 + $0xa8] sm:$0xff]   ;;  %v97_v33 = vsub.s32 1, %v1206_v28  ;;  %v105_v35 = vsub.s32 3, %v1206_v28  ;;  %v93_v39 = vsub.s32 0, %v1206_v28 }
   0x5   :  { %958 = vmatpush3.bf16.msra.mxu1 %v1035_v3  ;;  %937 = vmatprep.subr.bf16.mxu0 %v1036_v4  ;;  %v1044_v12 = vld [vmem:[%s1371_s3 + $0x60] sm:$0xff]   ;;  %v1048_v16 = vld [vmem:[%s1371_s3 + $0x58] sm:$0xff]   ;;  %v1052_v20 = vld [vmem:[%s1371_s3 + $0x50] sm:$0xff]   ;;  %v101_v40 = vsub.s32 2, %v1206_v28 }
   0x6   :  { %959 = vmatprep.subr.bf16.mxu1 %v1037_v5  ;;  %v1045_v13 = vld [vmem:[%s1371_s3 + $0xe0] sm:$0xff]   ;;  %v1049_v17 = vld [vmem:[%s1371_s3 + $0xd8] sm:$0xff]   ;;  %v1053_v21 = vld [vmem:[%s1371_s3 + $0xd0] sm:$0xff]  }
   0x7   :  { %v1046_v14 = vld [vmem:[%s1371_s3 + $0x20] sm:$0xff]   ;;  %v1050_v18 = vld [vmem:[%s1371_s3 + $0x18] sm:$0xff]   ;;  %v1054_v22 = vld [vmem:[%s1371_s3 + $0x10] sm:$0xff]  }
   0x8   :  { %938 = vmatpush3.bf16.msra.mxu0 %v1038_v6  ;;  %v1047_v15 = vld [vmem:[%s1371_s3 + $0xa0] sm:$0xff]   ;;  %v1051_v19 = vld [vmem:[%s1371_s3 + $0x98] sm:$0xff]   ;;  %v1055_v24 = vld [vmem:[%s1371_s3 + $0x90] sm:$0xff]  }
   0x9   :  { %960 = vmatpush3.bf16.msra.mxu1 %v1039_v7  ;;  %939 = vmatprep.subr.bf16.mxu0 %v1040_v8  ;;  %v1056_v25 = vld [vmem:[%s1371_s3 + $0x48] sm:$0xff]   ;;  %v1060_v30 = vld [vmem:[%s1371_s3 + $0x40] sm:$0xff]   ;;  %v1064_v52 = vld [vmem:[%s1371_s3 + $0x178] sm:$0xff]  }
   0xa   :  { %961 = vmatprep.subr.bf16.mxu1 %v1041_v9  ;;  %v1057_v26 = vld [vmem:[%s1371_s3 + $0xc8] sm:$0xff]   ;;  %v1061_v31 = vld [vmem:[%s1371_s3 + $0xc0] sm:$0xff]  }
   0xb   :  { %v1058_v27 = vld [vmem:[%s1371_s3 + $0x8] sm:$0xff]   ;;  %v1062_v32 = vld [vmem:[%s1371_s3] sm:$0xff]  }
   0xc   :  { %940 = vmatpush3.bf16.msra.mxu0 %v1042_v10  ;;  %v1059_v29 = vld [vmem:[%s1371_s3 + $0x88] sm:$0xff]   ;;  %v1063_v34 = vld [vmem:[%s1371_s3 + $0x80] sm:$0xff]  }
   0xd   :  { %962 = vmatpush3.bf16.msra.mxu1 %v1043_v11  ;;  %941 = vmatprep.subr.bf16.mxu0 %v1044_v12  ;;  %v27_v36 = vld [vmem:[%s1368_s0] sm:$0xff]  ;;  %v29_v46 = vld [vmem:[%s1368_s0 + $0x8] sm:$0xff] }
   0xe   :  { %963 = vmatprep.subr.bf16.mxu1 %v1045_v13  ;;  %v33_v37 = vld [vmem:[%s1368_s0 + $0x20] sm:$0xff]  ;;  %v75_v41 = vunpack.c.l.bf16 %v27_v36  ;;  %v76_v42 = vunpack.c.h.bf16 %v27_v36  ;;  %v35_v47 = vld [vmem:[%s1368_s0 + $0x28] sm:$0xff]  ;;  %v77_v50 = vunpack.c.l.bf16 %v29_v46  ;;  %v78_v51 = vunpack.c.h.bf16 %v29_v46 }
   0xf   :  { %v1234_v38 = vld [vmem:[%s1369_s1] sm:$0xff]  ;;  %v82_v43 = vunpack.c.l.bf16 %v33_v37  ;;  %v83_v44 = vunpack.c.h.bf16 %v33_v37  ;;  %v84_v54 = vunpack.c.l.bf16 %v35_v47  ;;  %v85_v55 = vunpack.c.h.bf16 %v35_v47  ;;  %v37_v47 = vld [vmem:[%s1368_s0 + $0x30] sm:$0xff] }
  0x10   :  { %942 = vmatpush3.bf16.msra.mxu0 %v1046_v14  ;;  %v1241_v45 = vld [vmem:[%s1370_s2] sm:$0xff]  ;;  %v98_v48 = vrot.slane %v1234_v38, %v97_v33  ;;  %v106_v56 = vrot.slane %v1234_v38, %v105_v35  ;;  %v94_v60 = vrot.slane %v1234_v38, %v93_v39  ;;  %v102_v0 = vrot.slane %v1234_v38, %v101_v40 }
  0x11   :  { %964 = vmatpush3.bf16.msra.mxu1 %v1047_v15  ;;  %943 = vmatprep.subr.bf16.mxu0 %v1048_v16  ;;  %v149_v49 = vrot.slane %v1241_v45, %v97_v33  ;;  %v157_v57 = vrot.slane %v1241_v45, %v105_v35  ;;  %v145_v61 = vrot.slane %v1241_v45, %v93_v39  ;;  %v1071_v33 = vld [vmem:[%s1371_s3 + $0x128] sm:$0xff]   ;;  %v1073_v35 = vld [vmem:[%s1371_s3 + $0x160] sm:$0xff]   ;;  %v113_v36 = vsub.s32 5, %v1206_v28 }
  0x12   :  { %965 = vmatprep.subr.bf16.mxu1 %v1049_v17  ;;  %v127_v58 = vmul.f32 %v98_v48, %v76_v42  ;;  %v134_v59 = vmul.f32 %v98_v48, %v83_v44  ;;  %v129_v62 = vmul.f32 %v106_v56, %v78_v51  ;;  %v136_v63 = vmul.f32 %v106_v56, %v85_v55  ;;  %v1074_v37 = vld [vmem:[%s1371_s3 + $0x120] sm:$0xff]   ;;  %v31_v44 = vld [vmem:[%s1368_s0 + $0x10] sm:$0xff]  ;;  %v866_v51 = vld [vmem:[%s1368_s0 + $0x18] sm:$0xf] }
  0x13   :  { %v153_v1 = vrot.slane %v1241_v45, %v101_v40  ;;  %v126_v4 = vmul.f32 %v94_v60, %v75_v41  ;;  %v133_v5 = vmul.f32 %v94_v60, %v82_v43  ;;  %v128_v8 = vmul.f32 %v102_v0, %v77_v50  ;;  %v1075_v40 = vld [vmem:[%s1371_s3 + $0x1a0] sm:$0xff]   ;;  %v1076_v41 = vld [vmem:[%s1371_s3 + $0x158] sm:$0xff]   ;;  %v1079_v55 = vld [vmem:[%s1371_s3 + $0x150] sm:$0xff]   ;;  %50 = vst [vmem:[#allocation2 + $0x18] sm:$0xf] %v866_v51 }
  0x14   :  { %944 = vmatpush3.bf16.msra.mxu0 %v1050_v18  ;;  %v178_v2 = vadd.f32 %v149_v49, %v127_v58  ;;  %v185_v3 = vadd.f32 %v149_v49, %v134_v59  ;;  %v180_v6 = vadd.f32 %v157_v57, %v129_v62  ;;  %v187_v7 = vadd.f32 %v157_v57, %v136_v63  ;;  %v1065_v18 = vld [vmem:[%s1371_s3 + $0x138] sm:$0xff]  }
  0x15   :  { %966 = vmatpush3.bf16.msra.mxu1 %v1051_v19  ;;  %945 = vmatprep.subr.bf16.mxu0 %v1052_v20  ;;  %v135_v9 = vmul.f32 %v102_v0, %v84_v54  ;;  %v177_v12 = vadd.f32 %v145_v61, %v126_v4  ;;  %v184_v13 = vadd.f32 %v145_v61, %v133_v5  ;;  %v109_v39 = vsub.s32 4, %v1206_v28  ;;  %v1077_v43 = vld [vmem:[%s1371_s3 + $0x118] sm:$0xff]   ;;  %v1080_v0 = vld [vmem:[%s1371_s3 + $0x110] sm:$0xff]  }
  0x16   :  { %967 = vmatprep.subr.bf16.mxu1 %v1053_v21  ;;  %v192_v10 = vmax.f32 %v178_v2, 0.0  ;;  %v199_v11 = vmax.f32 %v185_v3, 0.0  ;;  %v194_v14 = vmax.f32 %v180_v6, 0.0  ;;  %v201_v15 = vmax.f32 %v187_v7, 0.0  ;;  %v1078_v54 = vld [vmem:[%s1371_s3 + $0x198] sm:$0xff]   ;;  %v1081_v2 = vld [vmem:[%s1371_s3 + $0x190] sm:$0xff]  }
  0x17   :  { %v179_v16 = vadd.f32 %v153_v1, %v128_v8  ;;  %v186_v17 = vadd.f32 %v153_v1, %v135_v9  ;;  %v191_v20 = vmax.f32 %v177_v12, 0.0  ;;  %v198_v21 = vmax.f32 %v184_v13, 0.0  ;;  %v1083_v9 = vld [vmem:[%s1371_s3 + $0x108] sm:$0xff]   ;;  %v1085_v12 = vld [vmem:[%s1371_s3 + $0x140] sm:$0xff]  }
  0x18   :  { %946 = vmatpush3.bf16.msra.mxu0 %v1054_v22  ;;  %v206_v19 = vpack.c.bf16 %v199_v11, %v192_v10  ;;  %v208_v22 = vpack.c.bf16 %v201_v15, %v194_v14  ;;  %v114_v42 = vrot.slane %v1234_v38, %v113_v36  ;;  %v110_v46 = vrot.slane %v1234_v38, %v109_v39  ;;  %v1084_v11 = vld [vmem:[%s1371_s3 + $0x188] sm:$0xff]  }
  0x19   :  { %968 = vmatpush3.bf16.msra.mxu1 %v1055_v24  ;;  %947 = vmatprep.subr.bf16.mxu0 %v1056_v25  ;;  %v193_v23 = vmax.f32 %v179_v16, 0.0  ;;  %v200_v24 = vmax.f32 %v186_v17, 0.0  ;;  %v1066_v25 = vld [vmem:[%s1371_s3 + $0x1b8] sm:$0xff]   ;;  %v79_v48 = vunpack.c.l.bf16 %v31_v44  ;;  %v80_v49 = vunpack.c.h.bf16 %v31_v44 }
  0x1a   :  { %969 = vmatprep.subr.bf16.mxu1 %v1057_v26  ;;  %v1067_v26 = vld [vmem:[%s1371_s3 + $0x170] sm:$0xff]   ;;  %692 = vmatprep.mubr.bf16.mxu0 %v206_v19  ;;  %v165_v50 = vrot.slane %v1241_v45, %v113_v36  ;;  %v86_v56 = vunpack.c.l.bf16 %v37_v47  ;;  %v87_v57 = vunpack.c.h.bf16 %v37_v47  ;;  %v117_v59 = vsub.s32 6, %v1206_v28  ;;  %v1082_v28 = vld [vmem:[%s1371_s3 + $0x148] sm:$0xff]  }
  0x1b   :  { %733 = vmatprep.mubr.bf16.mxu1 %v208_v22  ;;  %v131_v58 = vmul.f32 %v114_v42, %v80_v49  ;;  %v130_v61 = vmul.f32 %v110_v46, %v79_v48  ;;  %v161_v63 = vrot.slane %v1241_v45, %v109_v39 }
  0x1c   :  { %948 = vmatpush3.bf16.msra.mxu0 %v1058_v27  ;;  %v205_v27 = vpack.c.bf16 %v198_v21, %v191_v20  ;;  %v138_v60 = vmul.f32 %v114_v42, %v87_v57  ;;  %v137_v62 = vmul.f32 %v110_v46, %v86_v56  ;;  %v118_v8 = vrot.slane %v1234_v38, %v117_v59  ;;  %v1086_v20 = vld [vmem:[%s1371_s3 + $0x100] sm:$0xff]  }
  0x1d   :  { %970 = vmatpush3.bf16.msra.mxu1 %v1059_v29  ;;  %949 = vmatprep.subr.bf16.mxu0 %v1060_v30  ;;  %v207_v29 = vpack.c.bf16 %v200_v24, %v193_v23  ;;  %v1068_v30 = vld [vmem:[%s1371_s3 + $0x130] sm:$0xff]   ;;  %v182_v1 = vadd.f32 %v165_v50, %v131_v58  ;;  %v181_v6 = vadd.f32 %v161_v63, %v130_v61  ;;  %v1087_v21 = vld [vmem:[%s1371_s3 + $0x180] sm:$0xff]  }
  0x1e   :  { %971 = vmatprep.subr.bf16.mxu1 %v1061_v31  ;;  %v1069_v31 = vld [vmem:[%s1371_s3 + $0x1b0] sm:$0xff]   ;;  %v189_v3 = vadd.f32 %v165_v50, %v138_v60  ;;  %v188_v7 = vadd.f32 %v161_v63, %v137_v62  ;;  %v169_v38 = vrot.slane %v1241_v45, %v117_v59  ;;  %v924_v50 = vld [vmem:[%s1372_s4] ss:$0 sm:$0xff] }
  0x1f   :  { %v196_v4 = vmax.f32 %v182_v1, 0.0  ;;  %v195_v16 = vmax.f32 %v181_v6, 0.0  ;;  %v925_v59 = vld [vmem:[%s1373_s5] ss:$0 sm:$0xff] }
  0x20   :  { %950 = vmatpush3.bf16.msra.mxu0 %v1062_v32  ;;  %v1070_v32 = vld [vmem:[%s1371_s3 + $0x168] sm:$0xff]   ;;  %v203_v5 = vmax.f32 %v189_v3, 0.0  ;;  %v202_v17 = vmax.f32 %v188_v7, 0.0 }
  0x21   :  { %972 = vmatpush3.bf16.msra.mxu1 %v1063_v34  ;;  %979 = vmatprep.subr.bf16.mxu0 %v1064_v52  ;;  %v1072_v34 = vld [vmem:[%s1371_s3 + $0x1a8] sm:$0xff]   ;;  %v867_v52 = vld [vmem:[%s1368_s0 + $0x38] sm:$0xf] }
  0x22   :  { %1010 = vmatprep.subr.bf16.mxu1 %v1088_v53  ;;  %52 = vst [vmem:[#allocation2 + $0x34] sm:$0xf] %v867_v52  ;;  %v210_v13 = vpack.c.bf16 %v203_v5, %v196_v4  ;;  %v209_v23 = vpack.c.bf16 %v202_v17, %v195_v16 }
  0x23   :  { %693 = vmatmul.mubr.bf16.vlgmr.msra.gmra.mxu0 %v205_v27 }
  0x24   :  { %734 = vmatmul.mubr.bf16.vlgmr.msra.gmra.mxu1 %v207_v29  ;;  %980 = vmatpush3.bf16.msra.mxu0 %v1065_v18 }
  0x25   :  { %1011 = vmatpush3.bf16.msra.mxu1 %v1066_v25  ;;  %981 = vmatprep.subr.bf16.mxu0 %v1067_v26 }
  0x26   :  { %1012 = vmatprep.subr.bf16.mxu1 %v1088_v53  ;;  %1026 = vmatprep.mubr.msk.bf16.mxu1 %vm1089_vm0, %v1088_v53 }
  0x27   :  { %774 = vmatprep.mubr.bf16.mxu0 %v210_v13 }
  0x28   :  { %982 = vmatpush3.bf16.msra.mxu0 %v1068_v30 }
  0x29   :  { %1013 = vmatpush3.bf16.msra.mxu1 %v1069_v31  ;;  %983 = vmatprep.subr.bf16.mxu0 %v1070_v32  ;;  %v70_v10 = vld [vmem:[#allocation2 + $0x18] ss:$28 sps:$4 sm:$0xff]  }
  0x2a   :  { %1014 = vmatprep.subr.bf16.mxu1 %v1088_v53  ;;  %v81_v14 = vunpack.c.l.bf16 %v70_v10  ;;  %v88_v15 = vunpack.c.h.bf16 %v70_v10 }
  0x2c   :  { %984 = vmatpush3.bf16.msra.mxu0 %v1071_v33  ;;  %v132_v18 = vmul.f32 %v118_v8, %v81_v14  ;;  %v139_v19 = vmul.f32 %v118_v8, %v88_v15 }
  0x2d   :  { %1015 = vmatpush3.bf16.msra.mxu1 %v1072_v34  ;;  %985 = vmatprep.subr.bf16.mxu0 %v1073_v35 }
  0x2e   :  { %1016 = vmatprep.subr.bf16.mxu1 %v1088_v53  ;;  %v183_v22 = vadd.f32 %v169_v38, %v132_v18  ;;  %v190_v45 = vadd.f32 %v169_v38, %v139_v19 }
  0x30   :  { %986 = vmatpush3.bf16.msra.mxu0 %v1074_v37  ;;  %v197_v24 = vmax.f32 %v183_v22, 0.0  ;;  %v204_v25 = vmax.f32 %v190_v45, 0.0 }
  0x31   :  { %1017 = vmatpush3.bf16.msra.mxu1 %v1075_v40  ;;  %987 = vmatprep.subr.bf16.mxu0 %v1076_v41 }
  0x32   :  { %1018 = vmatprep.subr.bf16.mxu1 %v1088_v53  ;;  %v211_v26 = vpack.c.bf16 %v204_v25, %v197_v24 }
  0x34   :  { %988 = vmatpush3.bf16.msra.mxu0 %v1077_v43 }
  0x35   :  { %1019 = vmatpush3.bf16.msra.mxu1 %v1078_v54  ;;  %989 = vmatprep.subr.bf16.mxu0 %v1079_v55 }
  0x36   :  { %1020 = vmatprep.subr.bf16.mxu1 %v1088_v53 }
  0x38   :  { %990 = vmatpush3.bf16.msra.mxu0 %v1080_v0 }
  0x39   :  { %1021 = vmatpush3.bf16.msra.mxu1 %v1081_v2  ;;  %991 = vmatprep.subr.bf16.mxu0 %v1082_v28 }
  0x3a   :  { %1022 = vmatprep.subr.bf16.mxu1 %v1088_v53 }
  0x3c   :  { %992 = vmatpush3.bf16.msra.mxu0 %v1083_v9 }
  0x3d   :  { %1023 = vmatpush3.bf16.msra.mxu1 %v1084_v11  ;;  %993 = vmatprep.subr.bf16.mxu0 %v1085_v12 }
  0x3e   :  { %1024 = vmatprep.subr.bf16.mxu1 %v1088_v53 }
  0x40   :  { %994 = vmatpush3.bf16.msra.mxu0 %v1086_v20 }
  0x41   :  { %1025 = vmatpush3.bf16.msra.mxu1 %v1087_v21 }
  0x43   :  { %775 = vmatmul.mubr.bf16.vlgmr.msra.gmra.mxu0 %v209_v23 }
  0x44   :  { %1027 = vmatmul.mubr.bf16.vlgmr.msra.gmra.mxu1 %v211_v26 }
  0xe3   :  { %v951_v27 = vpop.f32.mrf.mxu0 }
  0xe4   :  { %v973_v29 = vpop.f32.mrf.mxu1 }
  0xe5   :  { %v952_v30 = vpop.f32.mrf.mxu0 }
  0xe6   :  { %v974_v31 = vpop.f32.mrf.mxu1  ;;  %v953_v35 = vadd.f32 %v952_v30, %v951_v27 }
  0xe7   :  { %v954_v32 = vpop.f32.mrf.mxu0  ;;  %v975_v36 = vadd.f32 %v974_v31, %v973_v29 }
  0xe8   :  { %v976_v33 = vpop.f32.mrf.mxu1 }
  0xe9   :  { %v955_v34 = vpop.f32.mrf.mxu0  ;;  %v736_v41 = vadd.f32 %v975_v36, %v953_v35 }
  0xea   :  { %v977_v37 = vpop.f32.mrf.mxu1  ;;  %v956_v42 = vadd.f32 %v955_v34, %v954_v32 }
  0xeb   :  { %v978_v43 = vadd.f32 %v977_v37, %v976_v33 }
  0xed   :  { %v739_v52 = vadd.f32 %v978_v43, %v956_v42 }
 0x103   :  { %v995_v39 = vpop.f32.mrf.mxu0 }
 0x104   :  { %v817_v53 = vpop.f32.mrf.mxu1 }
 0x105   :  { %v996_v40 = vpop.f32.mrf.mxu0 }
 0x106   :  { %v997_v44 = vadd.f32 %v996_v40, %v995_v39  ;;  %v1028_v46 = vpop.f32.mrf.mxu1 }
 0x107   :  { %v998_v47 = vpop.f32.mrf.mxu0 }
 0x108   :  { %v777_v48 = vadd.f32 %v997_v44, %v736_v41  ;;  %v820_v49 = vpop.f32.mrf.mxu1 }
 0x109   :  { %v999_v51 = vpop.f32.mrf.mxu0 }
 0x10a   :  { %v818_v54 = vadd.f32 %v817_v53, %v777_v48  ;;  %v1000_v55 = vadd.f32 %v999_v51, %v998_v47  ;;  %v1029_v56 = vpop.f32.mrf.mxu1 }
 0x10c   :  { %v831_v57 = vmul.f32 %v924_v50, %v818_v54  ;;  %v780_v58 = vadd.f32 %v1000_v55, %v739_v52 }
 0x10e   :  { %v821_v60 = vadd.f32 %v820_v49, %v780_v58  ;;  %v840_v61 = vadd.f32 %v925_v59, %v831_v57 }
 0x110   :  { %v832_v62 = vmul.f32 %v924_v50, %v821_v60  ;;  %v842_v0 = vmax.f32 %v840_v61, 0.0 }
 0x112   :  { %v841_v63 = vadd.f32 %v925_v59, %v832_v62 }
 0x114   :  { %v843_v1 = vmax.f32 %v841_v63, 0.0 }
 0x116   :  { %v933_v2 = vpack.c.bf16 %v843_v1, %v842_v0 }
 0x118   :  { %934 = vst [vmem:[%s1374_s6] sm:$0xff] %v933_v2  }

// kernel: densenet121_forward.210
= control target key start
LH: loop header
LB: loop body
LE: loop exit
PB: predicated region body
PF: predicated region fallthrough
CT: control target
= control target key end

     0   :  { %v50_v23 = vlaneseq  ;;  %s1421_s3 = inlined_call_operand.vmem [shape: bf16[1024,128], index: 3, kind: input, shape index: {}]   ;;  %s1422_s0 = inlined_call_operand.vmem [shape: bf16[16,1024], index: 0, kind: input, shape index: {}]   ;;  %s1423_s1 = inlined_call_operand.vmem [shape: f32[1,1024], index: 1, kind: input, shape index: {}]   ;;  %s1424_s2 = inlined_call_operand.vmem [shape: f32[1,1024], index: 2, kind: input, shape index: {}]   ;;  %s1425_s4 = inlined_call_operand.vmem [shape: f32[1,128], index: 4, kind: input, shape index: {}]   ;;  %s1426_s5 = inlined_call_operand.vmem [shape: f32[1,128], index: 5, kind: input, shape index: {}]   ;;  %s1427_s6 = inlined_call_operand.vmem [shape: bf16[16,128], index: 6, kind: output, shape index: {}]  }
   0x1   :  { %v1061_v0 = vld [vmem:[%s1421_s3 + $0x78] sm:$0xff]   ;;  %v1065_v4 = vld [vmem:[%s1421_s3 + $0x70] sm:$0xff]   ;;  %v1069_v8 = vld [vmem:[%s1421_s3 + $0x68] sm:$0xff]  }
   0x2   :  { %v1062_v1 = vld [vmem:[%s1421_s3 + $0xf8] sm:$0xff]   ;;  %973 = vmatprep.subr.bf16.mxu0 %v1061_v0  ;;  %v1066_v5 = vld [vmem:[%s1421_s3 + $0xf0] sm:$0xff]   ;;  %v1070_v9 = vld [vmem:[%s1421_s3 + $0xe8] sm:$0xff]   ;;  %v1241_v28 = vshrl.u32 %v50_v23, 7 }
   0x3   :  { %v1063_v2 = vld [vmem:[%s1421_s3 + $0x38] sm:$0xff]   ;;  %995 = vmatprep.subr.bf16.mxu1 %v1062_v1  ;;  %v1067_v6 = vld [vmem:[%s1421_s3 + $0x30] sm:$0xff]   ;;  %v1071_v10 = vld [vmem:[%s1421_s3 + $0x28] sm:$0xff]  }
   0x4   :  { %v1064_v3 = vld [vmem:[%s1421_s3 + $0xb8] sm:$0xff]   ;;  %974 = vmatpush3.bf16.msra.mxu0 %v1063_v2  ;;  %v1068_v7 = vld [vmem:[%s1421_s3 + $0xb0] sm:$0xff]   ;;  %v1072_v11 = vld [vmem:[%s1421_s3 + $0xa8] sm:$0xff]   ;;  %v56_v33 = vsub.s32 1, %v1241_v28  ;;  %v64_v35 = vsub.s32 3, %v1241_v28  ;;  %v52_v39 = vsub.s32 0, %v1241_v28 }
   0x5   :  { %996 = vmatpush3.bf16.msra.mxu1 %v1064_v3  ;;  %975 = vmatprep.subr.bf16.mxu0 %v1065_v4  ;;  %v1073_v12 = vld [vmem:[%s1421_s3 + $0x60] sm:$0xff]   ;;  %v1077_v16 = vld [vmem:[%s1421_s3 + $0x58] sm:$0xff]   ;;  %v1081_v20 = vld [vmem:[%s1421_s3 + $0x50] sm:$0xff]   ;;  %v60_v40 = vsub.s32 2, %v1241_v28 }
   0x6   :  { %997 = vmatprep.subr.bf16.mxu1 %v1066_v5  ;;  %v1074_v13 = vld [vmem:[%s1421_s3 + $0xe0] sm:$0xff]   ;;  %v1078_v17 = vld [vmem:[%s1421_s3 + $0xd8] sm:$0xff]   ;;  %v1082_v21 = vld [vmem:[%s1421_s3 + $0xd0] sm:$0xff]  }
   0x7   :  { %v1075_v14 = vld [vmem:[%s1421_s3 + $0x20] sm:$0xff]   ;;  %v1079_v18 = vld [vmem:[%s1421_s3 + $0x18] sm:$0xff]   ;;  %v1083_v22 = vld [vmem:[%s1421_s3 + $0x10] sm:$0xff]  }
   0x8   :  { %976 = vmatpush3.bf16.msra.mxu0 %v1067_v6  ;;  %v1076_v15 = vld [vmem:[%s1421_s3 + $0xa0] sm:$0xff]   ;;  %v1080_v19 = vld [vmem:[%s1421_s3 + $0x98] sm:$0xff]   ;;  %v1084_v24 = vld [vmem:[%s1421_s3 + $0x90] sm:$0xff]  }
   0x9   :  { %998 = vmatpush3.bf16.msra.mxu1 %v1068_v7  ;;  %977 = vmatprep.subr.bf16.mxu0 %v1069_v8  ;;  %v1085_v25 = vld [vmem:[%s1421_s3 + $0x48] sm:$0xff]   ;;  %v1089_v30 = vld [vmem:[%s1421_s3 + $0x40] sm:$0xff]   ;;  %v1093_v52 = vld [vmem:[%s1421_s3 + $0x178] sm:$0xff]  }
   0xa   :  { %999 = vmatprep.subr.bf16.mxu1 %v1070_v9  ;;  %v1086_v26 = vld [vmem:[%s1421_s3 + $0xc8] sm:$0xff]   ;;  %v1090_v31 = vld [vmem:[%s1421_s3 + $0xc0] sm:$0xff]   ;;  %v1094_v57 = vld [vmem:[%s1421_s3 + $0x1f8] sm:$0xff]  }
   0xb   :  { %v1087_v27 = vld [vmem:[%s1421_s3 + $0x8] sm:$0xff]   ;;  %v1091_v32 = vld [vmem:[%s1421_s3] sm:$0xff]  }
   0xc   :  { %978 = vmatpush3.bf16.msra.mxu0 %v1071_v10  ;;  %v1088_v29 = vld [vmem:[%s1421_s3 + $0x88] sm:$0xff]   ;;  %v1092_v34 = vld [vmem:[%s1421_s3 + $0x80] sm:$0xff]  }
   0xd   :  { %1000 = vmatpush3.bf16.msra.mxu1 %v1072_v11  ;;  %979 = vmatprep.subr.bf16.mxu0 %v1073_v12  ;;  %v24_v36 = vld [vmem:[%s1422_s0] sm:$0xff]  ;;  %v25_v46 = vld [vmem:[%s1422_s0 + $0x8] sm:$0xff] }
   0xe   :  { %1001 = vmatprep.subr.bf16.mxu1 %v1074_v13  ;;  %v28_v37 = vld [vmem:[%s1422_s0 + $0x20] sm:$0xff]  ;;  %v32_v41 = vunpack.c.l.bf16 %v24_v36  ;;  %v33_v42 = vunpack.c.h.bf16 %v24_v36  ;;  %v29_v47 = vld [vmem:[%s1422_s0 + $0x28] sm:$0xff]  ;;  %v34_v50 = vunpack.c.l.bf16 %v25_v46  ;;  %v35_v51 = vunpack.c.h.bf16 %v25_v46  ;;  %v1112_v46 = vld [vmem:[%s1421_s3 + $0x198] sm:$0xff]  }
   0xf   :  { %v1269_v38 = vld [vmem:[%s1423_s1] sm:$0xff]  ;;  %v40_v43 = vunpack.c.l.bf16 %v28_v37  ;;  %v41_v44 = vunpack.c.h.bf16 %v28_v37  ;;  %v42_v53 = vunpack.c.l.bf16 %v29_v47  ;;  %v43_v54 = vunpack.c.h.bf16 %v29_v47  ;;  %v1104_v36 = vld [vmem:[%s1421_s3 + $0x1a8] sm:$0xff]  }
  0x10   :  { %980 = vmatpush3.bf16.msra.mxu0 %v1075_v14  ;;  %v1276_v45 = vld [vmem:[%s1424_s2] sm:$0xff]  ;;  %v57_v48 = vrot.slane %v1269_v38, %v56_v33  ;;  %v65_v55 = vrot.slane %v1269_v38, %v64_v35  ;;  %v53_v60 = vrot.slane %v1269_v38, %v52_v39  ;;  %v61_v0 = vrot.slane %v1269_v38, %v60_v40 }
  0x11   :  { %1002 = vmatpush3.bf16.msra.mxu1 %v1076_v15  ;;  %981 = vmatprep.subr.bf16.mxu0 %v1077_v16  ;;  %v115_v49 = vrot.slane %v1276_v45, %v56_v33  ;;  %v123_v56 = vrot.slane %v1276_v45, %v64_v35  ;;  %v111_v61 = vrot.slane %v1276_v45, %v52_v39  ;;  %v1101_v33 = vld [vmem:[%s1421_s3 + $0x168] sm:$0xff]   ;;  %v1105_v37 = vld [vmem:[%s1421_s3 + $0x160] sm:$0xff]   ;;  %v72_v47 = vsub.s32 5, %v1241_v28 }
  0x12   :  { %1003 = vmatprep.subr.bf16.mxu1 %v1078_v17  ;;  %v91_v58 = vmul.f32 %v57_v48, %v33_v42  ;;  %v99_v59 = vmul.f32 %v57_v48, %v41_v44  ;;  %v93_v62 = vmul.f32 %v65_v55, %v35_v51  ;;  %v101_v63 = vmul.f32 %v65_v55, %v43_v54  ;;  %v1103_v35 = vld [vmem:[%s1421_s3 + $0x128] sm:$0xff]   ;;  %v1106_v39 = vld [vmem:[%s1421_s3 + $0x1e0] sm:$0xff]   ;;  %v1109_v42 = vld [vmem:[%s1421_s3 + $0x158] sm:$0xff]  }
  0x13   :  { %v119_v1 = vrot.slane %v1276_v45, %v60_v40  ;;  %v90_v4 = vmul.f32 %v53_v60, %v32_v41  ;;  %v98_v5 = vmul.f32 %v53_v60, %v40_v43  ;;  %v92_v8 = vmul.f32 %v61_v0, %v34_v50  ;;  %v1107_v40 = vld [vmem:[%s1421_s3 + $0x120] sm:$0xff]   ;;  %v1110_v43 = vld [vmem:[%s1421_s3 + $0x1d8] sm:$0xff]   ;;  %v1113_v48 = vld [vmem:[%s1421_s3 + $0x150] sm:$0xff]  }
  0x14   :  { %982 = vmatpush3.bf16.msra.mxu0 %v1079_v18  ;;  %v149_v2 = vadd.f32 %v115_v49, %v91_v58  ;;  %v157_v3 = vadd.f32 %v115_v49, %v99_v59  ;;  %v151_v6 = vadd.f32 %v123_v56, %v93_v62  ;;  %v159_v7 = vadd.f32 %v123_v56, %v101_v63  ;;  %v1095_v18 = vld [vmem:[%s1421_s3 + $0x138] sm:$0xff]   ;;  %v1108_v41 = vld [vmem:[%s1421_s3 + $0x1a0] sm:$0xff]   ;;  %v1114_v50 = vld [vmem:[%s1421_s3 + $0x1d0] sm:$0xff]  }
  0x15   :  { %1004 = vmatpush3.bf16.msra.mxu1 %v1080_v19  ;;  %983 = vmatprep.subr.bf16.mxu0 %v1081_v20  ;;  %v100_v9 = vmul.f32 %v61_v0, %v42_v53  ;;  %v148_v12 = vadd.f32 %v111_v61, %v90_v4  ;;  %v156_v13 = vadd.f32 %v111_v61, %v98_v5  ;;  %v1111_v44 = vld [vmem:[%s1421_s3 + $0x118] sm:$0xff]   ;;  %v80_v49 = vsub.s32 7, %v1241_v28  ;;  %v1116_v54 = vld [vmem:[%s1421_s3 + $0x190] sm:$0xff]   ;;  %v1117_v55 = vld [vmem:[%s1421_s3 + $0x148] sm:$0xff]  }
  0x16   :  { %1005 = vmatprep.subr.bf16.mxu1 %v1082_v21  ;;  %v165_v10 = vmax.f32 %v149_v2, 0.0  ;;  %v173_v11 = vmax.f32 %v157_v3, 0.0  ;;  %v167_v14 = vmax.f32 %v151_v6, 0.0  ;;  %v175_v15 = vmax.f32 %v159_v7, 0.0  ;;  %v1118_v56 = vld [vmem:[%s1421_s3 + $0x1c8] sm:$0xff]   ;;  %v26_v59 = vld [vmem:[%s1422_s0 + $0x10] sm:$0xff] }
  0x17   :  { %v150_v16 = vadd.f32 %v119_v1, %v92_v8  ;;  %v158_v17 = vadd.f32 %v119_v1, %v100_v9  ;;  %v164_v20 = vmax.f32 %v148_v12, 0.0  ;;  %v172_v21 = vmax.f32 %v156_v13, 0.0  ;;  %v1119_v58 = vld [vmem:[%s1421_s3 + $0x108] sm:$0xff]   ;;  %v30_v0 = vld [vmem:[%s1422_s0 + $0x30] sm:$0xff]  ;;  %v27_v3 = vld [vmem:[%s1422_s0 + $0x18] sm:$0xff] }
  0x18   :  { %984 = vmatpush3.bf16.msra.mxu0 %v1083_v22  ;;  %v181_v19 = vpack.c.bf16 %v173_v11, %v165_v10  ;;  %v183_v22 = vpack.c.bf16 %v175_v15, %v167_v14  ;;  %v68_v51 = vsub.s32 4, %v1241_v28  ;;  %v76_v53 = vsub.s32 6, %v1241_v28  ;;  %v31_v4 = vld [vmem:[%s1422_s0 + $0x38] sm:$0xff]  ;;  %v1121_v7 = vld [vmem:[%s1421_s3 + $0x140] sm:$0xff]  }
  0x19   :  { %1006 = vmatpush3.bf16.msra.mxu1 %v1084_v24  ;;  %985 = vmatprep.subr.bf16.mxu0 %v1085_v25  ;;  %v166_v23 = vmax.f32 %v150_v16, 0.0  ;;  %v174_v24 = vmax.f32 %v158_v17, 0.0  ;;  %v1096_v25 = vld [vmem:[%s1421_s3 + $0x1b8] sm:$0xff]   ;;  %v131_v60 = vrot.slane %v1276_v45, %v72_v47  ;;  %v81_v61 = vrot.slane %v1269_v38, %v80_v49  ;;  %v1122_v12 = vld [vmem:[%s1421_s3 + $0x1c0] sm:$0xff]  }
  0x1a   :  { %1007 = vmatprep.subr.bf16.mxu1 %v1086_v26  ;;  %v1097_v26 = vld [vmem:[%s1421_s3 + $0x170] sm:$0xff]   ;;  %732 = vmatprep.mubr.bf16.mxu0 %v181_v19  ;;  %v69_v28 = vrot.slane %v1269_v38, %v68_v51  ;;  %v139_v62 = vrot.slane %v1276_v45, %v80_v49  ;;  %v77_v63 = vrot.slane %v1269_v38, %v76_v53  ;;  %v36_v1 = vunpack.c.l.bf16 %v26_v59 }
  0x1b   :  { %773 = vmatprep.mubr.bf16.mxu1 %v183_v22  ;;  %v37_v2 = vunpack.c.h.bf16 %v26_v59  ;;  %v127_v5 = vrot.slane %v1276_v45, %v68_v51  ;;  %v135_v6 = vrot.slane %v1276_v45, %v76_v53  ;;  %v44_v8 = vunpack.c.l.bf16 %v30_v0 }
  0x1c   :  { %986 = vmatpush3.bf16.msra.mxu0 %v1087_v27  ;;  %v180_v27 = vpack.c.bf16 %v172_v21, %v164_v20  ;;  %v45_v9 = vunpack.c.h.bf16 %v30_v0  ;;  %v38_v10 = vunpack.c.l.bf16 %v27_v3  ;;  %v39_v11 = vunpack.c.h.bf16 %v27_v3  ;;  %v1123_v20 = vld [vmem:[%s1421_s3 + $0x100] sm:$0xff]  }
  0x1d   :  { %1008 = vmatpush3.bf16.msra.mxu1 %v1088_v29  ;;  %987 = vmatprep.subr.bf16.mxu0 %v1089_v30  ;;  %v182_v29 = vpack.c.bf16 %v174_v24, %v166_v23  ;;  %v1098_v30 = vld [vmem:[%s1421_s3 + $0x1f0] sm:$0xff]   ;;  %v46_v13 = vunpack.c.l.bf16 %v31_v4  ;;  %v47_v14 = vunpack.c.h.bf16 %v31_v4  ;;  %v94_v15 = vmul.f32 %v69_v28, %v36_v1  ;;  %v962_v4 = vld [vmem:[%s1425_s4] ss:$0 sm:$0xff] }
  0x1e   :  { %1009 = vmatprep.subr.bf16.mxu1 %v1090_v31  ;;  %v1099_v31 = vld [vmem:[%s1421_s3 + $0x130] sm:$0xff]   ;;  %v97_v17 = vmul.f32 %v81_v61, %v39_v11  ;;  %v96_v19 = vmul.f32 %v77_v63, %v38_v10 }
  0x1f   :  { %v105_v22 = vmul.f32 %v81_v61, %v47_v14  ;;  %v152_v23 = vadd.f32 %v127_v5, %v94_v15  ;;  %v104_v24 = vmul.f32 %v77_v63, %v46_v13 }
  0x20   :  { %988 = vmatpush3.bf16.msra.mxu0 %v1091_v32  ;;  %v1100_v32 = vld [vmem:[%s1421_s3 + $0x1b0] sm:$0xff]  }
  0x21   :  { %1010 = vmatpush3.bf16.msra.mxu1 %v1092_v34  ;;  %1017 = vmatprep.subr.bf16.mxu0 %v1093_v52  ;;  %v1102_v34 = vld [vmem:[%s1421_s3 + $0x1e8] sm:$0xff]   ;;  %v1115_v52 = vld [vmem:[%s1421_s3 + $0x110] sm:$0xff]  }
  0x22   :  { %1039 = vmatprep.subr.bf16.mxu1 %v1094_v57  ;;  %v73_v57 = vrot.slane %v1269_v38, %v72_v47  ;;  %v1120_v38 = vld [vmem:[%s1421_s3 + $0x188] sm:$0xff]  }
  0x23   :  { %733 = vmatmul.mubr.bf16.vlgmr.msra.gmra.mxu0 %v180_v27  ;;  %v155_v27 = vadd.f32 %v139_v62, %v97_v17 }
  0x24   :  { %774 = vmatmul.mubr.bf16.vlgmr.msra.gmra.mxu1 %v182_v29  ;;  %1018 = vmatpush3.bf16.msra.mxu0 %v1095_v18  ;;  %v95_v45 = vmul.f32 %v73_v57, %v37_v2  ;;  %v103_v16 = vmul.f32 %v73_v57, %v45_v9  ;;  %v102_v18 = vmul.f32 %v69_v28, %v44_v8 }
  0x25   :  { %1040 = vmatpush3.bf16.msra.mxu1 %v1096_v25  ;;  %1019 = vmatprep.subr.bf16.mxu0 %v1097_v26  ;;  %v1124_v25 = vld [vmem:[%s1421_s3 + $0x180] sm:$0xff]  }
  0x26   :  { %1041 = vmatprep.subr.bf16.mxu1 %v1098_v30  ;;  %v153_v21 = vadd.f32 %v131_v60, %v95_v45  ;;  %v161_v26 = vadd.f32 %v131_v60, %v103_v16  ;;  %v160_v29 = vadd.f32 %v127_v5, %v102_v18 }
  0x28   :  { %1020 = vmatpush3.bf16.msra.mxu0 %v1099_v31  ;;  %v169_v30 = vmax.f32 %v153_v21, 0.0  ;;  %v163_v31 = vadd.f32 %v139_v62, %v105_v22 }
  0x29   :  { %1042 = vmatpush3.bf16.msra.mxu1 %v1100_v32  ;;  %1021 = vmatprep.subr.bf16.mxu0 %v1101_v33  ;;  %v168_v32 = vmax.f32 %v152_v23, 0.0  ;;  %v154_v33 = vadd.f32 %v135_v6, %v96_v19 }
  0x2a   :  { %1043 = vmatprep.subr.bf16.mxu1 %v1102_v34  ;;  %v177_v34 = vmax.f32 %v161_v26, 0.0 }
  0x2c   :  { %1022 = vmatpush3.bf16.msra.mxu0 %v1103_v35  ;;  %v171_v35 = vmax.f32 %v155_v27, 0.0 }
  0x2d   :  { %1044 = vmatpush3.bf16.msra.mxu1 %v1104_v36  ;;  %1023 = vmatprep.subr.bf16.mxu0 %v1105_v37  ;;  %v176_v36 = vmax.f32 %v160_v29, 0.0  ;;  %v162_v37 = vadd.f32 %v135_v6, %v104_v24 }
  0x2e   :  { %1045 = vmatprep.subr.bf16.mxu1 %v1106_v39  ;;  %v179_v39 = vmax.f32 %v163_v31, 0.0 }
  0x30   :  { %1024 = vmatpush3.bf16.msra.mxu0 %v1107_v40  ;;  %v170_v40 = vmax.f32 %v154_v33, 0.0 }
  0x31   :  { %1046 = vmatpush3.bf16.msra.mxu1 %v1108_v41  ;;  %1025 = vmatprep.subr.bf16.mxu0 %v1109_v42  ;;  %v185_v41 = vpack.c.bf16 %v177_v34, %v169_v30  ;;  %v184_v42 = vpack.c.bf16 %v176_v36, %v168_v32 }
  0x32   :  { %1047 = vmatprep.subr.bf16.mxu1 %v1110_v43  ;;  %v178_v43 = vmax.f32 %v162_v37, 0.0 }
  0x33   :  { %814 = vmatprep.mubr.bf16.mxu0 %v185_v41 }
  0x34   :  { %1026 = vmatpush3.bf16.msra.mxu0 %v1111_v44  ;;  %v187_v44 = vpack.c.bf16 %v179_v39, %v171_v35 }
  0x35   :  { %1048 = vmatpush3.bf16.msra.mxu1 %v1112_v46  ;;  %1027 = vmatprep.subr.bf16.mxu0 %v1113_v48  ;;  %v186_v46 = vpack.c.bf16 %v178_v43, %v170_v40 }
  0x36   :  { %1049 = vmatprep.subr.bf16.mxu1 %v1114_v50  ;;  %855 = vmatprep.mubr.bf16.mxu1 %v187_v44 }
  0x38   :  { %1028 = vmatpush3.bf16.msra.mxu0 %v1115_v52 }
  0x39   :  { %1050 = vmatpush3.bf16.msra.mxu1 %v1116_v54  ;;  %1029 = vmatprep.subr.bf16.mxu0 %v1117_v55 }
  0x3a   :  { %1051 = vmatprep.subr.bf16.mxu1 %v1118_v56 }
  0x3c   :  { %1030 = vmatpush3.bf16.msra.mxu0 %v1119_v58 }
  0x3d   :  { %1052 = vmatpush3.bf16.msra.mxu1 %v1120_v38  ;;  %1031 = vmatprep.subr.bf16.mxu0 %v1121_v7 }
  0x3e   :  { %1053 = vmatprep.subr.bf16.mxu1 %v1122_v12  ;;  %v963_v12 = vld [vmem:[%s1426_s5] ss:$0 sm:$0xff] }
  0x40   :  { %1032 = vmatpush3.bf16.msra.mxu0 %v1123_v20 }
  0x41   :  { %1054 = vmatpush3.bf16.msra.mxu1 %v1124_v25 }
  0x43   :  { %815 = vmatmul.mubr.bf16.vlgmr.msra.gmra.mxu0 %v184_v42 }
  0x44   :  { %856 = vmatmul.mubr.bf16.vlgmr.msra.gmra.mxu1 %v186_v46 }
  0xe3   :  { %v989_v47 = vpop.f32.mrf.mxu0 }
  0xe4   :  { %v1011_v48 = vpop.f32.mrf.mxu1 }
  0xe5   :  { %v990_v49 = vpop.f32.mrf.mxu0 }
  0xe6   :  { %v1012_v50 = vpop.f32.mrf.mxu1  ;;  %v991_v54 = vadd.f32 %v990_v49, %v989_v47 }
  0xe7   :  { %v992_v51 = vpop.f32.mrf.mxu0  ;;  %v1013_v55 = vadd.f32 %v1012_v50, %v1011_v48 }
  0xe8   :  { %v1014_v52 = vpop.f32.mrf.mxu1 }
  0xe9   :  { %v993_v53 = vpop.f32.mrf.mxu0  ;;  %v776_v59 = vadd.f32 %v1013_v55, %v991_v54 }
  0xea   :  { %v1015_v56 = vpop.f32.mrf.mxu1  ;;  %v994_v60 = vadd.f32 %v993_v53, %v992_v51 }
  0xeb   :  { %v1016_v61 = vadd.f32 %v1015_v56, %v1014_v52 }
  0xed   :  { %v779_v6 = vadd.f32 %v1016_v61, %v994_v60 }
 0x103   :  { %v1033_v57 = vpop.f32.mrf.mxu0 }
 0x104   :  { %v1055_v28 = vpop.f32.mrf.mxu1 }
 0x105   :  { %v1034_v58 = vpop.f32.mrf.mxu0 }
 0x106   :  { %v1035_v62 = vadd.f32 %v1034_v58, %v1033_v57  ;;  %v1056_v63 = vpop.f32.mrf.mxu1 }
 0x107   :  { %v1036_v0 = vpop.f32.mrf.mxu0  ;;  %v1057_v2 = vadd.f32 %v1056_v63, %v1055_v28 }
 0x108   :  { %v817_v1 = vadd.f32 %v1035_v62, %v776_v59  ;;  %v1058_v3 = vpop.f32.mrf.mxu1 }
 0x109   :  { %v1037_v5 = vpop.f32.mrf.mxu0 }
 0x10a   :  { %v858_v38 = vadd.f32 %v1057_v2, %v817_v1  ;;  %v1038_v7 = vadd.f32 %v1037_v5, %v1036_v0  ;;  %v1059_v8 = vpop.f32.mrf.mxu1 }
 0x10b   :  { %v1060_v11 = vadd.f32 %v1059_v8, %v1058_v3 }
 0x10c   :  { %v871_v9 = vmul.f32 %v962_v4, %v858_v38  ;;  %v820_v10 = vadd.f32 %v1038_v7, %v779_v6 }
 0x10e   :  { %v861_v45 = vadd.f32 %v1060_v11, %v820_v10  ;;  %v880_v13 = vadd.f32 %v963_v12, %v871_v9 }
 0x110   :  { %v872_v14 = vmul.f32 %v962_v4, %v861_v45  ;;  %v882_v16 = vmax.f32 %v880_v13, 0.0 }
 0x112   :  { %v881_v15 = vadd.f32 %v963_v12, %v872_v14 }
 0x114   :  { %v883_v17 = vmax.f32 %v881_v15, 0.0 }
 0x116   :  { %v971_v18 = vpack.c.bf16 %v883_v17, %v882_v16 }
 0x118   :  { %972 = vst [vmem:[%s1427_s6] sm:$0xff] %v971_v18  }

// kernel: densenet121_forward.217
= control target key start
LH: loop header
LB: loop body
LE: loop exit
PB: predicated region body
PF: predicated region fallthrough
CT: control target
= control target key end

     0   :  { %v24_v0 = vlaneseq  ;;  %v190_v3 = vmov 1983009808   ;;  %vm104_vm0 = vcmask 1041408   ;;  %v191_v16 = vmov 1966171168   ;;  %s227_s0 = inlined_call_operand.vmem [shape: bf16[4,2,512], index: 0, kind: input, shape index: {}]   ;;  %s228_s1 = inlined_call_operand.vmem [shape: bf16[2,512], index: 1, kind: output, shape index: {}]  }
   0x1   :  { %v180_v1 = vld [vmem:[%s227_s0] sm:$0xff]   ;;  %v187_v2 = vld [vmem:[%s227_s0 + $0x8] sm:$0xff]   ;;  %v22_v4 = vunpack.c.l.s4 %v190_v3  ;;  %v149_v17 = vunpack.c.l.s4 %v191_v16 }
   0x2   :  { %v181_v5 = vunpack.c.l.bf16 %v180_v1  ;;  %v182_v6 = vunpack.c.h.bf16 %v180_v1  ;;  %v185_v7 = vunpack.c.l.bf16 %v187_v2  ;;  %v186_v8 = vunpack.c.h.bf16 %v187_v2 }
   0x3   :  { %v23_v9 = vunpack.c.0.s8 %v22_v4  ;;  %v25_v10 = vshrl.u32 %v24_v0, 7  ;;  %v150_v57 = vunpack.c.0.s8 %v149_v17 }
   0x4   :  { %v20_v11 = vcombine.high %v181_v5, %v181_v5  ;;  %v37_v12 = vcombine.high %v182_v6, %v182_v6  ;;  %v54_v13 = vcombine.high %v185_v7, %v185_v7  ;;  %v71_v14 = vcombine.high %v186_v8, %v186_v8 }
   0x5   :  { %v26_v15 = vsub.s32 %v23_v9, %v25_v10  ;;  %v153_v2 = vsub.s32 %v150_v57, %v25_v10 }
   0x7   :  { %v27_v18 = vrot.slane %v181_v5, %v26_v15  ;;  %v34_v19 = vrot.slane %v20_v11, %v26_v15  ;;  %v44_v20 = vrot.slane %v182_v6, %v26_v15  ;;  %v51_v21 = vrot.slane %v37_v12, %v26_v15 }
   0x8   :  { %v61_v22 = vrot.slane %v185_v7, %v26_v15  ;;  %v68_v23 = vrot.slane %v54_v13, %v26_v15  ;;  %v78_v24 = vrot.slane %v186_v8, %v26_v15  ;;  %v85_v25 = vrot.slane %v71_v14, %v26_v15 }
   0x9   :  { %v35_v26 = vcombine.high %v27_v18, %v27_v18  ;;  %v36_v27 = vcombine.high %v34_v19, %v34_v19  ;;  %v52_v28 = vcombine.high %v44_v20, %v44_v20  ;;  %v53_v29 = vcombine.high %v51_v21, %v51_v21 }
   0xa   :  { %v69_v30 = vcombine.high %v61_v22, %v61_v22  ;;  %v70_v31 = vcombine.high %v68_v23, %v68_v23  ;;  %v86_v32 = vcombine.high %v78_v24, %v78_v24  ;;  %v87_v33 = vcombine.high %v85_v25, %v85_v25 }
   0xb   :  { %v105_v34 = vsel %vm104_vm0, %v27_v18, 0.0  ;;  %v106_v35 = vsel %vm104_vm0, %v44_v20, 0.0  ;;  %v108_v36 = vsel %vm104_vm0, %v61_v22, 0.0  ;;  %v110_v37 = vsel %vm104_vm0, %v78_v24, 0.0 }
   0xc   :  { %v107_v38 = vadd.f32 %v106_v35, %v105_v34  ;;  %v112_v39 = vsel %vm104_vm0, %v35_v26, 0.0  ;;  %v113_v40 = vsel %vm104_vm0, %v52_v28, 0.0  ;;  %v115_v41 = vsel %vm104_vm0, %v69_v30, 0.0 }
   0xd   :  { %v114_v42 = vadd.f32 %v113_v40, %v112_v39  ;;  %v117_v43 = vsel %vm104_vm0, %v86_v32, 0.0  ;;  %v119_v44 = vsel %vm104_vm0, %v34_v19, 0.0  ;;  %v120_v45 = vsel %vm104_vm0, %v51_v21, 0.0 }
   0xe   :  { %v109_v46 = vadd.f32 %v108_v36, %v107_v38  ;;  %v121_v47 = vadd.f32 %v120_v45, %v119_v44  ;;  %v122_v48 = vsel %vm104_vm0, %v68_v23, 0.0  ;;  %v124_v49 = vsel %vm104_vm0, %v85_v25, 0.0 }
   0xf   :  { %v116_v50 = vadd.f32 %v115_v41, %v114_v42  ;;  %v126_v51 = vsel %vm104_vm0, %v36_v27, 0.0  ;;  %v127_v52 = vsel %vm104_vm0, %v53_v29, 0.0  ;;  %v129_v53 = vsel %vm104_vm0, %v70_v31, 0.0 }
  0x10   :  { %v111_v54 = vadd.f32 %v110_v37, %v109_v46  ;;  %v123_v55 = vadd.f32 %v122_v48, %v121_v47  ;;  %v128_v56 = vadd.f32 %v127_v52, %v126_v51  ;;  %v131_v59 = vsel %vm104_vm0, %v87_v33, 0.0 }
  0x11   :  { %v118_v58 = vadd.f32 %v117_v43, %v116_v50 }
  0x12   :  { %v125_v60 = vadd.f32 %v124_v49, %v123_v55  ;;  %v130_v61 = vadd.f32 %v129_v53, %v128_v56  ;;  %v134_v62 = vmul.f32 0.25, %v111_v54 }
  0x13   :  { %v135_v63 = vmul.f32 0.25, %v118_v58 }
  0x14   :  { %v132_v0 = vadd.f32 %v131_v59, %v130_v61  ;;  %v136_v1 = vmul.f32 0.25, %v125_v60 }
  0x15   :  { %v176_v3 = vpack.c.bf16 %v135_v63, %v134_v62 }
  0x16   :  { %v137_v4 = vmul.f32 0.25, %v132_v0 }
  0x17   :  { %v154_v6 = vrot.slane %v176_v3, %v153_v2 }
  0x18   :  { %v177_v5 = vpack.c.bf16 %v137_v4, %v136_v1 }
  0x1a   :  { %v161_v7 = vrot.slane %v177_v5, %v153_v2 }
  0x1c   :  { %v162_v8 = vcombine.low %v154_v6, %v161_v7 }
  0x1e   :  { %178 = vst.sshfl [vmem:[%s228_s1] sm:$0x55 pattern:$0x73625140] %v162_v8 }

// kernel: densenet121_forward.216
= control target key start
LH: loop header
LB: loop body
LE: loop exit
PB: predicated region body
PF: predicated region fallthrough
CT: control target
= control target key end

     0   :  { %v43_v37 = vlaneseq  ;;  %s3654_s3 = inlined_call_operand.vmem [shape: bf16[1024,512], index: 3, kind: input, shape index: {}]   ;;  %s3655_s0 = inlined_call_operand.vmem [shape: bf16[16,1024], index: 0, kind: input, shape index: {}]   ;;  %s3656_s1 = inlined_call_operand.vmem [shape: f32[1,1024], index: 1, kind: input, shape index: {}]   ;;  %s3657_s2 = inlined_call_operand.vmem [shape: f32[1,1024], index: 2, kind: input, shape index: {}]   ;;  %s3658_s4 = inlined_call_operand.vmem [shape: bf16[16,512], index: 4, kind: output, shape index: {}]  }
   0x1   :  { %v2357_v0 = vld [vmem:[%s3654_s3 + $0xe4] ss:$16 sps:$4 sm:$0xff]   ;;  %v2361_v2 = vld [vmem:[%s3654_s3 + $0xe0] ss:$16 sps:$4 sm:$0xff]   ;;  %v18_v62 = vld [vmem:[%s3655_s0 + $0x8] sm:$0xff] }
   0x2   :  { %v2359_v1 = vld [vmem:[%s3654_s3 + $0x2e4] ss:$16 sps:$4 sm:$0xff]   ;;  %1717 = vmatprep.subr.bf16.mxu0 %v2357_v0  ;;  %v2362_v3 = vld [vmem:[%s3654_s3 + $0x2e0] ss:$16 sps:$4 sm:$0xff]   ;;  %v2889_v42 = vshrl.u32 %v43_v37, 7  ;;  %v22_v63 = vld [vmem:[%s3655_s0 + $0x28] sm:$0xff] }
   0x3   :  { %1760 = vmatprep.subr.bf16.mxu1 %v2359_v1  ;;  %v2363_v4 = vld [vmem:[%s3654_s3 + $0xc4] ss:$16 sps:$4 sm:$0xff]   ;;  %1718 = vmatpush1.bf16.msra.mxu0 %v2361_v2  ;;  %v2367_v6 = vld [vmem:[%s3654_s3 + $0xc0] ss:$16 sps:$4 sm:$0xff]  }
   0x4   :  { %1761 = vmatpush1.bf16.msra.mxu1 %v2362_v3  ;;  %v2365_v5 = vld [vmem:[%s3654_s3 + $0x2c4] ss:$16 sps:$4 sm:$0xff]   ;;  %1719 = vmatprep.subr.bf16.mxu0 %v2363_v4  ;;  %v2368_v7 = vld [vmem:[%s3654_s3 + $0x2c0] ss:$16 sps:$4 sm:$0xff]   ;;  %v49_v47 = vsub.s32 1, %v2889_v42  ;;  %v57_v52 = vsub.s32 3, %v2889_v42  ;;  %v28_v4 = vunpack.c.h.bf16 %v18_v62 }
   0x5   :  { %1762 = vmatprep.subr.bf16.mxu1 %v2365_v5  ;;  %v2369_v8 = vld [vmem:[%s3654_s3 + $0xa4] ss:$16 sps:$4 sm:$0xff]   ;;  %v2373_v10 = vld [vmem:[%s3654_s3 + $0xa0] ss:$16 sps:$4 sm:$0xff]   ;;  %v45_v57 = vsub.s32 0, %v2889_v42  ;;  %v53_v58 = vsub.s32 2, %v2889_v42  ;;  %v36_v5 = vunpack.c.h.bf16 %v22_v63 }
   0x6   :  { %v2371_v9 = vld [vmem:[%s3654_s3 + $0x2a4] ss:$16 sps:$4 sm:$0xff]   ;;  %v2374_v11 = vld [vmem:[%s3654_s3 + $0x2a0] ss:$16 sps:$4 sm:$0xff]  }
   0x7   :  { %1720 = vmatpush1.bf16.msra.mxu0 %v2367_v6  ;;  %v2375_v12 = vld [vmem:[%s3654_s3 + $0x84] ss:$16 sps:$4 sm:$0xff]   ;;  %v2379_v14 = vld [vmem:[%s3654_s3 + $0x80] ss:$16 sps:$4 sm:$0xff]  }
   0x8   :  { %1763 = vmatpush1.bf16.msra.mxu1 %v2368_v7  ;;  %1721 = vmatprep.subr.bf16.mxu0 %v2369_v8  ;;  %v2377_v13 = vld [vmem:[%s3654_s3 + $0x284] ss:$16 sps:$4 sm:$0xff]   ;;  %v2380_v15 = vld [vmem:[%s3654_s3 + $0x280] ss:$16 sps:$4 sm:$0xff]  }
   0x9   :  { %1764 = vmatprep.subr.bf16.mxu1 %v2371_v9  ;;  %v2381_v16 = vld [vmem:[%s3654_s3 + $0x64] ss:$16 sps:$4 sm:$0xff]   ;;  %v2385_v18 = vld [vmem:[%s3654_s3 + $0x60] ss:$16 sps:$4 sm:$0xff]  }
   0xa   :  { %v2383_v17 = vld [vmem:[%s3654_s3 + $0x264] ss:$16 sps:$4 sm:$0xff]   ;;  %v2386_v19 = vld [vmem:[%s3654_s3 + $0x260] ss:$16 sps:$4 sm:$0xff]  }
   0xb   :  { %1722 = vmatpush1.bf16.msra.mxu0 %v2373_v10  ;;  %v2387_v20 = vld [vmem:[%s3654_s3 + $0x44] ss:$16 sps:$4 sm:$0xff]   ;;  %v2391_v22 = vld [vmem:[%s3654_s3 + $0x40] ss:$16 sps:$4 sm:$0xff]   ;;  %v27_v10 = vunpack.c.l.bf16 %v18_v62 }
   0xc   :  { %1765 = vmatpush1.bf16.msra.mxu1 %v2374_v11  ;;  %1723 = vmatprep.subr.bf16.mxu0 %v2375_v12  ;;  %v2389_v21 = vld [vmem:[%s3654_s3 + $0x244] ss:$16 sps:$4 sm:$0xff]   ;;  %v2392_v23 = vld [vmem:[%s3654_s3 + $0x240] ss:$16 sps:$4 sm:$0xff]   ;;  %v35_v11 = vunpack.c.l.bf16 %v22_v63 }
   0xd   :  { %1766 = vmatprep.subr.bf16.mxu1 %v2377_v13  ;;  %v2393_v24 = vld [vmem:[%s3654_s3 + $0x24] ss:$16 sps:$4 sm:$0xff]   ;;  %v2397_v26 = vld [vmem:[%s3654_s3 + $0x20] ss:$16 sps:$4 sm:$0xff]  }
   0xe   :  { %v2395_v25 = vld [vmem:[%s3654_s3 + $0x224] ss:$16 sps:$4 sm:$0xff]   ;;  %v2398_v27 = vld [vmem:[%s3654_s3 + $0x220] ss:$16 sps:$4 sm:$0xff]  }
   0xf   :  { %1724 = vmatpush1.bf16.msra.mxu0 %v2379_v14  ;;  %v2399_v28 = vld [vmem:[%s3654_s3 + $0x4] ss:$16 sps:$4 sm:$0xff]   ;;  %v2403_v30 = vld [vmem:[%s3654_s3] ss:$16 sps:$4 sm:$0xff]  }
  0x10   :  { %1767 = vmatpush1.bf16.msra.mxu1 %v2380_v15  ;;  %1725 = vmatprep.subr.bf16.mxu0 %v2381_v16  ;;  %v2401_v29 = vld [vmem:[%s3654_s3 + $0x204] ss:$16 sps:$4 sm:$0xff]   ;;  %v2404_v31 = vld [vmem:[%s3654_s3 + $0x200] ss:$16 sps:$4 sm:$0xff]  }
  0x11   :  { %1768 = vmatprep.subr.bf16.mxu1 %v2383_v17  ;;  %v2405_v32 = vld [vmem:[%s3654_s3 + $0x1e4] ss:$16 sps:$4 sm:$0xff]   ;;  %v2409_v34 = vld [vmem:[%s3654_s3 + $0x1e0] ss:$16 sps:$4 sm:$0xff]  }
  0x12   :  { %v2407_v33 = vld [vmem:[%s3654_s3 + $0x3e4] ss:$16 sps:$4 sm:$0xff]   ;;  %v2410_v35 = vld [vmem:[%s3654_s3 + $0x3e0] ss:$16 sps:$4 sm:$0xff]  }
  0x13   :  { %1726 = vmatpush1.bf16.msra.mxu0 %v2385_v18  ;;  %v2411_v36 = vld [vmem:[%s3654_s3 + $0x1c4] ss:$16 sps:$4 sm:$0xff]   ;;  %v2415_v39 = vld [vmem:[%s3654_s3 + $0x1c0] ss:$16 sps:$4 sm:$0xff]  }
  0x14   :  { %1769 = vmatpush1.bf16.msra.mxu1 %v2386_v19  ;;  %1727 = vmatprep.subr.bf16.mxu0 %v2387_v20  ;;  %v2413_v38 = vld [vmem:[%s3654_s3 + $0x3c4] ss:$16 sps:$4 sm:$0xff]   ;;  %v2416_v40 = vld [vmem:[%s3654_s3 + $0x3c0] ss:$16 sps:$4 sm:$0xff]   ;;  %v61_v19 = vsub.s32 4, %v2889_v42 }
  0x15   :  { %1770 = vmatprep.subr.bf16.mxu1 %v2389_v21  ;;  %v2417_v41 = vld [vmem:[%s3654_s3 + $0x1a4] ss:$16 sps:$4 sm:$0xff]   ;;  %v2421_v44 = vld [vmem:[%s3654_s3 + $0x1a0] ss:$16 sps:$4 sm:$0xff]  }
  0x16   :  { %v2419_v43 = vld [vmem:[%s3654_s3 + $0x3a4] ss:$16 sps:$4 sm:$0xff]   ;;  %v2422_v45 = vld [vmem:[%s3654_s3 + $0x3a0] ss:$16 sps:$4 sm:$0xff]  }
  0x17   :  { %1728 = vmatpush1.bf16.msra.mxu0 %v2391_v22  ;;  %v2423_v46 = vld [vmem:[%s3654_s3 + $0x184] ss:$16 sps:$4 sm:$0xff]   ;;  %v2427_v49 = vld [vmem:[%s3654_s3 + $0x180] ss:$16 sps:$4 sm:$0xff]  }
  0x18   :  { %1771 = vmatpush1.bf16.msra.mxu1 %v2392_v23  ;;  %1729 = vmatprep.subr.bf16.mxu0 %v2393_v24  ;;  %v2425_v48 = vld [vmem:[%s3654_s3 + $0x384] ss:$16 sps:$4 sm:$0xff]   ;;  %v2428_v50 = vld [vmem:[%s3654_s3 + $0x380] ss:$16 sps:$4 sm:$0xff]  }
  0x19   :  { %1772 = vmatprep.subr.bf16.mxu1 %v2395_v25  ;;  %v17_v51 = vld [vmem:[%s3655_s0] sm:$0xff]  ;;  %v69_v25 = vsub.s32 6, %v2889_v42 }
  0x1a   :  { %v21_v53 = vld [vmem:[%s3655_s0 + $0x20] sm:$0xff]  ;;  %v26_v54 = vunpack.c.h.bf16 %v17_v51  ;;  %v25_v2 = vunpack.c.l.bf16 %v17_v51 }
  0x1b   :  { %1730 = vmatpush1.bf16.msra.mxu0 %v2397_v26  ;;  %v2923_v55 = vld [vmem:[%s3656_s1] sm:$0xff]  ;;  %v34_v59 = vunpack.c.h.bf16 %v21_v53  ;;  %v33_v3 = vunpack.c.l.bf16 %v21_v53 }
  0x1c   :  { %1773 = vmatpush1.bf16.msra.mxu1 %v2398_v27  ;;  %1731 = vmatprep.subr.bf16.mxu0 %v2399_v28  ;;  %v2928_v56 = vld [vmem:[%s3657_s2] sm:$0xff]  ;;  %v50_v60 = vrot.slane %v2923_v55, %v49_v47  ;;  %v58_v8 = vrot.slane %v2923_v55, %v57_v52  ;;  %v46_v12 = vrot.slane %v2923_v55, %v45_v57 }
  0x1d   :  { %1774 = vmatprep.subr.bf16.mxu1 %v2401_v29  ;;  %v108_v61 = vrot.slane %v2928_v56, %v49_v47  ;;  %v2429_v0 = vld [vmem:[%s3654_s3 + $0x164] ss:$16 sps:$4 sm:$0xff]   ;;  %v116_v9 = vrot.slane %v2928_v56, %v57_v52  ;;  %v54_v13 = vrot.slane %v2923_v55, %v53_v58  ;;  %v2433_v14 = vld [vmem:[%s3654_s3 + $0x160] ss:$16 sps:$4 sm:$0xff]   ;;  %v104_v24 = vrot.slane %v2928_v56, %v45_v57 }
  0x1e   :  { %v2431_v1 = vld [vmem:[%s3654_s3 + $0x364] ss:$16 sps:$4 sm:$0xff]   ;;  %v84_v6 = vmul.f32 %v50_v60, %v26_v54  ;;  %v92_v7 = vmul.f32 %v50_v60, %v34_v59  ;;  %v2434_v15 = vld [vmem:[%s3654_s3 + $0x360] ss:$16 sps:$4 sm:$0xff]   ;;  %v86_v18 = vmul.f32 %v58_v8, %v28_v4  ;;  %v94_v22 = vmul.f32 %v58_v8, %v36_v5 }
  0x1f   :  { %1732 = vmatpush1.bf16.msra.mxu0 %v2403_v30  ;;  %v2435_v20 = vld [vmem:[%s3654_s3 + $0x144] ss:$16 sps:$4 sm:$0xff]   ;;  %v83_v23 = vmul.f32 %v46_v12, %v25_v2  ;;  %v91_v29 = vmul.f32 %v46_v12, %v33_v3  ;;  %v2996_v51 = vrot.slane %v2928_v56, %v61_v19  ;;  %v2999_v52 = vrot.slane %v2923_v55, %v69_v25  ;;  %v2451_v57 = vld [vmem:[%s3654_s3 + $0x100] ss:$16 sps:$4 sm:$0xff]  }
  0x20   :  { %1775 = vmatpush1.bf16.msra.mxu1 %v2404_v31  ;;  %1733 = vmatprep.subr.bf16.mxu0 %v2405_v32  ;;  %v142_v16 = vadd.f32 %v108_v61, %v84_v6  ;;  %v150_v17 = vadd.f32 %v108_v61, %v92_v7  ;;  %v2437_v21 = vld [vmem:[%s3654_s3 + $0x344] ss:$16 sps:$4 sm:$0xff]   ;;  %v144_v28 = vadd.f32 %v116_v9, %v86_v18  ;;  %v2452_v62 = vld [vmem:[%s3654_s3 + $0x300] ss:$16 sps:$4 sm:$0xff]  }
  0x21   :  { %1776 = vmatprep.subr.bf16.mxu1 %v2407_v33  ;;  %v152_v30 = vadd.f32 %v116_v9, %v94_v22  ;;  %v85_v31 = vmul.f32 %v54_v13, %v27_v10  ;;  %v93_v32 = vmul.f32 %v54_v13, %v35_v11  ;;  %v112_v33 = vrot.slane %v2928_v56, %v53_v58  ;;  %v2449_v54 = vld [vmem:[%s3654_s3 + $0x304] ss:$16 sps:$4 sm:$0xff]   ;;  %v2453_v3 = vld [vmem:[%s3654_s3 + $0x4e0] ss:$16 sps:$4 sm:$0xff]  }
  0x22   :  { %v158_v26 = vmax.f32 %v142_v16, 0.0  ;;  %v166_v27 = vmax.f32 %v150_v17, 0.0  ;;  %v160_v37 = vmax.f32 %v144_v28, 0.0  ;;  %v3002_v53 = vrot.slane %v2928_v56, %v69_v25  ;;  %v2455_v63 = vld [vmem:[%s3654_s3 + $0x4e4] ss:$16 sps:$4 sm:$0xff]  }
  0x23   :  { %1734 = vmatpush2.bf16.msra.mxu0 %v2409_v34  ;;  %v2439_v34 = vld [vmem:[%s3654_s3 + $0x140] ss:$16 sps:$4 sm:$0xff]   ;;  %v151_v47 = vadd.f32 %v112_v33, %v93_v32  ;;  %v2461_v5 = vld [vmem:[%s3654_s3 + $0x4c4] ss:$16 sps:$4 sm:$0xff]   ;;  %v73_v25 = vsub.s32 7, %v2889_v42 }
  0x24   :  { %1777 = vmatpush2.bf16.msra.mxu1 %v2410_v35  ;;  %1735 = vmatprep.subr.bf16.mxu0 %v2411_v36  ;;  %v2440_v35 = vld [vmem:[%s3654_s3 + $0x340] ss:$16 sps:$4 sm:$0xff]   ;;  %v2972_v36 = vpack.c.bf16 %v166_v27, %v158_v26  ;;  %v2464_v6 = vld [vmem:[%s3654_s3 + $0x6c4] ss:$16 sps:$4 sm:$0xff]  }
  0x25   :  { %1778 = vmatprep.subr.bf16.mxu1 %v2413_v38  ;;  %v2441_v38 = vld [vmem:[%s3654_s3 + $0x124] ss:$16 sps:$4 sm:$0xff]   ;;  %v167_v61 = vmax.f32 %v151_v47, 0.0  ;;  %v2456_v4 = vld [vmem:[%s3654_s3 + $0x6e0] ss:$16 sps:$4 sm:$0xff]  }
  0x26   :  { %1749 = vmatprep.mubr.bf16.mxu0 %v2972_v36  ;;  %v2459_v7 = vld [vmem:[%s3654_s3 + $0x4c0] ss:$16 sps:$4 sm:$0xff]   ;;  %v2467_v9 = vld [vmem:[%s3654_s3 + $0x4a4] ss:$16 sps:$4 sm:$0xff]  }
  0x27   :  { %1736 = vmatpush2.bf16.msra.mxu0 %v2415_v39  ;;  %v2443_v39 = vld [vmem:[%s3654_s3 + $0x324] ss:$16 sps:$4 sm:$0xff]   ;;  %v2462_v8 = vld [vmem:[%s3654_s3 + $0x6c0] ss:$16 sps:$4 sm:$0xff]  }
  0x28   :  { %1779 = vmatpush2.bf16.msra.mxu1 %v2416_v40  ;;  %1737 = vmatprep.subr.bf16.mxu0 %v2417_v41  ;;  %v168_v40 = vmax.f32 %v152_v30, 0.0  ;;  %v141_v41 = vadd.f32 %v104_v24, %v83_v23  ;;  %v2470_v10 = vld [vmem:[%s3654_s3 + $0x6a4] ss:$16 sps:$4 sm:$0xff]   ;;  %v2465_v11 = vld [vmem:[%s3654_s3 + $0x4a0] ss:$16 sps:$4 sm:$0xff]   ;;  %v65_v23 = vsub.s32 5, %v2889_v42 }
  0x29   :  { %1780 = vmatprep.subr.bf16.mxu1 %v2419_v43  ;;  %v149_v43 = vadd.f32 %v104_v24, %v91_v29  ;;  %v2468_v12 = vld [vmem:[%s3654_s3 + $0x6a0] ss:$16 sps:$4 sm:$0xff]   ;;  %v2473_v13 = vld [vmem:[%s3654_s3 + $0x484] ss:$16 sps:$4 sm:$0xff]  }
  0x2a   :  { %v157_v58 = vmax.f32 %v141_v41, 0.0  ;;  %v2474_v16 = vld [vmem:[%s3654_s3 + $0x680] ss:$16 sps:$4 sm:$0xff]   ;;  %v2479_v17 = vld [vmem:[%s3654_s3 + $0x464] ss:$16 sps:$4 sm:$0xff]   ;;  %v66_v29 = vrot.slane %v2923_v55, %v65_v23 }
  0x2b   :  { %1738 = vmatpush2.bf16.msra.mxu0 %v2421_v44  ;;  %v2445_v44 = vld [vmem:[%s3654_s3 + $0x120] ss:$16 sps:$4 sm:$0xff]   ;;  %v165_v59 = vmax.f32 %v149_v43, 0.0  ;;  %v2482_v18 = vld [vmem:[%s3654_s3 + $0x664] ss:$16 sps:$4 sm:$0xff]  }
  0x2c   :  { %1781 = vmatpush2.bf16.msra.mxu1 %v2422_v45  ;;  %1739 = vmatprep.subr.bf16.mxu0 %v2423_v46  ;;  %v2984_v45 = vpack.c.bf16 %v168_v40, %v160_v37  ;;  %v143_v46 = vadd.f32 %v112_v33, %v85_v31  ;;  %v2488_v22 = vld [vmem:[%s3654_s3 + $0x644] ss:$16 sps:$4 sm:$0xff]   ;;  %v2483_v24 = vld [vmem:[%s3654_s3 + $0x440] ss:$16 sps:$4 sm:$0xff]   ;;  %v74_v33 = vrot.slane %v2923_v55, %v73_v25  ;;  %v24_v40 = vld [vmem:[%s3655_s0 + $0x38] sm:$0xff] }
  0x2d   :  { %1782 = vmatprep.subr.bf16.mxu1 %v2425_v48  ;;  %v2987_v48 = vrot.slane %v2923_v55, %v61_v19  ;;  %v2477_v19 = vld [vmem:[%s3654_s3 + $0x460] ss:$16 sps:$4 sm:$0xff]   ;;  %v2491_v27 = vld [vmem:[%s3654_s3 + $0x424] ss:$16 sps:$4 sm:$0xff]   ;;  %v132_v55 = vrot.slane %v2928_v56, %v73_v25 }
  0x2e   :  { %1792 = vmatprep.mubr.bf16.mxu1 %v2984_v45  ;;  %v159_v60 = vmax.f32 %v143_v46, 0.0  ;;  %v2486_v26 = vld [vmem:[%s3654_s3 + $0x640] ss:$16 sps:$4 sm:$0xff]   ;;  %v2494_v28 = vld [vmem:[%s3654_s3 + $0x624] ss:$16 sps:$4 sm:$0xff]  }
  0x2f   :  { %1740 = vmatpush2.bf16.msra.mxu0 %v2427_v49  ;;  %v2446_v49 = vld [vmem:[%s3654_s3 + $0x320] ss:$16 sps:$4 sm:$0xff]   ;;  %v2497_v31 = vld [vmem:[%s3654_s3 + $0x404] ss:$16 sps:$4 sm:$0xff]  }
  0x30   :  { %1783 = vmatpush2.bf16.msra.mxu1 %v2428_v50  ;;  %1741 = vmatprep.subr.bf16.mxu0 %v2429_v0  ;;  %v2447_v50 = vld [vmem:[%s3654_s3 + $0x104] ss:$16 sps:$4 sm:$0xff]   ;;  %v3022_v2 = vpack.c.bf16 %v167_v61, %v159_v60  ;;  %v2489_v42 = vld [vmem:[%s3654_s3 + $0x420] ss:$16 sps:$4 sm:$0xff]  }
  0x31   :  { %1784 = vmatprep.subr.bf16.mxu1 %v2431_v1  ;;  %v2458_v0 = vld [vmem:[%s3654_s3 + $0x6e4] ss:$16 sps:$4 sm:$0xff]   ;;  %v3020_v1 = vpack.c.bf16 %v165_v59, %v157_v58  ;;  %v2492_v30 = vld [vmem:[%s3654_s3 + $0x620] ss:$16 sps:$4 sm:$0xff]  }
  0x32   :  { %v19_v32 = vld [vmem:[%s3655_s0 + $0x10] sm:$0xff] }
  0x33   :  { %1742 = vmatpush2.bf16.msra.mxu0 %v2433_v14  ;;  %v2476_v14 = vld [vmem:[%s3654_s3 + $0x684] ss:$16 sps:$4 sm:$0xff]   ;;  %v30_v37 = vunpack.c.h.bf16 %v19_v32  ;;  %v2495_v58 = vld [vmem:[%s3654_s3 + $0x400] ss:$16 sps:$4 sm:$0xff]  }
  0x34   :  { %1785 = vmatpush2.bf16.msra.mxu1 %v2434_v15  ;;  %1743 = vmatprep.subr.bf16.mxu0 %v2435_v20  ;;  %v2471_v15 = vld [vmem:[%s3654_s3 + $0x480] ss:$16 sps:$4 sm:$0xff]   ;;  %v2500_v41 = vld [vmem:[%s3654_s3 + $0x604] ss:$16 sps:$4 sm:$0xff]  }
  0x35   :  { %1786 = vmatprep.subr.bf16.mxu1 %v2437_v21  ;;  %v2480_v20 = vld [vmem:[%s3654_s3 + $0x660] ss:$16 sps:$4 sm:$0xff]   ;;  %v2485_v21 = vld [vmem:[%s3654_s3 + $0x444] ss:$16 sps:$4 sm:$0xff]  }
  0x36   :  { %v2507_v25 = vld [vmem:[%s3654_s3 + $0x5c0] ss:$16 sps:$4 sm:$0xff]  }
  0x37   :  { %1744 = vmatpush2.bf16.msra.mxu0 %v2439_v34  ;;  %v23_v34 = vld [vmem:[%s3655_s0 + $0x30] sm:$0xff] }
  0x38   :  { %1787 = vmatpush2.bf16.msra.mxu1 %v2440_v35  ;;  %1745 = vmatprep.subr.bf16.mxu0 %v2441_v38  ;;  %v29_v35 = vunpack.c.l.bf16 %v19_v32  ;;  %v124_v38 = vrot.slane %v2928_v56, %v65_v23  ;;  %v37_v43 = vunpack.c.l.bf16 %v23_v34  ;;  %v2519_v32 = vld [vmem:[%s3654_s3 + $0x580] ss:$16 sps:$4 sm:$0xff]  }
  0x39   :  { %1788 = vmatprep.subr.bf16.mxu1 %v2443_v39  ;;  %v20_v39 = vld [vmem:[%s3655_s0 + $0x18] sm:$0xff] }
  0x3a   :  { %v31_v46 = vunpack.c.l.bf16 %v20_v39  ;;  %v32_v47 = vunpack.c.h.bf16 %v20_v39  ;;  %v95_v60 = vmul.f32 %v2987_v48, %v37_v43  ;;  %v2533_v39 = vld [vmem:[%s3654_s3 + $0x544] ss:$16 sps:$4 sm:$0xff]  }
  0x3b   :  { %1746 = vmatpush2.bf16.msra.mxu0 %v2445_v44  ;;  %v38_v44 = vunpack.c.h.bf16 %v23_v34  ;;  %v2527_v34 = vld [vmem:[%s3654_s3 + $0x564] ss:$16 sps:$4 sm:$0xff]  }
  0x3c   :  { %1789 = vmatpush2.bf16.msra.mxu1 %v2446_v49  ;;  %1747 = vmatprep.subr.bf16.mxu0 %v2447_v50  ;;  %v88_v49 = vmul.f32 %v66_v29, %v30_v37  ;;  %v39_v50 = vunpack.c.l.bf16 %v24_v40  ;;  %v90_v59 = vmul.f32 %v74_v33, %v32_v47  ;;  %v89_v61 = vmul.f32 %v2999_v52, %v31_v46  ;;  %v2525_v37 = vld [vmem:[%s3654_s3 + $0x560] ss:$16 sps:$4 sm:$0xff]   ;;  %v2539_v43 = vld [vmem:[%s3654_s3 + $0x524] ss:$16 sps:$4 sm:$0xff]  }
  0x3d   :  { %1790 = vmatprep.subr.bf16.mxu1 %v2449_v54  ;;  %v40_v54 = vunpack.c.h.bf16 %v24_v40  ;;  %v96_v56 = vmul.f32 %v66_v29, %v38_v44  ;;  %v2516_v29 = vld [vmem:[%s3654_s3 + $0x7a0] ss:$16 sps:$4 sm:$0xff]   ;;  %v2536_v40 = vld [vmem:[%s3654_s3 + $0x744] ss:$16 sps:$4 sm:$0xff]  }
  0x3e   :  { %v2542_v44 = vld [vmem:[%s3654_s3 + $0x724] ss:$16 sps:$4 sm:$0xff]   ;;  %v2537_v46 = vld [vmem:[%s3654_s3 + $0x520] ss:$16 sps:$4 sm:$0xff]  }
  0x3f   :  { %1748 = vmatpush2.bf16.msra.mxu0 %v2451_v57  ;;  %v87_v57 = vmul.f32 %v2987_v48, %v29_v35  ;;  %v2506_v48 = vld [vmem:[%s3654_s3 + $0x7e4] ss:$16 sps:$4 sm:$0xff]   ;;  %v2540_v47 = vld [vmem:[%s3654_s3 + $0x720] ss:$16 sps:$4 sm:$0xff]  }
  0x40   :  { %1791 = vmatpush2.bf16.msra.mxu1 %v2452_v62  ;;  %1803 = vmatprep.subr.bf16.mxu0 %v2455_v63  ;;  %v2498_v62 = vld [vmem:[%s3654_s3 + $0x600] ss:$16 sps:$4 sm:$0xff]   ;;  %v2503_v63 = vld [vmem:[%s3654_s3 + $0x5e4] ss:$16 sps:$4 sm:$0xff]  }
  0x41   :  { %1846 = vmatprep.subr.bf16.mxu1 %v2458_v0  ;;  %v146_v0 = vadd.f32 %v124_v38, %v88_v49  ;;  %v2530_v35 = vld [vmem:[%s3654_s3 + $0x764] ss:$16 sps:$4 sm:$0xff]  }
  0x42   :  { %1750 = vmatmul.mubr.bf16.vlgmr.msra.gmra.mxu0 %v3020_v1  ;;  %v2545_v49 = vld [vmem:[%s3654_s3 + $0x504] ss:$16 sps:$4 sm:$0xff]  }
  0x43   :  { %1793 = vmatmul.mubr.bf16.vlgmr.msra.gmra.mxu1 %v3022_v2  ;;  %1804 = vmatpush1.bf16.msra.mxu0 %v2453_v3  ;;  %v98_v3 = vmul.f32 %v74_v33, %v40_v54  ;;  %v2522_v33 = vld [vmem:[%s3654_s3 + $0x780] ss:$16 sps:$4 sm:$0xff]  }
  0x44   :  { %1847 = vmatpush1.bf16.msra.mxu1 %v2456_v4  ;;  %1805 = vmatprep.subr.bf16.mxu0 %v2461_v5  ;;  %v145_v4 = vadd.f32 %v2996_v51, %v87_v57  ;;  %v154_v5 = vadd.f32 %v124_v38, %v96_v56  ;;  %v2528_v38 = vld [vmem:[%s3654_s3 + $0x760] ss:$16 sps:$4 sm:$0xff]   ;;  %v2554_v56 = vld [vmem:[%s3654_s3 + $0x2ec] ss:$16 sps:$4 sm:$0xff]  }
  0x45   :  { %1848 = vmatprep.subr.bf16.mxu1 %v2464_v6  ;;  %v148_v6 = vadd.f32 %v132_v55, %v90_v59  ;;  %v2543_v54 = vld [vmem:[%s3654_s3 + $0x500] ss:$16 sps:$4 sm:$0xff]   ;;  %v2549_v59 = vld [vmem:[%s3654_s3 + $0xe8] ss:$16 sps:$4 sm:$0xff]  }
  0x46   :  { %v2546_v57 = vld [vmem:[%s3654_s3 + $0x700] ss:$16 sps:$4 sm:$0xff]  }
  0x47   :  { %1806 = vmatpush1.bf16.msra.mxu0 %v2459_v7  ;;  %v153_v7 = vadd.f32 %v2996_v51, %v95_v60  ;;  %v2504_v51 = vld [vmem:[%s3654_s3 + $0x7e0] ss:$16 sps:$4 sm:$0xff]   ;;  %v2552_v60 = vld [vmem:[%s3654_s3 + $0x2e8] ss:$16 sps:$4 sm:$0xff]  }
  0x48   :  { %1849 = vmatpush1.bf16.msra.mxu1 %v2462_v8  ;;  %1807 = vmatprep.subr.bf16.mxu0 %v2467_v9  ;;  %v162_v8 = vmax.f32 %v146_v0, 0.0  ;;  %v156_v9 = vadd.f32 %v132_v55, %v98_v3  ;;  %v2531_v55 = vld [vmem:[%s3654_s3 + $0x540] ss:$16 sps:$4 sm:$0xff]   ;;  %v2558_v0 = vld [vmem:[%s3654_s3 + $0x2c8] ss:$16 sps:$4 sm:$0xff]  }
  0x49   :  { %1850 = vmatprep.subr.bf16.mxu1 %v2470_v10  ;;  %v161_v10 = vmax.f32 %v145_v4, 0.0  ;;  %v2563_v3 = vld [vmem:[%s3654_s3 + $0xac] ss:$16 sps:$4 sm:$0xff]  }
  0x4a   :  { %v2566_v4 = vld [vmem:[%s3654_s3 + $0x2ac] ss:$16 sps:$4 sm:$0xff]  }
  0x4b   :  { %1808 = vmatpush1.bf16.msra.mxu0 %v2465_v11  ;;  %v97_v11 = vmul.f32 %v2999_v52, %v39_v50  ;;  %v172_v52 = vmax.f32 %v156_v9, 0.0  ;;  %v2548_v50 = vld [vmem:[%s3654_s3 + $0x704] ss:$16 sps:$4 sm:$0xff]   ;;  %v2578_v9 = vld [vmem:[%s3654_s3 + $0x26c] ss:$16 sps:$4 sm:$0xff]  }
  0x4c   :  { %1851 = vmatpush1.bf16.msra.mxu1 %v2468_v12  ;;  %1809 = vmatprep.subr.bf16.mxu0 %v2473_v13  ;;  %v2501_v12 = vld [vmem:[%s3654_s3 + $0x5e0] ss:$16 sps:$4 sm:$0xff]   ;;  %v170_v13 = vmax.f32 %v154_v5, 0.0  ;;  %v2564_v5 = vld [vmem:[%s3654_s3 + $0x2a8] ss:$16 sps:$4 sm:$0xff]  }
  0x4d   :  { %1852 = vmatprep.subr.bf16.mxu1 %v2476_v14  ;;  %v164_v14 = vmax.f32 %v148_v6, 0.0  ;;  %v2569_v6 = vld [vmem:[%s3654_s3 + $0x8c] ss:$16 sps:$4 sm:$0xff]  }
  0x4f   :  { %1810 = vmatpush1.bf16.msra.mxu0 %v2471_v15  ;;  %v169_v15 = vmax.f32 %v153_v7, 0.0  ;;  %v3164_v23 = vpack.c.bf16 %v172_v52, %v164_v14  ;;  %v2570_v7 = vld [vmem:[%s3654_s3 + $0x288] ss:$16 sps:$4 sm:$0xff]  }
  0x50   :  { %1853 = vmatpush1.bf16.msra.mxu1 %v2474_v16  ;;  %1811 = vmatprep.subr.bf16.mxu0 %v2479_v17  ;;  %v147_v16 = vadd.f32 %v3002_v53, %v89_v61  ;;  %v2509_v17 = vld [vmem:[%s3654_s3 + $0x5c4] ss:$16 sps:$4 sm:$0xff]   ;;  %v2557_v61 = vld [vmem:[%s3654_s3 + $0xcc] ss:$16 sps:$4 sm:$0xff]   ;;  %v2579_v14 = vld [vmem:[%s3654_s3 + $0x48] ss:$16 sps:$4 sm:$0xff]  }
  0x51   :  { %1854 = vmatprep.subr.bf16.mxu1 %v2482_v18  ;;  %v155_v18 = vadd.f32 %v3002_v53, %v97_v11  ;;  %v2510_v53 = vld [vmem:[%s3654_s3 + $0x7c0] ss:$16 sps:$4 sm:$0xff]   ;;  %1878 = vmatprep.mubr.bf16.mxu1 %v3164_v23  ;;  %v2576_v11 = vld [vmem:[%s3654_s3 + $0x268] ss:$16 sps:$4 sm:$0xff]  }
  0x52   :  { %v2588_v52 = vld [vmem:[%s3654_s3 + $0x228] ss:$16 sps:$4 sm:$0xff]  }
  0x53   :  { %1812 = vmatpush1.bf16.msra.mxu0 %v2477_v19  ;;  %v2512_v19 = vld [vmem:[%s3654_s3 + $0x7c4] ss:$16 sps:$4 sm:$0xff]  }
  0x54   :  { %1855 = vmatpush1.bf16.msra.mxu1 %v2480_v20  ;;  %1813 = vmatprep.subr.bf16.mxu0 %v2485_v21  ;;  %v3160_v20 = vpack.c.bf16 %v170_v13, %v162_v8  ;;  %v3162_v21 = vpack.c.bf16 %v169_v15, %v161_v10  ;;  %v2575_v8 = vld [vmem:[%s3654_s3 + $0x6c] ss:$16 sps:$4 sm:$0xff]   ;;  %v2573_v10 = vld [vmem:[%s3654_s3 + $0x68] ss:$16 sps:$4 sm:$0xff]  }
  0x55   :  { %1856 = vmatprep.subr.bf16.mxu1 %v2488_v22  ;;  %v163_v22 = vmax.f32 %v147_v16, 0.0  ;;  %v2584_v13 = vld [vmem:[%s3654_s3 + $0x24c] ss:$16 sps:$4 sm:$0xff]   ;;  %v2582_v15 = vld [vmem:[%s3654_s3 + $0x248] ss:$16 sps:$4 sm:$0xff]  }
  0x56   :  { %1835 = vmatprep.mubr.bf16.mxu0 %v3160_v20  ;;  %v2587_v16 = vld [vmem:[%s3654_s3 + $0x2c] ss:$16 sps:$4 sm:$0xff]  }
  0x57   :  { %1814 = vmatpush1.bf16.msra.mxu0 %v2483_v24  ;;  %v171_v24 = vmax.f32 %v155_v18, 0.0  ;;  %v2593_v18 = vld [vmem:[%s3654_s3 + $0xc] ss:$16 sps:$4 sm:$0xff]  }
  0x58   :  { %1857 = vmatpush1.bf16.msra.mxu1 %v2486_v26  ;;  %1815 = vmatprep.subr.bf16.mxu0 %v2491_v27  ;;  %v2515_v26 = vld [vmem:[%s3654_s3 + $0x5a4] ss:$16 sps:$4 sm:$0xff]  }
  0x59   :  { %1858 = vmatprep.subr.bf16.mxu1 %v2494_v28  ;;  %v3176_v27 = vpack.c.bf16 %v171_v24, %v163_v22  ;;  %v2518_v28 = vld [vmem:[%s3654_s3 + $0x7a4] ss:$16 sps:$4 sm:$0xff]   ;;  %v2591_v22 = vld [vmem:[%s3654_s3 + $0x8] ss:$16 sps:$4 sm:$0xff]  }
  0x5a   :  { %v2594_v24 = vld [vmem:[%s3654_s3 + $0x208] ss:$16 sps:$4 sm:$0xff]  }
  0x5b   :  { %1816 = vmatpush1.bf16.msra.mxu0 %v2489_v42  ;;  %v2513_v42 = vld [vmem:[%s3654_s3 + $0x5a0] ss:$16 sps:$4 sm:$0xff]  }
  0x5c   :  { %1859 = vmatpush1.bf16.msra.mxu1 %v2492_v30  ;;  %1817 = vmatprep.subr.bf16.mxu0 %v2497_v31  ;;  %v2521_v30 = vld [vmem:[%s3654_s3 + $0x584] ss:$16 sps:$4 sm:$0xff]  }
  0x5d   :  { %1860 = vmatprep.subr.bf16.mxu1 %v2500_v41  ;;  %v2524_v31 = vld [vmem:[%s3654_s3 + $0x784] ss:$16 sps:$4 sm:$0xff]   ;;  %v2534_v41 = vld [vmem:[%s3654_s3 + $0x740] ss:$16 sps:$4 sm:$0xff]  }
  0x5f   :  { %1818 = vmatpush1.bf16.msra.mxu0 %v2495_v58  ;;  %v2551_v58 = vld [vmem:[%s3654_s3 + $0xec] ss:$16 sps:$4 sm:$0xff]  }
  0x60   :  { %1861 = vmatpush1.bf16.msra.mxu1 %v2498_v62  ;;  %1819 = vmatprep.subr.bf16.mxu0 %v2503_v63  ;;  %v2560_v62 = vld [vmem:[%s3654_s3 + $0x2cc] ss:$16 sps:$4 sm:$0xff]   ;;  %v2555_v63 = vld [vmem:[%s3654_s3 + $0xc8] ss:$16 sps:$4 sm:$0xff]  }
  0x61   :  { %1862 = vmatprep.subr.bf16.mxu1 %v2506_v48  ;;  %v2561_v48 = vld [vmem:[%s3654_s3 + $0xa8] ss:$16 sps:$4 sm:$0xff]  }
  0x63   :  { %1820 = vmatpush2.bf16.msra.mxu0 %v2501_v12  ;;  %v2581_v12 = vld [vmem:[%s3654_s3 + $0x4c] ss:$16 sps:$4 sm:$0xff]  }
  0x64   :  { %1863 = vmatpush2.bf16.msra.mxu1 %v2504_v51  ;;  %1821 = vmatprep.subr.bf16.mxu0 %v2509_v17  ;;  %v2590_v51 = vld [vmem:[%s3654_s3 + $0x22c] ss:$16 sps:$4 sm:$0xff]   ;;  %v2585_v17 = vld [vmem:[%s3654_s3 + $0x28] ss:$16 sps:$4 sm:$0xff]  }
  0x65   :  { %1864 = vmatprep.subr.bf16.mxu1 %v2512_v19  ;;  %v2596_v19 = vld [vmem:[%s3654_s3 + $0x20c] ss:$16 sps:$4 sm:$0xff]  }
  0x67   :  { %1822 = vmatpush2.bf16.msra.mxu0 %v2507_v25  ;;  %v2599_v25 = vld [vmem:[%s3654_s3 + $0x1ec] ss:$16 sps:$4 sm:$0xff]  }
  0x68   :  { %1865 = vmatpush2.bf16.msra.mxu1 %v2510_v53  ;;  %1823 = vmatprep.subr.bf16.mxu0 %v2515_v26  ;;  %v2602_v53 = vld [vmem:[%s3654_s3 + $0x3ec] ss:$16 sps:$4 sm:$0xff]   ;;  %v2597_v26 = vld [vmem:[%s3654_s3 + $0x1e8] ss:$16 sps:$4 sm:$0xff]  }
  0x69   :  { %1866 = vmatprep.subr.bf16.mxu1 %v2518_v28  ;;  %v2600_v28 = vld [vmem:[%s3654_s3 + $0x3e8] ss:$16 sps:$4 sm:$0xff]  }
  0x6b   :  { %1824 = vmatpush2.bf16.msra.mxu0 %v2513_v42  ;;  %v2605_v42 = vld [vmem:[%s3654_s3 + $0x1cc] ss:$16 sps:$4 sm:$0xff]  }
  0x6c   :  { %1867 = vmatpush2.bf16.msra.mxu1 %v2516_v29  ;;  %1825 = vmatprep.subr.bf16.mxu0 %v2521_v30  ;;  %v2608_v29 = vld [vmem:[%s3654_s3 + $0x3cc] ss:$16 sps:$4 sm:$0xff]   ;;  %v2603_v30 = vld [vmem:[%s3654_s3 + $0x1c8] ss:$16 sps:$4 sm:$0xff]  }
  0x6d   :  { %1868 = vmatprep.subr.bf16.mxu1 %v2524_v31  ;;  %v2606_v31 = vld [vmem:[%s3654_s3 + $0x3c8] ss:$16 sps:$4 sm:$0xff]  }
  0x6f   :  { %1826 = vmatpush2.bf16.msra.mxu0 %v2519_v32  ;;  %v2611_v32 = vld [vmem:[%s3654_s3 + $0x1ac] ss:$16 sps:$4 sm:$0xff]  }
  0x70   :  { %1869 = vmatpush2.bf16.msra.mxu1 %v2522_v33  ;;  %1827 = vmatprep.subr.bf16.mxu0 %v2527_v34  ;;  %v2614_v33 = vld [vmem:[%s3654_s3 + $0x3ac] ss:$16 sps:$4 sm:$0xff]   ;;  %v2609_v34 = vld [vmem:[%s3654_s3 + $0x1a8] ss:$16 sps:$4 sm:$0xff]  }
  0x71   :  { %1870 = vmatprep.subr.bf16.mxu1 %v2530_v35  ;;  %v2612_v35 = vld [vmem:[%s3654_s3 + $0x3a8] ss:$16 sps:$4 sm:$0xff]  }
  0x73   :  { %1828 = vmatpush2.bf16.msra.mxu0 %v2525_v37  ;;  %v2617_v37 = vld [vmem:[%s3654_s3 + $0x18c] ss:$16 sps:$4 sm:$0xff]  }
  0x74   :  { %1871 = vmatpush2.bf16.msra.mxu1 %v2528_v38  ;;  %1829 = vmatprep.subr.bf16.mxu0 %v2533_v39  ;;  %v2620_v38 = vld [vmem:[%s3654_s3 + $0x38c] ss:$16 sps:$4 sm:$0xff]   ;;  %v2615_v39 = vld [vmem:[%s3654_s3 + $0x188] ss:$16 sps:$4 sm:$0xff]  }
  0x75   :  { %1872 = vmatprep.subr.bf16.mxu1 %v2536_v40  ;;  %v2618_v40 = vld [vmem:[%s3654_s3 + $0x388] ss:$16 sps:$4 sm:$0xff]  }
  0x77   :  { %1830 = vmatpush2.bf16.msra.mxu0 %v2531_v55  ;;  %v2623_v55 = vld [vmem:[%s3654_s3 + $0x16c] ss:$16 sps:$4 sm:$0xff]  }
  0x78   :  { %1873 = vmatpush2.bf16.msra.mxu1 %v2534_v41  ;;  %1831 = vmatprep.subr.bf16.mxu0 %v2539_v43  ;;  %v2626_v41 = vld [vmem:[%s3654_s3 + $0x36c] ss:$16 sps:$4 sm:$0xff]   ;;  %v2621_v43 = vld [vmem:[%s3654_s3 + $0x168] ss:$16 sps:$4 sm:$0xff]  }
  0x79   :  { %1874 = vmatprep.subr.bf16.mxu1 %v2542_v44  ;;  %v2624_v44 = vld [vmem:[%s3654_s3 + $0x368] ss:$16 sps:$4 sm:$0xff]  }
  0x7b   :  { %1832 = vmatpush2.bf16.msra.mxu0 %v2537_v46  ;;  %v2629_v46 = vld [vmem:[%s3654_s3 + $0x14c] ss:$16 sps:$4 sm:$0xff]  }
  0x7c   :  { %1875 = vmatpush2.bf16.msra.mxu1 %v2540_v47  ;;  %1833 = vmatprep.subr.bf16.mxu0 %v2545_v49  ;;  %v2632_v47 = vld [vmem:[%s3654_s3 + $0x34c] ss:$16 sps:$4 sm:$0xff]   ;;  %v2627_v49 = vld [vmem:[%s3654_s3 + $0x148] ss:$16 sps:$4 sm:$0xff]  }
  0x7d   :  { %1876 = vmatprep.subr.bf16.mxu1 %v2548_v50  ;;  %v2630_v50 = vld [vmem:[%s3654_s3 + $0x348] ss:$16 sps:$4 sm:$0xff]  }
  0x7f   :  { %1834 = vmatpush2.bf16.msra.mxu0 %v2543_v54  ;;  %v2635_v54 = vld [vmem:[%s3654_s3 + $0x12c] ss:$16 sps:$4 sm:$0xff]  }
  0x80   :  { %1877 = vmatpush2.bf16.msra.mxu1 %v2546_v57  ;;  %1889 = vmatprep.subr.bf16.mxu0 %v2551_v58  ;;  %v2638_v57 = vld [vmem:[%s3654_s3 + $0x32c] ss:$16 sps:$4 sm:$0xff]   ;;  %v2633_v58 = vld [vmem:[%s3654_s3 + $0x128] ss:$16 sps:$4 sm:$0xff]  }
  0x81   :  { %1932 = vmatprep.subr.bf16.mxu1 %v2554_v56  ;;  %v2636_v56 = vld [vmem:[%s3654_s3 + $0x328] ss:$16 sps:$4 sm:$0xff]  }
  0x82   :  { %1836 = vmatmul.mubr.bf16.vlgmr.msra.gmra.mxu0 %v3162_v21 }
  0x83   :  { %1879 = vmatmul.mubr.bf16.vlgmr.msra.gmra.mxu1 %v3176_v27  ;;  %1890 = vmatpush1.bf16.msra.mxu0 %v2549_v59  ;;  %v2641_v59 = vld [vmem:[%s3654_s3 + $0x10c] ss:$16 sps:$4 sm:$0xff]  }
  0x84   :  { %1933 = vmatpush1.bf16.msra.mxu1 %v2552_v60  ;;  %1891 = vmatprep.subr.bf16.mxu0 %v2557_v61  ;;  %v2644_v60 = vld [vmem:[%s3654_s3 + $0x30c] ss:$16 sps:$4 sm:$0xff]   ;;  %v2639_v61 = vld [vmem:[%s3654_s3 + $0x108] ss:$16 sps:$4 sm:$0xff]  }
  0x85   :  { %1934 = vmatprep.subr.bf16.mxu1 %v2560_v62  ;;  %1921 = vmatprep.mubr.bf16.mxu0 %v2972_v36  ;;  %v2572_v36 = vld [vmem:[%s3654_s3 + $0x28c] ss:$16 sps:$4 sm:$0xff]   ;;  %v2642_v62 = vld [vmem:[%s3654_s3 + $0x308] ss:$16 sps:$4 sm:$0xff]  }
  0x86   :  { %1964 = vmatprep.mubr.bf16.mxu1 %v2984_v45  ;;  %v2567_v45 = vld [vmem:[%s3654_s3 + $0x88] ss:$16 sps:$4 sm:$0xff]  }
  0x87   :  { %1892 = vmatpush1.bf16.msra.mxu0 %v2555_v63  ;;  %v2647_v63 = vld [vmem:[%s3654_s3 + $0x4ec] ss:$16 sps:$4 sm:$0xff]  }
  0x88   :  { %1935 = vmatpush1.bf16.msra.mxu1 %v2558_v0  ;;  %1893 = vmatprep.subr.bf16.mxu0 %v2563_v3  ;;  %v2650_v0 = vld [vmem:[%s3654_s3 + $0x6ec] ss:$16 sps:$4 sm:$0xff]   ;;  %v2645_v3 = vld [vmem:[%s3654_s3 + $0x4e8] ss:$16 sps:$4 sm:$0xff]  }
  0x89   :  { %1936 = vmatprep.subr.bf16.mxu1 %v2566_v4  ;;  %v2648_v4 = vld [vmem:[%s3654_s3 + $0x6e8] ss:$16 sps:$4 sm:$0xff]  }
  0x8b   :  { %1894 = vmatpush1.bf16.msra.mxu0 %v2561_v48  ;;  %v2653_v48 = vld [vmem:[%s3654_s3 + $0x4cc] ss:$16 sps:$4 sm:$0xff]  }
  0x8c   :  { %1937 = vmatpush1.bf16.msra.mxu1 %v2564_v5  ;;  %1895 = vmatprep.subr.bf16.mxu0 %v2569_v6  ;;  %v2656_v5 = vld [vmem:[%s3654_s3 + $0x6cc] ss:$16 sps:$4 sm:$0xff]   ;;  %v2651_v6 = vld [vmem:[%s3654_s3 + $0x4c8] ss:$16 sps:$4 sm:$0xff]  }
  0x8d   :  { %1938 = vmatprep.subr.bf16.mxu1 %v2572_v36  ;;  %v2654_v36 = vld [vmem:[%s3654_s3 + $0x6c8] ss:$16 sps:$4 sm:$0xff]  }
  0x8f   :  { %1896 = vmatpush1.bf16.msra.mxu0 %v2567_v45  ;;  %v2659_v45 = vld [vmem:[%s3654_s3 + $0x4ac] ss:$16 sps:$4 sm:$0xff]  }
  0x90   :  { %1939 = vmatpush1.bf16.msra.mxu1 %v2570_v7  ;;  %1897 = vmatprep.subr.bf16.mxu0 %v2575_v8  ;;  %v2660_v7 = vld [vmem:[%s3654_s3 + $0x6a8] ss:$16 sps:$4 sm:$0xff]   ;;  %v2665_v8 = vld [vmem:[%s3654_s3 + $0x48c] ss:$16 sps:$4 sm:$0xff]  }
  0x91   :  { %1940 = vmatprep.subr.bf16.mxu1 %v2578_v9  ;;  %v2666_v9 = vld [vmem:[%s3654_s3 + $0x688] ss:$16 sps:$4 sm:$0xff]  }
  0x93   :  { %1898 = vmatpush1.bf16.msra.mxu0 %v2573_v10  ;;  %v2671_v10 = vld [vmem:[%s3654_s3 + $0x46c] ss:$16 sps:$4 sm:$0xff]  }
  0x94   :  { %1941 = vmatpush1.bf16.msra.mxu1 %v2576_v11  ;;  %1899 = vmatprep.subr.bf16.mxu0 %v2581_v12  ;;  %v2674_v11 = vld [vmem:[%s3654_s3 + $0x66c] ss:$16 sps:$4 sm:$0xff]   ;;  %v2669_v12 = vld [vmem:[%s3654_s3 + $0x468] ss:$16 sps:$4 sm:$0xff]  }
  0x95   :  { %1942 = vmatprep.subr.bf16.mxu1 %v2584_v13  ;;  %v2672_v13 = vld [vmem:[%s3654_s3 + $0x668] ss:$16 sps:$4 sm:$0xff]  }
  0x97   :  { %1900 = vmatpush1.bf16.msra.mxu0 %v2579_v14  ;;  %v2677_v14 = vld [vmem:[%s3654_s3 + $0x44c] ss:$16 sps:$4 sm:$0xff]  }
  0x98   :  { %1943 = vmatpush1.bf16.msra.mxu1 %v2582_v15  ;;  %1901 = vmatprep.subr.bf16.mxu0 %v2587_v16  ;;  %v2680_v15 = vld [vmem:[%s3654_s3 + $0x64c] ss:$16 sps:$4 sm:$0xff]   ;;  %v2675_v16 = vld [vmem:[%s3654_s3 + $0x448] ss:$16 sps:$4 sm:$0xff]  }
  0x99   :  { %1944 = vmatprep.subr.bf16.mxu1 %v2590_v51  ;;  %v2678_v51 = vld [vmem:[%s3654_s3 + $0x648] ss:$16 sps:$4 sm:$0xff]  }
  0x9b   :  { %1902 = vmatpush1.bf16.msra.mxu0 %v2585_v17  ;;  %v2683_v17 = vld [vmem:[%s3654_s3 + $0x42c] ss:$16 sps:$4 sm:$0xff]  }
  0x9c   :  { %1945 = vmatpush1.bf16.msra.mxu1 %v2588_v52  ;;  %1903 = vmatprep.subr.bf16.mxu0 %v2593_v18  ;;  %v2686_v52 = vld [vmem:[%s3654_s3 + $0x62c] ss:$16 sps:$4 sm:$0xff]   ;;  %v2681_v18 = vld [vmem:[%s3654_s3 + $0x428] ss:$16 sps:$4 sm:$0xff]  }
  0x9d   :  { %1946 = vmatprep.subr.bf16.mxu1 %v2596_v19  ;;  %v2684_v19 = vld [vmem:[%s3654_s3 + $0x628] ss:$16 sps:$4 sm:$0xff]  }
  0x9f   :  { %1904 = vmatpush1.bf16.msra.mxu0 %v2591_v22  ;;  %v2689_v22 = vld [vmem:[%s3654_s3 + $0x40c] ss:$16 sps:$4 sm:$0xff]  }
  0xa0   :  { %1947 = vmatpush1.bf16.msra.mxu1 %v2594_v24  ;;  %1905 = vmatprep.subr.bf16.mxu0 %v2599_v25  ;;  %v2692_v24 = vld [vmem:[%s3654_s3 + $0x60c] ss:$16 sps:$4 sm:$0xff]   ;;  %v2687_v25 = vld [vmem:[%s3654_s3 + $0x408] ss:$16 sps:$4 sm:$0xff]  }
  0xa1   :  { %1948 = vmatprep.subr.bf16.mxu1 %v2602_v53  ;;  %v2690_v53 = vld [vmem:[%s3654_s3 + $0x608] ss:$16 sps:$4 sm:$0xff]  }
  0xa3   :  { %1906 = vmatpush2.bf16.msra.mxu0 %v2597_v26  ;;  %v2695_v26 = vld [vmem:[%s3654_s3 + $0x5ec] ss:$16 sps:$4 sm:$0xff]  }
  0xa4   :  { %1949 = vmatpush2.bf16.msra.mxu1 %v2600_v28  ;;  %1907 = vmatprep.subr.bf16.mxu0 %v2605_v42  ;;  %v2698_v28 = vld [vmem:[%s3654_s3 + $0x7ec] ss:$16 sps:$4 sm:$0xff]   ;;  %v2693_v42 = vld [vmem:[%s3654_s3 + $0x5e8] ss:$16 sps:$4 sm:$0xff]  }
  0xa5   :  { %1950 = vmatprep.subr.bf16.mxu1 %v2608_v29  ;;  %v2696_v29 = vld [vmem:[%s3654_s3 + $0x7e8] ss:$16 sps:$4 sm:$0xff]  }
  0xa7   :  { %1908 = vmatpush2.bf16.msra.mxu0 %v2603_v30  ;;  %v2701_v30 = vld [vmem:[%s3654_s3 + $0x5cc] ss:$16 sps:$4 sm:$0xff]  }
  0xa8   :  { %1951 = vmatpush2.bf16.msra.mxu1 %v2606_v31  ;;  %1909 = vmatprep.subr.bf16.mxu0 %v2611_v32  ;;  %v2704_v31 = vld [vmem:[%s3654_s3 + $0x7cc] ss:$16 sps:$4 sm:$0xff]   ;;  %v2699_v32 = vld [vmem:[%s3654_s3 + $0x5c8] ss:$16 sps:$4 sm:$0xff]  }
  0xa9   :  { %1952 = vmatprep.subr.bf16.mxu1 %v2614_v33  ;;  %v2702_v33 = vld [vmem:[%s3654_s3 + $0x7c8] ss:$16 sps:$4 sm:$0xff]  }
  0xab   :  { %1910 = vmatpush2.bf16.msra.mxu0 %v2609_v34  ;;  %v2707_v34 = vld [vmem:[%s3654_s3 + $0x5ac] ss:$16 sps:$4 sm:$0xff]  }
  0xac   :  { %1953 = vmatpush2.bf16.msra.mxu1 %v2612_v35  ;;  %1911 = vmatprep.subr.bf16.mxu0 %v2617_v37  ;;  %v2710_v35 = vld [vmem:[%s3654_s3 + $0x7ac] ss:$16 sps:$4 sm:$0xff]   ;;  %v2705_v37 = vld [vmem:[%s3654_s3 + $0x5a8] ss:$16 sps:$4 sm:$0xff]  }
  0xad   :  { %1954 = vmatprep.subr.bf16.mxu1 %v2620_v38  ;;  %v2708_v38 = vld [vmem:[%s3654_s3 + $0x7a8] ss:$16 sps:$4 sm:$0xff]  }
  0xaf   :  { %1912 = vmatpush2.bf16.msra.mxu0 %v2615_v39  ;;  %v2713_v39 = vld [vmem:[%s3654_s3 + $0x58c] ss:$16 sps:$4 sm:$0xff]  }
  0xb0   :  { %1955 = vmatpush2.bf16.msra.mxu1 %v2618_v40  ;;  %1913 = vmatprep.subr.bf16.mxu0 %v2623_v55  ;;  %v2716_v40 = vld [vmem:[%s3654_s3 + $0x78c] ss:$16 sps:$4 sm:$0xff]   ;;  %v2711_v55 = vld [vmem:[%s3654_s3 + $0x588] ss:$16 sps:$4 sm:$0xff]  }
  0xb1   :  { %1956 = vmatprep.subr.bf16.mxu1 %v2626_v41  ;;  %v2714_v41 = vld [vmem:[%s3654_s3 + $0x788] ss:$16 sps:$4 sm:$0xff]  }
  0xb3   :  { %1914 = vmatpush2.bf16.msra.mxu0 %v2621_v43  ;;  %v2719_v43 = vld [vmem:[%s3654_s3 + $0x56c] ss:$16 sps:$4 sm:$0xff]  }
  0xb4   :  { %1957 = vmatpush2.bf16.msra.mxu1 %v2624_v44  ;;  %1915 = vmatprep.subr.bf16.mxu0 %v2629_v46  ;;  %v2722_v44 = vld [vmem:[%s3654_s3 + $0x76c] ss:$16 sps:$4 sm:$0xff]   ;;  %v2717_v46 = vld [vmem:[%s3654_s3 + $0x568] ss:$16 sps:$4 sm:$0xff]  }
  0xb5   :  { %1958 = vmatprep.subr.bf16.mxu1 %v2632_v47  ;;  %v2720_v47 = vld [vmem:[%s3654_s3 + $0x768] ss:$16 sps:$4 sm:$0xff]  }
  0xb7   :  { %1916 = vmatpush2.bf16.msra.mxu0 %v2627_v49  ;;  %v2725_v49 = vld [vmem:[%s3654_s3 + $0x54c] ss:$16 sps:$4 sm:$0xff]  }
  0xb8   :  { %1959 = vmatpush2.bf16.msra.mxu1 %v2630_v50  ;;  %1917 = vmatprep.subr.bf16.mxu0 %v2635_v54  ;;  %v2728_v50 = vld [vmem:[%s3654_s3 + $0x74c] ss:$16 sps:$4 sm:$0xff]   ;;  %v2723_v54 = vld [vmem:[%s3654_s3 + $0x548] ss:$16 sps:$4 sm:$0xff]  }
  0xb9   :  { %1960 = vmatprep.subr.bf16.mxu1 %v2638_v57  ;;  %v2726_v57 = vld [vmem:[%s3654_s3 + $0x748] ss:$16 sps:$4 sm:$0xff]  }
  0xbb   :  { %1918 = vmatpush2.bf16.msra.mxu0 %v2633_v58  ;;  %v2731_v58 = vld [vmem:[%s3654_s3 + $0x52c] ss:$16 sps:$4 sm:$0xff]  }
  0xbc   :  { %1961 = vmatpush2.bf16.msra.mxu1 %v2636_v56  ;;  %1919 = vmatprep.subr.bf16.mxu0 %v2641_v59  ;;  %v2734_v56 = vld [vmem:[%s3654_s3 + $0x72c] ss:$16 sps:$4 sm:$0xff]   ;;  %v2729_v59 = vld [vmem:[%s3654_s3 + $0x528] ss:$16 sps:$4 sm:$0xff]  }
  0xbd   :  { %1962 = vmatprep.subr.bf16.mxu1 %v2644_v60  ;;  %v2732_v60 = vld [vmem:[%s3654_s3 + $0x728] ss:$16 sps:$4 sm:$0xff]  }
  0xbf   :  { %1920 = vmatpush2.bf16.msra.mxu0 %v2639_v61  ;;  %v2737_v61 = vld [vmem:[%s3654_s3 + $0x50c] ss:$16 sps:$4 sm:$0xff]  }
  0xc0   :  { %1963 = vmatpush2.bf16.msra.mxu1 %v2642_v62  ;;  %1975 = vmatprep.subr.bf16.mxu0 %v2647_v63  ;;  %v2740_v62 = vld [vmem:[%s3654_s3 + $0x70c] ss:$16 sps:$4 sm:$0xff]   ;;  %v2735_v63 = vld [vmem:[%s3654_s3 + $0x508] ss:$16 sps:$4 sm:$0xff]  }
  0xc1   :  { %2018 = vmatprep.subr.bf16.mxu1 %v2650_v0  ;;  %v2738_v0 = vld [vmem:[%s3654_s3 + $0x708] ss:$16 sps:$4 sm:$0xff]  }
  0xc2   :  { %1922 = vmatmul.mubr.bf16.vlgmr.msra.gmra.mxu0 %v3020_v1  ;;  %v2662_v1 = vld [vmem:[%s3654_s3 + $0x6ac] ss:$16 sps:$4 sm:$0xff]  }
  0xc3   :  { %1965 = vmatmul.mubr.bf16.vlgmr.msra.gmra.mxu1 %v3022_v2  ;;  %1976 = vmatpush1.bf16.msra.mxu0 %v2645_v3  ;;  %v2657_v2 = vld [vmem:[%s3654_s3 + $0x4a8] ss:$16 sps:$4 sm:$0xff]  }
  0xc4   :  { %2019 = vmatpush1.bf16.msra.mxu1 %v2648_v4  ;;  %1977 = vmatprep.subr.bf16.mxu0 %v2653_v48 }
  0xc5   :  { %2020 = vmatprep.subr.bf16.mxu1 %v2656_v5  ;;  %2007 = vmatprep.mubr.bf16.mxu0 %v3160_v20  ;;  %v2668_v20 = vld [vmem:[%s3654_s3 + $0x68c] ss:$16 sps:$4 sm:$0xff]  }
  0xc6   :  { %2050 = vmatprep.mubr.bf16.mxu1 %v3164_v23  ;;  %v2663_v23 = vld [vmem:[%s3654_s3 + $0x488] ss:$16 sps:$4 sm:$0xff]  }
  0xc7   :  { %1978 = vmatpush1.bf16.msra.mxu0 %v2651_v6 }
  0xc8   :  { %2021 = vmatpush1.bf16.msra.mxu1 %v2654_v36  ;;  %1979 = vmatprep.subr.bf16.mxu0 %v2659_v45 }
  0xc9   :  { %2022 = vmatprep.subr.bf16.mxu1 %v2662_v1 }
  0xcb   :  { %1980 = vmatpush1.bf16.msra.mxu0 %v2657_v2 }
  0xcc   :  { %2023 = vmatpush1.bf16.msra.mxu1 %v2660_v7  ;;  %1981 = vmatprep.subr.bf16.mxu0 %v2665_v8 }
  0xcd   :  { %2024 = vmatprep.subr.bf16.mxu1 %v2668_v20 }
  0xcf   :  { %1982 = vmatpush1.bf16.msra.mxu0 %v2663_v23 }
  0xd0   :  { %2025 = vmatpush1.bf16.msra.mxu1 %v2666_v9  ;;  %1983 = vmatprep.subr.bf16.mxu0 %v2671_v10 }
  0xd1   :  { %2026 = vmatprep.subr.bf16.mxu1 %v2674_v11 }
  0xd3   :  { %1984 = vmatpush1.bf16.msra.mxu0 %v2669_v12 }
  0xd4   :  { %2027 = vmatpush1.bf16.msra.mxu1 %v2672_v13  ;;  %1985 = vmatprep.subr.bf16.mxu0 %v2677_v14 }
  0xd5   :  { %2028 = vmatprep.subr.bf16.mxu1 %v2680_v15 }
  0xd7   :  { %1986 = vmatpush1.bf16.msra.mxu0 %v2675_v16 }
  0xd8   :  { %2029 = vmatpush1.bf16.msra.mxu1 %v2678_v51  ;;  %1987 = vmatprep.subr.bf16.mxu0 %v2683_v17 }
  0xd9   :  { %2030 = vmatprep.subr.bf16.mxu1 %v2686_v52 }
  0xdb   :  { %1988 = vmatpush1.bf16.msra.mxu0 %v2681_v18 }
  0xdc   :  { %2031 = vmatpush1.bf16.msra.mxu1 %v2684_v19  ;;  %1989 = vmatprep.subr.bf16.mxu0 %v2689_v22 }
  0xdd   :  { %2032 = vmatprep.subr.bf16.mxu1 %v2692_v24 }
  0xdf   :  { %1990 = vmatpush1.bf16.msra.mxu0 %v2687_v25 }
  0xe0   :  { %2033 = vmatpush1.bf16.msra.mxu1 %v2690_v53  ;;  %1991 = vmatprep.subr.bf16.mxu0 %v2695_v26 }
  0xe1   :  { %2034 = vmatprep.subr.bf16.mxu1 %v2698_v28 }
  0xe3   :  { %1992 = vmatpush2.bf16.msra.mxu0 %v2693_v42 }
  0xe4   :  { %2035 = vmatpush2.bf16.msra.mxu1 %v2696_v29  ;;  %1993 = vmatprep.subr.bf16.mxu0 %v2701_v30 }
  0xe5   :  { %2036 = vmatprep.subr.bf16.mxu1 %v2704_v31 }
  0xe7   :  { %1994 = vmatpush2.bf16.msra.mxu0 %v2699_v32 }
  0xe8   :  { %2037 = vmatpush2.bf16.msra.mxu1 %v2702_v33  ;;  %1995 = vmatprep.subr.bf16.mxu0 %v2707_v34 }
  0xe9   :  { %2038 = vmatprep.subr.bf16.mxu1 %v2710_v35 }
  0xeb   :  { %1996 = vmatpush2.bf16.msra.mxu0 %v2705_v37 }
  0xec   :  { %2039 = vmatpush2.bf16.msra.mxu1 %v2708_v38  ;;  %1997 = vmatprep.subr.bf16.mxu0 %v2713_v39 }
  0xed   :  { %2040 = vmatprep.subr.bf16.mxu1 %v2716_v40 }
  0xef   :  { %1998 = vmatpush2.bf16.msra.mxu0 %v2711_v55 }
  0xf0   :  { %2041 = vmatpush2.bf16.msra.mxu1 %v2714_v41  ;;  %1999 = vmatprep.subr.bf16.mxu0 %v2719_v43 }
  0xf1   :  { %2042 = vmatprep.subr.bf16.mxu1 %v2722_v44 }
  0xf3   :  { %2000 = vmatpush2.bf16.msra.mxu0 %v2717_v46 }
  0xf4   :  { %2043 = vmatpush2.bf16.msra.mxu1 %v2720_v47  ;;  %2001 = vmatprep.subr.bf16.mxu0 %v2725_v49 }
  0xf5   :  { %2044 = vmatprep.subr.bf16.mxu1 %v2728_v50 }
  0xf7   :  { %2002 = vmatpush2.bf16.msra.mxu0 %v2723_v54 }
  0xf8   :  { %2045 = vmatpush2.bf16.msra.mxu1 %v2726_v57  ;;  %2003 = vmatprep.subr.bf16.mxu0 %v2731_v58 }
  0xf9   :  { %2046 = vmatprep.subr.bf16.mxu1 %v2734_v56 }
  0xfb   :  { %2004 = vmatpush2.bf16.msra.mxu0 %v2729_v59 }
  0xfc   :  { %2047 = vmatpush2.bf16.msra.mxu1 %v2732_v60  ;;  %2005 = vmatprep.subr.bf16.mxu0 %v2737_v61 }
  0xfd   :  { %2048 = vmatprep.subr.bf16.mxu1 %v2740_v62 }
  0xff   :  { %2006 = vmatpush2.bf16.msra.mxu0 %v2735_v63 }
 0x100   :  { %2049 = vmatpush2.bf16.msra.mxu1 %v2738_v0 }
 0x102   :  { %2008 = vmatmul.mubr.bf16.vlgmr.msra.gmra.mxu0 %v3162_v21  ;;  %v1751_v3 = vpop.f32.mrf.mxu0 }
 0x103   :  { %2051 = vmatmul.mubr.bf16.vlgmr.msra.gmra.mxu1 %v3176_v27  ;;  %v1794_v4 = vpop.f32.mrf.mxu1 }
 0x104   :  { %v1753_v48 = vpop.f32.mrf.mxu0  ;;  %v1795_v2 = vadd.f32 %v1794_v4, %v1751_v3 }
 0x105   :  { %v1796_v5 = vpop.f32.mrf.mxu1 }
 0x106   :  { %v1755_v6 = vpop.f32.mrf.mxu0  ;;  %v1797_v20 = vadd.f32 %v1796_v5, %v1753_v48 }
 0x107   :  { %v1798_v36 = vpop.f32.mrf.mxu1 }
 0x108   :  { %v1757_v45 = vpop.f32.mrf.mxu0  ;;  %v1799_v11 = vadd.f32 %v1798_v36, %v1755_v6 }
 0x109   :  { %v1800_v1 = vpop.f32.mrf.mxu1 }
 0x10a   :  { %v1801_v27 = vadd.f32 %v1800_v1, %v1757_v45 }
 0x142   :  { %v1837_v7 = vpop.f32.mrf.mxu0 }
 0x143   :  { %v1880_v8 = vpop.f32.mrf.mxu1  ;;  %v1838_v23 = vadd.f32 %v1837_v7, %v1795_v2 }
 0x144   :  { %v1839_v9 = vpop.f32.mrf.mxu0 }
 0x145   :  { %v1882_v10 = vpop.f32.mrf.mxu1  ;;  %v1840_v12 = vadd.f32 %v1839_v9, %v1797_v20  ;;  %v1881_v14 = vadd.f32 %v1880_v8, %v1838_v23 }
 0x146   :  { %v1841_v21 = vpop.f32.mrf.mxu0 }
 0x147   :  { %v1884_v13 = vpop.f32.mrf.mxu1  ;;  %v1883_v15 = vadd.f32 %v1882_v10, %v1840_v12  ;;  %v1842_v16 = vadd.f32 %v1841_v21, %v1799_v11 }
 0x148   :  { %v1843_v51 = vpop.f32.mrf.mxu0 }
 0x149   :  { %v2353_v17 = vpack.c.bf16 %v1883_v15, %v1881_v14  ;;  %v1844_v52 = vadd.f32 %v1843_v51, %v1801_v27  ;;  %v1886_v18 = vpop.f32.mrf.mxu1  ;;  %v1885_v19 = vadd.f32 %v1884_v13, %v1842_v16 }
 0x14b   :  { %2085 = vst [vmem:[%s3658_s4] sm:$0xff] %v2353_v17  ;;  %v1887_v22 = vadd.f32 %v1886_v18, %v1844_v52 }
 0x14d   :  { %v2355_v24 = vpack.c.bf16 %v1887_v22, %v1885_v19 }
 0x14f   :  { %2087 = vst [vmem:[%s3658_s4 + $0x10] sm:$0xff] %v2355_v24 }
 0x182   :  { %v1923_v25 = vpop.f32.mrf.mxu0 }
 0x183   :  { %v1966_v53 = vpop.f32.mrf.mxu1 }
 0x184   :  { %v1925_v26 = vpop.f32.mrf.mxu0  ;;  %v1967_v32 = vadd.f32 %v1966_v53, %v1923_v25 }
 0x185   :  { %v1968_v28 = vpop.f32.mrf.mxu1 }
 0x186   :  { %v1927_v42 = vpop.f32.mrf.mxu0  ;;  %v1969_v35 = vadd.f32 %v1968_v28, %v1925_v26 }
 0x187   :  { %v1970_v29 = vpop.f32.mrf.mxu1 }
 0x188   :  { %v1929_v30 = vpop.f32.mrf.mxu0  ;;  %v1971_v40 = vadd.f32 %v1970_v29, %v1927_v42 }
 0x189   :  { %v1972_v31 = vpop.f32.mrf.mxu1 }
 0x18a   :  { %v1973_v44 = vadd.f32 %v1972_v31, %v1929_v30 }
 0x1c2   :  { %v2009_v33 = vpop.f32.mrf.mxu0 }
 0x1c3   :  { %v2052_v34 = vpop.f32.mrf.mxu1  ;;  %v2010_v37 = vadd.f32 %v2009_v33, %v1967_v32 }
 0x1c4   :  { %v2011_v38 = vpop.f32.mrf.mxu0 }
 0x1c5   :  { %v2054_v39 = vpop.f32.mrf.mxu1  ;;  %v2012_v55 = vadd.f32 %v2011_v38, %v1969_v35  ;;  %v2053_v46 = vadd.f32 %v2052_v34, %v2010_v37 }
 0x1c6   :  { %v2013_v41 = vpop.f32.mrf.mxu0 }
 0x1c7   :  { %v2056_v43 = vpop.f32.mrf.mxu1  ;;  %v2055_v47 = vadd.f32 %v2054_v39, %v2012_v55  ;;  %v2014_v49 = vadd.f32 %v2013_v41, %v1971_v40 }
 0x1c8   :  { %v2015_v50 = vpop.f32.mrf.mxu0 }
 0x1c9   :  { %v2354_v54 = vpack.c.bf16 %v2055_v47, %v2053_v46  ;;  %v2016_v57 = vadd.f32 %v2015_v50, %v1973_v44  ;;  %v2058_v58 = vpop.f32.mrf.mxu1  ;;  %v2057_v56 = vadd.f32 %v2056_v43, %v2014_v49 }
 0x1cb   :  { %2086 = vst [vmem:[%s3658_s4 + $0x8] sm:$0xff] %v2354_v54  ;;  %v2059_v59 = vadd.f32 %v2058_v58, %v2016_v57 }
 0x1cd   :  { %v2356_v60 = vpack.c.bf16 %v2059_v59, %v2057_v56 }
 0x1cf   :  { %2088 = vst [vmem:[%s3658_s4 + $0x18] sm:$0xff] %v2356_v60 }

// kernel: densenet121_forward.250
= control target key start
LH: loop header
LB: loop body
LE: loop exit
PB: predicated region body
PF: predicated region fallthrough
CT: control target
= control target key end

     0   :  { %s475_s12 = smov 0   ;;  %s477_s13 = smov 0   ;;  %s531_s0 = inlined_call_operand.vmem [shape: bf16[2,1,1024], index: 0, kind: input, shape index: {}]   ;;  %s532_s1 = inlined_call_operand.vmem [shape: f32[1,1,1024], index: 1, kind: input, shape index: {}]   ;;  %s533_s2 = inlined_call_operand.vmem [shape: f32[1,1,1024], index: 2, kind: input, shape index: {}]   ;;  %s534_s3 = inlined_call_operand.vmem [shape: f32[2,1024], index: 3, kind: output, shape index: {}]  }
   0x1   :  { %s479_s14 = smov 0  }
   0x2 LB: > { %s387_s15 = sadd.s32 4294967295, %s452_s14   ;;  %s492_s16 = sadd.s32 1, %s452_s14   ;;  %s452_s14 = sphi %s479_s14, %s537_s14   ;;  %s448_s13 = sphi %s477_s13, %s536_s13   ;;  %s444_s12 = sphi %s475_s12, %s535_s12  }
   0x3   : > { %s17_s17 = ssub.s32 %s452_s14, %s492_s16  ;;  %s20_s18 = sadd.s32 1, %s448_s13 }
   0x4   : > { %p18_p0 = scmp.eq.s32.totalorder %s17_s17, 0  ;;  %p27_p1 = scmp.ne.s32.totalorder %s448_s13, %s444_s12 }
   0x5   : > { %p28_p2 = scmp.eq.s32.totalorder %s452_s14, 0  ;;  %p390_p4 = scmp.ge.s32.totalorder %s452_s14, 2 }
   0x6   : > { %s501_s19 = scalar_select %p18_p0, %s448_s13, %s20_s18  }
   0x7   : > { %p29_p3 = por %p28_p2, %p27_p1  ;;  %131 = sbr.rel (%p390_p4) target bundleno = 17 (0x11), region = 16 }
   0xc   : > { %134 = sbr.rel (!%p29_p3) target bundleno = 17 (0x11), region = 20  ;;  %s136_s20 = sand.u32 (%p29_p3), 1, %s448_s13  }
   0xd   : > { %s392_s21 = sshll.u32 (%p29_p3), %s452_s14, 2  ;;  %s391_s22 = sshll.u32 (%p29_p3), %s136_s20, 3 }
   0xe   : > { %s140_s25 = scalar_lea.vmem (%p29_p3), %s531_s0, %s392_s21  ;;  %s138_s26 = scalar_lea.vmem (%p29_p3), [#allocation2], %s391_s22 }
   0xf   : > { %v157_v0 = vld [vmem:[%s140_s25] sm:$0xf] (%p29_p3)  ;;  %v159_v1 = vld [vmem:[%s140_s25 + $0x8] sm:$0xf] (%p29_p3) }
  0x10   : > { %158 = vst [vmem:[%s138_s26] sm:$0xf] (%p29_p3), %v157_v0  ;;  %160 = vst [vmem:[%s138_s26 + $0x4] sm:$0xf] (%p29_p3), %v159_v1 }
  0x11 PF: > { %p393_p5 = scmp.ge.s32.totalorder %s452_s14, 1  ;;  %p203_p6 = scmp.lt.s32.totalorder %s452_s14, 3 }
  0x13   : > { %p204_p7 = pnand %p393_p5, %p203_p6 }
  0x14   : > { %s210_s27 = sand.u32 (!%p204_p7), 1, %s444_s12   ;;  %s395_s28 = sshll.u32 (!%p204_p7), %s387_s15, 2 }
  0x15   : > { %207 = sbr.rel (%p204_p7) target bundleno = 48 (0x30), region = 69  ;;  %s394_s29 = sshll.u32 (!%p204_p7), %s210_s27, 3 }
  0x16   : > { %p243_p8 = scmp.lt.s32.totalorder (!%p204_p7), %s395_s28, 7  ;;  %s212_s30 = scalar_lea.vmem (!%p204_p7), [#allocation2], %s394_s29 }
  0x1a   : > { %v267_v2 = vlaneseq  ;;  %v454_v3 = vmov 857870592   ;;  %s539_s28 = smov (!%p243_p8, %s395_s28), 7  ;;  %v402_v6 = vld [vmem:[%s212_s30] sm:$0xff]   ;;  %vm297_vm0 = vcmask 1041409   ;;  %vm299_vm1 = vcmask 1043459  }
  0x1b   : > { %v265_v4 = vunpack.c.l.s4 %v454_v3  ;;  %s245_s6 = scalar_lea.vmem %s532_s1, %s539_s28  ;;  %s250_s9 = scalar_lea.vmem %s533_s2, %s539_s28  ;;  %v403_v8 = vunpack.c.l.bf16 %v402_v6  ;;  %v404_v9 = vunpack.c.h.bf16 %v402_v6  ;;  %vm301_vm2 = vcmask 1045509  }
  0x1c   : > { %v268_v5 = vshrl.u32 %v267_v2, 7  ;;  %v262_v11 = vld [vmem:[%s245_s6] sm:$0xf]  ;;  %s398_s10 = sshll.u32 %s539_s28, 1  ;;  %vm303_vm3 = vcmask 1047559  }
  0x1d   : > { %v266_v7 = vunpack.c.0.s8 %v265_v4  ;;  %v274_v12 = vld [vmem:[%s250_s9] sm:$0xf]  ;;  %s256_s14 = scalar_lea.vmem %s534_s3, %s398_s10 }
  0x1f   : > { %v269_v10 = vsub.s32 %v266_v7, %v268_v5 }
  0x21   : > { %v270_v13 = vrot.slane %v262_v11, %v269_v10  ;;  %v282_v14 = vrot.slane %v274_v12, %v269_v10 }
  0x23   : > { %v272_v15 = vmul.f32 %v403_v8, %v270_v13  ;;  %v273_v16 = vmul.f32 %v404_v9, %v270_v13 }
  0x25   : > { %v284_v17 = vadd.f32 %v282_v14, %v272_v15  ;;  %v285_v18 = vadd.f32 %v282_v14, %v273_v16 }
  0x27   : > { %v286_v19 = vmax.f32 %v284_v17, 0.0  ;;  %v287_v20 = vmax.f32 %v285_v18, 0.0 }
  0x29   : > { %v296_v21 = vrot.slane %v287_v20, 7 }
  0x2b   : > { %v298_v22 = vsel %vm297_vm0, %v296_v21, %v286_v19 }
  0x2c   : > { %v300_v23 = vsel %vm299_vm1, %v296_v21, %v298_v22 }
  0x2d   : > { %v302_v24 = vsel %vm301_vm2, %v296_v21, %v300_v23 }
  0x2e   : > { %v304_v25 = vsel %vm303_vm3, %v296_v21, %v302_v24 }
  0x2f   : > { %306 = vst [vmem:[%s256_s14] sm:$0xff] %v304_v25 }
  0x30 PF: > { %p10_p9 = scmp.ge.s32.totalorder %s492_s16, 4   ;;  %s535_s12 = smov %s448_s13 }
  0x31   : > { %s536_s13 = smov %s501_s19  ;;  %s537_s14 = smov %s492_s16 }
  0x32   :  { %12 = sbr.rel (!%p10_p9) target bundleno = 2 (0x2), region = 114 }

// kernel: densenet121_forward.251
= control target key start
LH: loop header
LB: loop body
LE: loop exit
PB: predicated region body
PF: predicated region fallthrough
CT: control target
= control target key end

     0   :  { %s1222_s1 = inlined_call_operand.vmem [shape: bf16[1024,128], index: 1, kind: input, shape index: {}]   ;;  %s1223_s0 = inlined_call_operand.vmem [shape: bf16[16,1024], index: 0, kind: input, shape index: {}]   ;;  %s1224_s2 = inlined_call_operand.vmem [shape: f32[1,128], index: 2, kind: input, shape index: {}]   ;;  %s1225_s3 = inlined_call_operand.vmem [shape: f32[16,128], index: 3, kind: output, shape index: {}]  }
   0x1   :  { %v913_v0 = vld [vmem:[%s1222_s1 + $0x78] sm:$0xff]   ;;  %v917_v4 = vld [vmem:[%s1222_s1 + $0x70] sm:$0xff]   ;;  %v921_v8 = vld [vmem:[%s1222_s1 + $0x68] sm:$0xff]  }
   0x2   :  { %v914_v1 = vld [vmem:[%s1222_s1 + $0xf8] sm:$0xff]   ;;  %825 = vmatprep.subr.bf16.mxu0 %v913_v0  ;;  %v918_v5 = vld [vmem:[%s1222_s1 + $0xf0] sm:$0xff]   ;;  %v922_v9 = vld [vmem:[%s1222_s1 + $0xe8] sm:$0xff]  }
   0x3   :  { %v915_v2 = vld [vmem:[%s1222_s1 + $0x38] sm:$0xff]   ;;  %847 = vmatprep.subr.bf16.mxu1 %v914_v1  ;;  %v919_v6 = vld [vmem:[%s1222_s1 + $0x30] sm:$0xff]   ;;  %v923_v10 = vld [vmem:[%s1222_s1 + $0x28] sm:$0xff]  }
   0x4   :  { %v916_v3 = vld [vmem:[%s1222_s1 + $0xb8] sm:$0xff]   ;;  %826 = vmatpush3.bf16.msra.mxu0 %v915_v2  ;;  %v920_v7 = vld [vmem:[%s1222_s1 + $0xb0] sm:$0xff]   ;;  %v924_v11 = vld [vmem:[%s1222_s1 + $0xa8] sm:$0xff]  }
   0x5   :  { %848 = vmatpush3.bf16.msra.mxu1 %v916_v3  ;;  %827 = vmatprep.subr.bf16.mxu0 %v917_v4  ;;  %v925_v12 = vld [vmem:[%s1222_s1 + $0x60] sm:$0xff]   ;;  %v929_v16 = vld [vmem:[%s1222_s1 + $0x58] sm:$0xff]   ;;  %v933_v20 = vld [vmem:[%s1222_s1 + $0x50] sm:$0xff]  }
   0x6   :  { %849 = vmatprep.subr.bf16.mxu1 %v918_v5  ;;  %v926_v13 = vld [vmem:[%s1222_s1 + $0xe0] sm:$0xff]   ;;  %v930_v17 = vld [vmem:[%s1222_s1 + $0xd8] sm:$0xff]   ;;  %v934_v21 = vld [vmem:[%s1222_s1 + $0xd0] sm:$0xff]  }
   0x7   :  { %v927_v14 = vld [vmem:[%s1222_s1 + $0x20] sm:$0xff]   ;;  %v931_v18 = vld [vmem:[%s1222_s1 + $0x18] sm:$0xff]   ;;  %v935_v22 = vld [vmem:[%s1222_s1 + $0x10] sm:$0xff]  }
   0x8   :  { %828 = vmatpush3.bf16.msra.mxu0 %v919_v6  ;;  %v928_v15 = vld [vmem:[%s1222_s1 + $0xa0] sm:$0xff]   ;;  %v932_v19 = vld [vmem:[%s1222_s1 + $0x98] sm:$0xff]   ;;  %v936_v23 = vld [vmem:[%s1222_s1 + $0x90] sm:$0xff]  }
   0x9   :  { %850 = vmatpush3.bf16.msra.mxu1 %v920_v7  ;;  %829 = vmatprep.subr.bf16.mxu0 %v921_v8  ;;  %v937_v24 = vld [vmem:[%s1222_s1 + $0x48] sm:$0xff]   ;;  %v941_v28 = vld [vmem:[%s1222_s1 + $0x40] sm:$0xff]   ;;  %v945_v40 = vld [vmem:[%s1222_s1 + $0x178] sm:$0xff]  }
   0xa   :  { %851 = vmatprep.subr.bf16.mxu1 %v922_v9  ;;  %v938_v25 = vld [vmem:[%s1222_s1 + $0xc8] sm:$0xff]   ;;  %v942_v29 = vld [vmem:[%s1222_s1 + $0xc0] sm:$0xff]   ;;  %v946_v41 = vld [vmem:[%s1222_s1 + $0x1f8] sm:$0xff]  }
   0xb   :  { %v939_v26 = vld [vmem:[%s1222_s1 + $0x8] sm:$0xff]   ;;  %v943_v30 = vld [vmem:[%s1222_s1] sm:$0xff]   ;;  %v947_v42 = vld [vmem:[%s1222_s1 + $0x138] sm:$0xff]  }
   0xc   :  { %830 = vmatpush3.bf16.msra.mxu0 %v923_v10  ;;  %v940_v27 = vld [vmem:[%s1222_s1 + $0x88] sm:$0xff]   ;;  %v944_v31 = vld [vmem:[%s1222_s1 + $0x80] sm:$0xff]   ;;  %v948_v43 = vld [vmem:[%s1222_s1 + $0x1b8] sm:$0xff]  }
   0xd   :  { %852 = vmatpush3.bf16.msra.mxu1 %v924_v11  ;;  %831 = vmatprep.subr.bf16.mxu0 %v925_v12  ;;  %v15_v32 = vld [vmem:[%s1223_s0] sm:$0xff]  ;;  %v16_v34 = vld [vmem:[%s1223_s0 + $0x8] sm:$0xff]  ;;  %v949_v44 = vld [vmem:[%s1222_s1 + $0x170] sm:$0xff]  }
   0xe   :  { %853 = vmatprep.subr.bf16.mxu1 %v926_v13  ;;  %v19_v33 = vld [vmem:[%s1223_s0 + $0x20] sm:$0xff]  ;;  %v20_v37 = vld [vmem:[%s1223_s0 + $0x28] sm:$0xff]  ;;  %v950_v45 = vld [vmem:[%s1222_s1 + $0x1f0] sm:$0xff]  }
   0xf   :  { %v753_v35 = vcombine.low %v15_v32, %v19_v33  ;;  %v754_v36 = vcombine.high %v15_v32, %v19_v33  ;;  %v755_v38 = vcombine.low %v16_v34, %v20_v37  ;;  %v756_v39 = vcombine.high %v16_v34, %v20_v37  ;;  %v951_v46 = vld [vmem:[%s1222_s1 + $0x130] sm:$0xff]   ;;  %v953_v48 = vld [vmem:[%s1222_s1 + $0x168] sm:$0xff]   ;;  %v957_v52 = vld [vmem:[%s1222_s1 + $0x160] sm:$0xff]  }
  0x10   :  { %832 = vmatpush3.bf16.msra.mxu0 %v927_v14  ;;  %v952_v47 = vld [vmem:[%s1222_s1 + $0x1b0] sm:$0xff]   ;;  %v954_v49 = vld [vmem:[%s1222_s1 + $0x1e8] sm:$0xff]   ;;  %v958_v53 = vld [vmem:[%s1222_s1 + $0x1e0] sm:$0xff]  }
  0x11   :  { %854 = vmatpush3.bf16.msra.mxu1 %v928_v15  ;;  %833 = vmatprep.subr.bf16.mxu0 %v929_v16  ;;  %v955_v50 = vld [vmem:[%s1222_s1 + $0x128] sm:$0xff]   ;;  %v959_v54 = vld [vmem:[%s1222_s1 + $0x120] sm:$0xff]   ;;  %v961_v56 = vld [vmem:[%s1222_s1 + $0x158] sm:$0xff]  }
  0x12   :  { %855 = vmatprep.subr.bf16.mxu1 %v930_v17  ;;  %614 = vmatprep.mubr.bf16.mxu0 %v754_v36  ;;  %v956_v51 = vld [vmem:[%s1222_s1 + $0x1a8] sm:$0xff]   ;;  %v960_v55 = vld [vmem:[%s1222_s1 + $0x1a0] sm:$0xff]   ;;  %v962_v57 = vld [vmem:[%s1222_s1 + $0x1d8] sm:$0xff]  }
  0x13   :  { %655 = vmatprep.mubr.bf16.mxu1 %v756_v39  ;;  %v963_v58 = vld [vmem:[%s1222_s1 + $0x118] sm:$0xff]   ;;  %v965_v60 = vld [vmem:[%s1222_s1 + $0x150] sm:$0xff]   ;;  %v969_v0 = vld [vmem:[%s1222_s1 + $0x148] sm:$0xff]  }
  0x14   :  { %834 = vmatpush3.bf16.msra.mxu0 %v931_v18  ;;  %v964_v59 = vld [vmem:[%s1222_s1 + $0x198] sm:$0xff]   ;;  %v966_v61 = vld [vmem:[%s1222_s1 + $0x1d0] sm:$0xff]   ;;  %v970_v1 = vld [vmem:[%s1222_s1 + $0x1c8] sm:$0xff]  }
  0x15   :  { %856 = vmatpush3.bf16.msra.mxu1 %v932_v19  ;;  %835 = vmatprep.subr.bf16.mxu0 %v933_v20  ;;  %v967_v62 = vld [vmem:[%s1222_s1 + $0x110] sm:$0xff]   ;;  %v971_v2 = vld [vmem:[%s1222_s1 + $0x108] sm:$0xff]   ;;  %v973_v4 = vld [vmem:[%s1222_s1 + $0x140] sm:$0xff]  }
  0x16   :  { %857 = vmatprep.subr.bf16.mxu1 %v934_v21  ;;  %v968_v63 = vld [vmem:[%s1222_s1 + $0x190] sm:$0xff]   ;;  %v972_v3 = vld [vmem:[%s1222_s1 + $0x188] sm:$0xff]   ;;  %v974_v5 = vld [vmem:[%s1222_s1 + $0x1c0] sm:$0xff]  }
  0x17   :  { %v975_v6 = vld [vmem:[%s1222_s1 + $0x100] sm:$0xff]   ;;  %v17_v8 = vld [vmem:[%s1223_s0 + $0x10] sm:$0xff]  ;;  %v18_v12 = vld [vmem:[%s1223_s0 + $0x18] sm:$0xff] }
  0x18   :  { %836 = vmatpush3.bf16.msra.mxu0 %v935_v22  ;;  %v976_v7 = vld [vmem:[%s1222_s1 + $0x180] sm:$0xff]   ;;  %v21_v9 = vld [vmem:[%s1223_s0 + $0x30] sm:$0xff]  ;;  %v22_v13 = vld [vmem:[%s1223_s0 + $0x38] sm:$0xff] }
  0x19   :  { %858 = vmatpush3.bf16.msra.mxu1 %v936_v23  ;;  %837 = vmatprep.subr.bf16.mxu0 %v937_v24  ;;  %v757_v10 = vcombine.low %v17_v8, %v21_v9  ;;  %v758_v11 = vcombine.high %v17_v8, %v21_v9  ;;  %v759_v14 = vcombine.low %v18_v12, %v22_v13  ;;  %v752_v23 = vld [vmem:[%s1224_s2] ss:$0 sm:$0xff] }
  0x1a   :  { %859 = vmatprep.subr.bf16.mxu1 %v938_v25  ;;  %v760_v15 = vcombine.high %v18_v12, %v22_v13 }
  0x1c   :  { %838 = vmatpush3.bf16.msra.mxu0 %v939_v26 }
  0x1d   :  { %860 = vmatpush3.bf16.msra.mxu1 %v940_v27  ;;  %839 = vmatprep.subr.bf16.mxu0 %v941_v28 }
  0x1e   :  { %861 = vmatprep.subr.bf16.mxu1 %v942_v29 }
  0x20   :  { %840 = vmatpush3.bf16.msra.mxu0 %v943_v30 }
  0x21   :  { %862 = vmatpush3.bf16.msra.mxu1 %v944_v31  ;;  %869 = vmatprep.subr.bf16.mxu0 %v945_v40 }
  0x22   :  { %891 = vmatprep.subr.bf16.mxu1 %v946_v41 }
  0x23   :  { %615 = vmatmul.mubr.bf16.vlgmr.msra.gmra.mxu0 %v753_v35 }
  0x24   :  { %656 = vmatmul.mubr.bf16.vlgmr.msra.gmra.mxu1 %v755_v38  ;;  %870 = vmatpush3.bf16.msra.mxu0 %v947_v42 }
  0x25   :  { %892 = vmatpush3.bf16.msra.mxu1 %v948_v43  ;;  %871 = vmatprep.subr.bf16.mxu0 %v949_v44 }
  0x26   :  { %893 = vmatprep.subr.bf16.mxu1 %v950_v45  ;;  %696 = vmatprep.mubr.bf16.mxu0 %v758_v11 }
  0x27   :  { %737 = vmatprep.mubr.bf16.mxu1 %v760_v15 }
  0x28   :  { %872 = vmatpush3.bf16.msra.mxu0 %v951_v46 }
  0x29   :  { %894 = vmatpush3.bf16.msra.mxu1 %v952_v47  ;;  %873 = vmatprep.subr.bf16.mxu0 %v953_v48 }
  0x2a   :  { %895 = vmatprep.subr.bf16.mxu1 %v954_v49 }
  0x2c   :  { %874 = vmatpush3.bf16.msra.mxu0 %v955_v50 }
  0x2d   :  { %896 = vmatpush3.bf16.msra.mxu1 %v956_v51  ;;  %875 = vmatprep.subr.bf16.mxu0 %v957_v52 }
  0x2e   :  { %897 = vmatprep.subr.bf16.mxu1 %v958_v53 }
  0x30   :  { %876 = vmatpush3.bf16.msra.mxu0 %v959_v54 }
  0x31   :  { %898 = vmatpush3.bf16.msra.mxu1 %v960_v55  ;;  %877 = vmatprep.subr.bf16.mxu0 %v961_v56 }
  0x32   :  { %899 = vmatprep.subr.bf16.mxu1 %v962_v57 }
  0x34   :  { %878 = vmatpush3.bf16.msra.mxu0 %v963_v58 }
  0x35   :  { %900 = vmatpush3.bf16.msra.mxu1 %v964_v59  ;;  %879 = vmatprep.subr.bf16.mxu0 %v965_v60 }
  0x36   :  { %901 = vmatprep.subr.bf16.mxu1 %v966_v61 }
  0x38   :  { %880 = vmatpush3.bf16.msra.mxu0 %v967_v62 }
  0x39   :  { %902 = vmatpush3.bf16.msra.mxu1 %v968_v63  ;;  %881 = vmatprep.subr.bf16.mxu0 %v969_v0 }
  0x3a   :  { %903 = vmatprep.subr.bf16.mxu1 %v970_v1 }
  0x3c   :  { %882 = vmatpush3.bf16.msra.mxu0 %v971_v2 }
  0x3d   :  { %904 = vmatpush3.bf16.msra.mxu1 %v972_v3  ;;  %883 = vmatprep.subr.bf16.mxu0 %v973_v4 }
  0x3e   :  { %905 = vmatprep.subr.bf16.mxu1 %v974_v5 }
  0x40   :  { %884 = vmatpush3.bf16.msra.mxu0 %v975_v6 }
  0x41   :  { %906 = vmatpush3.bf16.msra.mxu1 %v976_v7 }
  0x43   :  { %697 = vmatmul.mubr.bf16.vlgmr.msra.gmra.mxu0 %v757_v10 }
  0x44   :  { %738 = vmatmul.mubr.bf16.vlgmr.msra.gmra.mxu1 %v759_v14 }
  0xe3   :  { %v841_v16 = vpop.f32.mrf.mxu0 }
  0xe4   :  { %v863_v17 = vpop.f32.mrf.mxu1 }
  0xe5   :  { %v842_v18 = vpop.f32.mrf.mxu0 }
  0xe6   :  { %v864_v19 = vpop.f32.mrf.mxu1  ;;  %v843_v21 = vadd.f32 %v842_v18, %v841_v16 }
  0xe7   :  { %v844_v20 = vpop.f32.mrf.mxu0  ;;  %v865_v26 = vadd.f32 %v864_v19, %v863_v17 }
  0xe8   :  { %v866_v22 = vpop.f32.mrf.mxu1  ;;  %v617_v25 = vadd.f32 %v843_v21, %v752_v23 }
  0xe9   :  { %v845_v24 = vpop.f32.mrf.mxu0 }
  0xea   :  { %v846_v27 = vadd.f32 %v845_v24, %v844_v20  ;;  %v867_v28 = vpop.f32.mrf.mxu1  ;;  %v658_v32 = vadd.f32 %v865_v26, %v617_v25 }
  0xeb   :  { %v868_v37 = vadd.f32 %v867_v28, %v866_v22 }
  0xec   :  { %v620_v33 = vadd.f32 %v846_v27, %v752_v23 }
  0xee   :  { %v661_v42 = vadd.f32 %v868_v37, %v620_v33 }
 0x103   :  { %v885_v29 = vpop.f32.mrf.mxu0 }
 0x104   :  { %v907_v30 = vpop.f32.mrf.mxu1 }
 0x105   :  { %v886_v31 = vpop.f32.mrf.mxu0 }
 0x106   :  { %v887_v34 = vadd.f32 %v886_v31, %v885_v29  ;;  %v908_v35 = vpop.f32.mrf.mxu1 }
 0x107   :  { %v888_v36 = vpop.f32.mrf.mxu0  ;;  %v909_v39 = vadd.f32 %v908_v35, %v907_v30 }
 0x108   :  { %v699_v38 = vadd.f32 %v887_v34, %v658_v32  ;;  %v910_v40 = vpop.f32.mrf.mxu1 }
 0x109   :  { %v889_v41 = vpop.f32.mrf.mxu0 }
 0x10a   :  { %v740_v43 = vadd.f32 %v909_v39, %v699_v38  ;;  %v890_v44 = vadd.f32 %v889_v41, %v888_v36  ;;  %v911_v45 = vpop.f32.mrf.mxu1 }
 0x10b   :  { %v912_v47 = vadd.f32 %v911_v45, %v910_v40 }
 0x10c   :  { %746 = vst [vmem:[%s1225_s3] sm:$0xff] %v740_v43  ;;  %v702_v46 = vadd.f32 %v890_v44, %v661_v42 }
 0x10e   :  { %v743_v48 = vadd.f32 %v912_v47, %v702_v46 }
 0x110   :  { %747 = vst [vmem:[%s1225_s3 + $0x8] sm:$0xff] %v743_v48 }

</bundles_post_ra>
